<compile_context>
chip_gen: v7x
topology: tpu7x:2x2x1
jax: 0.10.0
libtpu: 0.0.40
codegen_flags: <defaults>
</compile_context>

<pallas_src>
import numpy as np
import jax
import jax.numpy as jnp
from jax.experimental import pallas as pl
from jax.experimental.pallas import tpu as pltpu


def _round_up(n, m):
    return -(-n // m) * m


def lead_encoder_kernel(x_ref, w1_ref, b1_ref, w2_ref, b2_ref, wp2_ref, bp2_ref,
                        w3_ref, b3_ref, wp3_ref, bp3_ref, out_ref,
                        slab2, p1s, slab3, p2s, pp1, pp2, rmax1, rmax2, rmax3):
    Bt = out_ref.shape[0]
    L = x_ref.shape[0] // Bt
    C1 = w1_ref.shape[1]
    C2 = w2_ref.shape[1]
    C3 = w3_ref.shape[1]
    L1 = (L - 5) // 2 + 1
    L2 = (L1 - 5) // 2 + 1
    L3 = (L2 - 5) // 2 + 1
    L1P = slab2.shape[0] // Bt          # per-batch stride (L1 rounded up to 8)
    L2P = slab3.shape[0] // Bt          # per-batch stride (L2 rounded up to 8)

    def pool5s2(v, rref, n_out):
        # MaxPool1d(kernel=5, stride=2): running window-max with 4 unstrided
        # shifted slices, then a single stride-2 read from VMEM scratch.
        win = 2 * n_out - 1
        r = v[0:win]
        for k in range(1, 5):
            r = jnp.maximum(r, v[k:k + win])
        rref[0:win, :] = r
        return rref[pl.ds(0, n_out, stride=2), :]

    # Zero only the 2-row halos of the padded tap sources (interiors are fully
    # rewritten below every step) -- no full-scratch zeroing.
    pp1[0:2, :] = jnp.zeros((2, C1), jnp.float32)
    pp1[2 + L1:4 + L1, :] = jnp.zeros((2, C1), jnp.float32)
    pp2[0:2, :] = jnp.zeros((2, C2), jnp.float32)
    pp2[2 + L2:4 + L2, :] = jnp.zeros((2, C2), jnp.float32)

    # ---- stage 1: conv1 (im2col from wrapper) + folded BN + ReLU -----------
    h1 = jnp.maximum(
        jnp.dot(x_ref[...], w1_ref[...], preferred_element_type=jnp.float32)
        + b1_ref[...], 0.0)                                    # (Bt*L, C1)

    for bt in range(Bt):
        p1 = pool5s2(h1[bt * L:(bt + 1) * L], rmax1, L1)       # (L1, C1)
        r0 = bt * L1P
        p1s[r0:r0 + L1, :] = p1
        if L1P > L1:
            p1s[r0 + L1:r0 + L1P, :] = jnp.zeros((L1P - L1, C1), jnp.float32)
        pp1[2:2 + L1, :] = p1
        # im2col: tap k goes to lanes [k*C1, (k+1)*C1) of the stacked slab.
        for k in range(5):
            slab2[r0:r0 + L1, k * C1:(k + 1) * C1] = pp1[pl.ds(k, L1), :]
        if L1P > L1:
            slab2[r0 + L1:r0 + L1P, :] = jnp.zeros((L1P - L1, 5 * C1),
                                                   jnp.float32)

    # ---- stage 2: conv2 block (residual) + pointconv2 + add ----------------
    r2 = jnp.maximum(
        jnp.dot(slab2[...], w2_ref[...], preferred_element_type=jnp.float32)
        + b2_ref[...], 0.0)                                    # (Bt*L1P, C2)
    s2 = (jnp.dot(p1s[...], wp2_ref[...], preferred_element_type=jnp.float32)
          + bp2_ref[...] + r2)

    for bt in range(Bt):
        p2 = pool5s2(s2[bt * L1P:bt * L1P + L1], rmax2, L2)    # (L2, C2)
        r0 = bt * L2P
        p2s[r0:r0 + L2, :] = p2
        if L2P > L2:
            p2s[r0 + L2:r0 + L2P, :] = jnp.zeros((L2P - L2, C2), jnp.float32)
        pp2[2:2 + L2, :] = p2
        for k in range(5):
            slab3[r0:r0 + L2, k * C2:(k + 1) * C2] = pp2[pl.ds(k, L2), :]
        if L2P > L2:
            slab3[r0 + L2:r0 + L2P, :] = jnp.zeros((L2P - L2, 5 * C2),
                                                   jnp.float32)

    # ---- stage 3: conv3 block (residual) + pointconv3 + add ----------------
    r3 = jnp.maximum(
        jnp.dot(slab3[...], w3_ref[...], preferred_element_type=jnp.float32)
        + b3_ref[...], 0.0)                                    # (Bt*L2P, C3)
    s3 = (jnp.dot(p2s[...], wp3_ref[...], preferred_element_type=jnp.float32)
          + bp3_ref[...] + r3)

    # ---- maxpool + global average pool (AdaptiveAvgPool1d(1)) --------------
    for bt in range(Bt):
        p3 = pool5s2(s3[bt * L2P:bt * L2P + L2], rmax3, L3)    # (L3, C3)
        out_ref[bt:bt + 1, :] = jnp.mean(p3, axis=0, keepdims=True)


def lead_encoder_forward(x_blc, params, block_batch=8):
    """x_blc: (B, L, Cin) float32.  Returns (B, 1, C3) matching PyTorch."""
    w1, b1, w2, b2, wp2, bp2, w3, b3, wp3, bp3 = params
    B, L, Cin = x_blc.shape
    C1, C2, C3 = w1.shape[2], w2.shape[2], w3.shape[2]
    L1 = (L - 5) // 2 + 1
    L2 = (L1 - 5) // 2 + 1
    L3 = (L2 - 5) // 2 + 1
    L1P = _round_up(L1, 8)
    L2P = _round_up(L2, 8)
    K1 = _round_up(5 * Cin, 8)

    Bt = min(block_batch, B)
    Bp = _round_up(B, Bt)
    if Bp != B:
        x_blc = jnp.concatenate(
            [x_blc, jnp.zeros((Bp - B, L, Cin), x_blc.dtype)], axis=0)

    # conv1 im2col in the wrapper (layout only): 5 taps on lanes, zero-padded
    # to an 8-aligned contraction dim.
    xp = jnp.pad(x_blc, ((0, 0), (2, 2), (0, 0)))
    x5 = jnp.concatenate([xp[:, k:k + L, :] for k in range(5)], axis=2)
    x5 = jnp.pad(x5, ((0, 0), (0, 0), (0, K1 - 5 * Cin)))
    x5 = x5.reshape(Bp * L, K1).astype(jnp.float32)

    # Fold the 5 conv taps into the K dimension of a single matmul per stage.
    w1f = jnp.pad(w1.reshape(5 * Cin, C1), ((0, K1 - 5 * Cin), (0, 0)))
    w2f = w2.reshape(5 * C1, C2)
    w3f = w3.reshape(5 * C2, C3)
    flat_params = (w1f, b1, w2f, b2, wp2, bp2, w3f, b3, wp3, bp3)

    def full(shape):
        return pl.BlockSpec(shape, lambda i, _n=len(shape): (0,) * _n)

    flops = 2 * Bp * (L * K1 * C1 + L1P * (5 * C1) * C2 + L1P * C1 * C2
                      + L2P * (5 * C2) * C3 + L2P * C2 * C3)
    bytes_acc = 4 * (int(x5.size) + Bp * C3
                     + sum(int(p.size) for p in flat_params))
    cost = pl.CostEstimate(flops=int(flops), transcendentals=0,
                           bytes_accessed=int(bytes_acc))

    out = pl.pallas_call(
        lead_encoder_kernel,
        out_shape=jax.ShapeDtypeStruct((Bp, C3), jnp.float32),
        grid_spec=pltpu.PrefetchScalarGridSpec(
            num_scalar_prefetch=0,
            grid=(Bp // Bt,),
            in_specs=[
                pl.BlockSpec((Bt * L, K1), lambda i: (i, 0)),
                full(w1f.shape), full(b1.shape),
                full(w2f.shape), full(b2.shape),
                full(wp2.shape), full(bp2.shape),
                full(w3f.shape), full(b3.shape),
                full(wp3.shape), full(bp3.shape),
            ],
            out_specs=pl.BlockSpec((Bt, C3), lambda i: (i, 0)),
            scratch_shapes=[
                pltpu.VMEM((Bt * L1P, 5 * C1), jnp.float32),            # slab2
                pltpu.VMEM((Bt * L1P, C1), jnp.float32),                # p1 stacked
                pltpu.VMEM((Bt * L2P, 5 * C2), jnp.float32),            # slab3
                pltpu.VMEM((Bt * L2P, C2), jnp.float32),                # p2 stacked
                pltpu.VMEM((_round_up(L1 + 4, 8), C1), jnp.float32),    # padded p1
                pltpu.VMEM((_round_up(L2 + 4, 8), C2), jnp.float32),    # padded p2
                pltpu.VMEM((_round_up(2 * L1 - 1, 8), C1), jnp.float32),  # pool 1
                pltpu.VMEM((_round_up(2 * L2 - 1, 8), C2), jnp.float32),  # pool 2
                pltpu.VMEM((_round_up(2 * L3 - 1, 8), C3), jnp.float32),  # pool 3
            ],
        ),
        compiler_params=pltpu.CompilerParams(
            dimension_semantics=("parallel",),   # batch axis -> both TCs on v7x
            vmem_limit_bytes=32 * 1024 * 1024,   # explicit; well below v7x 64 MiB
        ),
        cost_estimate=cost,
    )(x5, *flat_params)

    return out[:B].reshape(B, 1, C3)


def make_params(key, input_channel=1, initial_channel=32, eps=1e-5):
    """Deterministic synthetic parameters; BN (eval mode) folded into conv weights."""
    C1, C2, C3 = initial_channel, initial_channel * 2, initial_channel * 4
    ks = jax.random.split(key, 20)

    def conv_bn(k0, k1, k2, k3, k4, cout, cin):
        w_t = 0.1 * jax.random.normal(k0, (cout, cin, 5), jnp.float32)     # torch (O,I,K)
        gamma = 1.0 + 0.1 * jax.random.normal(k1, (cout,), jnp.float32)
        beta = 0.1 * jax.random.normal(k2, (cout,), jnp.float32)
        rmean = 0.1 * jax.random.normal(k3, (cout,), jnp.float32)
        rvar = jax.random.uniform(k4, (cout,), jnp.float32, 0.5, 1.5)
        scale = gamma / jnp.sqrt(rvar + eps)
        w_eff = jnp.transpose(w_t, (2, 1, 0)) * scale[None, None, :]        # (K, I, O)
        b_eff = (beta - rmean * scale).reshape(1, cout)
        return w_eff, b_eff

    def pointconv(k0, k1, cout, cin):
        w_t = 0.1 * jax.random.normal(k0, (cout, cin, 1), jnp.float32)      # torch (O,I,1)
        b = 0.1 * jax.random.normal(k1, (cout,), jnp.float32)
        return jnp.transpose(w_t[:, :, 0], (1, 0)), b.reshape(1, cout)      # (I,O), (1,O)

    w1, b1 = conv_bn(ks[0], ks[1], ks[2], ks[3], ks[4], C1, input_channel)
    w2, b2 = conv_bn(ks[5], ks[6], ks[7], ks[8], ks[9], C2, C1)
    w3, b3 = conv_bn(ks[10], ks[11], ks[12], ks[13], ks[14], C3, C2)
    wp2, bp2 = pointconv(ks[15], ks[16], C2, C1)
    wp3, bp3 = pointconv(ks[17], ks[18], C3, C2)
    return (w1, b1, w2, b2, wp2, bp2, w3, b3, wp3, bp3)


def ref_forward(x_blc, params):
    """Pure-JAX reference (same math, channels-last) for correctness checking."""
    w1, b1, w2, b2, wp2, bp2, w3, b3, wp3, bp3 = params

    def conv5(x, w, b):
        L = x.shape[0]
        xp = jnp.pad(x, ((2, 2), (0, 0)))
        acc = jnp.zeros((L, w.shape[2]), jnp.float32) + b
        for k in range(5):
            acc = acc + xp[k:k + L] @ w[k]
        return acc

    def maxpool(x):
        L = x.shape[0]
        Lo = (L - 5) // 2 + 1
        o = x[0:2 * Lo - 1:2]
        for k in range(1, 5):
            o = jnp.maximum(o, x[k:k + 2 * Lo - 1:2])
        return o

    outs = []
    for bi in range(x_blc.shape[0]):
        x = x_blc[bi]
        h = jnp.maximum(conv5(x, w1, b1), 0.0)
        p1 = maxpool(h)
        r2 = jnp.maximum(conv5(p1, w2, b2), 0.0)
        x2 = p1 @ wp2 + bp2 + r2
        p2 = maxpool(x2)
        r3 = jnp.maximum(conv5(p2, w3, b3), 0.0)
        x3 = p2 @ wp3 + bp3 + r3
        p3 = maxpool(x3)
        outs.append(jnp.mean(p3, axis=0, keepdims=True))
    return jnp.stack(outs, axis=0)


if __name__ == "__main__":
    key = jax.random.PRNGKey(0)
    kx, kp = jax.random.split(key)

    B, L = 2, 256                                  # PyTorch input: (B, 1, L) NCL
    x_ncl = jax.random.normal(kx, (B, 1, L), jnp.float32)
    x_blc = jnp.transpose(x_ncl, (0, 2, 1))        # kernel layout (B, L, 1)

    params = make_params(kp, input_channel=1, initial_channel=32)

    out = lead_encoder_forward(x_blc, params)
    out = jax.block_until_ready(out)
    assert out.shape == (B, 1, 128), out.shape

    ref = ref_forward(x_blc, params)
    np.testing.assert_allclose(np.asarray(out), np.asarray(ref), rtol=1e-3, atol=1e-3)

    print("KERNEL_OK")
</pallas_src>

<mosaic_0001>
module attributes {stable_mosaic.version = 11 : i64} {
  func.func @lead_encoder_kernel(%arg0: i32, %arg1: memref<512x8xf32, #tpu.memory_space<vmem>>, %arg2: memref<8x32xf32, #tpu.memory_space<vmem>>, %arg3: memref<1x32xf32, #tpu.memory_space<vmem>>, %arg4: memref<160x64xf32, #tpu.memory_space<vmem>>, %arg5: memref<1x64xf32, #tpu.memory_space<vmem>>, %arg6: memref<32x64xf32, #tpu.memory_space<vmem>>, %arg7: memref<1x64xf32, #tpu.memory_space<vmem>>, %arg8: memref<320x128xf32, #tpu.memory_space<vmem>>, %arg9: memref<1x128xf32, #tpu.memory_space<vmem>>, %arg10: memref<64x128xf32, #tpu.memory_space<vmem>>, %arg11: memref<1x128xf32, #tpu.memory_space<vmem>>, %arg12: memref<2x128xf32, #tpu.memory_space<vmem>>, %arg13: memref<256x160xf32, #tpu.memory_space<vmem>>, %arg14: memref<256x32xf32, #tpu.memory_space<vmem>>, %arg15: memref<128x320xf32, #tpu.memory_space<vmem>>, %arg16: memref<128x64xf32, #tpu.memory_space<vmem>>, %arg17: memref<136x32xf32, #tpu.memory_space<vmem>>, %arg18: memref<72x64xf32, #tpu.memory_space<vmem>>, %arg19: memref<256x32xf32, #tpu.memory_space<vmem>>, %arg20: memref<128x64xf32, #tpu.memory_space<vmem>>, %arg21: memref<64x128xf32, #tpu.memory_space<vmem>>) attributes {dimension_semantics = [#tpu.dimension_semantics<parallel>], iteration_bounds = array<i64: 1>, scalar_prefetch = 0 : i64, scratch_operands = 9 : i64, tpu.core_type = #tpu.core_type<tc>, window_params = [{transform_indices = @transform_0, window_bounds = array<i64: 512, 8>}, {pipeline_mode = #tpu.pipeline_mode<synchronous>, transform_indices = @transform_1, window_bounds = array<i64: 8, 32>}, {pipeline_mode = #tpu.pipeline_mode<synchronous>, transform_indices = @transform_2, window_bounds = array<i64: 1, 32>}, {pipeline_mode = #tpu.pipeline_mode<synchronous>, transform_indices = @transform_3, window_bounds = array<i64: 160, 64>}, {pipeline_mode = #tpu.pipeline_mode<synchronous>, transform_indices = @transform_4, window_bounds = array<i64: 1, 64>}, {pipeline_mode = #tpu.pipeline_mode<synchronous>, transform_indices = @transform_5, window_bounds = array<i64: 32, 64>}, {pipeline_mode = #tpu.pipeline_mode<synchronous>, transform_indices = @transform_6, window_bounds = array<i64: 1, 64>}, {pipeline_mode = #tpu.pipeline_mode<synchronous>, transform_indices = @transform_7, window_bounds = array<i64: 320, 128>}, {pipeline_mode = #tpu.pipeline_mode<synchronous>, transform_indices = @transform_8, window_bounds = array<i64: 1, 128>}, {pipeline_mode = #tpu.pipeline_mode<synchronous>, transform_indices = @transform_9, window_bounds = array<i64: 64, 128>}, {pipeline_mode = #tpu.pipeline_mode<synchronous>, transform_indices = @transform_10, window_bounds = array<i64: 1, 128>}, {transform_indices = @transform_11, window_bounds = array<i64: 2, 128>}]} {
    %cst = arith.constant 0.000000e+00 : f32
    %0 = vector.broadcast %cst : f32 to vector<2x32xf32>
    %c0 = arith.constant 0 : index
    %c0_0 = arith.constant 0 : index
    %1 = vector.load %arg17[%c0, %c0_0] : memref<136x32xf32, #tpu.memory_space<vmem>>, vector<2x32xf32>
    tpu.vector_store %arg17[%c0, %c0_0], %0 {strides = array<i32>} : memref<136x32xf32, #tpu.memory_space<vmem>>, vector<2x32xf32>,
    %cst_1 = arith.constant 0.000000e+00 : f32
    %2 = vector.broadcast %cst_1 : f32 to vector<2x32xf32>
    %c128 = arith.constant 128 : index
    %c0_2 = arith.constant 0 : index
    %3 = vector.load %arg17[%c128, %c0_2] : memref<136x32xf32, #tpu.memory_space<vmem>>, vector<2x32xf32>
    tpu.vector_store %arg17[%c128, %c0_2], %2 {strides = array<i32>} : memref<136x32xf32, #tpu.memory_space<vmem>>, vector<2x32xf32>,
    %cst_3 = arith.constant 0.000000e+00 : f32
    %4 = vector.broadcast %cst_3 : f32 to vector<2x64xf32>
    %c0_4 = arith.constant 0 : index
    %c0_5 = arith.constant 0 : index
    %5 = vector.load %arg18[%c0_4, %c0_5] : memref<72x64xf32, #tpu.memory_space<vmem>>, vector<2x64xf32>
    tpu.vector_store %arg18[%c0_4, %c0_5], %4 {strides = array<i32>} : memref<72x64xf32, #tpu.memory_space<vmem>>, vector<2x64xf32>,
    %cst_6 = arith.constant 0.000000e+00 : f32
    %6 = vector.broadcast %cst_6 : f32 to vector<2x64xf32>
    %c63 = arith.constant 63 : index
    %c0_7 = arith.constant 0 : index
    %7 = vector.load %arg18[%c63, %c0_7] : memref<72x64xf32, #tpu.memory_space<vmem>>, vector<2x64xf32>
    tpu.vector_store %arg18[%c63, %c0_7], %6 {strides = array<i32>} : memref<72x64xf32, #tpu.memory_space<vmem>>, vector<2x64xf32>,
    %c0_8 = arith.constant 0 : index
    %c0_9 = arith.constant 0 : index
    %8 = vector.load %arg1[%c0_8, %c0_9] : memref<512x8xf32, #tpu.memory_space<vmem>>, vector<512x8xf32>
    %c0_10 = arith.constant 0 : index
    %c0_11 = arith.constant 0 : index
    %9 = vector.load %arg2[%c0_10, %c0_11] : memref<8x32xf32, #tpu.memory_space<vmem>>, vector<8x32xf32>
    %cst_12 = arith.constant dense<0.000000e+00> : vector<512x32xf32>
    %10 = tpu.matmul %8, %9, %cst_12 {dimension_numbers = #tpu.dot_dimension_numbers<[1], [0], [0], [1], [0, 0, 1, 1], [], []>} : vector<512x8xf32>, vector<8x32xf32>, vector<512x32xf32> -> vector<512x32xf32>
    %c0_13 = arith.constant 0 : index
    %c0_14 = arith.constant 0 : index
    %11 = vector.load %arg3[%c0_13, %c0_14] : memref<1x32xf32, #tpu.memory_space<vmem>>, vector<1x32xf32>
    %12 = vector.broadcast %11 : vector<1x32xf32> to vector<512x32xf32>
    %13 = arith.addf %10, %12 : vector<512x32xf32>
    %cst_15 = arith.constant 0.000000e+00 : f32
    %14 = vector.broadcast %cst_15 : f32 to vector<512x32xf32>
    %15 = arith.maximumf %13, %14 : vector<512x32xf32>
    %16 = vector.extract_strided_slice %15 {offsets = [0, 0], sizes = [256, 32], strides = [1, 1]} : vector<512x32xf32> to vector<256x32xf32>
    %17 = vector.extract_strided_slice %16 {offsets = [0, 0], sizes = [251, 32], strides = [1, 1]} : vector<256x32xf32> to vector<251x32xf32>
    %18 = vector.extract_strided_slice %16 {offsets = [1, 0], sizes = [251, 32], strides = [1, 1]} : vector<256x32xf32> to vector<251x32xf32>
    %19 = arith.maximumf %17, %18 : vector<251x32xf32>
    %20 = vector.extract_strided_slice %16 {offsets = [2, 0], sizes = [251, 32], strides = [1, 1]} : vector<256x32xf32> to vector<251x32xf32>
    %21 = arith.maximumf %19, %20 : vector<251x32xf32>
    %22 = vector.extract_strided_slice %16 {offsets = [3, 0], sizes = [251, 32], strides = [1, 1]} : vector<256x32xf32> to vector<251x32xf32>
    %23 = arith.maximumf %21, %22 : vector<251x32xf32>
    %24 = vector.extract_strided_slice %16 {offsets = [4, 0], sizes = [251, 32], strides = [1, 1]} : vector<256x32xf32> to vector<251x32xf32>
    %25 = arith.maximumf %23, %24 : vector<251x32xf32>
    %c0_16 = arith.constant 0 : index
    %c0_17 = arith.constant 0 : index
    %26 = vector.load %arg19[%c0_16, %c0_17] : memref<256x32xf32, #tpu.memory_space<vmem>>, vector<251x32xf32>
    tpu.vector_store %arg19[%c0_16, %c0_17], %25 {strides = array<i32>} : memref<256x32xf32, #tpu.memory_space<vmem>>, vector<251x32xf32>,
    %c0_18 = arith.constant 0 : index
    %c0_19 = arith.constant 0 : index
    %27 = tpu.strided_load %arg19[%c0_18, %c0_19] {strides = array<i32: 2, 1>} : memref<256x32xf32, #tpu.memory_space<vmem>>, vector<126x32xf32>
    %c0_20 = arith.constant 0 : index
    %c0_21 = arith.constant 0 : index
    %28 = vector.load %arg14[%c0_20, %c0_21] : memref<256x32xf32, #tpu.memory_space<vmem>>, vector<126x32xf32>
    tpu.vector_store %arg14[%c0_20, %c0_21], %27 {strides = array<i32>} : memref<256x32xf32, #tpu.memory_space<vmem>>, vector<126x32xf32>,
    %cst_22 = arith.constant 0.000000e+00 : f32
    %29 = vector.broadcast %cst_22 : f32 to vector<2x32xf32>
    %c126 = arith.constant 126 : index
    %c0_23 = arith.constant 0 : index
    %30 = vector.load %arg14[%c126, %c0_23] : memref<256x32xf32, #tpu.memory_space<vmem>>, vector<2x32xf32>
    tpu.vector_store %arg14[%c126, %c0_23], %29 {strides = array<i32>} : memref<256x32xf32, #tpu.memory_space<vmem>>, vector<2x32xf32>,
    %c2 = arith.constant 2 : index
    %c0_24 = arith.constant 0 : index
    %31 = vector.load %arg17[%c2, %c0_24] : memref<136x32xf32, #tpu.memory_space<vmem>>, vector<126x32xf32>
    tpu.vector_store %arg17[%c2, %c0_24], %27 {strides = array<i32>} : memref<136x32xf32, #tpu.memory_space<vmem>>, vector<126x32xf32>,
    %c0_25 = arith.constant 0 : index
    %c0_26 = arith.constant 0 : index
    %32 = vector.load %arg17[%c0_25, %c0_26] : memref<136x32xf32, #tpu.memory_space<vmem>>, vector<126x32xf32>
    %c0_27 = arith.constant 0 : index
    %c0_28 = arith.constant 0 : index
    %33 = vector.load %arg13[%c0_27, %c0_28] : memref<256x160xf32, #tpu.memory_space<vmem>>, vector<126x32xf32>
    tpu.vector_store %arg13[%c0_27, %c0_28], %32 {strides = array<i32>} : memref<256x160xf32, #tpu.memory_space<vmem>>, vector<126x32xf32>,
    %c1 = arith.constant 1 : index
    %c0_29 = arith.constant 0 : index
    %34 = vector.load %arg17[%c1, %c0_29] : memref<136x32xf32, #tpu.memory_space<vmem>>, vector<126x32xf32>
    %c0_30 = arith.constant 0 : index
    %c32 = arith.constant 32 : index
    %35 = vector.load %arg13[%c0_30, %c32] : memref<256x160xf32, #tpu.memory_space<vmem>>, vector<126x32xf32>
    tpu.vector_store %arg13[%c0_30, %c32], %34 {strides = array<i32>} : memref<256x160xf32, #tpu.memory_space<vmem>>, vector<126x32xf32>,
    %c2_31 = arith.constant 2 : index
    %c0_32 = arith.constant 0 : index
    %36 = vector.load %arg17[%c2_31, %c0_32] : memref<136x32xf32, #tpu.memory_space<vmem>>, vector<126x32xf32>
    %c0_33 = arith.constant 0 : index
    %c64 = arith.constant 64 : index
    %37 = vector.load %arg13[%c0_33, %c64] : memref<256x160xf32, #tpu.memory_space<vmem>>, vector<126x32xf32>
    tpu.vector_store %arg13[%c0_33, %c64], %36 {strides = array<i32>} : memref<256x160xf32, #tpu.memory_space<vmem>>, vector<126x32xf32>,
    %c3 = arith.constant 3 : index
    %c0_34 = arith.constant 0 : index
    %38 = vector.load %arg17[%c3, %c0_34] : memref<136x32xf32, #tpu.memory_space<vmem>>, vector<126x32xf32>
    %c0_35 = arith.constant 0 : index
    %c96 = arith.constant 96 : index
    %39 = vector.load %arg13[%c0_35, %c96] : memref<256x160xf32, #tpu.memory_space<vmem>>, vector<126x32xf32>
    tpu.vector_store %arg13[%c0_35, %c96], %38 {strides = array<i32>} : memref<256x160xf32, #tpu.memory_space<vmem>>, vector<126x32xf32>,
    %c4 = arith.constant 4 : index
    %c0_36 = arith.constant 0 : index
    %40 = vector.load %arg17[%c4, %c0_36] : memref<136x32xf32, #tpu.memory_space<vmem>>, vector<126x32xf32>
    %c0_37 = arith.constant 0 : index
    %c128_38 = arith.constant 128 : index
    %41 = vector.load %arg13[%c0_37, %c128_38] : memref<256x160xf32, #tpu.memory_space<vmem>>, vector<126x32xf32>
    tpu.vector_store %arg13[%c0_37, %c128_38], %40 {strides = array<i32>} : memref<256x160xf32, #tpu.memory_space<vmem>>, vector<126x32xf32>,
    %cst_39 = arith.constant 0.000000e+00 : f32
    %42 = vector.broadcast %cst_39 : f32 to vector<2x160xf32>
    %c126_40 = arith.constant 126 : index
    %c0_41 = arith.constant 0 : index
    %43 = vector.load %arg13[%c126_40, %c0_41] : memref<256x160xf32, #tpu.memory_space<vmem>>, vector<2x160xf32>
    tpu.vector_store %arg13[%c126_40, %c0_41], %42 {strides = array<i32>} : memref<256x160xf32, #tpu.memory_space<vmem>>, vector<2x160xf32>,
    %44 = vector.extract_strided_slice %15 {offsets = [256, 0], sizes = [256, 32], strides = [1, 1]} : vector<512x32xf32> to vector<256x32xf32>
    %45 = vector.extract_strided_slice %44 {offsets = [0, 0], sizes = [251, 32], strides = [1, 1]} : vector<256x32xf32> to vector<251x32xf32>
    %46 = vector.extract_strided_slice %44 {offsets = [1, 0], sizes = [251, 32], strides = [1, 1]} : vector<256x32xf32> to vector<251x32xf32>
    %47 = arith.maximumf %45, %46 : vector<251x32xf32>
    %48 = vector.extract_strided_slice %44 {offsets = [2, 0], sizes = [251, 32], strides = [1, 1]} : vector<256x32xf32> to vector<251x32xf32>
    %49 = arith.maximumf %47, %48 : vector<251x32xf32>
    %50 = vector.extract_strided_slice %44 {offsets = [3, 0], sizes = [251, 32], strides = [1, 1]} : vector<256x32xf32> to vector<251x32xf32>
    %51 = arith.maximumf %49, %50 : vector<251x32xf32>
    %52 = vector.extract_strided_slice %44 {offsets = [4, 0], sizes = [251, 32], strides = [1, 1]} : vector<256x32xf32> to vector<251x32xf32>
    %53 = arith.maximumf %51, %52 : vector<251x32xf32>
    %c0_42 = arith.constant 0 : index
    %c0_43 = arith.constant 0 : index
    %54 = vector.load %arg19[%c0_42, %c0_43] : memref<256x32xf32, #tpu.memory_space<vmem>>, vector<251x32xf32>
    tpu.vector_store %arg19[%c0_42, %c0_43], %53 {strides = array<i32>} : memref<256x32xf32, #tpu.memory_space<vmem>>, vector<251x32xf32>,
    %c0_44 = arith.constant 0 : index
    %c0_45 = arith.constant 0 : index
    %55 = tpu.strided_load %arg19[%c0_44, %c0_45] {strides = array<i32: 2, 1>} : memref<256x32xf32, #tpu.memory_space<vmem>>, vector<126x32xf32>
    %c128_46 = arith.constant 128 : index
    %c0_47 = arith.constant 0 : index
    %56 = vector.load %arg14[%c128_46, %c0_47] : memref<256x32xf32, #tpu.memory_space<vmem>>, vector<126x32xf32>
    tpu.vector_store %arg14[%c128_46, %c0_47], %55 {strides = array<i32>} : memref<256x32xf32, #tpu.memory_space<vmem>>, vector<126x32xf32>,
    %cst_48 = arith.constant 0.000000e+00 : f32
    %57 = vector.broadcast %cst_48 : f32 to vector<2x32xf32>
    %c254 = arith.constant 254 : index
    %c0_49 = arith.constant 0 : index
    %58 = vector.load %arg14[%c254, %c0_49] : memref<256x32xf32, #tpu.memory_space<vmem>>, vector<2x32xf32>
    tpu.vector_store %arg14[%c254, %c0_49], %57 {strides = array<i32>} : memref<256x32xf32, #tpu.memory_space<vmem>>, vector<2x32xf32>,
    %c2_50 = arith.constant 2 : index
    %c0_51 = arith.constant 0 : index
    %59 = vector.load %arg17[%c2_50, %c0_51] : memref<136x32xf32, #tpu.memory_space<vmem>>, vector<126x32xf32>
    tpu.vector_store %arg17[%c2_50, %c0_51], %55 {strides = array<i32>} : memref<136x32xf32, #tpu.memory_space<vmem>>, vector<126x32xf32>,
    %c0_52 = arith.constant 0 : index
    %c0_53 = arith.constant 0 : index
    %60 = vector.load %arg17[%c0_52, %c0_53] : memref<136x32xf32, #tpu.memory_space<vmem>>, vector<126x32xf32>
    %c128_54 = arith.constant 128 : index
    %c0_55 = arith.constant 0 : index
    %61 = vector.load %arg13[%c128_54, %c0_55] : memref<256x160xf32, #tpu.memory_space<vmem>>, vector<126x32xf32>
    tpu.vector_store %arg13[%c128_54, %c0_55], %60 {strides = array<i32>} : memref<256x160xf32, #tpu.memory_space<vmem>>, vector<126x32xf32>,
    %c1_56 = arith.constant 1 : index
    %c0_57 = arith.constant 0 : index
    %62 = vector.load %arg17[%c1_56, %c0_57] : memref<136x32xf32, #tpu.memory_space<vmem>>, vector<126x32xf32>
    %c128_58 = arith.constant 128 : index
    %c32_59 = arith.constant 32 : index
    %63 = vector.load %arg13[%c128_58, %c32_59] : memref<256x160xf32, #tpu.memory_space<vmem>>, vector<126x32xf32>
    tpu.vector_store %arg13[%c128_58, %c32_59], %62 {strides = array<i32>} : memref<256x160xf32, #tpu.memory_space<vmem>>, vector<126x32xf32>,
    %c2_60 = arith.constant 2 : index
    %c0_61 = arith.constant 0 : index
    %64 = vector.load %arg17[%c2_60, %c0_61] : memref<136x32xf32, #tpu.memory_space<vmem>>, vector<126x32xf32>
    %c128_62 = arith.constant 128 : index
    %c64_63 = arith.constant 64 : index
    %65 = vector.load %arg13[%c128_62, %c64_63] : memref<256x160xf32, #tpu.memory_space<vmem>>, vector<126x32xf32>
    tpu.vector_store %arg13[%c128_62, %c64_63], %64 {strides = array<i32>} : memref<256x160xf32, #tpu.memory_space<vmem>>, vector<126x32xf32>,
    %c3_64 = arith.constant 3 : index
    %c0_65 = arith.constant 0 : index
    %66 = vector.load %arg17[%c3_64, %c0_65] : memref<136x32xf32, #tpu.memory_space<vmem>>, vector<126x32xf32>
    %c128_66 = arith.constant 128 : index
    %c96_67 = arith.constant 96 : index
    %67 = vector.load %arg13[%c128_66, %c96_67] : memref<256x160xf32, #tpu.memory_space<vmem>>, vector<126x32xf32>
    tpu.vector_store %arg13[%c128_66, %c96_67], %66 {strides = array<i32>} : memref<256x160xf32, #tpu.memory_space<vmem>>, vector<126x32xf32>,
    %c4_68 = arith.constant 4 : index
    %c0_69 = arith.constant 0 : index
    %68 = vector.load %arg17[%c4_68, %c0_69] : memref<136x32xf32, #tpu.memory_space<vmem>>, vector<126x32xf32>
    %c128_70 = arith.constant 128 : index
    %c128_71 = arith.constant 128 : index
    %69 = vector.load %arg13[%c128_70, %c128_71] : memref<256x160xf32, #tpu.memory_space<vmem>>, vector<126x32xf32>
    tpu.vector_store %arg13[%c128_70, %c128_71], %68 {strides = array<i32>} : memref<256x160xf32, #tpu.memory_space<vmem>>, vector<126x32xf32>,
    %cst_72 = arith.constant 0.000000e+00 : f32
    %70 = vector.broadcast %cst_72 : f32 to vector<2x160xf32>
    %c254_73 = arith.constant 254 : index
    %c0_74 = arith.constant 0 : index
    %71 = vector.load %arg13[%c254_73, %c0_74] : memref<256x160xf32, #tpu.memory_space<vmem>>, vector<2x160xf32>
    tpu.vector_store %arg13[%c254_73, %c0_74], %70 {strides = array<i32>} : memref<256x160xf32, #tpu.memory_space<vmem>>, vector<2x160xf32>,
    %c0_75 = arith.constant 0 : index
    %c0_76 = arith.constant 0 : index
    %72 = vector.load %arg13[%c0_75, %c0_76] : memref<256x160xf32, #tpu.memory_space<vmem>>, vector<256x160xf32>
    %c0_77 = arith.constant 0 : index
    %c0_78 = arith.constant 0 : index
    %73 = vector.load %arg4[%c0_77, %c0_78] : memref<160x64xf32, #tpu.memory_space<vmem>>, vector<160x64xf32>
    %cst_79 = arith.constant dense<0.000000e+00> : vector<256x64xf32>
    %74 = tpu.matmul %72, %73, %cst_79 {dimension_numbers = #tpu.dot_dimension_numbers<[1], [0], [0], [1], [0, 0, 1, 1], [], []>} : vector<256x160xf32>, vector<160x64xf32>, vector<256x64xf32> -> vector<256x64xf32>
    %c0_80 = arith.constant 0 : index
    %c0_81 = arith.constant 0 : index
    %75 = vector.load %arg5[%c0_80, %c0_81] : memref<1x64xf32, #tpu.memory_space<vmem>>, vector<1x64xf32>
    %76 = vector.broadcast %75 : vector<1x64xf32> to vector<256x64xf32>
    %77 = arith.addf %74, %76 : vector<256x64xf32>
    %cst_82 = arith.constant 0.000000e+00 : f32
    %78 = vector.broadcast %cst_82 : f32 to vector<256x64xf32>
    %79 = arith.maximumf %77, %78 : vector<256x64xf32>
    %c0_83 = arith.constant 0 : index
    %c0_84 = arith.constant 0 : index
    %80 = vector.load %arg14[%c0_83, %c0_84] : memref<256x32xf32, #tpu.memory_space<vmem>>, vector<256x32xf32>
    %c0_85 = arith.constant 0 : index
    %c0_86 = arith.constant 0 : index
    %81 = vector.load %arg6[%c0_85, %c0_86] : memref<32x64xf32, #tpu.memory_space<vmem>>, vector<32x64xf32>
    %cst_87 = arith.constant dense<0.000000e+00> : vector<256x64xf32>
    %82 = tpu.matmul %80, %81, %cst_87 {dimension_numbers = #tpu.dot_dimension_numbers<[1], [0], [0], [1], [0, 0, 1, 1], [], []>} : vector<256x32xf32>, vector<32x64xf32>, vector<256x64xf32> -> vector<256x64xf32>
    %c0_88 = arith.constant 0 : index
    %c0_89 = arith.constant 0 : index
    %83 = vector.load %arg7[%c0_88, %c0_89] : memref<1x64xf32, #tpu.memory_space<vmem>>, vector<1x64xf32>
    %84 = vector.broadcast %83 : vector<1x64xf32> to vector<256x64xf32>
    %85 = arith.addf %82, %84 : vector<256x64xf32>
    %86 = arith.addf %85, %79 : vector<256x64xf32>
    %87 = vector.extract_strided_slice %86 {offsets = [0, 0], sizes = [126, 64], strides = [1, 1]} : vector<256x64xf32> to vector<126x64xf32>
    %88 = vector.extract_strided_slice %87 {offsets = [0, 0], sizes = [121, 64], strides = [1, 1]} : vector<126x64xf32> to vector<121x64xf32>
    %89 = vector.extract_strided_slice %87 {offsets = [1, 0], sizes = [121, 64], strides = [1, 1]} : vector<126x64xf32> to vector<121x64xf32>
    %90 = arith.maximumf %88, %89 : vector<121x64xf32>
    %91 = vector.extract_strided_slice %87 {offsets = [2, 0], sizes = [121, 64], strides = [1, 1]} : vector<126x64xf32> to vector<121x64xf32>
    %92 = arith.maximumf %90, %91 : vector<121x64xf32>
    %93 = vector.extract_strided_slice %87 {offsets = [3, 0], sizes = [121, 64], strides = [1, 1]} : vector<126x64xf32> to vector<121x64xf32>
    %94 = arith.maximumf %92, %93 : vector<121x64xf32>
    %95 = vector.extract_strided_slice %87 {offsets = [4, 0], sizes = [121, 64], strides = [1, 1]} : vector<126x64xf32> to vector<121x64xf32>
    %96 = arith.maximumf %94, %95 : vector<121x64xf32>
    %c0_90 = arith.constant 0 : index
    %c0_91 = arith.constant 0 : index
    %97 = vector.load %arg20[%c0_90, %c0_91] : memref<128x64xf32, #tpu.memory_space<vmem>>, vector<121x64xf32>
    tpu.vector_store %arg20[%c0_90, %c0_91], %96 {strides = array<i32>} : memref<128x64xf32, #tpu.memory_space<vmem>>, vector<121x64xf32>,
    %c0_92 = arith.constant 0 : index
    %c0_93 = arith.constant 0 : index
    %98 = tpu.strided_load %arg20[%c0_92, %c0_93] {strides = array<i32: 2, 1>} : memref<128x64xf32, #tpu.memory_space<vmem>>, vector<61x64xf32>
    %c0_94 = arith.constant 0 : index
    %c0_95 = arith.constant 0 : index
    %99 = vector.load %arg16[%c0_94, %c0_95] : memref<128x64xf32, #tpu.memory_space<vmem>>, vector<61x64xf32>
    tpu.vector_store %arg16[%c0_94, %c0_95], %98 {strides = array<i32>} : memref<128x64xf32, #tpu.memory_space<vmem>>, vector<61x64xf32>,
    %cst_96 = arith.constant 0.000000e+00 : f32
    %100 = vector.broadcast %cst_96 : f32 to vector<3x64xf32>
    %c61 = arith.constant 61 : index
    %c0_97 = arith.constant 0 : index
    %101 = vector.load %arg16[%c61, %c0_97] : memref<128x64xf32, #tpu.memory_space<vmem>>, vector<3x64xf32>
    tpu.vector_store %arg16[%c61, %c0_97], %100 {strides = array<i32>} : memref<128x64xf32, #tpu.memory_space<vmem>>, vector<3x64xf32>,
    %c2_98 = arith.constant 2 : index
    %c0_99 = arith.constant 0 : index
    %102 = vector.load %arg18[%c2_98, %c0_99] : memref<72x64xf32, #tpu.memory_space<vmem>>, vector<61x64xf32>
    tpu.vector_store %arg18[%c2_98, %c0_99], %98 {strides = array<i32>} : memref<72x64xf32, #tpu.memory_space<vmem>>, vector<61x64xf32>,
    %c0_100 = arith.constant 0 : index
    %c0_101 = arith.constant 0 : index
    %103 = vector.load %arg18[%c0_100, %c0_101] : memref<72x64xf32, #tpu.memory_space<vmem>>, vector<61x64xf32>
    %c0_102 = arith.constant 0 : index
    %c0_103 = arith.constant 0 : index
    %104 = vector.load %arg15[%c0_102, %c0_103] : memref<128x320xf32, #tpu.memory_space<vmem>>, vector<61x64xf32>
    tpu.vector_store %arg15[%c0_102, %c0_103], %103 {strides = array<i32>} : memref<128x320xf32, #tpu.memory_space<vmem>>, vector<61x64xf32>,
    %c1_104 = arith.constant 1 : index
    %c0_105 = arith.constant 0 : index
    %105 = vector.load %arg18[%c1_104, %c0_105] : memref<72x64xf32, #tpu.memory_space<vmem>>, vector<61x64xf32>
    %c0_106 = arith.constant 0 : index
    %c64_107 = arith.constant 64 : index
    %106 = vector.load %arg15[%c0_106, %c64_107] : memref<128x320xf32, #tpu.memory_space<vmem>>, vector<61x64xf32>
    tpu.vector_store %arg15[%c0_106, %c64_107], %105 {strides = array<i32>} : memref<128x320xf32, #tpu.memory_space<vmem>>, vector<61x64xf32>,
    %c2_108 = arith.constant 2 : index
    %c0_109 = arith.constant 0 : index
    %107 = vector.load %arg18[%c2_108, %c0_109] : memref<72x64xf32, #tpu.memory_space<vmem>>, vector<61x64xf32>
    %c0_110 = arith.constant 0 : index
    %c128_111 = arith.constant 128 : index
    %108 = vector.load %arg15[%c0_110, %c128_111] : memref<128x320xf32, #tpu.memory_space<vmem>>, vector<61x64xf32>
    tpu.vector_store %arg15[%c0_110, %c128_111], %107 {strides = array<i32>} : memref<128x320xf32, #tpu.memory_space<vmem>>, vector<61x64xf32>,
    %c3_112 = arith.constant 3 : index
    %c0_113 = arith.constant 0 : index
    %109 = vector.load %arg18[%c3_112, %c0_113] : memref<72x64xf32, #tpu.memory_space<vmem>>, vector<61x64xf32>
    %c0_114 = arith.constant 0 : index
    %c192 = arith.constant 192 : index
    %110 = vector.load %arg15[%c0_114, %c192] : memref<128x320xf32, #tpu.memory_space<vmem>>, vector<61x64xf32>
    tpu.vector_store %arg15[%c0_114, %c192], %109 {strides = array<i32>} : memref<128x320xf32, #tpu.memory_space<vmem>>, vector<61x64xf32>,
    %c4_115 = arith.constant 4 : index
    %c0_116 = arith.constant 0 : index
    %111 = vector.load %arg18[%c4_115, %c0_116] : memref<72x64xf32, #tpu.memory_space<vmem>>, vector<61x64xf32>
    %c0_117 = arith.constant 0 : index
    %c256 = arith.constant 256 : index
    %112 = vector.load %arg15[%c0_117, %c256] : memref<128x320xf32, #tpu.memory_space<vmem>>, vector<61x64xf32>
    tpu.vector_store %arg15[%c0_117, %c256], %111 {strides = array<i32>} : memref<128x320xf32, #tpu.memory_space<vmem>>, vector<61x64xf32>,
    %cst_118 = arith.constant 0.000000e+00 : f32
    %113 = vector.broadcast %cst_118 : f32 to vector<3x320xf32>
    %c61_119 = arith.constant 61 : index
    %c0_120 = arith.constant 0 : index
    %114 = vector.load %arg15[%c61_119, %c0_120] : memref<128x320xf32, #tpu.memory_space<vmem>>, vector<3x320xf32>
    tpu.vector_store %arg15[%c61_119, %c0_120], %113 {strides = array<i32>} : memref<128x320xf32, #tpu.memory_space<vmem>>, vector<3x320xf32>,
    %115 = vector.extract_strided_slice %86 {offsets = [128, 0], sizes = [126, 64], strides = [1, 1]} : vector<256x64xf32> to vector<126x64xf32>
    %116 = vector.extract_strided_slice %115 {offsets = [0, 0], sizes = [121, 64], strides = [1, 1]} : vector<126x64xf32> to vector<121x64xf32>
    %117 = vector.extract_strided_slice %115 {offsets = [1, 0], sizes = [121, 64], strides = [1, 1]} : vector<126x64xf32> to vector<121x64xf32>
    %118 = arith.maximumf %116, %117 : vector<121x64xf32>
    %119 = vector.extract_strided_slice %115 {offsets = [2, 0], sizes = [121, 64], strides = [1, 1]} : vector<126x64xf32> to vector<121x64xf32>
    %120 = arith.maximumf %118, %119 : vector<121x64xf32>
    %121 = vector.extract_strided_slice %115 {offsets = [3, 0], sizes = [121, 64], strides = [1, 1]} : vector<126x64xf32> to vector<121x64xf32>
    %122 = arith.maximumf %120, %121 : vector<121x64xf32>
    %123 = vector.extract_strided_slice %115 {offsets = [4, 0], sizes = [121, 64], strides = [1, 1]} : vector<126x64xf32> to vector<121x64xf32>
    %124 = arith.maximumf %122, %123 : vector<121x64xf32>
    %c0_121 = arith.constant 0 : index
    %c0_122 = arith.constant 0 : index
    %125 = vector.load %arg20[%c0_121, %c0_122] : memref<128x64xf32, #tpu.memory_space<vmem>>, vector<121x64xf32>
    tpu.vector_store %arg20[%c0_121, %c0_122], %124 {strides = array<i32>} : memref<128x64xf32, #tpu.memory_space<vmem>>, vector<121x64xf32>,
    %c0_123 = arith.constant 0 : index
    %c0_124 = arith.constant 0 : index
    %126 = tpu.strided_load %arg20[%c0_123, %c0_124] {strides = array<i32: 2, 1>} : memref<128x64xf32, #tpu.memory_space<vmem>>, vector<61x64xf32>
    %c64_125 = arith.constant 64 : index
    %c0_126 = arith.constant 0 : index
    %127 = vector.load %arg16[%c64_125, %c0_126] : memref<128x64xf32, #tpu.memory_space<vmem>>, vector<61x64xf32>
    tpu.vector_store %arg16[%c64_125, %c0_126], %126 {strides = array<i32>} : memref<128x64xf32, #tpu.memory_space<vmem>>, vector<61x64xf32>,
    %cst_127 = arith.constant 0.000000e+00 : f32
    %128 = vector.broadcast %cst_127 : f32 to vector<3x64xf32>
    %c125 = arith.constant 125 : index
    %c0_128 = arith.constant 0 : index
    %129 = vector.load %arg16[%c125, %c0_128] : memref<128x64xf32, #tpu.memory_space<vmem>>, vector<3x64xf32>
    tpu.vector_store %arg16[%c125, %c0_128], %128 {strides = array<i32>} : memref<128x64xf32, #tpu.memory_space<vmem>>, vector<3x64xf32>,
    %c2_129 = arith.constant 2 : index
    %c0_130 = arith.constant 0 : index
    %130 = vector.load %arg18[%c2_129, %c0_130] : memref<72x64xf32, #tpu.memory_space<vmem>>, vector<61x64xf32>
    tpu.vector_store %arg18[%c2_129, %c0_130], %126 {strides = array<i32>} : memref<72x64xf32, #tpu.memory_space<vmem>>, vector<61x64xf32>,
    %c0_131 = arith.constant 0 : index
    %c0_132 = arith.constant 0 : index
    %131 = vector.load %arg18[%c0_131, %c0_132] : memref<72x64xf32, #tpu.memory_space<vmem>>, vector<61x64xf32>
    %c64_133 = arith.constant 64 : index
    %c0_134 = arith.constant 0 : index
    %132 = vector.load %arg15[%c64_133, %c0_134] : memref<128x320xf32, #tpu.memory_space<vmem>>, vector<61x64xf32>
    tpu.vector_store %arg15[%c64_133, %c0_134], %131 {strides = array<i32>} : memref<128x320xf32, #tpu.memory_space<vmem>>, vector<61x64xf32>,
    %c1_135 = arith.constant 1 : index
    %c0_136 = arith.constant 0 : index
    %133 = vector.load %arg18[%c1_135, %c0_136] : memref<72x64xf32, #tpu.memory_space<vmem>>, vector<61x64xf32>
    %c64_137 = arith.constant 64 : index
    %c64_138 = arith.constant 64 : index
    %134 = vector.load %arg15[%c64_137, %c64_138] : memref<128x320xf32, #tpu.memory_space<vmem>>, vector<61x64xf32>
    tpu.vector_store %arg15[%c64_137, %c64_138], %133 {strides = array<i32>} : memref<128x320xf32, #tpu.memory_space<vmem>>, vector<61x64xf32>,
    %c2_139 = arith.constant 2 : index
    %c0_140 = arith.constant 0 : index
    %135 = vector.load %arg18[%c2_139, %c0_140] : memref<72x64xf32, #tpu.memory_space<vmem>>, vector<61x64xf32>
    %c64_141 = arith.constant 64 : index
    %c128_142 = arith.constant 128 : index
    %136 = vector.load %arg15[%c64_141, %c128_142] : memref<128x320xf32, #tpu.memory_space<vmem>>, vector<61x64xf32>
    tpu.vector_store %arg15[%c64_141, %c128_142], %135 {strides = array<i32>} : memref<128x320xf32, #tpu.memory_space<vmem>>, vector<61x64xf32>,
    %c3_143 = arith.constant 3 : index
    %c0_144 = arith.constant 0 : index
    %137 = vector.load %arg18[%c3_143, %c0_144] : memref<72x64xf32, #tpu.memory_space<vmem>>, vector<61x64xf32>
    %c64_145 = arith.constant 64 : index
    %c192_146 = arith.constant 192 : index
    %138 = vector.load %arg15[%c64_145, %c192_146] : memref<128x320xf32, #tpu.memory_space<vmem>>, vector<61x64xf32>
    tpu.vector_store %arg15[%c64_145, %c192_146], %137 {strides = array<i32>} : memref<128x320xf32, #tpu.memory_space<vmem>>, vector<61x64xf32>,
    %c4_147 = arith.constant 4 : index
    %c0_148 = arith.constant 0 : index
    %139 = vector.load %arg18[%c4_147, %c0_148] : memref<72x64xf32, #tpu.memory_space<vmem>>, vector<61x64xf32>
    %c64_149 = arith.constant 64 : index
    %c256_150 = arith.constant 256 : index
    %140 = vector.load %arg15[%c64_149, %c256_150] : memref<128x320xf32, #tpu.memory_space<vmem>>, vector<61x64xf32>
    tpu.vector_store %arg15[%c64_149, %c256_150], %139 {strides = array<i32>} : memref<128x320xf32, #tpu.memory_space<vmem>>, vector<61x64xf32>,
    %cst_151 = arith.constant 0.000000e+00 : f32
    %141 = vector.broadcast %cst_151 : f32 to vector<3x320xf32>
    %c125_152 = arith.constant 125 : index
    %c0_153 = arith.constant 0 : index
    %142 = vector.load %arg15[%c125_152, %c0_153] : memref<128x320xf32, #tpu.memory_space<vmem>>, vector<3x320xf32>
    tpu.vector_store %arg15[%c125_152, %c0_153], %141 {strides = array<i32>} : memref<128x320xf32, #tpu.memory_space<vmem>>, vector<3x320xf32>,
    %c0_154 = arith.constant 0 : index
    %c0_155 = arith.constant 0 : index
    %143 = vector.load %arg15[%c0_154, %c0_155] : memref<128x320xf32, #tpu.memory_space<vmem>>, vector<128x320xf32>
    %c0_156 = arith.constant 0 : index
    %c0_157 = arith.constant 0 : index
    %144 = vector.load %arg8[%c0_156, %c0_157] : memref<320x128xf32, #tpu.memory_space<vmem>>, vector<320x128xf32>
    %cst_158 = arith.constant dense<0.000000e+00> : vector<128x128xf32>
    %145 = tpu.matmul %143, %144, %cst_158 {dimension_numbers = #tpu.dot_dimension_numbers<[1], [0], [0], [1], [0, 0, 1, 1], [], []>} : vector<128x320xf32>, vector<320x128xf32>, vector<128x128xf32> -> vector<128x128xf32>
    %c0_159 = arith.constant 0 : index
    %c0_160 = arith.constant 0 : index
    %146 = vector.load %arg9[%c0_159, %c0_160] : memref<1x128xf32, #tpu.memory_space<vmem>>, vector<1x128xf32>
    %147 = vector.broadcast %146 : vector<1x128xf32> to vector<128x128xf32>
    %148 = arith.addf %145, %147 : vector<128x128xf32>
    %cst_161 = arith.constant 0.000000e+00 : f32
    %149 = vector.broadcast %cst_161 : f32 to vector<128x128xf32>
    %150 = arith.maximumf %148, %149 : vector<128x128xf32>
    %c0_162 = arith.constant 0 : index
    %c0_163 = arith.constant 0 : index
    %151 = vector.load %arg16[%c0_162, %c0_163] : memref<128x64xf32, #tpu.memory_space<vmem>>, vector<128x64xf32>
    %c0_164 = arith.constant 0 : index
    %c0_165 = arith.constant 0 : index
    %152 = vector.load %arg10[%c0_164, %c0_165] : memref<64x128xf32, #tpu.memory_space<vmem>>, vector<64x128xf32>
    %cst_166 = arith.constant dense<0.000000e+00> : vector<128x128xf32>
    %153 = tpu.matmul %151, %152, %cst_166 {dimension_numbers = #tpu.dot_dimension_numbers<[1], [0], [0], [1], [0, 0, 1, 1], [], []>} : vector<128x64xf32>, vector<64x128xf32>, vector<128x128xf32> -> vector<128x128xf32>
    %c0_167 = arith.constant 0 : index
    %c0_168 = arith.constant 0 : index
    %154 = vector.load %arg11[%c0_167, %c0_168] : memref<1x128xf32, #tpu.memory_space<vmem>>, vector<1x128xf32>
    %155 = vector.broadcast %154 : vector<1x128xf32> to vector<128x128xf32>
    %156 = arith.addf %153, %155 : vector<128x128xf32>
    %157 = arith.addf %156, %150 : vector<128x128xf32>
    %158 = vector.extract_strided_slice %157 {offsets = [0, 0], sizes = [61, 128], strides = [1, 1]} : vector<128x128xf32> to vector<61x128xf32>
    %159 = vector.extract_strided_slice %158 {offsets = [0, 0], sizes = [57, 128], strides = [1, 1]} : vector<61x128xf32> to vector<57x128xf32>
    %160 = vector.extract_strided_slice %158 {offsets = [1, 0], sizes = [57, 128], strides = [1, 1]} : vector<61x128xf32> to vector<57x128xf32>
    %161 = arith.maximumf %159, %160 : vector<57x128xf32>
    %162 = vector.extract_strided_slice %158 {offsets = [2, 0], sizes = [57, 128], strides = [1, 1]} : vector<61x128xf32> to vector<57x128xf32>
    %163 = arith.maximumf %161, %162 : vector<57x128xf32>
    %164 = vector.extract_strided_slice %158 {offsets = [3, 0], sizes = [57, 128], strides = [1, 1]} : vector<61x128xf32> to vector<57x128xf32>
    %165 = arith.maximumf %163, %164 : vector<57x128xf32>
    %166 = vector.extract_strided_slice %158 {offsets = [4, 0], sizes = [57, 128], strides = [1, 1]} : vector<61x128xf32> to vector<57x128xf32>
    %167 = arith.maximumf %165, %166 : vector<57x128xf32>
    %c0_169 = arith.constant 0 : index
    %c0_170 = arith.constant 0 : index
    %168 = vector.load %arg21[%c0_169, %c0_170] : memref<64x128xf32, #tpu.memory_space<vmem>>, vector<57x128xf32>
    tpu.vector_store %arg21[%c0_169, %c0_170], %167 {strides = array<i32>} : memref<64x128xf32, #tpu.memory_space<vmem>>, vector<57x128xf32>,
    %c0_171 = arith.constant 0 : index
    %c0_172 = arith.constant 0 : index
    %169 = tpu.strided_load %arg21[%c0_171, %c0_172] {strides = array<i32: 2, 1>} : memref<64x128xf32, #tpu.memory_space<vmem>>, vector<29x128xf32>
    %cst_173 = arith.constant dense<0.000000e+00> : vector<128xf32>
    %170 = vector.multi_reduction <add>, %169, %cst_173 [0] : vector<29x128xf32> to vector<128xf32>
    %171 = vector.shape_cast %170 : vector<128xf32> to vector<1x128xf32>
    %cst_174 = arith.constant 2.900000e+01 : f32
    %172 = vector.broadcast %cst_174 : f32 to vector<1x128xf32>
    %173 = arith.divf %171, %172 : vector<1x128xf32>
    %c0_175 = arith.constant 0 : index
    %c0_176 = arith.constant 0 : index
    %174 = vector.load %arg12[%c0_175, %c0_176] : memref<2x128xf32, #tpu.memory_space<vmem>>, vector<1x128xf32>
    tpu.vector_store %arg12[%c0_175, %c0_176], %173 {strides = array<i32>} : memref<2x128xf32, #tpu.memory_space<vmem>>, vector<1x128xf32>,
    %175 = vector.extract_strided_slice %157 {offsets = [64, 0], sizes = [61, 128], strides = [1, 1]} : vector<128x128xf32> to vector<61x128xf32>
    %176 = vector.extract_strided_slice %175 {offsets = [0, 0], sizes = [57, 128], strides = [1, 1]} : vector<61x128xf32> to vector<57x128xf32>
    %177 = vector.extract_strided_slice %175 {offsets = [1, 0], sizes = [57, 128], strides = [1, 1]} : vector<61x128xf32> to vector<57x128xf32>
    %178 = arith.maximumf %176, %177 : vector<57x128xf32>
    %179 = vector.extract_strided_slice %175 {offsets = [2, 0], sizes = [57, 128], strides = [1, 1]} : vector<61x128xf32> to vector<57x128xf32>
    %180 = arith.maximumf %178, %179 : vector<57x128xf32>
    %181 = vector.extract_strided_slice %175 {offsets = [3, 0], sizes = [57, 128], strides = [1, 1]} : vector<61x128xf32> to vector<57x128xf32>
    %182 = arith.maximumf %180, %181 : vector<57x128xf32>
    %183 = vector.extract_strided_slice %175 {offsets = [4, 0], sizes = [57, 128], strides = [1, 1]} : vector<61x128xf32> to vector<57x128xf32>
    %184 = arith.maximumf %182, %183 : vector<57x128xf32>
    %c0_177 = arith.constant 0 : index
    %c0_178 = arith.constant 0 : index
    %185 = vector.load %arg21[%c0_177, %c0_178] : memref<64x128xf32, #tpu.memory_space<vmem>>, vector<57x128xf32>
    tpu.vector_store %arg21[%c0_177, %c0_178], %184 {strides = array<i32>} : memref<64x128xf32, #tpu.memory_space<vmem>>, vector<57x128xf32>,
    %c0_179 = arith.constant 0 : index
    %c0_180 = arith.constant 0 : index
    %186 = tpu.strided_load %arg21[%c0_179, %c0_180] {strides = array<i32: 2, 1>} : memref<64x128xf32, #tpu.memory_space<vmem>>, vector<29x128xf32>
    %cst_181 = arith.constant dense<0.000000e+00> : vector<128xf32>
    %187 = vector.multi_reduction <add>, %186, %cst_181 [0] : vector<29x128xf32> to vector<128xf32>
    %188 = vector.shape_cast %187 : vector<128xf32> to vector<1x128xf32>
    %cst_182 = arith.constant 2.900000e+01 : f32
    %189 = vector.broadcast %cst_182 : f32 to vector<1x128xf32>
    %190 = arith.divf %188, %189 : vector<1x128xf32>
    %c1_183 = arith.constant 1 : index
    %c0_184 = arith.constant 0 : index
    %191 = vector.load %arg12[%c1_183, %c0_184] : memref<2x128xf32, #tpu.memory_space<vmem>>, vector<1x128xf32>
    tpu.vector_store %arg12[%c1_183, %c0_184], %190 {strides = array<i32>} : memref<2x128xf32, #tpu.memory_space<vmem>>, vector<1x128xf32>,
    return
  }
  func.func @transform_0(%arg0: i32) -> (i32, i32) {
    %c0_i32 = arith.constant 0 : i32
    %c0_i32_0 = arith.constant 0 : i32
    return %arg0, %c0_i32 : i32, i32
  }
  func.func @transform_1(%arg0: i32) -> (i32, i32) {
    %c0_i32 = arith.constant 0 : i32
    %c0_i32_0 = arith.constant 0 : i32
    %c0_i32_1 = arith.constant 0 : i32
    return %c0_i32, %c0_i32_0 : i32, i32
  }
  func.func @transform_2(%arg0: i32) -> (i32, i32) {
    %c0_i32 = arith.constant 0 : i32
    %c0_i32_0 = arith.constant 0 : i32
    %c0_i32_1 = arith.constant 0 : i32
    return %c0_i32, %c0_i32_0 : i32, i32
  }
  func.func @transform_3(%arg0: i32) -> (i32, i32) {
    %c0_i32 = arith.constant 0 : i32
    %c0_i32_0 = arith.constant 0 : i32
    %c0_i32_1 = arith.constant 0 : i32
    return %c0_i32, %c0_i32_0 : i32, i32
  }
  func.func @transform_4(%arg0: i32) -> (i32, i32) {
    %c0_i32 = arith.constant 0 : i32
    %c0_i32_0 = arith.constant 0 : i32
    %c0_i32_1 = arith.constant 0 : i32
    return %c0_i32, %c0_i32_0 : i32, i32
  }
  func.func @transform_5(%arg0: i32) -> (i32, i32) {
    %c0_i32 = arith.constant 0 : i32
    %c0_i32_0 = arith.constant 0 : i32
    %c0_i32_1 = arith.constant 0 : i32
    return %c0_i32, %c0_i32_0 : i32, i32
  }
  func.func @transform_6(%arg0: i32) -> (i32, i32) {
    %c0_i32 = arith.constant 0 : i32
    %c0_i32_0 = arith.constant 0 : i32
    %c0_i32_1 = arith.constant 0 : i32
    return %c0_i32, %c0_i32_0 : i32, i32
  }
  func.func @transform_7(%arg0: i32) -> (i32, i32) {
    %c0_i32 = arith.constant 0 : i32
    %c0_i32_0 = arith.constant 0 : i32
    %c0_i32_1 = arith.constant 0 : i32
    return %c0_i32, %c0_i32_0 : i32, i32
  }
  func.func @transform_8(%arg0: i32) -> (i32, i32) {
    %c0_i32 = arith.constant 0 : i32
    %c0_i32_0 = arith.constant 0 : i32
    %c0_i32_1 = arith.constant 0 : i32
    return %c0_i32, %c0_i32_0 : i32, i32
  }
  func.func @transform_9(%arg0: i32) -> (i32, i32) {
    %c0_i32 = arith.constant 0 : i32
    %c0_i32_0 = arith.constant 0 : i32
    %c0_i32_1 = arith.constant 0 : i32
    return %c0_i32, %c0_i32_0 : i32, i32
  }
  func.func @transform_10(%arg0: i32) -> (i32, i32) {
    %c0_i32 = arith.constant 0 : i32
    %c0_i32_0 = arith.constant 0 : i32
    %c0_i32_1 = arith.constant 0 : i32
    return %c0_i32, %c0_i32_0 : i32, i32
  }
  func.func @transform_11(%arg0: i32) -> (i32, i32) {
    %c0_i32 = arith.constant 0 : i32
    %c0_i32_0 = arith.constant 0 : i32
    return %arg0, %c0_i32 : i32, i32
  }
}

</mosaic_0001>

<bundles_post_ra>
// kernel: tpu_custom_call.1
= control target key start
LH: loop header
LB: loop body
LE: loop exit
PB: predicated region body
PF: predicated region fallthrough
CT: control target
= control target key end

     0   :  { %vm117_vm0 = vcmask 64512   ;;  %s9500_s0 = inlined_call_operand.vmem [shape: f32[512,8], index: 0, kind: input, shape index: {}]   ;;  %s9501_s1 = inlined_call_operand.vmem [shape: f32[8,32], index: 1, kind: input, shape index: {}]   ;;  %s9502_s2 = inlined_call_operand.vmem [shape: f32[1,32], index: 2, kind: input, shape index: {}]   ;;  %s9503_s3 = inlined_call_operand.vmem [shape: f32[160,64], index: 3, kind: input, shape index: {}]   ;;  %s9504_s4 = inlined_call_operand.vmem [shape: f32[1,64], index: 4, kind: input, shape index: {}]   ;;  %s9505_s5 = inlined_call_operand.vmem [shape: f32[32,64], index: 5, kind: input, shape index: {}]   ;;  %s9506_s6 = inlined_call_operand.vmem [shape: f32[1,64], index: 6, kind: input, shape index: {}]   ;;  %s9507_s7 = inlined_call_operand.vmem [shape: f32[320,128], index: 7, kind: input, shape index: {}]   ;;  %s9508_s8 = inlined_call_operand.vmem [shape: f32[1,128], index: 8, kind: input, shape index: {}]   ;;  %s9509_s9 = inlined_call_operand.vmem [shape: f32[64,128], index: 9, kind: input, shape index: {}]   ;;  %s9510_s10 = inlined_call_operand.vmem [shape: f32[1,128], index: 10, kind: input, shape index: {}]   ;;  %s9511_s11 = inlined_call_operand.hbm [shape: f32[2,128], index: 11, kind: output, shape index: {}]  }
   0x1   :  { %v109_v0 = vld [vmem:[%s9501_s1] sm:$0xff]  ;;  %v46_v2 = vld [vmem:[%s9500_s0 + $0x8] sm:$0xff]  ;;  %v47_v3 = vld [vmem:[%s9500_s0 + $0x10] sm:$0xff] }
   0x2   :  { %v45_v1 = vld [vmem:[%s9500_s0] sm:$0xff]  ;;  %5917 = vmatprep.subr.mxu0 %v109_v0  ;;  %v48_v4 = vld [vmem:[%s9500_s0 + $0x18] sm:$0xff]  ;;  %v50_v6 = vld [vmem:[%s9500_s0 + $0x28] sm:$0xff] }
   0x3   :  { %5919 = vmatprep.mubr.msk.f32.mxu0 %vm117_vm0, %v45_v1  ;;  %5918 = vmatpush3.msra.mxu0 %v109_v0  ;;  %v49_v5 = vld [vmem:[%s9500_s0 + $0x20] sm:$0xff]  ;;  %v51_v7 = vld [vmem:[%s9500_s0 + $0x30] sm:$0xff]  ;;  %v52_v8 = vld [vmem:[%s9500_s0 + $0x38] sm:$0xff] }
   0x4   :  { %5920 = vmatmul.mubr.msk.f32.vlgmr.msra.gmra.mrb[0].mxu0 %vm117_vm0, %v46_v2  ;;  %v53_v9 = vld [vmem:[%s9500_s0 + $0x40] sm:$0xff]  ;;  %v54_v10 = vld [vmem:[%s9500_s0 + $0x48] sm:$0xff]  ;;  %v55_v11 = vld [vmem:[%s9500_s0 + $0x50] sm:$0xff] }
   0x5   :  { %5922 = vmatprep.mubr.msk.f32.mxu0 %vm117_vm0, %v47_v3  ;;  %v56_v12 = vld [vmem:[%s9500_s0 + $0x58] sm:$0xff]  ;;  %v57_v13 = vld [vmem:[%s9500_s0 + $0x60] sm:$0xff] }
   0x8   :  { %5923 = vmatmul.mubr.msk.f32.gmra.mrb[2].mxu0 %vm117_vm0, %v48_v4 }
   0x9   :  { %5925 = vmatprep.mubr.msk.f32.mxu0 %vm117_vm0, %v49_v5 }
   0xc   :  { %5926 = vmatmul.mubr.msk.f32.gmra.mrb[4].mxu0 %vm117_vm0, %v50_v6 }
   0xd   :  { %5928 = vmatprep.mubr.msk.f32.mxu0 %vm117_vm0, %v51_v7 }
  0x10   :  { %5929 = vmatmul.mubr.msk.f32.gmra.mrb[6].mxu0 %vm117_vm0, %v52_v8 }
  0x11   :  { %5931 = vmatprep.mubr.msk.f32.mxu0 %vm117_vm0, %v53_v9 }
  0x14   :  { %5932 = vmatmul.mubr.msk.f32.gmra.mrb[8].mxu0 %vm117_vm0, %v54_v10 }
  0x15   :  { %5934 = vmatprep.mubr.msk.f32.mxu0 %vm117_vm0, %v55_v11 }
  0x16   :  { %16 = vsyncpa [#allocation12], 0  ;;  %v58_v14 = vld [vmem:[%s9500_s0 + $0x68] sm:$0xff]  ;;  %v59_v15 = vld [vmem:[%s9500_s0 + $0x70] sm:$0xff]  ;;  %vm39_vm1 = vcmask 254976   ;;  %v9512_v1 = vmov 0.0  }
  0x17   :  { %v60_v16 = vld [vmem:[%s9500_s0 + $0x78] sm:$0xff]  ;;  %v61_v17 = vld [vmem:[%s9500_s0 + $0x80] sm:$0xff]  ;;  %v62_v18 = vld [vmem:[%s9500_s0 + $0x88] sm:$0xff]  ;;  %40 = vst.msk [vmem:[#allocation6] sm:$0x3] %vm39_vm1, %v9512_v1  ;;  %vm791_vm2 = vcmask 1046528  }
  0x18   :  { %5935 = vmatmul.mubr.msk.f32.gmra.mrb[10].mxu0 %vm117_vm0, %v56_v12  ;;  %v63_v19 = vld [vmem:[%s9500_s0 + $0x90] sm:$0xff]  ;;  %v64_v20 = vld [vmem:[%s9500_s0 + $0x98] sm:$0xff]  ;;  %v65_v21 = vld [vmem:[%s9500_s0 + $0xa0] sm:$0xff]  ;;  %41 = vst.msk [vmem:[#allocation6 + $0x80] sm:$0x3] %vm39_vm1, %v9512_v1  ;;  %vm919_vm3 = vcmask 1045504  }
  0x19   :  { %5937 = vmatprep.mubr.msk.f32.mxu0 %vm117_vm0, %v57_v13  ;;  %v66_v22 = vld [vmem:[%s9500_s0 + $0xa8] sm:$0xff]  ;;  %v67_v23 = vld [vmem:[%s9500_s0 + $0xb0] sm:$0xff]  ;;  %v68_v24 = vld [vmem:[%s9500_s0 + $0xb8] sm:$0xff]  ;;  %1385 = vst.msk [vmem:[#allocation3 + $0x7e] sm:$0x3] %vm39_vm1, %v9512_v1  ;;  %vm1047_vm4 = vcmask 1044480  }
  0x1a   :  { %v69_v25 = vld [vmem:[%s9500_s0 + $0xc0] sm:$0xff]  ;;  %v70_v26 = vld [vmem:[%s9500_s0 + $0xc8] sm:$0xff]  ;;  %v71_v27 = vld [vmem:[%s9500_s0 + $0xd0] sm:$0xff]  ;;  %1760 = vst [vmem:[#allocation2 + $0xf0] sm:$0xc0] %v9512_v1  ;;  %vm1175_vm5 = vcmask 1043456  }
  0x1b   :  { %v72_v28 = vld [vmem:[%s9500_s0 + $0xd8] sm:$0xff]  ;;  %v73_v29 = vld [vmem:[%s9500_s0 + $0xe0] sm:$0xff]  ;;  %v74_v30 = vld [vmem:[%s9500_s0 + $0xe8] sm:$0xff]  ;;  %2367 = vst.msk [vmem:[#allocation3 + $0xfe] sm:$0x3] %vm39_vm1, %v9512_v1  ;;  %vm1303_vm6 = vcmask 261120  }
  0x1c   :  { %5938 = vmatmul.mubr.msk.f32.gmra.mrb[12].mxu0 %vm117_vm0, %v58_v14  ;;  %v75_v31 = vld [vmem:[%s9500_s0 + $0xf0] sm:$0xff]  ;;  %v76_v32 = vld [vmem:[%s9500_s0 + $0xf8] sm:$0xff]  ;;  %v77_v33 = vld [vmem:[%s9500_s0 + $0x100] sm:$0xff]  ;;  %2736 = vst [vmem:[#allocation2 + $0x1f0] sm:$0xc0] %v9512_v1  ;;  %s6297_s16 = smov 64  }
  0x1d   :  { %5940 = vmatprep.mubr.msk.f32.mxu0 %vm117_vm0, %v59_v15  ;;  %v78_v34 = vld [vmem:[%s9500_s0 + $0x108] sm:$0xff]  ;;  %v79_v35 = vld [vmem:[%s9500_s0 + $0x110] sm:$0xff]  ;;  %v80_v36 = vld [vmem:[%s9500_s0 + $0x118] sm:$0xff]  ;;  %4044 = vst [vmem:[#allocation4 + $0xa8] sm:$0xe0] %v9512_v1  ;;  %s6298_s17 = smov 96  }
  0x1e   :  { %v81_v37 = vld [vmem:[%s9500_s0 + $0x120] sm:$0xff]  ;;  %v82_v38 = vld [vmem:[%s9500_s0 + $0x128] sm:$0xff]  ;;  %v83_v39 = vld [vmem:[%s9500_s0 + $0x130] sm:$0xff]  ;;  %4045 = vst [vmem:[#allocation4 + $0xb0] sm:$0xe0] %v9512_v1  ;;  %vm1335_vm7 = vcmask 256000  }
  0x1f   :  { %v84_v40 = vld [vmem:[%s9500_s0 + $0x138] sm:$0xff]  ;;  %v85_v41 = vld [vmem:[%s9500_s0 + $0x140] sm:$0xff]  ;;  %v86_v42 = vld [vmem:[%s9500_s0 + $0x148] sm:$0xff]  ;;  %4501 = vst [vmem:[#allocation4 + $0x168] sm:$0xe0] %v9512_v1  ;;  %vm1383_vm8 = vcmask 259072  }
  0x20   :  { %5941 = vmatmul.mubr.msk.f32.gmra.mrb[14].mxu0 %vm117_vm0, %v60_v16  ;;  %v87_v43 = vld [vmem:[%s9500_s0 + $0x150] sm:$0xff]  ;;  %v88_v44 = vld [vmem:[%s9500_s0 + $0x158] sm:$0xff]  ;;  %v89_v45 = vld [vmem:[%s9500_s0 + $0x160] sm:$0xff]  ;;  %4502 = vst [vmem:[#allocation4 + $0x170] sm:$0xe0] %v9512_v1  ;;  %vm1514_vm9 = vcmask 523520  }
  0x21   :  { %5943 = vmatprep.mubr.msk.f32.mxu0 %vm117_vm0, %v61_v17  ;;  %v90_v46 = vld [vmem:[%s9500_s0 + $0x168] sm:$0xff]  ;;  %v91_v47 = vld [vmem:[%s9500_s0 + $0x170] sm:$0xff]  ;;  %v92_v48 = vld [vmem:[%s9500_s0 + $0x178] sm:$0xff]  ;;  %vm1612_vm10 = vcmask 785920   ;;  %vm1710_vm11 = vcmask 1048320   ;;  %vm1761_vm12 = vcmask 261126  }
  0x22   :  { %v93_v49 = vld [vmem:[%s9500_s0 + $0x180] sm:$0xff]  ;;  %v94_v50 = vld [vmem:[%s9500_s0 + $0x188] sm:$0xff]  ;;  %v95_v51 = vld [vmem:[%s9500_s0 + $0x190] sm:$0xff]  ;;  %1762 = vst.msk [vmem:[#allocation2 + $0xf8] sm:$0xc0] %vm1761_vm12, %v9512_v1  ;;  %vm1530_vm13 = vcmask 521472  }
  0x23   :  { %v96_v52 = vld [vmem:[%s9500_s0 + $0x198] sm:$0xff]  ;;  %v97_v53 = vld [vmem:[%s9500_s0 + $0x1a0] sm:$0xff]  ;;  %v98_v54 = vld [vmem:[%s9500_s0 + $0x1a8] sm:$0xff]  ;;  %2737 = vst.msk [vmem:[#allocation2 + $0x1f8] sm:$0xc0] %vm1761_vm12, %v9512_v1  ;;  %vm1628_vm14 = vcmask 783872  }
  0x24   :  { %5944 = vmatmul.mubr.msk.f32.gmra.mrb[16].mxu0 %vm117_vm0, %v62_v18  ;;  %v99_v55 = vld [vmem:[%s9500_s0 + $0x1b0] sm:$0xff]  ;;  %v100_v56 = vld [vmem:[%s9500_s0 + $0x1b8] sm:$0xff]  ;;  %v101_v57 = vld [vmem:[%s9500_s0 + $0x1c0] sm:$0xff]  ;;  %vm1726_vm15 = vcmask 1046272   ;;  %vm4046_vm1 = vcmask 523269  }
  0x25   :  { %5946 = vmatprep.mubr.msk.f32.mxu0 %vm117_vm0, %v63_v19  ;;  %v102_v58 = vld [vmem:[%s9500_s0 + $0x1c8] sm:$0xff]  ;;  %v103_v59 = vld [vmem:[%s9500_s0 + $0x1d0] sm:$0xff]  ;;  %v104_v60 = vld [vmem:[%s9500_s0 + $0x1d8] sm:$0xff]  ;;  %4047 = vst.msk [vmem:[#allocation4 + $0xb8] sm:$0xe0] %vm4046_vm1, %v9512_v1 }
  0x26   :  { %v105_v61 = vld [vmem:[%s9500_s0 + $0x1e0] sm:$0xff]  ;;  %v106_v62 = vld [vmem:[%s9500_s0 + $0x1e8] sm:$0xff]  ;;  %v107_v63 = vld [vmem:[%s9500_s0 + $0x1f0] sm:$0xff]  ;;  %4503 = vst.msk [vmem:[#allocation4 + $0x178] sm:$0xe0] %vm4046_vm1, %v9512_v1 }
  0x27   :  { %v108_v0 = vld [vmem:[%s9500_s0 + $0x1f8] sm:$0xff]  ;;  %v3214_v2 = vld [vmem:[%s9505_s5] sm:$0xff]  ;;  %v3215_v3 = vld [vmem:[%s9505_s5 + $0x8] sm:$0xff] }
  0x28   :  { %5947 = vmatmul.mubr.msk.f32.gmra.mrb[18].mxu0 %vm117_vm0, %v64_v20  ;;  %v6181_v4 = vpack.c.bf16 %v3215_v3, %v3214_v2  ;;  %v3216_v5 = vld [vmem:[%s9505_s5 + $0x10] sm:$0xff]  ;;  %v3217_v6 = vld [vmem:[%s9505_s5 + $0x18] sm:$0xff]  ;;  %v6645_v8 = vld [vmem:[%s9502_s2] ss:$0 sm:$0xff]  ;;  %s6296_s5 = smov 32  }
  0x29   :  { %5949 = vmatprep.mubr.msk.f32.mxu0 %vm117_vm0, %v65_v21  ;;  %v6185_v7 = vpack.c.bf16 %v3217_v6, %v3216_v5 }
  0x2a   :  { %6182 = vmatprep.subr.bf16.mxu0 %v6181_v4 }
  0x2b   :  { %6184 = vmatpush3.bf16.msra.mxu0 %v6181_v4 }
  0x2c   :  { %5950 = vmatmul.mubr.msk.f32.gmra.mrb[20].mxu0 %vm117_vm0, %v66_v22  ;;  %6186 = vmatprep.subr.bf16.mxu0 %v6185_v7 }
  0x2d   :  { %5952 = vmatprep.mubr.msk.f32.mxu0 %vm117_vm0, %v67_v23 }
  0x2f   :  { %6188 = vmatpush3.bf16.msra.mxu0 %v6185_v7 }
  0x30   :  { %5953 = vmatmul.mubr.msk.f32.gmra.mrb[22].mxu0 %vm117_vm0, %v68_v24 }
  0x31   :  { %5955 = vmatprep.mubr.msk.f32.mxu0 %vm117_vm0, %v69_v25 }
  0x34   :  { %5956 = vmatmul.mubr.msk.f32.gmra.mrb[24].mxu0 %vm117_vm0, %v70_v26 }
  0x35   :  { %5958 = vmatprep.mubr.msk.f32.mxu0 %vm117_vm0, %v71_v27 }
  0x38   :  { %5959 = vmatmul.mubr.msk.f32.gmra.mrb[26].mxu0 %vm117_vm0, %v72_v28 }
  0x39   :  { %5961 = vmatprep.mubr.msk.f32.mxu0 %vm117_vm0, %v73_v29 }
  0x3c   :  { %5962 = vmatmul.mubr.msk.f32.gmra.mrb[28].mxu0 %vm117_vm0, %v74_v30 }
  0x3d   :  { %5964 = vmatprep.mubr.msk.f32.mxu0 %vm117_vm0, %v75_v31 }
  0x40   :  { %5965 = vmatmul.mubr.msk.f32.gmra.mrb[30].mxu0 %vm117_vm0, %v76_v32 }
  0x41   :  { %5967 = vmatprep.mubr.msk.f32.mxu0 %vm117_vm0, %v77_v33 }
  0x44   :  { %5968 = vmatmul.mubr.msk.f32.gmra.mrb[32].mxu0 %vm117_vm0, %v78_v34 }
  0x45   :  { %5970 = vmatprep.mubr.msk.f32.mxu0 %vm117_vm0, %v79_v35 }
  0x48   :  { %5971 = vmatmul.mubr.msk.f32.gmra.mrb[34].mxu0 %vm117_vm0, %v80_v36 }
  0x49   :  { %5973 = vmatprep.mubr.msk.f32.mxu0 %vm117_vm0, %v81_v37 }
  0x4c   :  { %5974 = vmatmul.mubr.msk.f32.gmra.mrb[36].mxu0 %vm117_vm0, %v82_v38 }
  0x4d   :  { %5976 = vmatprep.mubr.msk.f32.mxu0 %vm117_vm0, %v83_v39 }
  0x50   :  { %5977 = vmatmul.mubr.msk.f32.gmra.mrb[38].mxu0 %vm117_vm0, %v84_v40 }
  0x51   :  { %5979 = vmatprep.mubr.msk.f32.mxu0 %vm117_vm0, %v85_v41 }
  0x54   :  { %5980 = vmatmul.mubr.msk.f32.gmra.mrb[40].mxu0 %vm117_vm0, %v86_v42 }
  0x55   :  { %5982 = vmatprep.mubr.msk.f32.mxu0 %vm117_vm0, %v87_v43 }
  0x58   :  { %5983 = vmatmul.mubr.msk.f32.gmra.mrb[42].mxu0 %vm117_vm0, %v88_v44 }
  0x59   :  { %5985 = vmatprep.mubr.msk.f32.mxu0 %vm117_vm0, %v89_v45 }
  0x5c   :  { %5986 = vmatmul.mubr.msk.f32.gmra.mrb[44].mxu0 %vm117_vm0, %v90_v46 }
  0x5d   :  { %5988 = vmatprep.mubr.msk.f32.mxu0 %vm117_vm0, %v91_v47 }
  0x60   :  { %5989 = vmatmul.mubr.msk.f32.gmra.mrb[46].mxu0 %vm117_vm0, %v92_v48 }
  0x61   :  { %5991 = vmatprep.mubr.msk.f32.mxu0 %vm117_vm0, %v93_v49 }
  0x64   :  { %5992 = vmatmul.mubr.msk.f32.gmra.mrb[48].mxu0 %vm117_vm0, %v94_v50 }
  0x65   :  { %5994 = vmatprep.mubr.msk.f32.mxu0 %vm117_vm0, %v95_v51 }
  0x68   :  { %5995 = vmatmul.mubr.msk.f32.gmra.mrb[50].mxu0 %vm117_vm0, %v96_v52 }
  0x69   :  { %5997 = vmatprep.mubr.msk.f32.mxu0 %vm117_vm0, %v97_v53 }
  0x6c   :  { %5998 = vmatmul.mubr.msk.f32.gmra.mrb[52].mxu0 %vm117_vm0, %v98_v54 }
  0x6d   :  { %6000 = vmatprep.mubr.msk.f32.mxu0 %vm117_vm0, %v99_v55 }
  0x70   :  { %6001 = vmatmul.mubr.msk.f32.gmra.mrb[54].mxu0 %vm117_vm0, %v100_v56 }
  0x71   :  { %6003 = vmatprep.mubr.msk.f32.mxu0 %vm117_vm0, %v101_v57 }
  0x74   :  { %6004 = vmatmul.mubr.msk.f32.gmra.mrb[56].mxu0 %vm117_vm0, %v102_v58 }
  0x75   :  { %6006 = vmatprep.mubr.msk.f32.mxu0 %vm117_vm0, %v103_v59 }
  0x78   :  { %6007 = vmatmul.mubr.msk.f32.gmra.mrb[58].mxu0 %vm117_vm0, %v104_v60 }
  0x79   :  { %6009 = vmatprep.mubr.msk.f32.mxu0 %vm117_vm0, %v105_v61 }
  0x7c   :  { %6010 = vmatmul.mubr.msk.f32.gmra.mrb[60].mxu0 %vm117_vm0, %v106_v62 }
  0x7d   :  { %6012 = vmatprep.mubr.msk.f32.mxu0 %vm117_vm0, %v107_v63 }
  0x80   :  { %6013 = vmatmul.mubr.msk.f32.gmra.mrb[62].mxu0 %vm117_vm0, %v108_v0  ;;  %vm42_vm0 = vcmask 517120  }
  0x81   :  { %43 = vst.msk [vmem:[#allocation7] sm:$0x3] %vm42_vm0, %v9512_v1  ;;  %44 = vst.msk [vmem:[#allocation7 + $0x3f] sm:$0x3] %vm42_vm0, %v9512_v1 }
  0xd7   :  { %v5921_v9 = vpop.f32.mrb[0].mxu0 }
  0xd8   :  { %v382_v10 = vadd.f32 %v5921_v9, %v6645_v8  ;;  %v376_v11 = vpop.f32.mrb[1].mxu0 }
  0xd9   :  { %v377_v12 = vadd.f32 %v6645_v8, %v376_v11 }
  0xda   :  { %v696_v13 = vmax.f32 %v382_v10, 0.0 }
  0xdb   :  { %v695_v14 = vmax.f32 %v377_v12, 0.0  ;;  %v5924_v15 = vpop.f32.mrb[2].mxu0 }
  0xdc   :  { %v793_v16 = vrot.slane %v696_v13, 1  ;;  %v921_v17 = vrot.slane %v696_v13, 2  ;;  %v1049_v18 = vrot.slane %v696_v13, 3  ;;  %v1177_v19 = vrot.slane %v696_v13, 4  ;;  %v386_v20 = vpop.f32.mrb[3].mxu0 }
  0xdd   :  { %v792_v21 = vrot.slane %v695_v14, 1  ;;  %v920_v22 = vrot.slane %v695_v14, 2  ;;  %v1048_v23 = vrot.slane %v695_v14, 3  ;;  %v1176_v24 = vrot.slane %v695_v14, 4 }
  0xde   :  { %v392_v25 = vadd.f32 %v5924_v15, %v6645_v8  ;;  %v387_v26 = vadd.f32 %v6645_v8, %v386_v20 }
  0xdf   :  { %v794_v27 = vsel %vm791_vm2, %v792_v21, %v793_v16  ;;  %v922_v28 = vsel %vm919_vm3, %v920_v22, %v921_v17  ;;  %v1050_v29 = vsel %vm1047_vm4, %v1048_v23, %v1049_v18  ;;  %v1178_v30 = vsel %vm1175_vm5, %v1176_v24, %v1177_v19  ;;  %v5927_v31 = vpop.f32.mrb[4].mxu0 }
  0xe0   :  { %v887_v32 = vmax.f32 %v695_v14, %v794_v27  ;;  %v6655_v33 = vmax.f32 %v392_v25, 0.0  ;;  %v697_v34 = vmax.f32 %v387_v26, 0.0  ;;  %v402_v35 = vadd.f32 %v5927_v31, %v6645_v8  ;;  %v396_v36 = vpop.f32.mrb[5].mxu0 }
  0xe1   :  { %v397_v37 = vadd.f32 %v6645_v8, %v396_v36 }
  0xe2   :  { %v1015_v38 = vmax.f32 %v887_v32, %v922_v28  ;;  %v797_v39 = vrot.slane %v6655_v33, 1  ;;  %v925_v40 = vrot.slane %v6655_v33, 2  ;;  %v1053_v41 = vrot.slane %v6655_v33, 3 }
  0xe3   :  { %v1181_v42 = vrot.slane %v6655_v33, 4  ;;  %v795_v43 = vrot.slane %v697_v34, 1  ;;  %v923_v44 = vrot.slane %v697_v34, 2  ;;  %v1051_v45 = vrot.slane %v697_v34, 3  ;;  %v5930_v46 = vpop.f32.mrb[6].mxu0 }
  0xe4   :  { %v1143_v47 = vmax.f32 %v1015_v38, %v1050_v29  ;;  %v1179_v48 = vrot.slane %v697_v34, 4  ;;  %v6663_v49 = vmax.f32 %v402_v35, 0.0  ;;  %v699_v50 = vmax.f32 %v397_v37, 0.0  ;;  %v406_v51 = vpop.f32.mrb[7].mxu0 }
  0xe5   :  { %v796_v52 = vsel %vm791_vm2, %v793_v16, %v795_v43  ;;  %v798_v53 = vsel %vm791_vm2, %v795_v43, %v797_v39  ;;  %v924_v54 = vsel %vm919_vm3, %v921_v17, %v923_v44  ;;  %v926_v55 = vsel %vm919_vm3, %v923_v44, %v925_v40 }
  0xe6   :  { %v1271_v56 = vmax.f32 %v1143_v47, %v1178_v30  ;;  %v888_v57 = vmax.f32 %v696_v13, %v796_v52  ;;  %v889_v58 = vmax.f32 %v697_v34, %v798_v53  ;;  %v1052_v59 = vsel %vm1047_vm4, %v1049_v18, %v1051_v45 }
  0xe7   :  { %v1054_v60 = vsel %vm1047_vm4, %v1051_v45, %v1053_v41  ;;  %v1180_v61 = vsel %vm1175_vm5, %v1177_v19, %v1179_v48  ;;  %v1182_v62 = vsel %vm1175_vm5, %v1179_v48, %v1181_v42  ;;  %v801_v63 = vrot.slane %v6663_v49, 1  ;;  %v5933_v0 = vpop.f32.mrb[8].mxu0 }
  0xe8   :  { %1304 = vst.msk [vmem:[#allocation8] sm:$0xff] %vm1303_vm6, %v1271_v56  ;;  %v1016_v2 = vmax.f32 %v888_v57, %v924_v54  ;;  %v1017_v3 = vmax.f32 %v889_v58, %v926_v55  ;;  %v929_v4 = vrot.slane %v6663_v49, 2  ;;  %v1057_v5 = vrot.slane %v6663_v49, 3  ;;  %v416_v6 = vpop.f32.mrb[9].mxu0 }
  0xe9   :  { %v1185_v7 = vrot.slane %v6663_v49, 4  ;;  %v799_v9 = vrot.slane %v699_v50, 1  ;;  %v927_v10 = vrot.slane %v699_v50, 2  ;;  %v1055_v11 = vrot.slane %v699_v50, 3 }
  0xea   :  { %v1144_v12 = vmax.f32 %v1016_v2, %v1052_v59  ;;  %v1145_v13 = vmax.f32 %v1017_v3, %v1054_v60  ;;  %v1183_v14 = vrot.slane %v699_v50, 4  ;;  %v412_v15 = vadd.f32 %v5930_v46, %v6645_v8 }
  0xeb   :  { %v800_v16 = vsel %vm791_vm2, %v797_v39, %v799_v9  ;;  %v802_v17 = vsel %vm791_vm2, %v799_v9, %v801_v63  ;;  %v928_v18 = vsel %vm919_vm3, %v925_v40, %v927_v10  ;;  %v930_v19 = vsel %vm919_vm3, %v927_v10, %v929_v4  ;;  %v5936_v20 = vpop.f32.mrb[10].mxu0 }
  0xec   :  { %v1272_v21 = vmax.f32 %v1144_v12, %v1180_v61  ;;  %v1273_v22 = vmax.f32 %v1145_v13, %v1182_v62  ;;  %v890_v23 = vmax.f32 %v6655_v33, %v800_v16  ;;  %v891_v24 = vmax.f32 %v699_v50, %v802_v17  ;;  %v426_v25 = vpop.f32.mrb[11].mxu0 }
  0xed   :  { %v1056_v26 = vsel %vm1047_vm4, %v1053_v41, %v1055_v11  ;;  %v1058_v27 = vsel %vm1047_vm4, %v1055_v11, %v1057_v5  ;;  %v1184_v28 = vsel %vm1175_vm5, %v1181_v42, %v1183_v14  ;;  %v1186_v29 = vsel %vm1175_vm5, %v1183_v14, %v1185_v7 }
  0xee   :  { %1305 = vst.msk [vmem:[#allocation8 + $0x8] sm:$0xff] %vm1303_vm6, %v1272_v21  ;;  %1306 = vst.msk [vmem:[#allocation8 + $0x10] sm:$0xff] %vm1303_vm6, %v1273_v22  ;;  %v1018_v30 = vmax.f32 %v890_v23, %v928_v18  ;;  %v1019_v31 = vmax.f32 %v891_v24, %v930_v19  ;;  %v6698_v32 = vmax.f32 %v412_v15, 0.0  ;;  %v407_v33 = vadd.f32 %v6645_v8, %v406_v51 }
  0xef   :  { %v422_v34 = vadd.f32 %v5933_v0, %v6645_v8  ;;  %v417_v35 = vadd.f32 %v6645_v8, %v416_v6  ;;  %v432_v36 = vadd.f32 %v5936_v20, %v6645_v8  ;;  %v6705_v37 = vadd.f32 %v6645_v8, %v426_v25  ;;  %v6707_v38 = vpop.f32.mrb[12].mxu0 }
  0xf0   :  { %v1146_v39 = vmax.f32 %v1018_v30, %v1056_v26  ;;  %v1147_v40 = vmax.f32 %v1019_v31, %v1058_v27  ;;  %v805_v41 = vrot.slane %v6698_v32, 1  ;;  %v933_v42 = vrot.slane %v6698_v32, 2  ;;  %v6711_v43 = vpop.f32.mrb[13].mxu0 }
  0xf1   :  { %v1061_v44 = vrot.slane %v6698_v32, 3  ;;  %v1189_v45 = vrot.slane %v6698_v32, 4  ;;  %v701_v46 = vmax.f32 %v407_v33, 0.0  ;;  %v6715_v47 = vmax.f32 %v422_v34, 0.0 }
  0xf2   :  { %v1274_v48 = vmax.f32 %v1146_v39, %v1184_v28  ;;  %v1275_v50 = vmax.f32 %v1147_v40, %v1186_v29  ;;  %v703_v51 = vmax.f32 %v417_v35, 0.0  ;;  %v6717_v52 = vmax.f32 %v432_v36, 0.0 }
  0xf3   :  { %v803_v53 = vrot.slane %v701_v46, 1  ;;  %v931_v54 = vrot.slane %v701_v46, 2  ;;  %v1059_v55 = vrot.slane %v701_v46, 3  ;;  %v1187_v56 = vrot.slane %v701_v46, 4  ;;  %v6719_v57 = vpop.f32.mrb[14].mxu0 }
  0xf4   :  { %1307 = vst.msk [vmem:[#allocation8 + $0x18] sm:$0xff] %vm1303_vm6, %v1274_v48  ;;  %1308 = vst.msk [vmem:[#allocation8 + $0x20] sm:$0xff] %vm1303_vm6, %v1275_v50  ;;  %v809_v58 = vrot.slane %v6715_v47, 1  ;;  %v937_v59 = vrot.slane %v6715_v47, 2  ;;  %v1065_v60 = vrot.slane %v6715_v47, 3  ;;  %v1193_v61 = vrot.slane %v6715_v47, 4 }
  0xf5   :  { %v446_v62 = vpop.f32.mrb[15].mxu0  ;;  %v804_v0 = vsel %vm791_vm2, %v801_v63, %v803_v53  ;;  %v806_v2 = vsel %vm791_vm2, %v803_v53, %v805_v41  ;;  %v932_v3 = vsel %vm919_vm3, %v929_v4, %v931_v54  ;;  %v934_v6 = vsel %vm919_vm3, %v931_v54, %v933_v42  ;;  %v1337_v9 = vld [vmem:[#allocation8] ss:$2 sm:$0xff] }
  0xf6   :  { %v892_v10 = vmax.f32 %v6663_v49, %v804_v0  ;;  %v893_v11 = vmax.f32 %v701_v46, %v806_v2  ;;  %v1060_v12 = vsel %vm1047_vm4, %v1057_v5, %v1059_v55  ;;  %v1062_v13 = vsel %vm1047_vm4, %v1059_v55, %v1061_v44  ;;  %1368 = vst.msk [vmem:[#allocation3] sm:$0xff] %vm1303_vm6, %v1337_v9 }
  0xf7   :  { %1386 = vst.msk [vmem:[#allocation6 + $0x2] sm:$0xff] %vm1303_vm6, %v1337_v9  ;;  %v1188_v63 = vsel %vm1175_vm5, %v1185_v7, %v1187_v56  ;;  %v1190_v4 = vsel %vm1175_vm5, %v1187_v56, %v1189_v45  ;;  %v807_v14 = vrot.slane %v703_v51, 1  ;;  %v935_v15 = vrot.slane %v703_v51, 2  ;;  %v5945_v16 = vpop.f32.mrb[16].mxu0 }
  0xf8   :  { %v1020_v17 = vmax.f32 %v892_v10, %v932_v3  ;;  %v1021_v18 = vmax.f32 %v893_v11, %v934_v6  ;;  %v1063_v19 = vrot.slane %v703_v51, 3  ;;  %v1191_v20 = vrot.slane %v703_v51, 4  ;;  %v6746_v5 = vpop.f32.mrb[17].mxu0 }
  0xf9   :  { %v808_v21 = vsel %vm791_vm2, %v805_v41, %v807_v14  ;;  %v810_v22 = vsel %vm791_vm2, %v807_v14, %v809_v58  ;;  %v936_v49 = vsel %vm919_vm3, %v933_v42, %v935_v15  ;;  %v938_v7 = vsel %vm919_vm3, %v935_v15, %v937_v59 }
  0xfa   :  { %v1148_v23 = vmax.f32 %v1020_v17, %v1060_v12  ;;  %v1149_v24 = vmax.f32 %v1021_v18, %v1062_v13  ;;  %v894_v25 = vmax.f32 %v6698_v32, %v808_v21  ;;  %v895_v26 = vmax.f32 %v703_v51, %v810_v22 }
  0xfb   :  { %v1064_v27 = vsel %vm1047_vm4, %v1061_v44, %v1063_v19  ;;  %v1066_v28 = vsel %vm1047_vm4, %v1063_v19, %v1065_v60  ;;  %v1192_v29 = vsel %vm1175_vm5, %v1189_v45, %v1191_v20  ;;  %v1194_v30 = vsel %vm1175_vm5, %v1191_v20, %v1193_v61  ;;  %v6765_v31 = vpop.f32.mrb[18].mxu0  ;;  %v1339_v33 = vld [vmem:[#allocation8 + $0x10] ss:$2 sm:$0xff] }
  0xfc   :  { %v1276_v34 = vmax.f32 %v1148_v23, %v1188_v63  ;;  %v1277_v35 = vmax.f32 %v1149_v24, %v1190_v4  ;;  %v1022_v36 = vmax.f32 %v894_v25, %v936_v49  ;;  %v1023_v32 = vmax.f32 %v895_v26, %v938_v7  ;;  %v6767_v39 = vpop.f32.mrb[19].mxu0  ;;  %1387 = vst.msk [vmem:[#allocation6 + $0xa] sm:$0xff] %vm1303_vm6, %v1339_v33 }
  0xfd   :  { %1369 = vst.msk [vmem:[#allocation3 + $0x8] sm:$0xff] %vm1303_vm6, %v1339_v33  ;;  %v813_v40 = vrot.slane %v6717_v52, 1  ;;  %v941_v41 = vrot.slane %v6717_v52, 2  ;;  %v1069_v42 = vrot.slane %v6717_v52, 3  ;;  %v1197_v44 = vrot.slane %v6717_v52, 4  ;;  %v3182_v45 = vld [vmem:[#allocation3] sm:$0xff] }
  0xfe   :  { %v1434_v46 = vld [vmem:[#allocation6 + $0x1] sm:$0xff]  ;;  %1309 = vst.msk [vmem:[#allocation8 + $0x28] sm:$0xff] %vm1303_vm6, %v1276_v34  ;;  %1310 = vst.msk [vmem:[#allocation8 + $0x30] sm:$0xff] %vm1303_vm6, %v1277_v35  ;;  %v1150_v48 = vmax.f32 %v1022_v36, %v1064_v27  ;;  %v1151_v50 = vmax.f32 %v1023_v32, %v1066_v28  ;;  %v705_v51 = vmax.f32 %v6705_v37, 0.0  ;;  %v442_v53 = vadd.f32 %v6707_v38, %v6645_v8 }
  0xff   :  { %6023 = vmatprep.mubr.msk.f32.mxu0 %vm1303_vm6, %v3182_v45  ;;  %1466 = vrot.lane.b32.xlu0 %v1434_v46, %s6296_s5  ;;  %v1402_v54 = vld [vmem:[#allocation6] sm:$0xff]  ;;  %v437_v55 = vadd.f32 %v6645_v8, %v6711_v43  ;;  %v452_v56 = vadd.f32 %v6719_v57, %v6645_v8  ;;  %v447_v0 = vadd.f32 %v6645_v8, %v446_v62  ;;  %v6790_v37 = vpop.f32.mrb[20].mxu0 }
 0x100   :  { %v6788_v2 = vadd.f32 %v5945_v16, %v6645_v8  ;;  %1418 = vst.msk [vmem:[#allocation2] sm:$0xff] %vm1303_vm6, %v1402_v54  ;;  %v1278_v38 = vmax.f32 %v1150_v48, %v1192_v29  ;;  %v1279_v3 = vmax.f32 %v1151_v50, %v1194_v30  ;;  %v811_v6 = vrot.slane %v705_v51, 1  ;;  %v6793_v10 = vpop.f32.mrb[21].mxu0  ;;  %v1532_v62 = vld [vmem:[#allocation6 + $0x2] sm:$0xff] }
 0x101   :  { %v939_v9 = vrot.slane %v705_v51, 2  ;;  %v1067_v11 = vrot.slane %v705_v51, 3  ;;  %v1195_v43 = vrot.slane %v705_v51, 4  ;;  %v6795_v12 = vmax.f32 %v442_v53, 0.0 }
 0x102   :  { %v6797_v57 = vmax.f32 %v437_v55, 0.0  ;;  %1311 = vst.msk [vmem:[#allocation8 + $0x38] sm:$0xff] %vm1303_vm6, %v1278_v38  ;;  %1312 = vst.msk [vmem:[#allocation8 + $0x40] sm:$0xff] %vm1303_vm6, %v1279_v3  ;;  %v812_v13 = vsel %vm791_vm2, %v809_v58, %v811_v6  ;;  %v814_v63 = vsel %vm791_vm2, %v811_v6, %v813_v40  ;;  %v6846_v36 = vmax.f32 %v452_v56, 0.0 }
 0x103   :  { %v940_v4 = vsel %vm919_vm3, %v937_v59, %v939_v9  ;;  %v942_v14 = vsel %vm919_vm3, %v939_v9, %v941_v41  ;;  %1564 = vrot.lane.b32.xlu0 %v1532_v62, %s6297_s16  ;;  %v896_v15 = vmax.f32 %v6715_v47, %v812_v13  ;;  %v897_v16 = vmax.f32 %v705_v51, %v814_v63  ;;  %v1630_v18 = vld [vmem:[#allocation6 + $0x3] sm:$0xff]  ;;  %v6821_v19 = vpop.f32.mrb[22].mxu0 }
 0x104   :  { %v1068_v58 = vsel %vm1047_vm4, %v1065_v60, %v1067_v11  ;;  %v1070_v17 = vsel %vm1047_vm4, %v1067_v11, %v1069_v42  ;;  %v3183_v59 = vld [vmem:[#allocation3 + $0x8] sm:$0xff]  ;;  %v1196_v20 = vsel %vm1175_vm5, %v1193_v61, %v1195_v43  ;;  %v1198_v21 = vsel %vm1175_vm5, %v1195_v43, %v1197_v44  ;;  %1662 = vrot.lane.b32.xlu1 %v1630_v18, %s6298_s17  ;;  %v6833_v49 = vpop.f32.mrb[23].mxu0 }
 0x105   :  { %v817_v22 = vrot.slane %v6795_v12, 1  ;;  %v945_v60 = vrot.slane %v6795_v12, 2  ;;  %6024 = vmatmul.mubr.msk.f32.vlgmr.msra.gmra.mrb[64].mxu0 %vm1303_vm6, %v3183_v59  ;;  %v1728_v7 = vld [vmem:[#allocation6 + $0x4] sm:$0xff]  ;;  %v1024_v23 = vmax.f32 %v896_v15, %v940_v4  ;;  %v1025_v47 = vmax.f32 %v897_v16, %v942_v14  ;;  %v1341_v25 = vld [vmem:[#allocation8 + $0x20] ss:$2 sm:$0xff] }
 0x106   :  { %v1073_v61 = vrot.slane %v6795_v12, 3  ;;  %v1201_v24 = vrot.slane %v6795_v12, 4  ;;  %v1533_v26 = vld [vmem:[#allocation6 + $0xa] sm:$0xff]  ;;  %1744 = vst.msk [vmem:[#allocation2 + $0x8] sm:$0xff] %vm1303_vm6, %v1728_v7  ;;  %v815_v28 = vrot.slane %v6797_v57, 1  ;;  %v943_v29 = vrot.slane %v6797_v57, 2 }
 0x107   :  { %v1403_v27 = vld [vmem:[#allocation6 + $0x8] sm:$0xff]  ;;  %v1071_v30 = vrot.slane %v6797_v57, 3  ;;  %v1199_v33 = vrot.slane %v6797_v57, 4  ;;  %1370 = vst.msk [vmem:[#allocation3 + $0x10] sm:$0xff] %vm1303_vm6, %v1341_v25  ;;  %1388 = vst.msk [vmem:[#allocation6 + $0x12] sm:$0xff] %vm1303_vm6, %v1341_v25  ;;  %1566 = vrot.lane.b32.xlu0 %v1533_v26, %s6297_s16  ;;  %v1152_v34 = vmax.f32 %v1024_v23, %v1068_v58  ;;  %v1153_v35 = vmax.f32 %v1025_v47, %v1070_v17  ;;  %v6850_v46 = vpop.f32.mrb[24].mxu0 }
 0x108   :  { %1419 = vst.msk [vmem:[#allocation2 + $0x10] sm:$0xff] %vm1303_vm6, %v1403_v27  ;;  %v6848_v32 = vmax.f32 %v447_v0, 0.0  ;;  %v1435_v45 = vld [vmem:[#allocation6 + $0x9] sm:$0xff]  ;;  %v816_v48 = vsel %vm791_vm2, %v813_v40, %v815_v28  ;;  %v818_v50 = vsel %vm791_vm2, %v815_v28, %v817_v22  ;;  %v944_v51 = vsel %vm919_vm3, %v941_v41, %v943_v29  ;;  %v6865_v54 = vpop.f32.mrb[25].mxu0 }
 0x109   :  { %v946_v53 = vsel %vm919_vm3, %v943_v29, %v945_v60  ;;  %1468 = vrot.lane.b32.xlu1 %v1435_v45, %s6296_s5  ;;  %v1280_v55 = vmax.f32 %v1152_v34, %v1196_v20  ;;  %v1281_v56 = vmax.f32 %v1153_v35, %v1198_v21  ;;  %v898_v40 = vmax.f32 %v6717_v52, %v816_v48  ;;  %v1343_v38 = vld [vmem:[#allocation8 + $0x30] ss:$2 sm:$0xff] }
 0x10a   :  { %v899_v0 = vmax.f32 %v6797_v57, %v818_v50  ;;  %v1072_v3 = vsel %vm1047_vm4, %v1069_v42, %v1071_v30  ;;  %v1074_v41 = vsel %vm1047_vm4, %v1071_v30, %v1073_v61  ;;  %v1200_v6 = vsel %vm1175_vm5, %v1197_v44, %v1199_v33  ;;  %1371 = vst.msk [vmem:[#allocation3 + $0x18] sm:$0xff] %vm1303_vm6, %v1343_v38 }
 0x10b   :  { %v1202_v9 = vsel %vm1175_vm5, %v1199_v33, %v1201_v24  ;;  %1389 = vst.msk [vmem:[#allocation6 + $0x1a] sm:$0xff] %vm1303_vm6, %v1343_v38  ;;  %1313 = vst.msk [vmem:[#allocation8 + $0x48] sm:$0xff] %vm1303_vm6, %v1280_v55  ;;  %v1026_v42 = vmax.f32 %v898_v40, %v944_v51  ;;  %v821_v43 = vrot.slane %v6846_v36, 1  ;;  %v949_v52 = vrot.slane %v6846_v36, 2  ;;  %v6887_v57 = vpop.f32.mrb[26].mxu0 }
 0x10c   :  { %1314 = vst.msk [vmem:[#allocation8 + $0x50] sm:$0xff] %vm1303_vm6, %v1281_v56  ;;  %v1027_v11 = vmax.f32 %v899_v0, %v946_v53  ;;  %v1077_v44 = vrot.slane %v6846_v36, 3  ;;  %v1205_v62 = vrot.slane %v6846_v36, 4  ;;  %v819_v13 = vrot.slane %v6848_v32, 1  ;;  %v6893_v14 = vpop.f32.mrb[27].mxu0 }
 0x10d   :  { %v947_v63 = vrot.slane %v6848_v32, 2  ;;  %v2739_v4 = vld [vmem:[#allocation2 + $0x8] sm:$0xff]  ;;  %v1154_v15 = vmax.f32 %v1026_v42, %v1072_v3  ;;  %v1075_v58 = vrot.slane %v6848_v32, 3  ;;  %v1203_v17 = vrot.slane %v6848_v32, 4 }
 0x10e   :  { %v1155_v16 = vmax.f32 %v1027_v11, %v1074_v41  ;;  %v3184_v18 = vld [vmem:[#allocation3 + $0x10] sm:$0xff]  ;;  %5589 = vmatprep.mubr.msk.f32.mxu1 %vm1303_vm6, %v2739_v4  ;;  %v820_v20 = vsel %vm791_vm2, %v817_v22, %v819_v13  ;;  %v822_v21 = vsel %vm791_vm2, %v819_v13, %v821_v43  ;;  %v6936_v48 = vmax.f32 %v6788_v2, 0.0 }
 0x10f   :  { %v1404_v59 = vld [vmem:[#allocation6 + $0x10] sm:$0xff]  ;;  %v948_v7 = vsel %vm919_vm3, %v945_v60, %v947_v63  ;;  %v950_v23 = vsel %vm919_vm3, %v947_v63, %v949_v52  ;;  %6026 = vmatprep.mubr.msk.f32.mxu0 %vm1303_vm6, %v3184_v18  ;;  %v1282_v26 = vmax.f32 %v1154_v15, %v1200_v6  ;;  %v900_v27 = vmax.f32 %v6795_v12, %v820_v20  ;;  %v6916_v29 = vpop.f32.mrb[28].mxu0 }
 0x110   :  { %v1631_v47 = vld [vmem:[#allocation6 + $0xb] sm:$0xff]  ;;  %1420 = vst.msk [vmem:[#allocation2 + $0x20] sm:$0xff] %vm1303_vm6, %v1404_v59  ;;  %v1283_v22 = vmax.f32 %v1155_v16, %v1202_v9  ;;  %v901_v28 = vmax.f32 %v6848_v32, %v822_v21  ;;  %v1076_v30 = vsel %vm1047_vm4, %v1073_v61, %v1075_v58  ;;  %v1078_v33 = vsel %vm1047_vm4, %v1075_v58, %v1077_v44  ;;  %v6931_v32 = vpop.f32.mrb[29].mxu0 }
 0x111   :  { %v1729_v25 = vld [vmem:[#allocation6 + $0xc] sm:$0xff]  ;;  %1664 = vrot.lane.b32.xlu1 %v1631_v47, %s6298_s17  ;;  %v1204_v34 = vsel %vm1175_vm5, %v1201_v24, %v1203_v17  ;;  %v1206_v35 = vsel %vm1175_vm5, %v1203_v17, %v1205_v62  ;;  %1315 = vst.msk [vmem:[#allocation8 + $0x58] sm:$0xff] %vm1303_vm6, %v1282_v26  ;;  %v1028_v61 = vmax.f32 %v900_v27, %v948_v7  ;;  %v3185_v24 = vld [vmem:[#allocation3 + $0x18] sm:$0xff]  ;;  %v1081_v3 = vrot.slane %v6936_v48, 3 }
 0x112   :  { %1745 = vst.msk [vmem:[#allocation2 + $0x18] sm:$0xff] %vm1303_vm6, %v1729_v25  ;;  %v1436_v60 = vld [vmem:[#allocation6 + $0x11] sm:$0xff]  ;;  %1316 = vst.msk [vmem:[#allocation8 + $0x60] sm:$0xff] %vm1303_vm6, %v1283_v22  ;;  %v1029_v45 = vmax.f32 %v901_v28, %v950_v23  ;;  %v457_v12 = vadd.f32 %v6645_v8, %v6746_v5  ;;  %v472_v51 = vadd.f32 %v6765_v31, %v6645_v8  ;;  %6027 = vmatmul.mubr.msk.f32.gmra.mrb[66].mxu0 %vm1303_vm6, %v3185_v24  ;;  %v1437_v18 = vld [vmem:[#allocation6 + $0x19] sm:$0xff] }
 0x113   :  { %1470 = vrot.lane.b32.xlu0 %v1436_v60, %s6296_s5  ;;  %v1405_v50 = vld [vmem:[#allocation6 + $0x18] sm:$0xff]  ;;  %v467_v53 = vadd.f32 %v6645_v8, %v6767_v39  ;;  %v482_v55 = vadd.f32 %v6790_v37, %v6645_v8  ;;  %v6948_v56 = vadd.f32 %v6645_v8, %v6793_v10  ;;  %v1156_v0 = vmax.f32 %v1028_v61, %v1076_v30  ;;  %v6958_v10 = vpop.f32.mrb[30].mxu0 }
 0x114   :  { %v1534_v2 = vld [vmem:[#allocation6 + $0x12] sm:$0xff]  ;;  %1421 = vst.msk [vmem:[#allocation2 + $0x30] sm:$0xff] %vm1303_vm6, %v1405_v50  ;;  %v1157_v38 = vmax.f32 %v1029_v45, %v1078_v33  ;;  %v825_v31 = vrot.slane %v6936_v48, 1  ;;  %v953_v39 = vrot.slane %v6936_v48, 2  ;;  %v1209_v41 = vrot.slane %v6936_v48, 4  ;;  %v6965_v42 = vpop.f32.mrb[31].mxu0 }
 0x115   :  { %v1345_v40 = vld [vmem:[#allocation8 + $0x40] ss:$2 sm:$0xff]  ;;  %1568 = vrot.lane.b32.xlu1 %v1534_v2, %s6297_s16  ;;  %v711_v6 = vmax.f32 %v457_v12, 0.0  ;;  %v6962_v9 = vmax.f32 %v472_v51, 0.0  ;;  %v1284_v11 = vmax.f32 %v1156_v0, %v1204_v34  ;;  %v6967_v63 = vmax.f32 %v467_v53, 0.0 }
 0x116   :  { %v1730_v5 = vld [vmem:[#allocation6 + $0x14] sm:$0xff]  ;;  %1372 = vst.msk [vmem:[#allocation3 + $0x20] sm:$0xff] %vm1303_vm6, %v1345_v40  ;;  %1390 = vst.msk [vmem:[#allocation6 + $0x22] sm:$0xff] %vm1303_vm6, %v1345_v40  ;;  %v1285_v13 = vmax.f32 %v1157_v38, %v1206_v35  ;;  %v6969_v4 = vmax.f32 %v482_v55, 0.0 }
 0x117   :  { %v1632_v37 = vld [vmem:[#allocation6 + $0x13] sm:$0xff]  ;;  %1746 = vst.msk [vmem:[#allocation2 + $0x28] sm:$0xff] %vm1303_vm6, %v1730_v5  ;;  %v823_v15 = vrot.slane %v711_v6, 1  ;;  %v951_v16 = vrot.slane %v711_v6, 2  ;;  %v1079_v58 = vrot.slane %v711_v6, 3  ;;  %v1207_v17 = vrot.slane %v711_v6, 4 }
 0x118   :  { %1666 = vrot.lane.b32.xlu0 %v1632_v37, %s6298_s17  ;;  %1317 = vst.msk [vmem:[#allocation8 + $0x68] sm:$0xff] %vm1303_vm6, %v1284_v11  ;;  %1318 = vst.msk [vmem:[#allocation8 + $0x70] sm:$0xff] %vm1303_vm6, %v1285_v13  ;;  %v829_v59 = vrot.slane %v6962_v9, 1  ;;  %v957_v20 = vrot.slane %v6962_v9, 2  ;;  %v1085_v21 = vrot.slane %v6962_v9, 3  ;;  %v1213_v7 = vrot.slane %v6962_v9, 4 }
 0x119   :  { %1472 = vrot.lane.b32.xlu1 %v1437_v18, %s6296_s5  ;;  %v1535_v23 = vld [vmem:[#allocation6 + $0x1a] sm:$0xff]  ;;  %v6978_v47 = vpop.f32.mrb[32].mxu0  ;;  %v824_v25 = vsel %vm791_vm2, %v821_v43, %v823_v15  ;;  %v826_v26 = vsel %vm791_vm2, %v823_v15, %v825_v31  ;;  %v952_v22 = vsel %vm919_vm3, %v949_v52, %v951_v16  ;;  %v954_v27 = vsel %vm919_vm3, %v951_v16, %v953_v39 }
 0x11a   :  { %v1347_v28 = vld [vmem:[#allocation8 + $0x50] ss:$2 sm:$0xff]  ;;  %v6993_v60 = vpop.f32.mrb[33].mxu0  ;;  %v902_v30 = vmax.f32 %v6846_v36, %v824_v25  ;;  %v903_v43 = vmax.f32 %v711_v6, %v826_v26  ;;  %v1080_v33 = vsel %vm1047_vm4, %v1077_v44, %v1079_v58  ;;  %v1082_v52 = vsel %vm1047_vm4, %v1079_v58, %v1081_v3 }
 0x11b   :  { %1373 = vst.msk [vmem:[#allocation3 + $0x28] sm:$0xff] %vm1303_vm6, %v1347_v28  ;;  %1391 = vst.msk [vmem:[#allocation6 + $0x2a] sm:$0xff] %vm1303_vm6, %v1347_v28  ;;  %v1208_v34 = vsel %vm1175_vm5, %v1205_v62, %v1207_v17  ;;  %v1210_v35 = vsel %vm1175_vm5, %v1207_v17, %v1209_v41  ;;  %v827_v61 = vrot.slane %v6967_v63, 1  ;;  %v955_v44 = vrot.slane %v6967_v63, 2  ;;  %v7017_v2 = vpop.f32.mrb[34].mxu0 }
 0x11c   :  { %1570 = vrot.lane.b32.xlu0 %v1535_v23, %s6297_s16  ;;  %v1030_v50 = vmax.f32 %v902_v30, %v952_v22  ;;  %v1031_v51 = vmax.f32 %v903_v43, %v954_v27  ;;  %v1083_v53 = vrot.slane %v6967_v63, 3  ;;  %v1211_v55 = vrot.slane %v6967_v63, 4  ;;  %v7033_v37 = vpop.f32.mrb[35].mxu0 }
 0x11d   :  { %v3186_v45 = vld [vmem:[#allocation3 + $0x20] sm:$0xff]  ;;  %v828_v40 = vsel %vm791_vm2, %v825_v31, %v827_v61  ;;  %v830_v5 = vsel %vm791_vm2, %v827_v61, %v829_v59  ;;  %v956_v0 = vsel %vm919_vm3, %v953_v39, %v955_v44  ;;  %v958_v38 = vsel %vm919_vm3, %v955_v44, %v957_v20 }
 0x11e   :  { %v1406_v12 = vld [vmem:[#allocation6 + $0x20] sm:$0xff]  ;;  %6029 = vmatprep.mubr.msk.f32.mxu0 %vm1303_vm6, %v3186_v45  ;;  %v1158_v6 = vmax.f32 %v1030_v50, %v1080_v33  ;;  %v1159_v31 = vmax.f32 %v1031_v51, %v1082_v52  ;;  %v904_v11 = vmax.f32 %v6936_v48, %v828_v40  ;;  %v905_v13 = vmax.f32 %v6967_v63, %v830_v5 }
 0x11f   :  { %v1633_v24 = vld [vmem:[#allocation6 + $0x1b] sm:$0xff]  ;;  %1422 = vst.msk [vmem:[#allocation2 + $0x40] sm:$0xff] %vm1303_vm6, %v1406_v12  ;;  %v1084_v39 = vsel %vm1047_vm4, %v1081_v3, %v1083_v53  ;;  %v1086_v15 = vsel %vm1047_vm4, %v1083_v53, %v1085_v21  ;;  %v1212_v16 = vsel %vm1175_vm5, %v1209_v41, %v1211_v55  ;;  %v1214_v58 = vsel %vm1175_vm5, %v1211_v55, %v1213_v7  ;;  %v7052_v3 = vpop.f32.mrb[36].mxu0 }
 0x120   :  { %v1731_v36 = vld [vmem:[#allocation6 + $0x1c] sm:$0xff]  ;;  %1668 = vrot.lane.b32.xlu1 %v1633_v24, %s6298_s17  ;;  %v1286_v23 = vmax.f32 %v1158_v6, %v1208_v34  ;;  %v1287_v63 = vmax.f32 %v1159_v31, %v1210_v35  ;;  %v1032_v25 = vmax.f32 %v904_v11, %v956_v0  ;;  %v1033_v26 = vmax.f32 %v905_v13, %v958_v38  ;;  %v7065_v44 = vpop.f32.mrb[37].mxu0 }
 0x121   :  { %v1438_v62 = vld [vmem:[#allocation6 + $0x21] sm:$0xff]  ;;  %1747 = vst.msk [vmem:[#allocation2 + $0x38] sm:$0xff] %vm1303_vm6, %v1731_v36  ;;  %v1349_v17 = vld [vmem:[#allocation8 + $0x60] ss:$2 sm:$0xff]  ;;  %v833_v48 = vrot.slane %v6969_v4, 1  ;;  %v961_v41 = vrot.slane %v6969_v4, 2  ;;  %v492_v34 = vadd.f32 %v6821_v19, %v6645_v8  ;;  %v487_v45 = vadd.f32 %v6645_v8, %v6833_v49 }
 0x122   :  { %1474 = vrot.lane.b32.xlu0 %v1438_v62, %s6296_s5  ;;  %v1536_v18 = vld [vmem:[#allocation6 + $0x22] sm:$0xff]  ;;  %1374 = vst.msk [vmem:[#allocation3 + $0x30] sm:$0xff] %vm1303_vm6, %v1349_v17  ;;  %1392 = vst.msk [vmem:[#allocation6 + $0x32] sm:$0xff] %vm1303_vm6, %v1349_v17  ;;  %v1089_v22 = vrot.slane %v6969_v4, 3  ;;  %v1217_v27 = vrot.slane %v6969_v4, 4  ;;  %v1160_v43 = vmax.f32 %v1032_v25, %v1084_v39  ;;  %v1161_v33 = vmax.f32 %v1033_v26, %v1086_v15  ;;  %v1537_v38 = vld [vmem:[#allocation6 + $0x2a] sm:$0xff] }
 0x123   :  { %v3187_v28 = vld [vmem:[#allocation3 + $0x28] sm:$0xff]  ;;  %1319 = vst.msk [vmem:[#allocation8 + $0x78] sm:$0xff] %vm1303_vm6, %v1286_v23  ;;  %1320 = vst.msk [vmem:[#allocation8 + $0x80] sm:$0xff] %vm1303_vm6, %v1287_v63  ;;  %v715_v52 = vmax.f32 %v6948_v56, 0.0  ;;  %v502_v12 = vadd.f32 %v6850_v46, %v6645_v8  ;;  %v497_v56 = vadd.f32 %v6645_v8, %v6865_v54  ;;  %v7075_v19 = vadd.f32 %v6887_v57, %v6645_v8  ;;  %v7080_v49 = vpop.f32.mrb[38].mxu0 }
 0x124   :  { %1572 = vrot.lane.b32.xlu1 %v1536_v18, %s6297_s16  ;;  %v1407_v30 = vld [vmem:[#allocation6 + $0x28] sm:$0xff]  ;;  %6030 = vmatmul.mubr.msk.f32.gmra.mrb[68].mxu0 %vm1303_vm6, %v3187_v28  ;;  %v1288_v50 = vmax.f32 %v1160_v43, %v1212_v16  ;;  %v1289_v51 = vmax.f32 %v1161_v33, %v1214_v58  ;;  %v7082_v54 = vmax.f32 %v492_v34, 0.0  ;;  %v7084_v62 = vmax.f32 %v487_v45, 0.0  ;;  %v7086_v8 = vpop.f32.mrb[39].mxu0 }
 0x125   :  { %v1634_v35 = vld [vmem:[#allocation6 + $0x23] sm:$0xff]  ;;  %1423 = vst.msk [vmem:[#allocation2 + $0x50] sm:$0xff] %vm1303_vm6, %v1407_v30  ;;  %v831_v53 = vrot.slane %v715_v52, 1  ;;  %v959_v55 = vrot.slane %v715_v52, 2  ;;  %v1087_v46 = vrot.slane %v715_v52, 3  ;;  %v1215_v36 = vrot.slane %v715_v52, 4 }
 0x126   :  { %v1732_v61 = vld [vmem:[#allocation6 + $0x24] sm:$0xff]  ;;  %1670 = vrot.lane.b32.xlu0 %v1634_v35, %s6298_s17  ;;  %1321 = vst.msk [vmem:[#allocation8 + $0x88] sm:$0xff] %vm1303_vm6, %v1288_v50  ;;  %1322 = vst.msk [vmem:[#allocation8 + $0x90] sm:$0xff] %vm1303_vm6, %v1289_v51  ;;  %v837_v58 = vrot.slane %v7082_v54, 1  ;;  %v1221_v63 = vrot.slane %v7082_v54, 4  ;;  %v835_v28 = vrot.slane %v7084_v62, 1 }
 0x127   :  { %1748 = vst.msk [vmem:[#allocation2 + $0x48] sm:$0xff] %vm1303_vm6, %v1732_v61  ;;  %v1439_v24 = vld [vmem:[#allocation6 + $0x29] sm:$0xff]  ;;  %v832_v57 = vsel %vm791_vm2, %v829_v59, %v831_v53  ;;  %v834_v40 = vsel %vm791_vm2, %v831_v53, %v833_v48  ;;  %v960_v5 = vsel %vm919_vm3, %v957_v20, %v959_v55  ;;  %v962_v0 = vsel %vm919_vm3, %v959_v55, %v961_v41  ;;  %v7121_v18 = vpop.f32.mrb[40].mxu0 }
 0x128   :  { %1476 = vrot.lane.b32.xlu1 %v1439_v24, %s6296_s5  ;;  %v906_v6 = vmax.f32 %v6962_v9, %v832_v57  ;;  %v907_v31 = vmax.f32 %v715_v52, %v834_v40  ;;  %v1088_v59 = vsel %vm1047_vm4, %v1085_v21, %v1087_v46  ;;  %v1090_v11 = vsel %vm1047_vm4, %v1087_v46, %v1089_v22  ;;  %v7126_v26 = vpop.f32.mrb[41].mxu0 }
 0x129   :  { %v3188_v13 = vld [vmem:[#allocation3 + $0x30] sm:$0xff]  ;;  %v1216_v15 = vsel %vm1175_vm5, %v1213_v7, %v1215_v36  ;;  %v1218_v16 = vsel %vm1175_vm5, %v1215_v36, %v1217_v27  ;;  %v965_v21 = vrot.slane %v7082_v54, 2  ;;  %v1093_v7 = vrot.slane %v7082_v54, 3 }
 0x12a   :  { %1574 = vrot.lane.b32.xlu0 %v1537_v38, %s6297_s16  ;;  %v1408_v20 = vld [vmem:[#allocation6 + $0x30] sm:$0xff]  ;;  %6032 = vmatprep.mubr.msk.f32.mxu0 %vm1303_vm6, %v3188_v13  ;;  %v1034_v9 = vmax.f32 %v906_v6, %v960_v5  ;;  %v1035_v23 = vmax.f32 %v907_v31, %v962_v0  ;;  %v1351_v25 = vld [vmem:[#allocation8 + $0x70] ss:$2 sm:$0xff]  ;;  %v963_v30 = vrot.slane %v7084_v62, 2  ;;  %v1091_v43 = vrot.slane %v7084_v62, 3 }
 0x12b   :  { %v1635_v39 = vld [vmem:[#allocation6 + $0x2b] sm:$0xff]  ;;  %1424 = vst.msk [vmem:[#allocation2 + $0x60] sm:$0xff] %vm1303_vm6, %v1408_v20  ;;  %v1219_v33 = vrot.slane %v7084_v62, 4  ;;  %1375 = vst.msk [vmem:[#allocation3 + $0x38] sm:$0xff] %vm1303_vm6, %v1351_v25  ;;  %v7134_v61 = vmax.f32 %v502_v12, 0.0  ;;  %v7136_v45 = vmax.f32 %v497_v56, 0.0  ;;  %v836_v50 = vsel %vm791_vm2, %v833_v48, %v835_v28 }
 0x12c   :  { %v1733_v17 = vld [vmem:[#allocation6 + $0x2c] sm:$0xff]  ;;  %1672 = vrot.lane.b32.xlu1 %v1635_v39, %s6298_s17  ;;  %1393 = vst.msk [vmem:[#allocation6 + $0x3a] sm:$0xff] %vm1303_vm6, %v1351_v25  ;;  %v1162_v34 = vmax.f32 %v1034_v9, %v1088_v59  ;;  %v1163_v35 = vmax.f32 %v1035_v23, %v1090_v11  ;;  %v838_v51 = vsel %vm791_vm2, %v835_v28, %v837_v58  ;;  %v7152_v56 = vpop.f32.mrb[42].mxu0 }
 0x12d   :  { %1749 = vst.msk [vmem:[#allocation2 + $0x58] sm:$0xff] %vm1303_vm6, %v1733_v17  ;;  %v1440_v52 = vld [vmem:[#allocation6 + $0x31] sm:$0xff]  ;;  %v964_v53 = vsel %vm919_vm3, %v961_v41, %v963_v30  ;;  %v966_v12 = vsel %vm919_vm3, %v963_v30, %v965_v21  ;;  %v908_v48 = vmax.f32 %v6969_v4, %v836_v50  ;;  %v909_v36 = vmax.f32 %v7084_v62, %v838_v51  ;;  %v7156_v40 = vpop.f32.mrb[43].mxu0 }
 0x12e   :  { %1478 = vrot.lane.b32.xlu0 %v1440_v52, %s6296_s5  ;;  %v1538_v24 = vld [vmem:[#allocation6 + $0x32] sm:$0xff]  ;;  %v1290_v55 = vmax.f32 %v1162_v34, %v1216_v15  ;;  %v1291_v46 = vmax.f32 %v1163_v35, %v1218_v16  ;;  %v1092_v41 = vsel %vm1047_vm4, %v1089_v22, %v1091_v43  ;;  %v1094_v5 = vsel %vm1047_vm4, %v1091_v43, %v1093_v7 }
 0x12f   :  { %v1353_v57 = vld [vmem:[#allocation8 + $0x80] ss:$2 sm:$0xff]  ;;  %v1220_v0 = vsel %vm1175_vm5, %v1217_v27, %v1219_v33  ;;  %v1222_v38 = vsel %vm1175_vm5, %v1219_v33, %v1221_v63  ;;  %v1036_v22 = vmax.f32 %v908_v48, %v964_v53  ;;  %v1037_v62 = vmax.f32 %v909_v36, %v966_v12  ;;  %v7180_v13 = vpop.f32.mrb[44].mxu0 }
 0x130   :  { %1576 = vrot.lane.b32.xlu1 %v1538_v24, %s6297_s16  ;;  %1376 = vst.msk [vmem:[#allocation3 + $0x40] sm:$0xff] %vm1303_vm6, %v1353_v57  ;;  %1394 = vst.msk [vmem:[#allocation6 + $0x42] sm:$0xff] %vm1303_vm6, %v1353_v57  ;;  %v841_v6 = vrot.slane %v7134_v61, 1  ;;  %v969_v4 = vrot.slane %v7134_v61, 2  ;;  %v1097_v27 = vrot.slane %v7134_v61, 3  ;;  %v1225_v31 = vrot.slane %v7134_v61, 4 }
 0x131   :  { %1323 = vst.msk [vmem:[#allocation8 + $0x98] sm:$0xff] %vm1303_vm6, %v1290_v55  ;;  %1324 = vst.msk [vmem:[#allocation8 + $0xa0] sm:$0xff] %vm1303_vm6, %v1291_v46  ;;  %v839_v59 = vrot.slane %v7136_v45, 1  ;;  %v967_v11 = vrot.slane %v7136_v45, 2  ;;  %v1164_v20 = vmax.f32 %v1036_v22, %v1092_v41  ;;  %v1165_v39 = vmax.f32 %v1037_v62, %v1094_v5  ;;  %v7184_v23 = vpop.f32.mrb[45].mxu0 }
 0x132   :  { %v1095_v15 = vrot.slane %v7136_v45, 3  ;;  %v1223_v16 = vrot.slane %v7136_v45, 4  ;;  %v3189_v17 = vld [vmem:[#allocation3 + $0x38] sm:$0xff]  ;;  %v7222_v46 = vmax.f32 %v7075_v19, 0.0 }
 0x133   :  { %v1409_v9 = vld [vmem:[#allocation6 + $0x38] sm:$0xff]  ;;  %v840_v25 = vsel %vm791_vm2, %v837_v58, %v839_v59  ;;  %v842_v28 = vsel %vm791_vm2, %v839_v59, %v841_v6  ;;  %v968_v30 = vsel %vm919_vm3, %v965_v21, %v967_v11  ;;  %v970_v43 = vsel %vm919_vm3, %v967_v11, %v969_v4  ;;  %6033 = vmatmul.mubr.msk.f32.gmra.mrb[70].mxu0 %vm1303_vm6, %v3189_v17  ;;  %v7217_v12 = vpop.f32.mrb[46].mxu0 }
 0x134   :  { %v1636_v33 = vld [vmem:[#allocation6 + $0x33] sm:$0xff]  ;;  %1425 = vst.msk [vmem:[#allocation2 + $0x70] sm:$0xff] %vm1303_vm6, %v1409_v9  ;;  %v1292_v34 = vmax.f32 %v1164_v20, %v1220_v0  ;;  %v1293_v58 = vmax.f32 %v1165_v39, %v1222_v38  ;;  %v910_v35 = vmax.f32 %v7082_v54, %v840_v25  ;;  %v911_v24 = vmax.f32 %v7136_v45, %v842_v28  ;;  %v7227_v54 = vld [vmem:[%s9502_s2] ss:$0 sm:$0xff]  ;;  %v7231_v57 = vpop.f32.mrb[47].mxu0 }
 0x135   :  { %v1734_v52 = vld [vmem:[#allocation6 + $0x34] sm:$0xff]  ;;  %1674 = vrot.lane.b32.xlu0 %v1636_v33, %s6298_s17  ;;  %v1096_v50 = vsel %vm1047_vm4, %v1093_v7, %v1095_v15  ;;  %v1098_v51 = vsel %vm1047_vm4, %v1095_v15, %v1097_v27  ;;  %v1224_v53 = vsel %vm1175_vm5, %v1221_v63, %v1223_v16  ;;  %v1226_v45 = vsel %vm1175_vm5, %v1223_v16, %v1225_v31 }
 0x136   :  { %1750 = vst.msk [vmem:[#allocation2 + $0x68] sm:$0xff] %vm1303_vm6, %v1734_v52  ;;  %v1441_v21 = vld [vmem:[#allocation6 + $0x39] sm:$0xff]  ;;  %1325 = vst.msk [vmem:[#allocation8 + $0xa8] sm:$0xff] %vm1303_vm6, %v1292_v34  ;;  %v1038_v7 = vmax.f32 %v910_v35, %v968_v30  ;;  %v1039_v55 = vmax.f32 %v911_v24, %v970_v43  ;;  %v507_v63 = vadd.f32 %v7227_v54, %v6893_v14  ;;  %v1229_v11 = vrot.slane %v7222_v46, 4 }
 0x137   :  { %1480 = vrot.lane.b32.xlu1 %v1441_v21, %s6296_s5  ;;  %1326 = vst.msk [vmem:[#allocation8 + $0xb0] sm:$0xff] %vm1303_vm6, %v1293_v58  ;;  %v3190_v48 = vld [vmem:[#allocation3 + $0x40] sm:$0xff]  ;;  %v522_v41 = vadd.f32 %v7227_v54, %v6916_v29  ;;  %v517_v5 = vadd.f32 %v7227_v54, %v6931_v32  ;;  %v532_v19 = vadd.f32 %v7227_v54, %v6958_v10  ;;  %v845_v29 = vrot.slane %v7222_v46, 1  ;;  %v7256_v15 = vpop.f32.mrb[48].mxu0 }
 0x138   :  { %v1410_v36 = vld [vmem:[#allocation6 + $0x40] sm:$0xff]  ;;  %v7241_v0 = vadd.f32 %v7227_v54, %v6965_v42  ;;  %6035 = vmatprep.mubr.msk.f32.mxu0 %vm1303_vm6, %v3190_v48  ;;  %v1166_v62 = vmax.f32 %v1038_v7, %v1096_v50  ;;  %v1167_v59 = vmax.f32 %v1039_v55, %v1098_v51  ;;  %v973_v32 = vrot.slane %v7222_v46, 2  ;;  %v7262_v28 = vpop.f32.mrb[49].mxu0 }
 0x139   :  { %v1355_v14 = vld [vmem:[#allocation8 + $0x90] ss:$2 sm:$0xff]  ;;  %1426 = vst.msk [vmem:[#allocation2 + $0x80] sm:$0xff] %vm1303_vm6, %v1410_v36  ;;  %v1101_v42 = vrot.slane %v7222_v46, 3  ;;  %v721_v20 = vmax.f32 %v507_v63, 0.0  ;;  %v7253_v39 = vmax.f32 %v522_v41, 0.0 }
 0x13a   :  { %v1539_v38 = vld [vmem:[#allocation6 + $0x3a] sm:$0xff]  ;;  %1377 = vst.msk [vmem:[#allocation3 + $0x48] sm:$0xff] %vm1303_vm6, %v1355_v14  ;;  %1395 = vst.msk [vmem:[#allocation6 + $0x4a] sm:$0xff] %vm1303_vm6, %v1355_v14  ;;  %v1294_v16 = vmax.f32 %v1166_v62, %v1224_v53  ;;  %v1295_v17 = vmax.f32 %v1167_v59, %v1226_v45  ;;  %v7258_v9 = vmax.f32 %v517_v5, 0.0  ;;  %v7260_v25 = vmax.f32 %v532_v19, 0.0  ;;  %v1540_v50 = vld [vmem:[#allocation6 + $0x42] sm:$0xff] }
 0x13b   :  { %v1735_v22 = vld [vmem:[#allocation6 + $0x3c] sm:$0xff]  ;;  %1578 = vrot.lane.b32.xlu0 %v1539_v38, %s6297_s16  ;;  %v843_v30 = vrot.slane %v721_v20, 1  ;;  %v971_v43 = vrot.slane %v721_v20, 2  ;;  %v1099_v33 = vrot.slane %v721_v20, 3  ;;  %v1227_v52 = vrot.slane %v721_v20, 4  ;;  %v7282_v63 = vpop.f32.mrb[50].mxu0 }
 0x13c   :  { %v1637_v10 = vld [vmem:[#allocation6 + $0x3b] sm:$0xff]  ;;  %1751 = vst.msk [vmem:[#allocation2 + $0x78] sm:$0xff] %vm1303_vm6, %v1735_v22  ;;  %1327 = vst.msk [vmem:[#allocation8 + $0xb8] sm:$0xff] %vm1303_vm6, %v1294_v16  ;;  %v849_v58 = vrot.slane %v7253_v39, 1  ;;  %v977_v35 = vrot.slane %v7253_v39, 2  ;;  %v1105_v24 = vrot.slane %v7253_v39, 3 }
 0x13d   :  { %1676 = vrot.lane.b32.xlu1 %v1637_v10, %s6298_s17  ;;  %v1442_v34 = vld [vmem:[#allocation6 + $0x41] sm:$0xff]  ;;  %1328 = vst.msk [vmem:[#allocation8 + $0xc0] sm:$0xff] %vm1303_vm6, %v1295_v17  ;;  %v1233_v21 = vrot.slane %v7253_v39, 4  ;;  %v844_v51 = vsel %vm791_vm2, %v841_v6, %v843_v30  ;;  %v846_v53 = vsel %vm791_vm2, %v843_v30, %v845_v29  ;;  %v972_v45 = vsel %vm919_vm3, %v969_v4, %v971_v43  ;;  %v1357_v55 = vld [vmem:[#allocation8 + $0xa0] ss:$2 sm:$0xff]  ;;  %v7293_v41 = vpop.f32.mrb[51].mxu0 }
 0x13e   :  { %v974_v7 = vsel %vm919_vm3, %v971_v43, %v973_v32  ;;  %v912_v48 = vmax.f32 %v7134_v61, %v844_v51  ;;  %v913_v36 = vmax.f32 %v721_v20, %v846_v53  ;;  %v1100_v6 = vsel %vm1047_vm4, %v1097_v27, %v1099_v33  ;;  %1378 = vst.msk [vmem:[#allocation3 + $0x50] sm:$0xff] %vm1303_vm6, %v1357_v55 }
 0x13f   :  { %1482 = vrot.lane.b32.xlu0 %v1442_v34, %s6296_s5  ;;  %v1102_v4 = vsel %vm1047_vm4, %v1099_v33, %v1101_v42  ;;  %1396 = vst.msk [vmem:[#allocation6 + $0x52] sm:$0xff] %vm1303_vm6, %v1357_v55  ;;  %v1228_v5 = vsel %vm1175_vm5, %v1225_v31, %v1227_v52  ;;  %v1230_v19 = vsel %vm1175_vm5, %v1227_v52, %v1229_v11  ;;  %v847_v27 = vrot.slane %v7258_v9, 1  ;;  %v7320_v52 = vpop.f32.mrb[52].mxu0 }
 0x140   :  { %v975_v14 = vrot.slane %v7258_v9, 2  ;;  %v1040_v59 = vmax.f32 %v912_v48, %v972_v45  ;;  %v1041_v10 = vmax.f32 %v913_v36, %v974_v7  ;;  %v1103_v20 = vrot.slane %v7258_v9, 3  ;;  %v7324_v53 = vpop.f32.mrb[53].mxu0 }
 0x141   :  { %1580 = vrot.lane.b32.xlu1 %v1540_v50, %s6297_s16  ;;  %v3191_v38 = vld [vmem:[#allocation3 + $0x48] sm:$0xff]  ;;  %v1231_v16 = vrot.slane %v7258_v9, 4  ;;  %v848_v17 = vsel %vm791_vm2, %v845_v29, %v847_v27  ;;  %v850_v30 = vsel %vm791_vm2, %v847_v27, %v849_v58 }
 0x142   :  { %v1411_v22 = vld [vmem:[#allocation6 + $0x48] sm:$0xff]  ;;  %6036 = vmatmul.mubr.msk.f32.gmra.mrb[72].mxu0 %vm1303_vm6, %v3191_v38  ;;  %v976_v43 = vsel %vm919_vm3, %v973_v32, %v975_v14  ;;  %v978_v33 = vsel %vm919_vm3, %v975_v14, %v977_v35  ;;  %v1168_v34 = vmax.f32 %v1040_v59, %v1100_v6  ;;  %v1169_v29 = vmax.f32 %v1041_v10, %v1102_v4 }
 0x143   :  { %v1638_v62 = vld [vmem:[#allocation6 + $0x43] sm:$0xff]  ;;  %1427 = vst.msk [vmem:[#allocation2 + $0x90] sm:$0xff] %vm1303_vm6, %v1411_v22  ;;  %v914_v50 = vmax.f32 %v7222_v46, %v848_v17  ;;  %v915_v51 = vmax.f32 %v7258_v9, %v850_v30  ;;  %v1104_v32 = vsel %vm1047_vm4, %v1101_v42, %v1103_v20  ;;  %v1106_v45 = vsel %vm1047_vm4, %v1103_v20, %v1105_v24 }
 0x144   :  { %v1736_v61 = vld [vmem:[#allocation6 + $0x44] sm:$0xff]  ;;  %1678 = vrot.lane.b32.xlu0 %v1638_v62, %s6298_s17  ;;  %v1232_v7 = vsel %vm1175_vm5, %v1229_v11, %v1231_v16  ;;  %v1234_v55 = vsel %vm1175_vm5, %v1231_v16, %v1233_v21  ;;  %v1296_v36 = vmax.f32 %v1168_v34, %v1228_v5  ;;  %v1297_v6 = vmax.f32 %v1169_v29, %v1230_v19  ;;  %v7352_v16 = vpop.f32.mrb[54].mxu0 }
 0x145   :  { %v1443_v31 = vld [vmem:[#allocation6 + $0x49] sm:$0xff]  ;;  %1752 = vst.msk [vmem:[#allocation2 + $0x88] sm:$0xff] %vm1303_vm6, %v1736_v61  ;;  %v1042_v4 = vmax.f32 %v914_v50, %v976_v43  ;;  %v1043_v27 = vmax.f32 %v915_v51, %v978_v33  ;;  %v853_v46 = vrot.slane %v7260_v25, 1  ;;  %v981_v42 = vrot.slane %v7260_v25, 2  ;;  %v7363_v30 = vpop.f32.mrb[55].mxu0 }
 0x146   :  { %1484 = vrot.lane.b32.xlu1 %v1443_v31, %s6296_s5  ;;  %v1359_v48 = vld [vmem:[#allocation8 + $0xb0] ss:$2 sm:$0xff]  ;;  %v1109_v11 = vrot.slane %v7260_v25, 3  ;;  %v1237_v14 = vrot.slane %v7260_v25, 4  ;;  %v3192_v38 = vld [vmem:[#allocation3 + $0x50] sm:$0xff]  ;;  %1329 = vst.msk [vmem:[#allocation8 + $0xc8] sm:$0xff] %vm1303_vm6, %v1296_v36  ;;  %v542_v59 = vadd.f32 %v7227_v54, %v6978_v47  ;;  %v537_v31 = vadd.f32 %v7227_v54, %v6993_v60 }
 0x147   :  { %v1541_v9 = vld [vmem:[#allocation6 + $0x4a] sm:$0xff]  ;;  %1379 = vst.msk [vmem:[#allocation3 + $0x58] sm:$0xff] %vm1303_vm6, %v1359_v48  ;;  %1397 = vst.msk [vmem:[#allocation6 + $0x5a] sm:$0xff] %vm1303_vm6, %v1359_v48  ;;  %v1170_v19 = vmax.f32 %v1042_v4, %v1104_v32  ;;  %v1171_v22 = vmax.f32 %v1043_v27, %v1106_v45  ;;  %v725_v62 = vmax.f32 %v7241_v0, 0.0  ;;  %6038 = vmatprep.mubr.msk.f32.mxu0 %vm1303_vm6, %v3192_v38  ;;  %v7368_v51 = vpop.f32.mrb[56].mxu0 }
 0x148   :  { %1582 = vrot.lane.b32.xlu0 %v1541_v9, %s6297_s16  ;;  %v1412_v5 = vld [vmem:[#allocation6 + $0x50] sm:$0xff]  ;;  %1330 = vst.msk [vmem:[#allocation8 + $0xd0] sm:$0xff] %vm1303_vm6, %v1297_v6  ;;  %v918_v61 = vmax.f32 %v7260_v25, %v853_v46  ;;  %v552_v17 = vadd.f32 %v7227_v54, %v7017_v2  ;;  %v547_v0 = vadd.f32 %v7227_v54, %v7033_v37  ;;  %v7366_v2 = vmax.f32 %v542_v59, 0.0  ;;  %v7380_v48 = vpop.f32.mrb[57].mxu0 }
 0x149   :  { %v1639_v10 = vld [vmem:[#allocation6 + $0x4b] sm:$0xff]  ;;  %1428 = vst.msk [vmem:[#allocation2 + $0xa0] sm:$0xff] %vm1303_vm6, %v1412_v5  ;;  %v1298_v43 = vmax.f32 %v1170_v19, %v1232_v7  ;;  %v1299_v33 = vmax.f32 %v1171_v22, %v1234_v55  ;;  %v851_v34 = vrot.slane %v725_v62, 1  ;;  %v979_v25 = vrot.slane %v725_v62, 2 }
 0x14a   :  { %v1737_v20 = vld [vmem:[#allocation6 + $0x4c] sm:$0xff]  ;;  %1680 = vrot.lane.b32.xlu1 %v1639_v10, %s6298_s17  ;;  %v1046_v60 = vmax.f32 %v918_v61, %v981_v42  ;;  %v1107_v29 = vrot.slane %v725_v62, 3  ;;  %v1235_v50 = vrot.slane %v725_v62, 4  ;;  %v1796_v5 = vrot.slane %v7366_v2, 1 }
 0x14b   :  { %1753 = vst.msk [vmem:[#allocation2 + $0x98] sm:$0xff] %vm1303_vm6, %v1737_v20  ;;  %v1444_v47 = vld [vmem:[#allocation6 + $0x51] sm:$0xff]  ;;  %1331 = vst.msk [vmem:[#allocation8 + $0xd8] sm:$0xff] %vm1303_vm6, %v1298_v43  ;;  %v852_v37 = vsel %vm791_vm2, %v849_v58, %v851_v34  ;;  %v854_v32 = vsel %vm791_vm2, %v851_v34, %v853_v46  ;;  %v980_v45 = vsel %vm919_vm3, %v977_v35, %v979_v25  ;;  %v2177_v10 = vrot.slane %v7366_v2, 4 }
 0x14c   :  { %1486 = vrot.lane.b32.xlu0 %v1444_v47, %s6296_s5  ;;  %1332 = vst.msk [vmem:[#allocation8 + $0xe0] sm:$0xff] %vm1303_vm6, %v1299_v33  ;;  %v982_v7 = vsel %vm919_vm3, %v979_v25, %v981_v42  ;;  %v1542_v55 = vld [vmem:[#allocation6 + $0x52] sm:$0xff]  ;;  %v1174_v9 = vmax.f32 %v1046_v60, %v1109_v11  ;;  %v916_v36 = vmax.f32 %v7253_v39, %v852_v37  ;;  %v7398_v39 = vpop.f32.mrb[58].mxu0  ;;  %v727_v20 = vmax.f32 %v537_v31, 0.0 }
 0x14d   :  { %v917_v6 = vmax.f32 %v725_v62, %v854_v32  ;;  %v1108_v4 = vsel %vm1047_vm4, %v1105_v24, %v1107_v29  ;;  %v1110_v35 = vsel %vm1047_vm4, %v1107_v29, %v1109_v11  ;;  %v1236_v42 = vsel %vm1175_vm5, %v1233_v21, %v1235_v50  ;;  %v1361_v59 = vld [vmem:[#allocation8 + $0xc0] ss:$2 sm:$0xff]  ;;  %v7406_v47 = vpop.f32.mrb[59].mxu0 }
 0x14e   :  { %v3193_v58 = vld [vmem:[#allocation3 + $0x58] sm:$0xff]  ;;  %1584 = vrot.lane.b32.xlu1 %v1542_v55, %s6297_s16  ;;  %v1238_v38 = vsel %vm1175_vm5, %v1235_v50, %v1237_v14  ;;  %v1302_v24 = vmax.f32 %v1174_v9, %v1237_v14  ;;  %v1044_v22 = vmax.f32 %v916_v36, %v980_v45  ;;  %v1923_v11 = vrot.slane %v7366_v2, 2  ;;  %1380 = vst.msk [vmem:[#allocation3 + $0x60] sm:$0xff] %vm1303_vm6, %v1361_v59 }
 0x14f   :  { %v1413_v27 = vld [vmem:[#allocation6 + $0x58] sm:$0xff]  ;;  %6039 = vmatmul.mubr.msk.f32.gmra.mrb[74].mxu0 %vm1303_vm6, %v3193_v58  ;;  %v1045_v62 = vmax.f32 %v917_v6, %v982_v7  ;;  %v2050_v21 = vrot.slane %v7366_v2, 3  ;;  %v7402_v61 = vmax.f32 %v552_v17, 0.0  ;;  %1398 = vst.msk [vmem:[#allocation6 + $0x62] sm:$0xff] %vm1303_vm6, %v1361_v59  ;;  %v729_v34 = vmax.f32 %v547_v0, 0.0  ;;  %v7415_v0 = vpop.f32.mrb[60].mxu0 }
 0x150   :  { %v1640_v46 = vld [vmem:[#allocation6 + $0x53] sm:$0xff]  ;;  %1429 = vst.msk [vmem:[#allocation2 + $0xb0] sm:$0xff] %vm1303_vm6, %v1413_v27  ;;  %v1172_v43 = vmax.f32 %v1044_v22, %v1108_v4  ;;  %v562_v25 = vadd.f32 %v7227_v54, %v7052_v3  ;;  %v1795_v17 = vrot.slane %v727_v20, 1  ;;  %v1922_v60 = vrot.slane %v727_v20, 2  ;;  %v7423_v4 = vpop.f32.mrb[61].mxu0 }
 0x151   :  { %v1738_v19 = vld [vmem:[#allocation6 + $0x54] sm:$0xff]  ;;  %1682 = vrot.lane.b32.xlu0 %v1640_v46, %s6298_s17  ;;  %1336 = vst.msk [vmem:[#allocation8 + $0xf8] sm:$0x7] %vm1335_vm7, %v1302_v24  ;;  %v1173_v33 = vmax.f32 %v1045_v62, %v1110_v35  ;;  %v2049_v29 = vrot.slane %v727_v20, 3  ;;  %v2176_v50 = vrot.slane %v727_v20, 4  ;;  %v1800_v45 = vrot.slane %v7402_v61, 1 }
 0x152   :  { %1754 = vst.msk [vmem:[#allocation2 + $0xa8] sm:$0xff] %vm1303_vm6, %v1738_v19  ;;  %v1445_v14 = vld [vmem:[#allocation6 + $0x59] sm:$0xff]  ;;  %v1300_v37 = vmax.f32 %v1172_v43, %v1236_v42  ;;  %v1927_v7 = vrot.slane %v7402_v61, 2  ;;  %v1797_v3 = vsel %vm791_vm2, %v1795_v17, %v1796_v5  ;;  %v1924_v9 = vsel %vm919_vm3, %v1922_v60, %v1923_v11 }
 0x153   :  { %1488 = vrot.lane.b32.xlu1 %v1445_v14, %s6296_s5  ;;  %v1543_v31 = vld [vmem:[#allocation6 + $0x5a] sm:$0xff]  ;;  %v1301_v32 = vmax.f32 %v1173_v33, %v1238_v38  ;;  %v2051_v36 = vsel %vm1047_vm4, %v2049_v29, %v2050_v21  ;;  %v2178_v6 = vsel %vm1175_vm5, %v2176_v50, %v2177_v10  ;;  %v1890_v58 = vmax.f32 %v727_v20, %v1797_v3  ;;  %v7437_v33 = vpop.f32.mrb[62].mxu0 }
 0x154   :  { %v1363_v55 = vld [vmem:[#allocation8 + $0xd0] ss:$2 sm:$0xff]  ;;  %1333 = vst.msk [vmem:[#allocation8 + $0xe8] sm:$0xff] %vm1303_vm6, %v1300_v37  ;;  %v2054_v27 = vrot.slane %v7402_v61, 3  ;;  %v2181_v46 = vrot.slane %v7402_v61, 4  ;;  %v1798_v35 = vrot.slane %v729_v34, 1  ;;  %v557_v20 = vadd.f32 %v7227_v54, %v7065_v44 }
 0x155   :  { %1586 = vrot.lane.b32.xlu0 %v1543_v31, %s6297_s16  ;;  %1381 = vst.msk [vmem:[#allocation3 + $0x68] sm:$0xff] %vm1303_vm6, %v1363_v55  ;;  %1399 = vst.msk [vmem:[#allocation6 + $0x6a] sm:$0xff] %vm1303_vm6, %v1363_v55  ;;  %v1925_v42 = vrot.slane %v729_v34, 2  ;;  %v2052_v38 = vrot.slane %v729_v34, 3  ;;  %v2179_v19 = vrot.slane %v729_v34, 4  ;;  %v7429_v24 = vmax.f32 %v562_v25, 0.0 }
 0x156   :  { %1334 = vst.msk [vmem:[#allocation8 + $0xf0] sm:$0xff] %vm1303_vm6, %v1301_v32  ;;  %v2017_v22 = vmax.f32 %v1890_v58, %v1924_v9  ;;  %v1799_v62 = vsel %vm791_vm2, %v1796_v5, %v1798_v35  ;;  %v1801_v59 = vsel %vm791_vm2, %v1798_v35, %v1800_v45  ;;  %v3194_v14 = vld [vmem:[#allocation3 + $0x60] sm:$0xff]  ;;  %v7446_v44 = vpop.f32.mrb[63].mxu0 }
 0x157   :  { %v1414_v43 = vld [vmem:[#allocation6 + $0x60] sm:$0xff]  ;;  %v1891_v31 = vmax.f32 %v7366_v2, %v1799_v62  ;;  %v1892_v17 = vmax.f32 %v729_v34, %v1801_v59  ;;  %v1926_v25 = vsel %vm919_vm3, %v1923_v11, %v1925_v42  ;;  %v1928_v5 = vsel %vm919_vm3, %v1925_v42, %v1927_v7  ;;  %6041 = vmatprep.mubr.msk.f32.mxu0 %vm1303_vm6, %v3194_v14 }
 0x158   :  { %v1641_v60 = vld [vmem:[#allocation6 + $0x5b] sm:$0xff]  ;;  %1430 = vst.msk [vmem:[#allocation2 + $0xc0] sm:$0xff] %vm1303_vm6, %v1414_v43  ;;  %v2144_v50 = vmax.f32 %v2017_v22, %v2051_v36  ;;  %v2053_v37 = vsel %vm1047_vm4, %v2050_v21, %v2052_v38  ;;  %v2055_v2 = vsel %vm1047_vm4, %v2052_v38, %v2054_v27  ;;  %v2180_v11 = vsel %vm1175_vm5, %v2177_v10, %v2179_v19 }
 0x159   :  { %v1739_v29 = vld [vmem:[#allocation6 + $0x5c] sm:$0xff]  ;;  %1684 = vrot.lane.b32.xlu1 %v1641_v60, %s6298_s17  ;;  %v2018_v32 = vmax.f32 %v1891_v31, %v1926_v25  ;;  %v2019_v55 = vmax.f32 %v1892_v17, %v1928_v5  ;;  %v2182_v3 = vsel %vm1175_vm5, %v2179_v19, %v2181_v46  ;;  %v1804_v9 = vrot.slane %v7429_v24, 1 }
 0x15a   :  { %1755 = vst.msk [vmem:[#allocation2 + $0xb8] sm:$0xff] %vm1303_vm6, %v1739_v29  ;;  %v1446_v34 = vld [vmem:[#allocation6 + $0x61] sm:$0xff]  ;;  %v2271_v21 = vmax.f32 %v2144_v50, %v2178_v6  ;;  %v1931_v36 = vrot.slane %v7429_v24, 2  ;;  %v2058_v10 = vrot.slane %v7429_v24, 3  ;;  %v2185_v58 = vrot.slane %v7429_v24, 4 }
 0x15b   :  { %1490 = vrot.lane.b32.xlu0 %v1446_v34, %s6296_s5  ;;  %v2145_v38 = vmax.f32 %v2018_v32, %v2053_v37  ;;  %v2146_v22 = vmax.f32 %v2019_v55, %v2055_v2  ;;  %v731_v62 = vmax.f32 %v557_v20, 0.0  ;;  %v572_v59 = vadd.f32 %v7227_v54, %v7080_v49  ;;  %v1365_v19 = vld [vmem:[#allocation8 + $0xe0] ss:$2 sm:$0xff]  ;;  %v1544_v14 = vld [vmem:[#allocation6 + $0x62] sm:$0xff] }
 0x15c   :  { %v3195_v35 = vld [vmem:[#allocation3 + $0x68] sm:$0xff]  ;;  %2303 = vst.msk [vmem:[#allocation8] sm:$0xff] %vm1303_vm6, %v2271_v21  ;;  %v567_v6 = vadd.f32 %v7227_v54, %v7086_v8  ;;  %v582_v43 = vadd.f32 %v7227_v54, %v7121_v18  ;;  %v577_v20 = vadd.f32 %v7227_v54, %v7126_v26  ;;  %v7476_v49 = vadd.f32 %v7227_v54, %v7152_v56 }
 0x15d   :  { %v1415_v42 = vld [vmem:[#allocation6 + $0x68] sm:$0xff]  ;;  %6042 = vmatmul.mubr.msk.f32.gmra.mrb[76].mxu0 %vm1303_vm6, %v3195_v35  ;;  %1382 = vst.msk [vmem:[#allocation3 + $0x70] sm:$0xff] %vm1303_vm6, %v1365_v19  ;;  %1400 = vst.msk [vmem:[#allocation6 + $0x72] sm:$0xff] %vm1303_vm6, %v1365_v19  ;;  %1588 = vrot.lane.b32.xlu1 %v1544_v14, %s6297_s16  ;;  %v2272_v25 = vmax.f32 %v2145_v38, %v2180_v11  ;;  %v2273_v8 = vmax.f32 %v2146_v22, %v2182_v3  ;;  %v1802_v5 = vrot.slane %v731_v62, 1 }
 0x15e   :  { %1431 = vst.msk [vmem:[#allocation2 + $0xd0] sm:$0xff] %vm1303_vm6, %v1415_v42  ;;  %v1642_v31 = vld [vmem:[#allocation6 + $0x63] sm:$0xff]  ;;  %v1929_v60 = vrot.slane %v731_v62, 2  ;;  %v2056_v18 = vrot.slane %v731_v62, 3  ;;  %v2183_v26 = vrot.slane %v731_v62, 4  ;;  %v7483_v56 = vmax.f32 %v572_v59, 0.0 }
 0x15f   :  { %v1740_v17 = vld [vmem:[#allocation6 + $0x64] sm:$0xff]  ;;  %1686 = vrot.lane.b32.xlu0 %v1642_v31, %s6298_s17  ;;  %v733_v29 = vmax.f32 %v567_v6, 0.0  ;;  %2304 = vst.msk [vmem:[#allocation8 + $0x8] sm:$0xff] %vm1303_vm6, %v2272_v25  ;;  %2305 = vst.msk [vmem:[#allocation8 + $0x10] sm:$0xff] %vm1303_vm6, %v2273_v8  ;;  %v1803_v50 = vsel %vm791_vm2, %v1800_v45, %v1802_v5  ;;  %v1805_v37 = vsel %vm791_vm2, %v1802_v5, %v1804_v9  ;;  %v7518_v8 = vmax.f32 %v582_v43, 0.0 }
 0x160   :  { %1756 = vst.msk [vmem:[#allocation2 + $0xc8] sm:$0xff] %vm1303_vm6, %v1740_v17  ;;  %v1930_v2 = vsel %vm919_vm3, %v1927_v7, %v1929_v60  ;;  %v1932_v11 = vsel %vm919_vm3, %v1929_v60, %v1931_v36  ;;  %v1447_v34 = vld [vmem:[#allocation6 + $0x69] sm:$0xff]  ;;  %v1893_v32 = vmax.f32 %v7402_v61, %v1803_v50  ;;  %v1894_v55 = vmax.f32 %v731_v62, %v1805_v37 }
 0x161   :  { %v2057_v45 = vsel %vm1047_vm4, %v2054_v27, %v2056_v18  ;;  %v2059_v3 = vsel %vm1047_vm4, %v2056_v18, %v2058_v10  ;;  %1492 = vrot.lane.b32.xlu1 %v1447_v34, %s6296_s5  ;;  %v1545_v21 = vld [vmem:[#allocation6 + $0x6a] sm:$0xff]  ;;  %v2184_v7 = vsel %vm1175_vm5, %v2181_v46, %v2183_v26  ;;  %v2186_v35 = vsel %vm1175_vm5, %v2183_v26, %v2185_v58 }
 0x162   :  { %v1808_v42 = vrot.slane %v7483_v56, 1  ;;  %v1935_v38 = vrot.slane %v7483_v56, 2  ;;  %v2020_v27 = vmax.f32 %v1893_v32, %v1930_v2  ;;  %v2021_v22 = vmax.f32 %v1894_v55, %v1932_v11 }
 0x163   :  { %1590 = vrot.lane.b32.xlu0 %v1545_v21, %s6297_s16  ;;  %v2062_v62 = vrot.slane %v7483_v56, 3  ;;  %v2189_v59 = vrot.slane %v7483_v56, 4  ;;  %v1806_v19 = vrot.slane %v733_v29, 1  ;;  %v1933_v61 = vrot.slane %v733_v29, 2 }
 0x164   :  { %v2060_v14 = vrot.slane %v733_v29, 3  ;;  %v2187_v46 = vrot.slane %v733_v29, 4  ;;  %v3196_v6 = vld [vmem:[#allocation3 + $0x70] sm:$0xff]  ;;  %v2147_v17 = vmax.f32 %v2020_v27, %v2057_v45  ;;  %v2148_v25 = vmax.f32 %v2021_v22, %v2059_v3 }
 0x165   :  { %v1416_v31 = vld [vmem:[#allocation6 + $0x70] sm:$0xff]  ;;  %v735_v5 = vmax.f32 %v577_v20, 0.0  ;;  %6044 = vmatprep.mubr.msk.f32.mxu0 %vm1303_vm6, %v3196_v6  ;;  %v1807_v26 = vsel %vm791_vm2, %v1804_v9, %v1806_v19  ;;  %v1809_v50 = vsel %vm791_vm2, %v1806_v19, %v1808_v42  ;;  %v1934_v37 = vsel %vm919_vm3, %v1931_v36, %v1933_v61 }
 0x166   :  { %v1643_v60 = vld [vmem:[#allocation6 + $0x6b] sm:$0xff]  ;;  %1432 = vst.msk [vmem:[#allocation2 + $0xe0] sm:$0xff] %vm1303_vm6, %v1416_v31  ;;  %v1936_v43 = vsel %vm919_vm3, %v1933_v61, %v1935_v38  ;;  %v2274_v2 = vmax.f32 %v2147_v17, %v2184_v7  ;;  %v2275_v11 = vmax.f32 %v2148_v25, %v2186_v35  ;;  %v1895_v34 = vmax.f32 %v7429_v24, %v1807_v26 }
 0x167   :  { %v1741_v18 = vld [vmem:[#allocation6 + $0x6c] sm:$0xff]  ;;  %1688 = vrot.lane.b32.xlu1 %v1643_v60, %s6298_s17  ;;  %v1896_v32 = vmax.f32 %v733_v29, %v1809_v50  ;;  %v2061_v55 = vsel %vm1047_vm4, %v2058_v10, %v2060_v14  ;;  %v2063_v36 = vsel %vm1047_vm4, %v2060_v14, %v2062_v62  ;;  %v2188_v45 = vsel %vm1175_vm5, %v2185_v58, %v2187_v46 }
 0x168   :  { %1757 = vst.msk [vmem:[#allocation2 + $0xd8] sm:$0xff] %vm1303_vm6, %v1741_v18  ;;  %v1448_v20 = vld [vmem:[#allocation6 + $0x71] sm:$0xff]  ;;  %v2190_v3 = vsel %vm1175_vm5, %v2187_v46, %v2189_v59  ;;  %2306 = vst.msk [vmem:[#allocation8 + $0x18] sm:$0xff] %vm1303_vm6, %v2274_v2  ;;  %v2022_v29 = vmax.f32 %v1895_v34, %v1934_v37  ;;  %v1812_v10 = vrot.slane %v7518_v8, 1  ;;  %v1939_v7 = vrot.slane %v7518_v8, 2 }
 0x169   :  { %1494 = vrot.lane.b32.xlu0 %v1448_v20, %s6296_s5  ;;  %v2335_v9 = vld [vmem:[#allocation8] ss:$2 sm:$0xff]  ;;  %2307 = vst.msk [vmem:[#allocation8 + $0x20] sm:$0xff] %vm1303_vm6, %v2275_v11  ;;  %v2023_v21 = vmax.f32 %v1896_v32, %v1936_v43  ;;  %v2066_v24 = vrot.slane %v7518_v8, 3  ;;  %v2193_v58 = vrot.slane %v7518_v8, 4  ;;  %v1810_v27 = vrot.slane %v735_v5, 1 }
 0x16a   :  { %2351 = vst.msk [vmem:[#allocation3 + $0x80] sm:$0xff] %vm1303_vm6, %v2335_v9  ;;  %2368 = vst.msk [vmem:[#allocation6 + $0x2] sm:$0xff] %vm1303_vm6, %v2335_v9  ;;  %v1546_v35 = vld [vmem:[#allocation6 + $0x72] sm:$0xff]  ;;  %v1937_v22 = vrot.slane %v735_v5, 2  ;;  %v2149_v19 = vmax.f32 %v2022_v29, %v2061_v55  ;;  %v2064_v14 = vrot.slane %v735_v5, 3  ;;  %v2191_v46 = vrot.slane %v735_v5, 4 }
 0x16b   :  { %1592 = vrot.lane.b32.xlu1 %v1546_v35, %s6297_s16  ;;  %v2150_v61 = vmax.f32 %v2023_v21, %v2063_v36  ;;  %v1811_v6 = vsel %vm791_vm2, %v1808_v42, %v1810_v27  ;;  %v1813_v31 = vsel %vm791_vm2, %v1810_v27, %v1812_v10  ;;  %v1367_v20 = vld [vmem:[#allocation8 + $0xf0] ss:$2 sm:$0x3f]  ;;  %v597_v11 = vadd.f32 %v7227_v54, %v7184_v23 }
 0x16c   :  { %v1938_v17 = vsel %vm919_vm3, %v1935_v38, %v1937_v22  ;;  %v1940_v25 = vsel %vm919_vm3, %v1937_v22, %v1939_v7  ;;  %v2276_v60 = vmax.f32 %v2149_v19, %v2188_v45  ;;  %v1897_v26 = vmax.f32 %v7483_v56, %v1811_v6  ;;  %1384 = vst.msk [vmem:[#allocation3 + $0x78] sm:$0x3f] %vm1383_vm8, %v1367_v20 }
 0x16d   :  { %v2277_v18 = vmax.f32 %v2150_v61, %v2190_v3  ;;  %v1898_v50 = vmax.f32 %v735_v5, %v1813_v31  ;;  %v2065_v37 = vsel %vm1047_vm4, %v2062_v62, %v2064_v14  ;;  %v2067_v42 = vsel %vm1047_vm4, %v2064_v14, %v2066_v24  ;;  %1401 = vst.msk [vmem:[#allocation6 + $0x7a] sm:$0x3f] %vm1383_vm8, %v1367_v20 }
 0x16e   :  { %v2192_v43 = vsel %vm1175_vm5, %v2189_v59, %v2191_v46  ;;  %v2194_v38 = vsel %vm1175_vm5, %v2191_v46, %v2193_v58  ;;  %2308 = vst.msk [vmem:[#allocation8 + $0x28] sm:$0xff] %vm1303_vm6, %v2276_v60  ;;  %v2024_v2 = vmax.f32 %v1897_v26, %v1938_v17  ;;  %v7571_v5 = vmax.f32 %v7476_v49, 0.0 }
 0x16f   :  { %2309 = vst.msk [vmem:[#allocation8 + $0x30] sm:$0xff] %vm1303_vm6, %v2277_v18  ;;  %v2025_v56 = vmax.f32 %v1898_v50, %v1940_v25  ;;  %v587_v62 = vadd.f32 %v7227_v54, %v7156_v40  ;;  %v602_v59 = vadd.f32 %v7227_v54, %v7180_v13  ;;  %v612_v34 = vadd.f32 %v7227_v54, %v7217_v12  ;;  %v2336_v32 = vld [vmem:[#allocation8 + $0x10] ss:$2 sm:$0xff] }
 0x170   :  { %v2151_v55 = vmax.f32 %v2024_v2, %v2065_v37  ;;  %v1816_v49 = vrot.slane %v7571_v5, 1  ;;  %v1943_v45 = vrot.slane %v7571_v5, 2  ;;  %2352 = vst.msk [vmem:[#allocation3 + $0x88] sm:$0xff] %vm1303_vm6, %v2336_v32  ;;  %2369 = vst.msk [vmem:[#allocation6 + $0xa] sm:$0xff] %vm1303_vm6, %v2336_v32  ;;  %v2070_v40 = vrot.slane %v7571_v5, 3 }
 0x171   :  { %v2384_v9 = vld [vmem:[#allocation6] sm:$0xff]  ;;  %v2152_v36 = vmax.f32 %v2025_v56, %v2067_v42  ;;  %v2197_v13 = vrot.slane %v7571_v5, 4  ;;  %v737_v23 = vmax.f32 %v587_v62, 0.0  ;;  %v7590_v12 = vmax.f32 %v602_v59, 0.0  ;;  %v7596_v14 = vpop.permute.xlu0 %1466 }
 0x172   :  { %2400 = vst.msk [vmem:[#allocation2 + $0x100] sm:$0xff] %vm1303_vm6, %v2384_v9  ;;  %v2278_v3 = vmax.f32 %v2151_v55, %v2192_v43  ;;  %v7592_v21 = vmax.f32 %v597_v11, 0.0  ;;  %v7594_v35 = vmax.f32 %v612_v34, 0.0 }
 0x173   :  { %v2279_v29 = vmax.f32 %v2152_v36, %v2194_v38  ;;  %v1814_v27 = vrot.slane %v737_v23, 1  ;;  %v1941_v22 = vrot.slane %v737_v23, 2  ;;  %v2068_v19 = vrot.slane %v737_v23, 3  ;;  %v3198_v38 = vld [vmem:[#allocation3 + $0x80] sm:$0xff]  ;;  %v3197_v2 = vld [vmem:[#allocation3 + $0x78] sm:$0xff]  ;;  %1515 = vst.msk [vmem:[#allocation2] sm:$0xff] %vm1514_vm9, %v7596_v14 }
 0x174   :  { %v2195_v61 = vrot.slane %v737_v23, 4  ;;  %2310 = vst.msk [vmem:[#allocation8 + $0x38] sm:$0xff] %vm1303_vm6, %v2278_v3  ;;  %v1820_v46 = vrot.slane %v7590_v12, 1  ;;  %v1947_v6 = vrot.slane %v7590_v12, 2  ;;  %v2074_v31 = vrot.slane %v7590_v12, 3  ;;  %v1644_v59 = vld [vmem:[#allocation6 + $0x73] sm:$0xff]  ;;  %6045 = vmatmul.mubr.msk.f32.gmra.mrb[78].mxu0 %vm1303_vm6, %v3197_v2 }
 0x175   :  { %2311 = vst.msk [vmem:[#allocation8 + $0x40] sm:$0xff] %vm1303_vm6, %v2279_v29  ;;  %v2201_v17 = vrot.slane %v7590_v12, 4  ;;  %v1815_v25 = vsel %vm791_vm2, %v1812_v10, %v1814_v27  ;;  %v1817_v60 = vsel %vm791_vm2, %v1814_v27, %v1816_v49  ;;  %v1942_v18 = vsel %vm919_vm3, %v1939_v7, %v1941_v22  ;;  %v2337_v50 = vld [vmem:[#allocation8 + $0x20] ss:$2 sm:$0xff]  ;;  %1690 = vrot.lane.b32.xlu0 %v1644_v59, %s6298_s17 }
 0x176   :  { %v1944_v26 = vsel %vm919_vm3, %v1941_v22, %v1943_v45  ;;  %v1899_v37 = vmax.f32 %v7518_v8, %v1815_v25  ;;  %v1900_v42 = vmax.f32 %v737_v23, %v1817_v60  ;;  %v2069_v43 = vsel %vm1047_vm4, %v2066_v24, %v2068_v19  ;;  %2353 = vst.msk [vmem:[#allocation3 + $0x90] sm:$0xff] %vm1303_vm6, %v2337_v50  ;;  %v1417_v62 = vld [vmem:[#allocation6 + $0x78] sm:$0x3f]  ;;  %v7644_v27 = vpop.permute.xlu1 %1662  ;;  %v7646_v22 = vpop.permute.xlu0 %1564 }
 0x177   :  { %v2071_v10 = vsel %vm1047_vm4, %v2068_v19, %v2070_v40  ;;  %2370 = vst.msk [vmem:[#allocation6 + $0x12] sm:$0xff] %vm1303_vm6, %v2337_v50  ;;  %v2196_v7 = vsel %vm1175_vm5, %v2193_v58, %v2195_v61  ;;  %v2198_v20 = vsel %vm1175_vm5, %v2195_v61, %v2197_v13  ;;  %v1818_v24 = vrot.slane %v7592_v21, 1  ;;  %v1742_v58 = vld [vmem:[#allocation6 + $0x74] sm:$0xff]  ;;  %6047 = vmatprep.mubr.msk.f32.mxu0 %vm1303_vm6, %v3198_v38  ;;  %v3199_v3 = vld [vmem:[#allocation3 + $0x88] sm:$0xff]  ;;  %v1743_v25 = vld [vmem:[#allocation6 + $0x7c] sm:$0x3f] }
 0x178   :  { %v1945_v56 = vrot.slane %v7592_v21, 2  ;;  %v2026_v11 = vmax.f32 %v1899_v37, %v1942_v18  ;;  %v2027_v34 = vmax.f32 %v1900_v42, %v1944_v26  ;;  %v2072_v32 = vrot.slane %v7592_v21, 3  ;;  %1433 = vst.msk [vmem:[#allocation2 + $0xf0] sm:$0x3f] %vm1383_vm8, %v1417_v62  ;;  %v1449_v29 = vld [vmem:[#allocation6 + $0x79] sm:$0x3f]  ;;  %6048 = vmatmul.mubr.msk.f32.gmra.mrb[80].mxu0 %vm1303_vm6, %v3199_v3 }
 0x179   :  { %v2199_v8 = vrot.slane %v7592_v21, 4  ;;  %v1819_v9 = vsel %vm791_vm2, %v1816_v49, %v1818_v24  ;;  %v1821_v55 = vsel %vm791_vm2, %v1818_v24, %v1820_v46  ;;  %1758 = vst.msk [vmem:[#allocation2 + $0xe8] sm:$0xff] %vm1303_vm6, %v1742_v58  ;;  %1496 = vrot.lane.b32.xlu1 %v1449_v29, %s6296_s5  ;;  %v2704_v2 = vld [vmem:[#allocation6 + $0x4] sm:$0xff]  ;;  %v1824_v24 = vrot.slane %v7594_v35, 1  ;;  %v2804_v62 = vld [vmem:[%s9503_s3 + $0x10] sm:$0xff]  ;;  %v2805_v58 = vld [vmem:[%s9503_s3 + $0x18] sm:$0xff] }
 0x17a   :  { %v1946_v36 = vsel %vm919_vm3, %v1943_v45, %v1945_v56  ;;  %v1948_v23 = vsel %vm919_vm3, %v1945_v56, %v1947_v6  ;;  %v2153_v49 = vmax.f32 %v2026_v11, %v2069_v43  ;;  %v2154_v19 = vmax.f32 %v2027_v34, %v2071_v10  ;;  %1759 = vst.msk [vmem:[#allocation2 + $0xf8] sm:$0x3f] %vm1383_vm8, %v1743_v25 }
 0x17b   :  { %v1901_v61 = vmax.f32 %v7571_v5, %v1819_v9  ;;  %v1902_v45 = vmax.f32 %v7592_v21, %v1821_v55  ;;  %v2073_v60 = vsel %vm1047_vm4, %v2070_v40, %v2072_v32  ;;  %v2075_v18 = vsel %vm1047_vm4, %v2072_v32, %v2074_v31  ;;  %v2802_v21 = vld [vmem:[%s9503_s3] sm:$0xff]  ;;  %v2385_v40 = vld [vmem:[#allocation6 + $0x8] sm:$0xff]  ;;  %2720 = vst.msk [vmem:[#allocation2 + $0x108] sm:$0xff] %vm1303_vm6, %v2704_v2  ;;  %v7693_v55 = vpop.permute.xlu1 %1468 }
 0x17c   :  { %v2200_v26 = vsel %vm1175_vm5, %v2197_v13, %v2199_v8  ;;  %v2202_v50 = vsel %vm1175_vm5, %v2199_v8, %v2201_v17  ;;  %v2338_v37 = vld [vmem:[#allocation8 + $0x30] ss:$2 sm:$0xff]  ;;  %v2280_v42 = vmax.f32 %v2153_v49, %v2196_v7  ;;  %v2281_v43 = vmax.f32 %v2154_v19, %v2198_v20  ;;  %v1547_v13 = vld [vmem:[#allocation6 + $0x7a] sm:$0x3f]  ;;  %2401 = vst.msk [vmem:[#allocation2 + $0x110] sm:$0xff] %vm1303_vm6, %v2385_v40 }
 0x17d   :  { %v2028_v10 = vmax.f32 %v1901_v61, %v1946_v36  ;;  %v2029_v38 = vmax.f32 %v1902_v45, %v1948_v23  ;;  %v2803_v5 = vld [vmem:[%s9503_s3 + $0x8] sm:$0xff]  ;;  %2354 = vst.msk [vmem:[#allocation3 + $0x98] sm:$0xff] %vm1303_vm6, %v2338_v37  ;;  %2371 = vst.msk [vmem:[#allocation6 + $0x1a] sm:$0xff] %vm1303_vm6, %v2338_v37  ;;  %v1951_v7 = vrot.slane %v7594_v35, 2  ;;  %v2078_v20 = vrot.slane %v7594_v35, 3  ;;  %1594 = vrot.lane.b32.xlu0 %v1547_v13, %s6297_s16  ;;  %v3200_v59 = vld [vmem:[#allocation3 + $0x90] sm:$0xff] }
 0x17e   :  { %v2205_v56 = vrot.slane %v7594_v35, 4  ;;  %2312 = vst.msk [vmem:[#allocation8 + $0x48] sm:$0xff] %vm1303_vm6, %v2280_v42  ;;  %2313 = vst.msk [vmem:[#allocation8 + $0x50] sm:$0xff] %vm1303_vm6, %v2281_v43  ;;  %v607_v32 = vadd.f32 %v7227_v54, %v7231_v57  ;;  %v622_v8 = vadd.f32 %v7227_v54, %v7256_v15  ;;  %6050 = vmatprep.mubr.msk.f32.mxu0 %vm1303_vm6, %v3200_v59  ;;  %v1645_v9 = vld [vmem:[#allocation6 + $0x7b] sm:$0x3f]  ;;  %v2386_v36 = vld [vmem:[#allocation6 + $0x10] sm:$0xff]  ;;  %v7700_v15 = vpop.permute.xlu0 %1566 }
 0x17f   :  { %v2155_v11 = vmax.f32 %v2028_v10, %v2073_v60  ;;  %v2156_v34 = vmax.f32 %v2029_v38, %v2075_v18  ;;  %v617_v23 = vadd.f32 %v7227_v54, %v7262_v28  ;;  %v6152_v3 = vpack.c.bf16 %v2803_v5, %v2802_v21  ;;  %1692 = vrot.lane.b32.xlu1 %v1645_v9, %s6298_s17  ;;  %v2705_v29 = vld [vmem:[#allocation6 + $0xc] sm:$0xff]  ;;  %v2416_v28 = vld [vmem:[#allocation6 + $0x1] sm:$0xff] }
 0x180   :  { %v632_v57 = vadd.f32 %v7227_v54, %v7282_v63  ;;  %2402 = vst.msk [vmem:[#allocation2 + $0x120] sm:$0xff] %vm1303_vm6, %v2386_v36  ;;  %v741_v61 = vmax.f32 %v607_v32, 0.0  ;;  %v7703_v45 = vmax.f32 %v622_v8, 0.0  ;;  %v6299_v25 = vmov 0.0|0.0   ;;  %2721 = vst.msk [vmem:[#allocation2 + $0x118] sm:$0xff] %vm1303_vm6, %v2705_v29  ;;  %v2512_v42 = vld [vmem:[#allocation6 + $0x2] sm:$0xff] }
 0x181   :  { %v2282_v49 = vmax.f32 %v2155_v11, %v2200_v26  ;;  %v2283_v19 = vmax.f32 %v2156_v34, %v2202_v50  ;;  %6151 = vmatprep.subr.bf16.mxu1 %v6299_v25  ;;  %v7707_v60 = vmax.f32 %v617_v23, 0.0  ;;  %v7713_v18 = vadd.f32 %v7227_v54, %v7293_v41  ;;  %2448 = vrot.lane.b32.xlu0 %v2416_v28, %s6296_s5  ;;  %v2608_v59 = vld [vmem:[#allocation6 + $0x3] sm:$0xff] }
 0x182   :  { %6153 = vmatpush1.bf16.msra.mxu1 %v6152_v3  ;;  %v7709_v63 = vmax.f32 %v632_v57, 0.0  ;;  %v6155_v26 = vpack.c.bf16 %v2805_v58, %v2804_v62  ;;  %v1822_v50 = vrot.slane %v741_v61, 1  ;;  %v1949_v21 = vrot.slane %v741_v61, 2  ;;  %v2417_v29 = vld [vmem:[#allocation6 + $0x9] sm:$0xff]  ;;  %1516 = vst.msk [vmem:[#allocation2 + $0x10] sm:$0xff] %vm1514_vm9, %v7693_v55 }
 0x183   :  { %2314 = vst.msk [vmem:[#allocation8 + $0x58] sm:$0xff] %vm1303_vm6, %v2282_v49  ;;  %2315 = vst.msk [vmem:[#allocation8 + $0x60] sm:$0xff] %vm1303_vm6, %v2283_v19  ;;  %v2076_v37 = vrot.slane %v741_v61, 3  ;;  %v2203_v40 = vrot.slane %v741_v61, 4  ;;  %6154 = vmatprep.subr.bf16.mxu1 %v6299_v25  ;;  %v1828_v43 = vrot.slane %v7703_v45, 1  ;;  %v1955_v10 = vrot.slane %v7703_v45, 2  ;;  %2544 = vrot.lane.b32.xlu1 %v2512_v42, %s6297_s16  ;;  %v7737_v11 = vpop.permute.xlu1 %1664 }
 0x184   :  { %v2082_v54 = vrot.slane %v7703_v45, 3  ;;  %v2209_v41 = vrot.slane %v7703_v45, 4  ;;  %v3201_v38 = vld [vmem:[#allocation3 + $0x98] sm:$0xff]  ;;  %v1823_v5 = vsel %vm791_vm2, %v1820_v46, %v1822_v50  ;;  %v1825_v13 = vsel %vm791_vm2, %v1822_v50, %v1824_v24  ;;  %1613 = vst.msk [vmem:[#allocation2] sm:$0xff] %vm1612_vm10, %v7646_v22  ;;  %1614 = vst.msk [vmem:[#allocation2 + $0x10] sm:$0xff] %vm1612_vm10, %v7700_v15 }
 0x185   :  { %v1950_v2 = vsel %vm919_vm3, %v1947_v6, %v1949_v21  ;;  %v1952_v62 = vsel %vm919_vm3, %v1949_v21, %v1951_v7  ;;  %6051 = vmatmul.mubr.msk.f32.gmra.mrb[82].mxu0 %vm1303_vm6, %v3201_v38  ;;  %v1903_v34 = vmax.f32 %v7590_v12, %v1823_v5  ;;  %v1904_v46 = vmax.f32 %v741_v61, %v1825_v13  ;;  %v2339_v8 = vld [vmem:[#allocation8 + $0x40] ss:$2 sm:$0xff]  ;;  %v7746_v58 = vpop.permute.xlu0 %1470 }
 0x186   :  { %v2077_v32 = vsel %vm1047_vm4, %v2074_v31, %v2076_v37  ;;  %v2079_v6 = vsel %vm1047_vm4, %v2076_v37, %v2078_v20  ;;  %6156 = vmatpush1.bf16.msra.mxu1 %v6155_v26  ;;  %v2387_v9 = vld [vmem:[#allocation6 + $0x18] sm:$0xff]  ;;  %v2204_v23 = vsel %vm1175_vm5, %v2201_v17, %v2203_v40  ;;  %v2206_v3 = vsel %vm1175_vm5, %v2203_v40, %v2205_v56  ;;  %v2513_v38 = vld [vmem:[#allocation6 + $0xa] sm:$0xff] }
 0x187   :  { %v2706_v36 = vld [vmem:[#allocation6 + $0x14] sm:$0xff]  ;;  %v1826_v31 = vrot.slane %v7707_v60, 1  ;;  %v1953_v57 = vrot.slane %v7707_v60, 2  ;;  %6157 = vmatprep.subr.bf16.mxu1 %v6299_v25  ;;  %2640 = vrot.lane.b32.xlu0 %v2608_v59, %s6298_s17  ;;  %2355 = vst.msk [vmem:[#allocation3 + $0xa0] sm:$0xff] %vm1303_vm6, %v2339_v8  ;;  %2372 = vst.msk [vmem:[#allocation6 + $0x22] sm:$0xff] %vm1303_vm6, %v2339_v8  ;;  %v2030_v12 = vmax.f32 %v1903_v34, %v1950_v2  ;;  %v2080_v49 = vrot.slane %v7707_v60, 3  ;;  %v7777_v21 = vpop.permute.xlu1 %1568 }
 0x188   :  { %2403 = vst.msk [vmem:[#allocation2 + $0x130] sm:$0xff] %vm1303_vm6, %v2387_v9  ;;  %2722 = vst.msk [vmem:[#allocation2 + $0x128] sm:$0xff] %vm1303_vm6, %v2706_v36  ;;  %v2031_v17 = vmax.f32 %v1904_v46, %v1952_v62  ;;  %v2207_v19 = vrot.slane %v7707_v60, 4  ;;  %2450 = vrot.lane.b32.xlu1 %v2417_v29, %s6296_s5  ;;  %v2806_v59 = vld [vmem:[%s9503_s3 + $0x20] sm:$0xff]  ;;  %v2609_v34 = vld [vmem:[#allocation6 + $0xb] sm:$0xff]  ;;  %v1832_v9 = vrot.slane %v7709_v63, 1 }
 0x189   :  { %v1827_v61 = vsel %vm791_vm2, %v1824_v24, %v1826_v31  ;;  %v1829_v28 = vsel %vm791_vm2, %v1826_v31, %v1828_v43  ;;  %v1954_v26 = vsel %vm919_vm3, %v1951_v7, %v1953_v57  ;;  %v1956_v50 = vsel %vm919_vm3, %v1953_v57, %v1955_v10  ;;  %v2809_v8 = vld [vmem:[%s9503_s3 + $0x38] sm:$0xff]  ;;  %1517 = vst.msk [vmem:[#allocation2 + $0x20] sm:$0xff] %vm1514_vm9, %v7746_v58 }
 0x18a   :  { %v2157_v37 = vmax.f32 %v2030_v12, %v2077_v32  ;;  %v2158_v40 = vmax.f32 %v2031_v17, %v2079_v6  ;;  %v1905_v42 = vmax.f32 %v7594_v35, %v1827_v61  ;;  %v1906_v24 = vmax.f32 %v7707_v60, %v1829_v28  ;;  %v2340_v5 = vld [vmem:[#allocation8 + $0x50] ss:$2 sm:$0xff]  ;;  %v7781_v13 = vpop.permute.xlu0 %1666  ;;  %v2808_v6 = vld [vmem:[%s9503_s3 + $0x30] sm:$0xff]  ;;  %1615 = vst.msk [vmem:[#allocation2 + $0x20] sm:$0xff] %vm1612_vm10, %v7777_v21 }
 0x18b   :  { %v2081_v7 = vsel %vm1047_vm4, %v2078_v20, %v2080_v49  ;;  %v2083_v2 = vsel %vm1047_vm4, %v2080_v49, %v2082_v54  ;;  %v2208_v62 = vsel %vm1175_vm5, %v2205_v56, %v2207_v19  ;;  %v2210_v60 = vsel %vm1175_vm5, %v2207_v19, %v2209_v41  ;;  %v2807_v20 = vld [vmem:[%s9503_s3 + $0x28] sm:$0xff]  ;;  %2546 = vrot.lane.b32.xlu0 %v2513_v38, %s6297_s16  ;;  %v7825_v61 = vld [vmem:[%s9502_s2] ss:$0 sm:$0xff] }
 0x18c   :  { %2356 = vst.msk [vmem:[#allocation3 + $0xa8] sm:$0xff] %vm1303_vm6, %v2340_v5  ;;  %2373 = vst.msk [vmem:[#allocation6 + $0x2a] sm:$0xff] %vm1303_vm6, %v2340_v5  ;;  %v2284_v35 = vmax.f32 %v2157_v37, %v2204_v23  ;;  %v2285_v56 = vmax.f32 %v2158_v40, %v2206_v3  ;;  %v2032_v46 = vmax.f32 %v1905_v42, %v1954_v26  ;;  %2642 = vrot.lane.b32.xlu1 %v2609_v34, %s6298_s17  ;;  %v7815_v3 = vpop.permute.xlu1 %1472 }
 0x18d   :  { %v2033_v32 = vmax.f32 %v1906_v24, %v1956_v50  ;;  %v1959_v36 = vrot.slane %v7709_v63, 2  ;;  %v2086_v31 = vrot.slane %v7709_v63, 3  ;;  %v2213_v23 = vrot.slane %v7709_v63, 4  ;;  %1518 = vst.msk [vmem:[#allocation2 + $0x30] sm:$0xff] %vm1514_vm9, %v7815_v3 }
 0x18e   :  { %2316 = vst.msk [vmem:[#allocation8 + $0x68] sm:$0xff] %vm1303_vm6, %v2284_v35  ;;  %2317 = vst.msk [vmem:[#allocation8 + $0x70] sm:$0xff] %vm1303_vm6, %v2285_v56  ;;  %v2159_v57 = vmax.f32 %v2032_v46, %v2081_v7  ;;  %v745_v12 = vmax.f32 %v7713_v18, 0.0  ;;  %v6158_v17 = vpack.c.bf16 %v2807_v20, %v2806_v59  ;;  %v3202_v49 = vld [vmem:[#allocation3 + $0xa0] sm:$0xff]  ;;  %v7820_v19 = vpop.permute.xlu0 %1570  ;;  %v642_v28 = vadd.f32 %v7825_v61, %v7320_v52  ;;  %v2418_v18 = vld [vmem:[#allocation6 + $0x11] sm:$0xff] }
 0x18f   :  { %v2160_v29 = vmax.f32 %v2033_v32, %v2083_v2  ;;  %v637_v26 = vadd.f32 %v7825_v61, %v7324_v53  ;;  %v6161_v50 = vpack.c.bf16 %v2809_v8, %v2808_v6  ;;  %v652_v37 = vadd.f32 %v7825_v61, %v7352_v16  ;;  %6053 = vmatprep.mubr.msk.f32.mxu0 %vm1303_vm6, %v3202_v49  ;;  %v2388_v40 = vld [vmem:[#allocation6 + $0x20] sm:$0xff]  ;;  %v2514_v7 = vld [vmem:[#allocation6 + $0x12] sm:$0xff] }
 0x190   :  { %v2286_v42 = vmax.f32 %v2159_v57, %v2208_v62  ;;  %v1830_v38 = vrot.slane %v745_v12, 1  ;;  %v1957_v5 = vrot.slane %v745_v12, 2  ;;  %6159 = vmatpush1.bf16.msra.mxu1 %v6158_v17  ;;  %2452 = vrot.lane.b32.xlu0 %v2418_v18, %s6296_s5  ;;  %2404 = vst.msk [vmem:[#allocation2 + $0x140] sm:$0xff] %vm1303_vm6, %v2388_v40  ;;  %v2707_v52 = vld [vmem:[#allocation6 + $0x1c] sm:$0xff]  ;;  %v2084_v53 = vrot.slane %v745_v12, 3 }
 0x191   :  { %v2287_v24 = vmax.f32 %v2160_v29, %v2210_v60  ;;  %v2211_v2 = vrot.slane %v745_v12, 4  ;;  %v7836_v59 = vmax.f32 %v642_v28, 0.0  ;;  %v7838_v16 = vmax.f32 %v637_v26, 0.0  ;;  %6160 = vmatprep.subr.bf16.mxu1 %v6299_v25  ;;  %2548 = vrot.lane.b32.xlu1 %v2514_v7, %s6297_s16  ;;  %2723 = vst.msk [vmem:[#allocation2 + $0x138] sm:$0xff] %vm1303_vm6, %v2707_v52  ;;  %v2419_v28 = vld [vmem:[#allocation6 + $0x19] sm:$0xff] }
 0x192   :  { %v7842_v62 = vpop.permute.xlu1 %1668  ;;  %2318 = vst.msk [vmem:[#allocation8 + $0x78] sm:$0xff] %vm1303_vm6, %v2286_v42  ;;  %v1831_v60 = vsel %vm791_vm2, %v1828_v43, %v1830_v38  ;;  %v1833_v20 = vsel %vm791_vm2, %v1830_v38, %v1832_v9  ;;  %v1958_v34 = vsel %vm919_vm3, %v1955_v10, %v1957_v5  ;;  %v1960_v35 = vsel %vm919_vm3, %v1957_v5, %v1959_v36  ;;  %v2610_v10 = vld [vmem:[#allocation6 + $0x13] sm:$0xff] }
 0x193   :  { %2319 = vst.msk [vmem:[#allocation8 + $0x80] sm:$0xff] %vm1303_vm6, %v2287_v24  ;;  %v3203_v56 = vld [vmem:[#allocation3 + $0xa8] sm:$0xff]  ;;  %v1907_v32 = vmax.f32 %v7703_v45, %v1831_v60  ;;  %v1908_v6 = vmax.f32 %v745_v12, %v1833_v20  ;;  %v2085_v43 = vsel %vm1047_vm4, %v2082_v54, %v2084_v53  ;;  %v2087_v8 = vsel %vm1047_vm4, %v2084_v53, %v2086_v31  ;;  %v2515_v60 = vld [vmem:[#allocation6 + $0x1a] sm:$0xff] }
 0x194   :  { %v7859_v46 = vpop.permute.xlu0 %1474  ;;  %6054 = vmatmul.mubr.msk.f32.gmra.mrb[84].mxu0 %vm1303_vm6, %v3203_v56  ;;  %v2389_v57 = vld [vmem:[#allocation6 + $0x28] sm:$0xff]  ;;  %v2212_v17 = vsel %vm1175_vm5, %v2209_v41, %v2211_v2  ;;  %v2214_v12 = vsel %vm1175_vm5, %v2211_v2, %v2213_v23  ;;  %v1836_v49 = vrot.slane %v7836_v59, 1  ;;  %v1963_v54 = vrot.slane %v7836_v59, 2  ;;  %6162 = vmatpush1.bf16.msra.mxu1 %v6161_v50  ;;  %1616 = vst.msk [vmem:[#allocation2 + $0x30] sm:$0xff] %vm1612_vm10, %v7820_v19  ;;  %v8135_v19 = vld [vmem:[%s9503_s3 + $0x90] sm:$0xff] }
 0x195   :  { %v2708_v29 = vld [vmem:[#allocation6 + $0x24] sm:$0xff]  ;;  %2644 = vrot.lane.b32.xlu0 %v2610_v10, %s6298_s17  ;;  %2405 = vst.msk [vmem:[#allocation2 + $0x150] sm:$0xff] %vm1303_vm6, %v2389_v57  ;;  %v2034_v26 = vmax.f32 %v1907_v32, %v1958_v34  ;;  %v2035_v45 = vmax.f32 %v1908_v6, %v1960_v35  ;;  %v2090_v41 = vrot.slane %v7836_v59, 3  ;;  %v2217_v18 = vrot.slane %v7836_v59, 4  ;;  %6163 = vmatprep.subr.bf16.mxu1 %v6299_v25  ;;  %v2341_v40 = vld [vmem:[#allocation8 + $0x60] ss:$2 sm:$0xff] }
 0x196   :  { %2724 = vst.msk [vmem:[#allocation2 + $0x148] sm:$0xff] %vm1303_vm6, %v2708_v29  ;;  %2454 = vrot.lane.b32.xlu1 %v2419_v28, %s6296_s5  ;;  %v7884_v42 = vpop.permute.xlu1 %1572  ;;  %v1834_v50 = vrot.slane %v7838_v16, 1  ;;  %v1961_v24 = vrot.slane %v7838_v16, 2  ;;  %v2088_v38 = vrot.slane %v7838_v16, 3  ;;  %v2215_v5 = vrot.slane %v7838_v16, 4  ;;  %2357 = vst.msk [vmem:[#allocation3 + $0xb0] sm:$0xff] %vm1303_vm6, %v2341_v40 }
 0x197   :  { %2374 = vst.msk [vmem:[#allocation6 + $0x32] sm:$0xff] %vm1303_vm6, %v2341_v40  ;;  %v2161_v7 = vmax.f32 %v2034_v26, %v2085_v43  ;;  %v2162_v52 = vmax.f32 %v2035_v45, %v2087_v8  ;;  %v7892_v53 = vmax.f32 %v652_v37, 0.0  ;;  %v647_v2 = vadd.f32 %v7825_v61, %v7363_v30  ;;  %v2611_v30 = vld [vmem:[#allocation6 + $0x1b] sm:$0xff]  ;;  %v2812_v28 = vld [vmem:[%s9503_s3 + $0x50] sm:$0xff] }
 0x198   :  { %v1835_v20 = vsel %vm791_vm2, %v1832_v9, %v1834_v50  ;;  %v1837_v34 = vsel %vm791_vm2, %v1834_v50, %v1836_v49  ;;  %v1962_v35 = vsel %vm919_vm3, %v1959_v36, %v1961_v24  ;;  %v1964_v37 = vsel %vm919_vm3, %v1961_v24, %v1963_v54  ;;  %v7909_v56 = vpop.permute.xlu0 %1670  ;;  %v2810_v8 = vld [vmem:[%s9503_s3 + $0x40] sm:$0xff]  ;;  %v2811_v36 = vld [vmem:[%s9503_s3 + $0x48] sm:$0xff]  ;;  %1519 = vst.msk [vmem:[#allocation2 + $0x40] sm:$0xff] %vm1514_vm9, %v7859_v46 }
 0x199   :  { %2550 = vrot.lane.b32.xlu0 %v2515_v60, %s6297_s16  ;;  %v2288_v32 = vmax.f32 %v2161_v7, %v2212_v17  ;;  %v2289_v6 = vmax.f32 %v2162_v52, %v2214_v12  ;;  %v1909_v9 = vmax.f32 %v7709_v63, %v1835_v20  ;;  %v1910_v43 = vmax.f32 %v7838_v16, %v1837_v34  ;;  %v2342_v10 = vld [vmem:[#allocation8 + $0x70] ss:$2 sm:$0xff] }
 0x19a   :  { %2646 = vrot.lane.b32.xlu1 %v2611_v30, %s6298_s17  ;;  %v7920_v57 = vpop.permute.xlu1 %1476  ;;  %v2089_v29 = vsel %vm1047_vm4, %v2086_v31, %v2088_v38  ;;  %v2091_v16 = vsel %vm1047_vm4, %v2088_v38, %v2090_v41  ;;  %v2216_v17 = vsel %vm1175_vm5, %v2213_v23, %v2215_v5  ;;  %v2218_v12 = vsel %vm1175_vm5, %v2215_v5, %v2217_v18  ;;  %v2813_v31 = vld [vmem:[%s9503_s3 + $0x58] sm:$0xff]  ;;  %v2420_v40 = vld [vmem:[#allocation6 + $0x21] sm:$0xff] }
 0x19b   :  { %2358 = vst.msk [vmem:[#allocation3 + $0xb8] sm:$0xff] %vm1303_vm6, %v2342_v10  ;;  %2375 = vst.msk [vmem:[#allocation6 + $0x3a] sm:$0xff] %vm1303_vm6, %v2342_v10  ;;  %v2036_v63 = vmax.f32 %v1909_v9, %v1962_v35  ;;  %v2037_v23 = vmax.f32 %v1910_v43, %v1964_v37  ;;  %v1840_v26 = vrot.slane %v7892_v53, 1  ;;  %v1967_v45 = vrot.slane %v7892_v53, 2  ;;  %v2516_v7 = vld [vmem:[#allocation6 + $0x22] sm:$0xff] }
 0x19c   :  { %2320 = vst.msk [vmem:[#allocation8 + $0x88] sm:$0xff] %vm1303_vm6, %v2288_v32  ;;  %2321 = vst.msk [vmem:[#allocation8 + $0x90] sm:$0xff] %vm1303_vm6, %v2289_v6  ;;  %v2094_v50 = vrot.slane %v7892_v53, 3  ;;  %v2221_v24 = vrot.slane %v7892_v53, 4  ;;  %v749_v38 = vmax.f32 %v647_v2, 0.0  ;;  %v6164_v5 = vpack.c.bf16 %v2811_v36, %v2810_v8  ;;  %v7949_v52 = vpop.permute.xlu0 %1574 }
 0x19d   :  { %2456 = vrot.lane.b32.xlu0 %v2420_v40, %s6296_s5  ;;  %v2163_v60 = vmax.f32 %v2036_v63, %v2089_v29  ;;  %v2164_v20 = vmax.f32 %v2037_v23, %v2091_v16  ;;  %v6167_v34 = vpack.c.bf16 %v2813_v31, %v2812_v28  ;;  %v662_v35 = vadd.f32 %v7825_v61, %v7368_v51  ;;  %v3204_v37 = vld [vmem:[#allocation3 + $0xb0] sm:$0xff]  ;;  %v2612_v29 = vld [vmem:[#allocation6 + $0x23] sm:$0xff] }
 0x19e   :  { %2552 = vrot.lane.b32.xlu1 %v2516_v7, %s6297_s16  ;;  %v7954_v30 = vpop.permute.xlu1 %1672  ;;  %v1838_v32 = vrot.slane %v749_v38, 1  ;;  %v1965_v6 = vrot.slane %v749_v38, 2  ;;  %v2092_v2 = vrot.slane %v749_v38, 3  ;;  %v2219_v9 = vrot.slane %v749_v38, 4  ;;  %6165 = vmatpush1.bf16.msra.mxu1 %v6164_v5  ;;  %v2390_v43 = vld [vmem:[#allocation6 + $0x30] sm:$0xff]  ;;  %v2814_v31 = vld [vmem:[%s9503_s3 + $0x60] sm:$0xff] }
 0x19f   :  { %6056 = vmatprep.mubr.msk.f32.mxu0 %vm1303_vm6, %v3204_v37  ;;  %v2290_v8 = vmax.f32 %v2163_v60, %v2216_v17  ;;  %v2291_v36 = vmax.f32 %v2164_v20, %v2218_v12  ;;  %6166 = vmatprep.subr.bf16.mxu1 %v6299_v25  ;;  %v7958_v10 = vmax.f32 %v662_v35, 0.0  ;;  %v657_v51 = vadd.f32 %v7825_v61, %v7380_v48  ;;  %v2709_v16 = vld [vmem:[#allocation6 + $0x2c] sm:$0xff]  ;;  %v8009_v37 = vld [vmem:[%s9503_s3 + $0x78] sm:$0xff] }
 0x1a0   :  { %2406 = vst.msk [vmem:[#allocation2 + $0x160] sm:$0xff] %vm1303_vm6, %v2390_v43  ;;  %v1839_v28 = vsel %vm791_vm2, %v1836_v49, %v1838_v32  ;;  %v1841_v17 = vsel %vm791_vm2, %v1838_v32, %v1840_v26  ;;  %v1966_v12 = vsel %vm919_vm3, %v1963_v54, %v1965_v6  ;;  %v1968_v48 = vsel %vm919_vm3, %v1965_v6, %v1967_v45  ;;  %v2421_v63 = vld [vmem:[#allocation6 + $0x29] sm:$0xff] }
 0x1a1   :  { %2648 = vrot.lane.b32.xlu0 %v2612_v29, %s6298_s17  ;;  %2725 = vst.msk [vmem:[#allocation2 + $0x158] sm:$0xff] %vm1303_vm6, %v2709_v16  ;;  %2322 = vst.msk [vmem:[#allocation8 + $0x98] sm:$0xff] %vm1303_vm6, %v2290_v8  ;;  %v1911_v49 = vmax.f32 %v7836_v59, %v1839_v28  ;;  %v1912_v54 = vmax.f32 %v749_v38, %v1841_v17  ;;  %v2093_v23 = vsel %vm1047_vm4, %v2090_v41, %v2092_v2  ;;  %v2815_v5 = vld [vmem:[%s9503_s3 + $0x68] sm:$0xff]  ;;  %v7995_v7 = vld [vmem:[%s9503_s3 + $0x70] sm:$0xff]  ;;  %v1479_v59 = vpop.permute.xlu0 %1478 }
 0x1a2   :  { %2323 = vst.msk [vmem:[#allocation8 + $0xa0] sm:$0xff] %vm1303_vm6, %v2291_v36  ;;  %v2095_v40 = vsel %vm1047_vm4, %v2092_v2, %v2094_v50  ;;  %v3205_v60 = vld [vmem:[#allocation3 + $0xb8] sm:$0xff]  ;;  %2458 = vrot.lane.b32.xlu1 %v2421_v63, %s6296_s5  ;;  %v2220_v41 = vsel %vm1175_vm5, %v2217_v18, %v2219_v9  ;;  %v2222_v38 = vsel %vm1175_vm5, %v2219_v9, %v2221_v24  ;;  %v1844_v20 = vrot.slane %v7958_v10, 1  ;;  %v2517_v9 = vld [vmem:[#allocation6 + $0x2a] sm:$0xff]  ;;  %v8017_v8 = vpop.permute.xlu1 %1576 }
 0x1a3   :  { %6168 = vmatpush1.bf16.msra.mxu1 %v6167_v34  ;;  %v1971_v35 = vrot.slane %v7958_v10, 2  ;;  %6057 = vmatmul.mubr.msk.f32.gmra.mrb[86].mxu0 %vm1303_vm6, %v3205_v60  ;;  %v2343_v32 = vld [vmem:[#allocation8 + $0x80] ss:$2 sm:$0xff]  ;;  %v2038_v18 = vmax.f32 %v1911_v49, %v1966_v12  ;;  %v2039_v2 = vmax.f32 %v1912_v54, %v1968_v48  ;;  %v2098_v43 = vrot.slane %v7958_v10, 3  ;;  %1520 = vst.msk [vmem:[#allocation2 + $0x50] sm:$0xff] %vm1514_vm9, %v7920_v57 }
 0x1a4   :  { %v2391_v6 = vld [vmem:[#allocation6 + $0x38] sm:$0xff]  ;;  %v2225_v34 = vrot.slane %v7958_v10, 4  ;;  %6169 = vmatprep.subr.bf16.mxu1 %v6299_v25  ;;  %2359 = vst.msk [vmem:[#allocation3 + $0xc0] sm:$0xff] %vm1303_vm6, %v2343_v32  ;;  %2376 = vst.msk [vmem:[#allocation6 + $0x42] sm:$0xff] %vm1303_vm6, %v2343_v32  ;;  %v751_v29 = vmax.f32 %v657_v51, 0.0  ;;  %v6170_v16 = vpack.c.bf16 %v2815_v5, %v2814_v31  ;;  %v672_v28 = vadd.f32 %v7825_v61, %v7398_v39  ;;  %v2613_v17 = vld [vmem:[#allocation6 + $0x2b] sm:$0xff] }
 0x1a5   :  { %2407 = vst.msk [vmem:[#allocation2 + $0x170] sm:$0xff] %vm1303_vm6, %v2391_v6  ;;  %v2710_v36 = vld [vmem:[#allocation6 + $0x34] sm:$0xff]  ;;  %2554 = vrot.lane.b32.xlu0 %v2517_v9, %s6297_s16  ;;  %v2165_v12 = vmax.f32 %v2038_v18, %v2093_v23  ;;  %v2166_v48 = vmax.f32 %v2039_v2, %v2095_v40  ;;  %v667_v63 = vadd.f32 %v7825_v61, %v7406_v47 }
 0x1a6   :  { %2726 = vst.msk [vmem:[#allocation2 + $0x168] sm:$0xff] %vm1303_vm6, %v2710_v36  ;;  %v6173_v51 = vpack.c.bf16 %v8009_v37, %v7995_v7  ;;  %2650 = vrot.lane.b32.xlu1 %v2613_v17, %s6298_s17  ;;  %v1842_v39 = vrot.slane %v751_v29, 1  ;;  %v1969_v47 = vrot.slane %v751_v29, 2  ;;  %v2096_v14 = vrot.slane %v751_v29, 3  ;;  %v2422_v54 = vld [vmem:[#allocation6 + $0x31] sm:$0xff] }
 0x1a7   :  { %1521 = vst.msk [vmem:[#allocation2 + $0x60] sm:$0xff] %vm1514_vm9, %v1479_v59  ;;  %v2223_v55 = vrot.slane %v751_v29, 4  ;;  %6171 = vmatpush1.bf16.msra.mxu1 %v6170_v16  ;;  %v2292_v31 = vmax.f32 %v2165_v12, %v2220_v41  ;;  %v2293_v58 = vmax.f32 %v2166_v48, %v2222_v38  ;;  %v8042_v49 = vmax.f32 %v672_v28, 0.0  ;;  %v2518_v7 = vld [vmem:[#allocation6 + $0x32] sm:$0xff]  ;;  %v8060_v60 = vpop.permute.xlu0 %1674 }
 0x1a8   :  { %6172 = vmatprep.subr.bf16.mxu1 %v6299_v25  ;;  %v8045_v3 = vmax.f32 %v667_v63, 0.0  ;;  %v1843_v46 = vsel %vm791_vm2, %v1840_v26, %v1842_v39  ;;  %v1845_v57 = vsel %vm791_vm2, %v1842_v39, %v1844_v20  ;;  %v1970_v23 = vsel %vm919_vm3, %v1967_v45, %v1969_v47  ;;  %v2344_v5 = vld [vmem:[#allocation8 + $0x90] ss:$2 sm:$0xff]  ;;  %1617 = vst.msk [vmem:[#allocation2 + $0x40] sm:$0xff] %vm1612_vm10, %v7884_v42 }
 0x1a9   :  { %v1972_v40 = vsel %vm919_vm3, %v1969_v47, %v1971_v35  ;;  %2460 = vrot.lane.b32.xlu0 %v2422_v54, %s6296_s5  ;;  %2324 = vst.msk [vmem:[#allocation8 + $0xa8] sm:$0xff] %vm1303_vm6, %v2292_v31  ;;  %2325 = vst.msk [vmem:[#allocation8 + $0xb0] sm:$0xff] %vm1303_vm6, %v2293_v58  ;;  %v1913_v26 = vmax.f32 %v7892_v53, %v1843_v46  ;;  %v1914_v41 = vmax.f32 %v751_v29, %v1845_v57  ;;  %v1481_v37 = vpop.permute.xlu1 %1480  ;;  %v2423_v48 = vld [vmem:[#allocation6 + $0x39] sm:$0xff] }
 0x1aa   :  { %v2097_v45 = vsel %vm1047_vm4, %v2094_v50, %v2096_v14  ;;  %v2099_v38 = vsel %vm1047_vm4, %v2096_v14, %v2098_v43  ;;  %2360 = vst.msk [vmem:[#allocation3 + $0xc8] sm:$0xff] %vm1303_vm6, %v2344_v5  ;;  %2377 = vst.msk [vmem:[#allocation6 + $0x4a] sm:$0xff] %vm1303_vm6, %v2344_v5  ;;  %2556 = vrot.lane.b32.xlu1 %v2518_v7, %s6297_s16  ;;  %v2224_v32 = vsel %vm1175_vm5, %v2221_v24, %v2223_v55  ;;  %v2614_v24 = vld [vmem:[#allocation6 + $0x33] sm:$0xff]  ;;  %v2818_v46 = vld [vmem:[%s9503_s3 + $0x80] sm:$0xff] }
 0x1ab   :  { %v2226_v59 = vsel %vm1175_vm5, %v2223_v55, %v2225_v34  ;;  %v1848_v50 = vrot.slane %v8042_v49, 1  ;;  %v1975_v6 = vrot.slane %v8042_v49, 2  ;;  %6174 = vmatpush1.bf16.msra.mxu1 %v6173_v51  ;;  %v3206_v18 = vld [vmem:[#allocation3 + $0xc0] sm:$0xff]  ;;  %1522 = vst.msk [vmem:[#allocation2 + $0x70] sm:$0xff] %vm1514_vm9, %v1481_v37  ;;  %v2040_v2 = vmax.f32 %v1913_v26, %v1970_v23 }
 0x1ac   :  { %v2041_v9 = vmax.f32 %v1914_v41, %v1972_v40  ;;  %v2102_v36 = vrot.slane %v8042_v49, 3  ;;  %v2229_v53 = vrot.slane %v8042_v49, 4  ;;  %6175 = vmatprep.subr.bf16.mxu1 %v6299_v25  ;;  %6059 = vmatprep.mubr.msk.f32.mxu0 %vm1303_vm6, %v3206_v18  ;;  %v2392_v29 = vld [vmem:[#allocation6 + $0x40] sm:$0xff]  ;;  %v1846_v16 = vrot.slane %v8045_v3, 1  ;;  %1618 = vst.msk [vmem:[#allocation2 + $0x50] sm:$0xff] %vm1612_vm10, %v7949_v52  ;;  %1619 = vst.msk [vmem:[#allocation2 + $0x60] sm:$0xff] %vm1612_vm10, %v8017_v8 }
 0x1ad   :  { %v1973_v28 = vrot.slane %v8045_v3, 2  ;;  %v2100_v17 = vrot.slane %v8045_v3, 3  ;;  %v2227_v12 = vrot.slane %v8045_v3, 4  ;;  %2652 = vrot.lane.b32.xlu0 %v2614_v24, %s6298_s17  ;;  %v1579_v63 = vpop.permute.xlu0 %1578  ;;  %2408 = vst.msk [vmem:[#allocation2 + $0x180] sm:$0xff] %vm1303_vm6, %v2392_v29  ;;  %v2711_v51 = vld [vmem:[#allocation6 + $0x3c] sm:$0xff]  ;;  %v2167_v39 = vmax.f32 %v2040_v2, %v2097_v45 }
 0x1ae   :  { %v2168_v47 = vmax.f32 %v2041_v9, %v2099_v38  ;;  %2462 = vrot.lane.b32.xlu1 %v2423_v48, %s6296_s5  ;;  %2727 = vst.msk [vmem:[#allocation2 + $0x178] sm:$0xff] %vm1303_vm6, %v2711_v51  ;;  %v1847_v55 = vsel %vm791_vm2, %v1844_v20, %v1846_v16  ;;  %v1849_v31 = vsel %vm791_vm2, %v1846_v16, %v1848_v50  ;;  %v2819_v20 = vld [vmem:[%s9503_s3 + $0x88] sm:$0xff]  ;;  %v2519_v42 = vld [vmem:[#allocation6 + $0x3a] sm:$0xff] }
 0x1af   :  { %v1677_v14 = vpop.permute.xlu1 %1676  ;;  %v1974_v58 = vsel %vm919_vm3, %v1971_v35, %v1973_v28  ;;  %v1976_v54 = vsel %vm919_vm3, %v1973_v28, %v1975_v6  ;;  %1620 = vst.msk [vmem:[#allocation2 + $0x70] sm:$0xff] %vm1612_vm10, %v1579_v63  ;;  %v2294_v22 = vmax.f32 %v2167_v39, %v2224_v32  ;;  %v1915_v15 = vmax.f32 %v7958_v10, %v1847_v55  ;;  %v2615_v57 = vld [vmem:[#allocation6 + $0x3b] sm:$0xff] }
 0x1b0   :  { %v2295_v35 = vmax.f32 %v2168_v47, %v2226_v59  ;;  %v1916_v21 = vmax.f32 %v8045_v3, %v1849_v31  ;;  %1711 = vst.msk [vmem:[#allocation2] sm:$0xff] %vm1710_vm11, %v7644_v27  ;;  %1712 = vst.msk [vmem:[#allocation2 + $0x10] sm:$0xff] %vm1710_vm11, %v7737_v11  ;;  %v2101_v27 = vsel %vm1047_vm4, %v2098_v43, %v2100_v17  ;;  %v2424_v38 = vld [vmem:[#allocation6 + $0x41] sm:$0xff] }
 0x1b1   :  { %1713 = vst.msk [vmem:[#allocation2 + $0x20] sm:$0xff] %vm1710_vm11, %v7781_v13  ;;  %1714 = vst.msk [vmem:[#allocation2 + $0x30] sm:$0xff] %vm1710_vm11, %v7842_v62  ;;  %v2103_v11 = vsel %vm1047_vm4, %v2100_v17, %v2102_v36  ;;  %v2228_v13 = vsel %vm1175_vm5, %v2225_v34, %v2227_v12  ;;  %v2230_v62 = vsel %vm1175_vm5, %v2227_v12, %v2229_v53  ;;  %v3207_v52 = vld [vmem:[#allocation3 + $0xc8] sm:$0xff]  ;;  %2558 = vrot.lane.b32.xlu0 %v2519_v42, %s6297_s16  ;;  %v1483_v43 = vpop.permute.xlu0 %1482  ;;  %v2741_v42 = vld [vmem:[#allocation2 + $0x18] sm:$0xff] }
 0x1b2   :  { %1715 = vst.msk [vmem:[#allocation2 + $0x40] sm:$0xff] %vm1710_vm11, %v7909_v56  ;;  %1716 = vst.msk [vmem:[#allocation2 + $0x50] sm:$0xff] %vm1710_vm11, %v7954_v30  ;;  %v2821_v56 = vld [vmem:[%s9503_s3 + $0x98] sm:$0xff]  ;;  %v2042_v10 = vmax.f32 %v1915_v15, %v1974_v58  ;;  %v2043_v8 = vmax.f32 %v1916_v21, %v1976_v54  ;;  %v6176_v34 = vpack.c.bf16 %v2819_v20, %v2818_v46  ;;  %6060 = vmatmul.mubr.msk.f32.gmra.mrb[88].mxu0 %vm1303_vm6, %v3207_v52  ;;  %v2393_v40 = vld [vmem:[#allocation6 + $0x48] sm:$0xff] }
 0x1b3   :  { %1717 = vst.msk [vmem:[#allocation2 + $0x60] sm:$0xff] %vm1710_vm11, %v8060_v60  ;;  %1718 = vst.msk [vmem:[#allocation2 + $0x70] sm:$0xff] %vm1710_vm11, %v1677_v14  ;;  %v2345_v30 = vld [vmem:[#allocation8 + $0xa0] ss:$2 sm:$0xff]  ;;  %v682_v3 = vadd.f32 %v7825_v61, %v7415_v0  ;;  %v1581_v23 = vpop.permute.xlu1 %1580  ;;  %v677_v5 = vadd.f32 %v7825_v61, %v7423_v4  ;;  %v692_v7 = vadd.f32 %v7825_v61, %v7437_v33  ;;  %2654 = vrot.lane.b32.xlu1 %v2615_v57, %s6298_s17  ;;  %v2712_v60 = vld [vmem:[#allocation6 + $0x44] sm:$0xff] }
 0x1b4   :  { %2326 = vst.msk [vmem:[#allocation8 + $0xb8] sm:$0xff] %vm1303_vm6, %v2294_v22  ;;  %2327 = vst.msk [vmem:[#allocation8 + $0xc0] sm:$0xff] %vm1303_vm6, %v2295_v35  ;;  %v687_v0 = vadd.f32 %v7825_v61, %v7446_v44  ;;  %v2169_v26 = vmax.f32 %v2042_v10, %v2101_v27  ;;  %v2170_v41 = vmax.f32 %v2043_v8, %v2103_v11  ;;  %6177 = vmatpush1.bf16.msra.mxu1 %v6176_v34  ;;  %v2520_v9 = vld [vmem:[#allocation6 + $0x42] sm:$0xff]  ;;  %v2521_v27 = vld [vmem:[#allocation6 + $0x4a] sm:$0xff] }
 0x1b5   :  { %2361 = vst.msk [vmem:[#allocation3 + $0xd0] sm:$0xff] %vm1303_vm6, %v2345_v30  ;;  %2378 = vst.msk [vmem:[#allocation6 + $0x52] sm:$0xff] %vm1303_vm6, %v2345_v30  ;;  %v8183_v45 = vmax.f32 %v682_v3, 0.0  ;;  %v6179_v4 = vpack.c.bf16 %v2821_v56, %v8135_v19  ;;  %v755_v33 = vmax.f32 %v677_v5, 0.0  ;;  %6178 = vmatprep.subr.bf16.mxu1 %v6299_v25  ;;  %v8188_v44 = vmax.f32 %v692_v7, 0.0  ;;  %2464 = vrot.lane.b32.xlu0 %v2424_v38, %s6296_s5  ;;  %v2616_v39 = vld [vmem:[#allocation6 + $0x43] sm:$0xff] }
 0x1b6   :  { %1523 = vst.msk [vmem:[#allocation2 + $0x80] sm:$0xff] %vm1514_vm9, %v1483_v43  ;;  %v8190_v61 = vmax.f32 %v687_v0, 0.0  ;;  %v1679_v37 = vpop.permute.xlu0 %1678  ;;  %v2296_v32 = vmax.f32 %v2169_v26, %v2228_v13  ;;  %v2297_v59 = vmax.f32 %v2170_v41, %v2230_v62  ;;  %v2425_v35 = vld [vmem:[#allocation6 + $0x49] sm:$0xff] }
 0x1b7   :  { %1621 = vst.msk [vmem:[#allocation2 + $0x80] sm:$0xff] %vm1612_vm10, %v1581_v23  ;;  %v1852_v18 = vrot.slane %v8183_v45, 1  ;;  %v1979_v2 = vrot.slane %v8183_v45, 2  ;;  %v2106_v29 = vrot.slane %v8183_v45, 3  ;;  %v2233_v25 = vrot.slane %v8183_v45, 4  ;;  %2560 = vrot.lane.b32.xlu1 %v2520_v9, %s6297_s16  ;;  %v2738_v51 = vld [vmem:[#allocation2] sm:$0xff] }
 0x1b8   :  { %2409 = vst.msk [vmem:[#allocation2 + $0x190] sm:$0xff] %vm1303_vm6, %v2393_v40  ;;  %2728 = vst.msk [vmem:[#allocation2 + $0x188] sm:$0xff] %vm1303_vm6, %v2712_v60  ;;  %v1485_v24 = vpop.permute.xlu1 %1484  ;;  %v1850_v16 = vrot.slane %v755_v33, 1  ;;  %v1977_v28 = vrot.slane %v755_v33, 2  ;;  %v2104_v17 = vrot.slane %v755_v33, 3  ;;  %v2231_v12 = vrot.slane %v755_v33, 4  ;;  %6180 = vmatpush1.bf16.msra.mxu1 %v6179_v4 }
 0x1b9   :  { %1719 = vst.msk [vmem:[#allocation2 + $0x80] sm:$0xff] %vm1710_vm11, %v1679_v37  ;;  %v1856_v48 = vrot.slane %v8188_v44, 1  ;;  %v1983_v63 = vrot.slane %v8188_v44, 2  ;;  %2656 = vrot.lane.b32.xlu0 %v2616_v39, %s6298_s17  ;;  %v2110_v19 = vrot.slane %v8188_v44, 3  ;;  %v2237_v62 = vrot.slane %v8188_v44, 4  ;;  %v2743_v41 = vld [vmem:[#allocation2 + $0x28] sm:$0xff] }
 0x1ba   :  { %1524 = vst.msk [vmem:[#allocation2 + $0x90] sm:$0xff] %vm1514_vm9, %v1485_v24  ;;  %v1851_v47 = vsel %vm791_vm2, %v1848_v50, %v1850_v16  ;;  %v1853_v14 = vsel %vm791_vm2, %v1850_v16, %v1852_v18  ;;  %v1978_v55 = vsel %vm919_vm3, %v1975_v6, %v1977_v28  ;;  %v1980_v31 = vsel %vm919_vm3, %v1977_v28, %v1979_v2  ;;  %v1583_v46 = vpop.permute.xlu0 %1582 }
 0x1bb   :  { %2328 = vst.msk [vmem:[#allocation8 + $0xc8] sm:$0xff] %vm1303_vm6, %v2296_v32  ;;  %2329 = vst.msk [vmem:[#allocation8 + $0xd0] sm:$0xff] %vm1303_vm6, %v2297_v59  ;;  %v2346_v54 = vld [vmem:[#allocation8 + $0xb0] ss:$2 sm:$0xff]  ;;  %v1917_v20 = vmax.f32 %v8042_v49, %v1851_v47  ;;  %v1918_v50 = vmax.f32 %v755_v33, %v1853_v14  ;;  %v2105_v22 = vsel %vm1047_vm4, %v2102_v36, %v2104_v17  ;;  %2990 = vmatmul.mubr.f32.vlgmr.msra.gmra.mrb[0].mxu1 %v2738_v51  ;;  %v2745_v47 = vld [vmem:[#allocation2 + $0x38] sm:$0xff] }
 0x1bc   :  { %v3208_v58 = vld [vmem:[#allocation3 + $0xd0] sm:$0xff]  ;;  %v2107_v6 = vsel %vm1047_vm4, %v2104_v17, %v2106_v29  ;;  %2362 = vst.msk [vmem:[#allocation3 + $0xd8] sm:$0xff] %vm1303_vm6, %v2346_v54  ;;  %2379 = vst.msk [vmem:[#allocation6 + $0x5a] sm:$0xff] %vm1303_vm6, %v2346_v54  ;;  %v2232_v15 = vsel %vm1175_vm5, %v2229_v53, %v2231_v12  ;;  %v2234_v36 = vsel %vm1175_vm5, %v2231_v12, %v2233_v25  ;;  %2466 = vrot.lane.b32.xlu1 %v2425_v35, %s6296_s5  ;;  %v1681_v56 = vpop.permute.xlu1 %1680  ;;  %v2742_v32 = vld [vmem:[#allocation2 + $0x20] sm:$0xff] }
 0x1bd   :  { %6062 = vmatprep.mubr.msk.f32.mxu0 %vm1303_vm6, %v3208_v58  ;;  %1622 = vst.msk [vmem:[#allocation2 + $0x90] sm:$0xff] %vm1612_vm10, %v1583_v46  ;;  %v1921_v21 = vmax.f32 %v8188_v44, %v1856_v48  ;;  %v2044_v11 = vmax.f32 %v1917_v20, %v1978_v55  ;;  %v2045_v13 = vmax.f32 %v1918_v50, %v1980_v31  ;;  %v1854_v49 = vrot.slane %v8190_v61, 1  ;;  %v2740_v53 = vld [vmem:[#allocation2 + $0x10] sm:$0xff]  ;;  %v2747_v46 = vld [vmem:[#allocation2 + $0x48] sm:$0xff]  ;;  %v2746_v20 = vld [vmem:[#allocation2 + $0x40] sm:$0xff] }
 0x1be   :  { %5590 = vmatprep.mubr.msk.f32.mxu1 %vm1303_vm6, %v2741_v42  ;;  %v2394_v52 = vld [vmem:[#allocation6 + $0x50] sm:$0xff]  ;;  %v1981_v10 = vrot.slane %v8190_v61, 2  ;;  %v2108_v8 = vrot.slane %v8190_v61, 3  ;;  %v2235_v34 = vrot.slane %v8190_v61, 4  ;;  %2562 = vrot.lane.b32.xlu0 %v2521_v27, %s6297_s16  ;;  %1720 = vst.msk [vmem:[#allocation2 + $0x90] sm:$0xff] %vm1710_vm11, %v1681_v56  ;;  %v1487_v3 = vpop.permute.xlu0 %1486  ;;  %v2750_v56 = vld [vmem:[#allocation2 + $0x60] sm:$0xff] }
 0x1bf   :  { %v2713_v30 = vld [vmem:[#allocation6 + $0x4c] sm:$0xff]  ;;  %v2048_v43 = vmax.f32 %v1921_v21, %v1983_v63  ;;  %2410 = vst.msk [vmem:[#allocation2 + $0x1a0] sm:$0xff] %vm1303_vm6, %v2394_v52  ;;  %v2171_v57 = vmax.f32 %v2044_v11, %v2105_v22  ;;  %v2172_v23 = vmax.f32 %v2045_v13, %v2107_v6  ;;  %v1855_v40 = vsel %vm791_vm2, %v1852_v18, %v1854_v49  ;;  %v2749_v21 = vld [vmem:[#allocation2 + $0x58] sm:$0xff] }
 0x1c0   :  { %2729 = vst.msk [vmem:[#allocation2 + $0x198] sm:$0xff] %vm1303_vm6, %v2713_v30  ;;  %v1857_v5 = vsel %vm791_vm2, %v1854_v49, %v1856_v48  ;;  %v1919_v0 = vmax.f32 %v8183_v45, %v1855_v40  ;;  %v1982_v26 = vsel %vm919_vm3, %v1979_v2, %v1981_v10  ;;  %2995 = vmatmul.mubr.f32.gmra.mrb[2].mxu1 %v2740_v53  ;;  %v1585_v59 = vpop.permute.xlu1 %1584  ;;  %v2426_v28 = vld [vmem:[#allocation6 + $0x51] sm:$0xff]  ;;  %v2751_v53 = vld [vmem:[#allocation2 + $0x68] sm:$0xff] }
 0x1c1   :  { %1525 = vst.msk [vmem:[#allocation2 + $0xa0] sm:$0xff] %vm1514_vm9, %v1487_v3  ;;  %v2175_v7 = vmax.f32 %v2048_v43, %v2110_v19  ;;  %v1920_v60 = vmax.f32 %v8190_v61, %v1857_v5  ;;  %v2298_v38 = vmax.f32 %v2171_v57, %v2232_v15  ;;  %v2299_v33 = vmax.f32 %v2172_v23, %v2234_v36  ;;  %v2617_v61 = vld [vmem:[#allocation6 + $0x4b] sm:$0xff]  ;;  %v2753_v57 = vld [vmem:[#allocation2 + $0x78] sm:$0xff] }
 0x1c2   :  { %v2347_v4 = vld [vmem:[#allocation8 + $0xc0] ss:$2 sm:$0xff]  ;;  %v1984_v44 = vsel %vm919_vm3, %v1981_v10, %v1983_v63  ;;  %v2109_v37 = vsel %vm1047_vm4, %v2106_v29, %v2108_v8  ;;  %5591 = vmatprep.mubr.msk.f32.mxu1 %vm1303_vm6, %v2743_v41  ;;  %v2046_v2 = vmax.f32 %v1919_v0, %v1982_v26  ;;  %v2111_v24 = vsel %vm1047_vm4, %v2108_v8, %v2110_v19  ;;  %v2755_v41 = vld [vmem:[#allocation2 + $0x88] sm:$0xff] }
 0x1c3   :  { %2363 = vst.msk [vmem:[#allocation3 + $0xe0] sm:$0xff] %vm1303_vm6, %v2347_v4  ;;  %2380 = vst.msk [vmem:[#allocation6 + $0x62] sm:$0xff] %vm1303_vm6, %v2347_v4  ;;  %v2302_v18 = vmax.f32 %v2175_v7, %v2237_v62  ;;  %v2047_v9 = vmax.f32 %v1920_v60, %v1984_v44  ;;  %v3209_v16 = vld [vmem:[#allocation3 + $0xd8] sm:$0xff]  ;;  %2658 = vrot.lane.b32.xlu1 %v2617_v61, %s6298_s17  ;;  %v1683_v29 = vpop.permute.xlu0 %1682  ;;  %v2236_v17 = vsel %vm1175_vm5, %v2233_v25, %v2235_v34  ;;  %v2744_v45 = vld [vmem:[#allocation2 + $0x30] sm:$0xff] }
 0x1c4   :  { %1623 = vst.msk [vmem:[#allocation2 + $0xa0] sm:$0xff] %vm1612_vm10, %v1585_v59  ;;  %v2238_v12 = vsel %vm1175_vm5, %v2235_v34, %v2237_v62  ;;  %6063 = vmatmul.mubr.msk.f32.gmra.mrb[90].mxu0 %vm1303_vm6, %v3209_v16  ;;  %2468 = vrot.lane.b32.xlu0 %v2426_v28, %s6296_s5  ;;  %v2395_v48 = vld [vmem:[#allocation6 + $0x58] sm:$0xff]  ;;  %v2173_v51 = vmax.f32 %v2046_v2, %v2109_v37  ;;  %v2748_v19 = vld [vmem:[#allocation2 + $0x50] sm:$0xff]  ;;  %v2754_v4 = vld [vmem:[#allocation2 + $0x80] sm:$0xff] }
 0x1c5   :  { %2330 = vst.msk [vmem:[#allocation8 + $0xd8] sm:$0xff] %vm1303_vm6, %v2298_v38  ;;  %2331 = vst.msk [vmem:[#allocation8 + $0xe0] sm:$0xff] %vm1303_vm6, %v2299_v33  ;;  %v2714_v63 = vld [vmem:[#allocation6 + $0x54] sm:$0xff]  ;;  %v2174_v39 = vmax.f32 %v2047_v9, %v2111_v24  ;;  %3000 = vmatmul.mubr.f32.gmra.mrb[4].mxu1 %v2742_v32  ;;  %v1489_v14 = vpop.permute.xlu1 %1488 }
 0x1c6   :  { %1721 = vst.msk [vmem:[#allocation2 + $0xa0] sm:$0xff] %vm1710_vm11, %v1683_v29  ;;  %5592 = vmatprep.mubr.msk.f32.mxu1 %vm1303_vm6, %v2745_v47  ;;  %v2522_v25 = vld [vmem:[#allocation6 + $0x52] sm:$0xff]  ;;  %v2300_v55 = vmax.f32 %v2173_v51, %v2236_v17  ;;  %v2523_v36 = vld [vmem:[#allocation6 + $0x5a] sm:$0xff] }
 0x1c7   :  { %2334 = vst.msk [vmem:[#allocation8 + $0xf8] sm:$0x7] %vm1335_vm7, %v2302_v18  ;;  %v2301_v31 = vmax.f32 %v2174_v39, %v2238_v12  ;;  %2564 = vrot.lane.b32.xlu1 %v2522_v25, %s6297_s16  ;;  %v2618_v58 = vld [vmem:[#allocation6 + $0x53] sm:$0xff]  ;;  %v1587_v54 = vpop.permute.xlu0 %1586  ;;  %vm3888_vm7 = vcmask 518144  }
 0x1c8   :  { %2411 = vst.msk [vmem:[#allocation2 + $0x1b0] sm:$0xff] %vm1303_vm6, %v2395_v48  ;;  %2730 = vst.msk [vmem:[#allocation2 + $0x1a8] sm:$0xff] %vm1303_vm6, %v2714_v63  ;;  %2660 = vrot.lane.b32.xlu0 %v2618_v58, %s6298_s17  ;;  %v2427_v22 = vld [vmem:[#allocation6 + $0x59] sm:$0xff]  ;;  %v2752_v23 = vld [vmem:[#allocation2 + $0x70] sm:$0xff] }
 0x1c9   :  { %1526 = vst.msk [vmem:[#allocation2 + $0xb0] sm:$0xff] %vm1514_vm9, %v1489_v14  ;;  %3005 = vmatmul.mubr.f32.gmra.mrb[6].mxu1 %v2744_v45  ;;  %v2757_v2 = vld [vmem:[#allocation2 + $0x98] sm:$0xff]  ;;  %v2756_v24 = vld [vmem:[#allocation2 + $0x90] sm:$0xff]  ;;  %v2759_v48 = vld [vmem:[#allocation2 + $0xa8] sm:$0xff] }
 0x1ca   :  { %1624 = vst.msk [vmem:[#allocation2 + $0xb0] sm:$0xff] %vm1612_vm10, %v1587_v54  ;;  %v3210_v50 = vld [vmem:[#allocation3 + $0xe0] sm:$0xff]  ;;  %5593 = vmatprep.mubr.msk.f32.mxu1 %vm1303_vm6, %v2747_v46  ;;  %v2761_v47 = vld [vmem:[#allocation2 + $0xb8] sm:$0xff]  ;;  %v2763_v14 = vld [vmem:[#allocation2 + $0xc8] sm:$0xff] }
 0x1cb   :  { %2332 = vst.msk [vmem:[#allocation8 + $0xe8] sm:$0xff] %vm1303_vm6, %v2300_v55  ;;  %2333 = vst.msk [vmem:[#allocation8 + $0xf0] sm:$0xff] %vm1303_vm6, %v2301_v31  ;;  %6065 = vmatprep.mubr.msk.f32.mxu0 %vm1303_vm6, %v3210_v50  ;;  %v2396_v6 = vld [vmem:[#allocation6 + $0x60] sm:$0xff]  ;;  %2470 = vrot.lane.b32.xlu1 %v2427_v22, %s6296_s5  ;;  %v1685_v27 = vpop.permute.xlu1 %1684  ;;  %v2765_v58 = vld [vmem:[#allocation2 + $0xd8] sm:$0xff] }
 0x1cc   :  { %v2715_v35 = vld [vmem:[#allocation6 + $0x5c] sm:$0xff]  ;;  %2412 = vst.msk [vmem:[#allocation2 + $0x1c0] sm:$0xff] %vm1303_vm6, %v2396_v6  ;;  %2566 = vrot.lane.b32.xlu0 %v2523_v36, %s6297_s16  ;;  %v2767_v22 = vld [vmem:[#allocation2 + $0xe8] sm:$0xff] }
 0x1cd   :  { %v2348_v15 = vld [vmem:[#allocation8 + $0xd0] ss:$2 sm:$0xff]  ;;  %2731 = vst.msk [vmem:[#allocation2 + $0x1b8] sm:$0xff] %vm1303_vm6, %v2715_v35  ;;  %3010 = vmatmul.mubr.f32.gmra.mrb[8].mxu1 %v2746_v20  ;;  %v1491_v13 = vpop.permute.xlu0 %1490 }
 0x1ce   :  { %2364 = vst.msk [vmem:[#allocation3 + $0xe8] sm:$0xff] %vm1303_vm6, %v2348_v15  ;;  %2381 = vst.msk [vmem:[#allocation6 + $0x6a] sm:$0xff] %vm1303_vm6, %v2348_v15  ;;  %5594 = vmatprep.mubr.msk.f32.mxu1 %vm1303_vm6, %v2749_v21  ;;  %v2619_v42 = vld [vmem:[#allocation6 + $0x5b] sm:$0xff] }
 0x1cf   :  { %2662 = vrot.lane.b32.xlu1 %v2619_v42, %s6298_s17  ;;  %v2428_v11 = vld [vmem:[#allocation6 + $0x61] sm:$0xff]  ;;  %1722 = vst.msk [vmem:[#allocation2 + $0xb0] sm:$0xff] %vm1710_vm11, %v1685_v27  ;;  %v1589_v30 = vpop.permute.xlu1 %1588  ;;  %v2769_v21 = vld [vmem:[#allocation2 + $0xf8] sm:$0xff] }
 0x1d0   :  { %2472 = vrot.lane.b32.xlu0 %v2428_v11, %s6296_s5  ;;  %1527 = vst.msk [vmem:[#allocation2 + $0xc0] sm:$0xff] %vm1514_vm9, %v1491_v13  ;;  %v2524_v52 = vld [vmem:[#allocation6 + $0x62] sm:$0xff] }
 0x1d1   :  { %3015 = vmatmul.mubr.f32.gmra.mrb[10].mxu1 %v2748_v19  ;;  %1625 = vst.msk [vmem:[#allocation2 + $0xc0] sm:$0xff] %vm1612_vm10, %v1589_v30  ;;  %v1687_v8 = vpop.permute.xlu0 %1686  ;;  %v2758_v51 = vld [vmem:[#allocation2 + $0xa0] sm:$0xff] }
 0x1d2   :  { %v2349_v62 = vld [vmem:[#allocation8 + $0xe0] ss:$2 sm:$0xff]  ;;  %v2350_v49 = vld [vmem:[#allocation8 + $0xf0] ss:$2 sm:$0x3f]  ;;  %5595 = vmatprep.mubr.msk.f32.mxu1 %vm1303_vm6, %v2751_v53  ;;  %1723 = vst.msk [vmem:[#allocation2 + $0xc0] sm:$0xff] %vm1710_vm11, %v1687_v8 }
 0x1d3   :  { %2365 = vst.msk [vmem:[#allocation3 + $0xf0] sm:$0xff] %vm1303_vm6, %v2349_v62  ;;  %2382 = vst.msk [vmem:[#allocation6 + $0x72] sm:$0xff] %vm1303_vm6, %v2349_v62  ;;  %2568 = vrot.lane.b32.xlu1 %v2524_v52, %s6297_s16  ;;  %v1493_v5 = vpop.permute.xlu1 %1492 }
 0x1d4   :  { %2366 = vst.msk [vmem:[#allocation3 + $0xf8] sm:$0x3f] %vm1383_vm8, %v2350_v49  ;;  %2383 = vst.msk [vmem:[#allocation6 + $0x7a] sm:$0x3f] %vm1383_vm8, %v2350_v49  ;;  %v2771_v49 = vld [vmem:[#allocation2 + $0x108] sm:$0xff] }
 0x1d5   :  { %v3211_v43 = vld [vmem:[#allocation3 + $0xe8] sm:$0xff]  ;;  %3020 = vmatmul.mubr.f32.gmra.mrb[12].mxu1 %v2750_v56  ;;  %1528 = vst.msk [vmem:[#allocation2 + $0xd0] sm:$0xff] %vm1514_vm9, %v1493_v5  ;;  %v1591_v0 = vpop.permute.xlu0 %1590 }
 0x1d6   :  { %v2620_v10 = vld [vmem:[#allocation6 + $0x63] sm:$0xff]  ;;  %6066 = vmatmul.mubr.msk.f32.gmra.mrb[92].mxu0 %vm1303_vm6, %v3211_v43  ;;  %5596 = vmatprep.mubr.msk.f32.mxu1 %vm1303_vm6, %v2753_v57  ;;  %1626 = vst.msk [vmem:[#allocation2 + $0xd0] sm:$0xff] %vm1612_vm10, %v1591_v0  ;;  %v2760_v25 = vld [vmem:[#allocation2 + $0xb0] sm:$0xff]  ;;  %v2773_v43 = vld [vmem:[#allocation2 + $0x118] sm:$0xff] }
 0x1d7   :  { %2664 = vrot.lane.b32.xlu0 %v2620_v10, %s6298_s17  ;;  %v2397_v34 = vld [vmem:[#allocation6 + $0x68] sm:$0xff] }
 0x1d8   :  { %v2716_v3 = vld [vmem:[#allocation6 + $0x64] sm:$0xff]  ;;  %2413 = vst.msk [vmem:[#allocation2 + $0x1d0] sm:$0xff] %vm1303_vm6, %v2397_v34  ;;  %v8330_v28 = vpop.f32.mrb[64].mxu0 }
 0x1d9   :  { %2732 = vst.msk [vmem:[#allocation2 + $0x1c8] sm:$0xff] %vm1303_vm6, %v2716_v3  ;;  %v2429_v40 = vld [vmem:[#allocation6 + $0x69] sm:$0xff]  ;;  %3025 = vmatmul.mubr.f32.gmra.mrb[14].mxu1 %v2752_v23  ;;  %v1689_v44 = vpop.permute.xlu1 %1688  ;;  %v8334_v12 = vpop.f32.mrb[65].mxu0  ;;  %v2762_v55 = vld [vmem:[#allocation2 + $0xc0] sm:$0xff] }
 0x1da   :  { %2474 = vrot.lane.b32.xlu1 %v2429_v40, %s6296_s5  ;;  %v2525_v7 = vld [vmem:[#allocation6 + $0x6a] sm:$0xff]  ;;  %5597 = vmatprep.mubr.msk.f32.mxu1 %vm1303_vm6, %v2755_v41  ;;  %1724 = vst.msk [vmem:[#allocation2 + $0xd0] sm:$0xff] %vm1710_vm11, %v1689_v44  ;;  %v2526_v16 = vld [vmem:[#allocation6 + $0x72] sm:$0xff] }
 0x1db   :  { %v3212_v60 = vld [vmem:[#allocation3 + $0xf0] sm:$0xff]  ;;  %v3213_v26 = vld [vmem:[#allocation3 + $0xf8] sm:$0xff]  ;;  %2570 = vrot.lane.b32.xlu0 %v2525_v7, %s6297_s16  ;;  %v1495_v61 = vpop.permute.xlu0 %1494  ;;  %v2775_v57 = vld [vmem:[#allocation2 + $0x128] sm:$0xff] }
 0x1dc   :  { %6068 = vmatprep.mubr.msk.f32.mxu0 %vm1303_vm6, %v3212_v60  ;;  %v2621_v38 = vld [vmem:[#allocation6 + $0x6b] sm:$0xff]  ;;  %v2399_v59 = vld [vmem:[#allocation6 + $0x78] sm:$0x3f]  ;;  %1529 = vst.msk [vmem:[#allocation2 + $0xe0] sm:$0xff] %vm1514_vm9, %v1495_v61 }
 0x1dd   :  { %6069 = vmatmul.mubr.msk.f32.gmra.mrb[94].mxu0 %vm1303_vm6, %v3213_v26  ;;  %v2430_v33 = vld [vmem:[#allocation6 + $0x71] sm:$0xff]  ;;  %3030 = vmatmul.mubr.f32.gmra.mrb[16].mxu1 %v2754_v4  ;;  %2415 = vst.msk [vmem:[#allocation2 + $0x1f0] sm:$0x3f] %vm1383_vm8, %v2399_v59  ;;  %v2719_v9 = vld [vmem:[#allocation6 + $0x7c] sm:$0x3f]  ;;  %v1593_v17 = vpop.permute.xlu1 %1592  ;;  %v2779_v44 = vld [vmem:[#allocation2 + $0x148] sm:$0xff] }
 0x1de   :  { %2666 = vrot.lane.b32.xlu1 %v2621_v38, %s6298_s17  ;;  %v2398_v37 = vld [vmem:[#allocation6 + $0x70] sm:$0xff]  ;;  %5598 = vmatprep.mubr.msk.f32.mxu1 %vm1303_vm6, %v2757_v2  ;;  %2735 = vst.msk [vmem:[#allocation2 + $0x1f8] sm:$0x3f] %vm1383_vm8, %v2719_v9  ;;  %v2431_v63 = vld [vmem:[#allocation6 + $0x79] sm:$0x3f]  ;;  %vm3862_vm8 = vcmask 516096  }
 0x1df   :  { %v2717_v32 = vld [vmem:[#allocation6 + $0x6c] sm:$0xff]  ;;  %2476 = vrot.lane.b32.xlu0 %v2430_v33, %s6296_s5  ;;  %2414 = vst.msk [vmem:[#allocation2 + $0x1e0] sm:$0xff] %vm1303_vm6, %v2398_v37  ;;  %v2718_v18 = vld [vmem:[#allocation6 + $0x74] sm:$0xff] }
 0x1e0   :  { %2733 = vst.msk [vmem:[#allocation2 + $0x1d8] sm:$0xff] %vm1303_vm6, %v2717_v32  ;;  %2734 = vst.msk [vmem:[#allocation2 + $0x1e8] sm:$0xff] %vm1303_vm6, %v2718_v18  ;;  %v2622_v29 = vld [vmem:[#allocation6 + $0x73] sm:$0xff]  ;;  %v2623_v45 = vld [vmem:[#allocation6 + $0x7b] sm:$0x3f] }
 0x1e1   :  { %1627 = vst.msk [vmem:[#allocation2 + $0xe0] sm:$0xff] %vm1612_vm10, %v1593_v17  ;;  %3035 = vmatmul.mubr.f32.gmra.mrb[18].mxu1 %v2756_v24  ;;  %v2527_v39 = vld [vmem:[#allocation6 + $0x7a] sm:$0x3f]  ;;  %v2764_v20 = vld [vmem:[#allocation2 + $0xd0] sm:$0xff] }
 0x1e2   :  { %2572 = vrot.lane.b32.xlu1 %v2526_v16, %s6297_s16  ;;  %5599 = vmatprep.mubr.msk.f32.mxu1 %vm1303_vm6, %v2759_v48  ;;  %v2777_v26 = vld [vmem:[#allocation2 + $0x138] sm:$0xff]  ;;  %v2783_v48 = vld [vmem:[#allocation2 + $0x168] sm:$0xff] }
 0x1e3   :  { %2668 = vrot.lane.b32.xlu0 %v2622_v29, %s6298_s17  ;;  %v2781_v9 = vld [vmem:[#allocation2 + $0x158] sm:$0xff] }
 0x1e5   :  { %3040 = vmatmul.mubr.f32.gmra.mrb[20].mxu1 %v2758_v51  ;;  %v8344_v31 = vpop.f32.mrb[66].mxu0 }
 0x1e6   :  { %2478 = vrot.lane.b32.xlu1 %v2431_v63, %s6296_s5  ;;  %5600 = vmatprep.mubr.msk.f32.mxu1 %vm1303_vm6, %v2761_v47  ;;  %v8346_v54 = vpop.f32.mrb[67].mxu0 }
 0x1e7   :  { %2574 = vrot.lane.b32.xlu0 %v2527_v39, %s6297_s16  ;;  %v1691_v46 = vpop.permute.xlu0 %1690 }
 0x1e8   :  { %1725 = vst.msk [vmem:[#allocation2 + $0xe0] sm:$0xff] %vm1710_vm11, %v1691_v46 }
 0x1e9   :  { %3045 = vmatmul.mubr.f32.gmra.mrb[22].mxu1 %v2760_v25 }
 0x1ea   :  { %2670 = vrot.lane.b32.xlu1 %v2623_v45, %s6298_s17  ;;  %5601 = vmatprep.mubr.msk.f32.mxu1 %vm1303_vm6, %v2763_v14  ;;  %v2785_v14 = vld [vmem:[#allocation2 + $0x178] sm:$0xff] }
 0x1eb   :  { %v1497_v50 = vpop.permute.xlu1 %1496 }
 0x1ec   :  { %1531 = vst.msk [vmem:[#allocation2 + $0xf0] sm:$0x3f] %vm1530_vm13, %v1497_v50  ;;  %v2787_v50 = vld [vmem:[#allocation2 + $0x188] sm:$0xff] }
 0x1ed   :  { %3050 = vmatmul.mubr.f32.gmra.mrb[24].mxu1 %v2762_v55 }
 0x1ee   :  { %5602 = vmatprep.mubr.msk.f32.mxu1 %vm1303_vm6, %v2765_v58 }
 0x1ef   :  { %v1595_v6 = vpop.permute.xlu0 %1594  ;;  %v2766_v15 = vld [vmem:[#allocation2 + $0xe0] sm:$0xff] }
 0x1f0   :  { %1629 = vst.msk [vmem:[#allocation2 + $0xf0] sm:$0x3f] %vm1628_vm14, %v1595_v6 }
 0x1f1   :  { %3055 = vmatmul.mubr.f32.gmra.mrb[26].mxu1 %v2764_v20  ;;  %v1693_v35 = vpop.permute.xlu1 %1692 }
 0x1f2   :  { %5603 = vmatprep.mubr.msk.f32.mxu1 %vm1303_vm6, %v2767_v22  ;;  %1727 = vst.msk [vmem:[#allocation2 + $0xf0] sm:$0x3f] %vm1726_vm15, %v1693_v35 }
 0x1f3   :  { %v2449_v36 = vpop.permute.xlu0 %2448 }
 0x1f4   :  { %2496 = vst.msk [vmem:[#allocation2 + $0x100] sm:$0xff] %vm1514_vm9, %v2449_v36 }
 0x1f5   :  { %3060 = vmatmul.mubr.f32.gmra.mrb[28].mxu1 %v2766_v15  ;;  %v2545_v19 = vpop.permute.xlu1 %2544 }
 0x1f6   :  { %5604 = vmatprep.mubr.msk.f32.mxu1 %vm1303_vm6, %v2769_v21  ;;  %2592 = vst.msk [vmem:[#allocation2 + $0x100] sm:$0xff] %vm1612_vm10, %v2545_v19  ;;  %v2789_v19 = vld [vmem:[#allocation2 + $0x198] sm:$0xff] }
 0x1f7   :  { %v8357_v42 = vpop.f32.mrb[68].mxu0 }
 0x1f8   :  { %v8359_v11 = vpop.f32.mrb[69].mxu0 }
 0x1f9   :  { %v2641_v27 = vpop.permute.xlu0 %2640  ;;  %v2768_v62 = vld [vmem:[#allocation2 + $0xf0] sm:$0xff] }
 0x1fa   :  { %2688 = vst.msk [vmem:[#allocation2 + $0x100] sm:$0xff] %vm1710_vm11, %v2641_v27  ;;  %v2451_v13 = vpop.permute.xlu1 %2450  ;;  %3065 = vmatmul.mubr.f32.gmra.mrb[30].mxu1 %v2768_v62 }
 0x1fb   :  { %2497 = vst.msk [vmem:[#allocation2 + $0x110] sm:$0xff] %vm1514_vm9, %v2451_v13  ;;  %5605 = vmatprep.mubr.msk.f32.mxu1 %vm1303_vm6, %v2771_v49 }
 0x1fd   :  { %v2547_v53 = vpop.permute.xlu0 %2546 }
 0x1fe   :  { %2593 = vst.msk [vmem:[#allocation2 + $0x110] sm:$0xff] %vm1612_vm10, %v2547_v53  ;;  %v2643_v56 = vpop.permute.xlu1 %2642 }
 0x1ff   :  { %2689 = vst.msk [vmem:[#allocation2 + $0x110] sm:$0xff] %vm1710_vm11, %v2643_v56  ;;  %v2791_v56 = vld [vmem:[#allocation2 + $0x1a8] sm:$0xff] }
 0x201   :  { %v2770_v52 = vld [vmem:[#allocation2 + $0x100] sm:$0xff] }
 0x202   :  { %v2453_v30 = vpop.permute.xlu0 %2452  ;;  %3070 = vmatmul.mubr.f32.gmra.mrb[32].mxu1 %v2770_v52 }
 0x203   :  { %2498 = vst.msk [vmem:[#allocation2 + $0x120] sm:$0xff] %vm1514_vm9, %v2453_v30  ;;  %5606 = vmatprep.mubr.msk.f32.mxu1 %vm1303_vm6, %v2773_v43  ;;  %v2549_v10 = vpop.permute.xlu1 %2548 }
 0x204   :  { %2594 = vst.msk [vmem:[#allocation2 + $0x120] sm:$0xff] %vm1612_vm10, %v2549_v10  ;;  %v2793_v10 = vld [vmem:[#allocation2 + $0x1b8] sm:$0xff] }
 0x206   :  { %v2772_v34 = vld [vmem:[#allocation2 + $0x110] sm:$0xff]  ;;  %v8372_v23 = vpop.f32.mrb[70].mxu0 }
 0x207   :  { %v2645_v8 = vpop.permute.xlu0 %2644  ;;  %3075 = vmatmul.mubr.f32.gmra.mrb[34].mxu1 %v2772_v34  ;;  %v8374_v40 = vpop.f32.mrb[71].mxu0 }
 0x208   :  { %2690 = vst.msk [vmem:[#allocation2 + $0x120] sm:$0xff] %vm1710_vm11, %v2645_v8  ;;  %v2455_v3 = vpop.permute.xlu1 %2454  ;;  %5607 = vmatprep.mubr.msk.f32.mxu1 %vm1303_vm6, %v2775_v57 }
 0x209   :  { %2499 = vst.msk [vmem:[#allocation2 + $0x130] sm:$0xff] %vm1514_vm9, %v2455_v3 }
 0x20b   :  { %v2551_v5 = vpop.permute.xlu0 %2550 }
 0x20c   :  { %2595 = vst.msk [vmem:[#allocation2 + $0x130] sm:$0xff] %vm1612_vm10, %v2551_v5  ;;  %v2647_v7 = vpop.permute.xlu1 %2646 }
 0x20d   :  { %2691 = vst.msk [vmem:[#allocation2 + $0x130] sm:$0xff] %vm1710_vm11, %v2647_v7  ;;  %v2795_v7 = vld [vmem:[#allocation2 + $0x1c8] sm:$0xff] }
 0x20f   :  { %v2457_v0 = vpop.permute.xlu0 %2456  ;;  %v2774_v60 = vld [vmem:[#allocation2 + $0x120] sm:$0xff] }
 0x210   :  { %2500 = vst.msk [vmem:[#allocation2 + $0x140] sm:$0xff] %vm1514_vm9, %v2457_v0  ;;  %3080 = vmatmul.mubr.f32.gmra.mrb[36].mxu1 %v2774_v60  ;;  %v2553_v41 = vpop.permute.xlu1 %2552  ;;  %v4584_v0 = vld [vmem:[%s9507_s7 + $0x100] sm:$0xff]  ;;  %v4585_v60 = vld [vmem:[%s9507_s7 + $0x108] sm:$0xff] }
 0x211   :  { %5608 = vmatprep.mubr.msk.f32.mxu1 %vm1303_vm6, %v2777_v26  ;;  %2596 = vst.msk [vmem:[#allocation2 + $0x140] sm:$0xff] %vm1612_vm10, %v2553_v41  ;;  %v4586_v26 = vld [vmem:[%s9507_s7 + $0x110] sm:$0xff] }
 0x213   :  { %v2649_v4 = vpop.permute.xlu0 %2648 }
 0x214   :  { %2692 = vst.msk [vmem:[#allocation2 + $0x140] sm:$0xff] %vm1710_vm11, %v2649_v4  ;;  %v2459_v38 = vpop.permute.xlu1 %2458  ;;  %v2776_v33 = vld [vmem:[#allocation2 + $0x130] sm:$0xff]  ;;  %v8440_v4 = vpack.c.bf16 %v4585_v60, %v4584_v0 }
 0x215   :  { %2501 = vst.msk [vmem:[#allocation2 + $0x150] sm:$0xff] %vm1514_vm9, %v2459_v38  ;;  %3085 = vmatmul.mubr.f32.gmra.mrb[38].mxu1 %v2776_v33  ;;  %v8384_v37 = vpop.f32.mrb[72].mxu0  ;;  %v4587_v38 = vld [vmem:[%s9507_s7 + $0x118] sm:$0xff] }
 0x216   :  { %5609 = vmatprep.mubr.msk.f32.mxu1 %vm1303_vm6, %v2779_v44  ;;  %v8386_v61 = vpop.f32.mrb[73].mxu0  ;;  %6222 = vmatprep.subr.bf16.mxu0 %v8440_v4 }
 0x217   :  { %v2555_v32 = vpop.permute.xlu0 %2554  ;;  %6224 = vmatpush3.bf16.msra.mxu0 %v8440_v4 }
 0x218   :  { %2597 = vst.msk [vmem:[#allocation2 + $0x150] sm:$0xff] %vm1612_vm10, %v2555_v32  ;;  %v2651_v59 = vpop.permute.xlu1 %2650  ;;  %v8446_v32 = vpack.c.bf16 %v4587_v38, %v4586_v26 }
 0x219   :  { %2693 = vst.msk [vmem:[#allocation2 + $0x150] sm:$0xff] %vm1710_vm11, %v2651_v59 }
 0x21a   :  { %6226 = vmatprep.subr.bf16.mxu0 %v8446_v32 }
 0x21b   :  { %v2461_v18 = vpop.permute.xlu0 %2460  ;;  %v2778_v2 = vld [vmem:[#allocation2 + $0x140] sm:$0xff]  ;;  %6228 = vmatpush3.bf16.msra.mxu0 %v8446_v32 }
 0x21c   :  { %2502 = vst.msk [vmem:[#allocation2 + $0x160] sm:$0xff] %vm1514_vm9, %v2461_v18  ;;  %3090 = vmatmul.mubr.f32.gmra.mrb[40].mxu1 %v2778_v2  ;;  %v2557_v24 = vpop.permute.xlu1 %2556  ;;  %v2797_v18 = vld [vmem:[#allocation2 + $0x1d8] sm:$0xff]  ;;  %v4588_v2 = vld [vmem:[%s9507_s7 + $0x120] sm:$0xff] }
 0x21d   :  { %5610 = vmatprep.mubr.msk.f32.mxu1 %vm1303_vm6, %v2781_v9  ;;  %2598 = vst.msk [vmem:[#allocation2 + $0x160] sm:$0xff] %vm1612_vm10, %v2557_v24  ;;  %v4589_v9 = vld [vmem:[%s9507_s7 + $0x128] sm:$0xff] }
 0x21f   :  { %v2653_v16 = vpop.permute.xlu0 %2652 }
 0x220   :  { %2694 = vst.msk [vmem:[#allocation2 + $0x160] sm:$0xff] %vm1710_vm11, %v2653_v16  ;;  %v2463_v29 = vpop.permute.xlu1 %2462  ;;  %v2780_v17 = vld [vmem:[#allocation2 + $0x150] sm:$0xff] }
 0x221   :  { %2503 = vst.msk [vmem:[#allocation2 + $0x170] sm:$0xff] %vm1514_vm9, %v2463_v29  ;;  %3095 = vmatmul.mubr.f32.gmra.mrb[42].mxu1 %v2780_v17  ;;  %v8463_v29 = vpack.c.bf16 %v4589_v9, %v4588_v2 }
 0x222   :  { %5611 = vmatprep.mubr.msk.f32.mxu1 %vm1303_vm6, %v2783_v48  ;;  %v8396_v63 = vpop.f32.mrb[74].mxu0 }
 0x223   :  { %v2559_v51 = vpop.permute.xlu0 %2558  ;;  %v8398_v39 = vpop.f32.mrb[75].mxu0  ;;  %9518 = vst [vmem:[#allocation14_spill] sm:$0xff] %v8463_v29  ;;  %6230 = vmatprep.subr.bf16.mxu0 %v8463_v29 }
 0x224   :  { %2599 = vst.msk [vmem:[#allocation2 + $0x170] sm:$0xff] %vm1612_vm10, %v2559_v51  ;;  %6232 = vmatpush3.bf16.msra.mxu0 %v8463_v29 }
 0x225   :  { %v2655_v47 = vpop.permute.xlu1 %2654 }
 0x226   :  { %2695 = vst.msk [vmem:[#allocation2 + $0x170] sm:$0xff] %vm1710_vm11, %v2655_v47  ;;  %v4590_v47 = vld [vmem:[%s9507_s7 + $0x130] sm:$0xff] }
 0x227   :  { %v2465_v45 = vpop.permute.xlu0 %2464  ;;  %v2782_v25 = vld [vmem:[#allocation2 + $0x160] sm:$0xff] }
 0x228   :  { %2504 = vst.msk [vmem:[#allocation2 + $0x180] sm:$0xff] %vm1514_vm9, %v2465_v45  ;;  %3100 = vmatmul.mubr.f32.gmra.mrb[44].mxu1 %v2782_v25  ;;  %v4591_v45 = vld [vmem:[%s9507_s7 + $0x138] sm:$0xff] }
 0x229   :  { %5612 = vmatprep.mubr.msk.f32.mxu1 %vm1303_vm6, %v2785_v14  ;;  %v2561_v55 = vpop.permute.xlu1 %2560 }
 0x22a   :  { %2600 = vst.msk [vmem:[#allocation2 + $0x180] sm:$0xff] %vm1612_vm10, %v2561_v55  ;;  %v8479_v55 = vpack.c.bf16 %v4591_v45, %v4590_v47 }
 0x22b   :  { %v2657_v58 = vpop.permute.xlu0 %2656 }
 0x22c   :  { %2696 = vst.msk [vmem:[#allocation2 + $0x180] sm:$0xff] %vm1710_vm11, %v2657_v58  ;;  %9519 = vst [vmem:[#allocation15_spill] sm:$0xff] %v8479_v55  ;;  %6234 = vmatprep.subr.bf16.mxu0 %v8479_v55 }
 0x22d   :  { %v2784_v20 = vld [vmem:[#allocation2 + $0x170] sm:$0xff]  ;;  %6236 = vmatpush3.bf16.msra.mxu0 %v8479_v55 }
 0x22e   :  { %v2467_v46 = vpop.permute.xlu1 %2466  ;;  %3105 = vmatmul.mubr.f32.gmra.mrb[46].mxu1 %v2784_v20 }
 0x22f   :  { %2505 = vst.msk [vmem:[#allocation2 + $0x190] sm:$0xff] %vm1514_vm9, %v2467_v46  ;;  %5613 = vmatprep.mubr.msk.f32.mxu1 %vm1303_vm6, %v2787_v50  ;;  %v2799_v46 = vld [vmem:[#allocation2 + $0x1e8] sm:$0xff] }
 0x230   :  { %v2563_v22 = vpop.permute.xlu0 %2562  ;;  %v8409_v6 = vpop.f32.mrb[76].mxu0 }
 0x231   :  { %2601 = vst.msk [vmem:[#allocation2 + $0x190] sm:$0xff] %vm1612_vm10, %v2563_v22  ;;  %v8411_v35 = vpop.f32.mrb[77].mxu0  ;;  %v2801_v22 = vld [vmem:[#allocation2 + $0x1f8] sm:$0xff] }
 0x233   :  { %v2786_v36 = vld [vmem:[#allocation2 + $0x180] sm:$0xff] }
 0x234   :  { %3110 = vmatmul.mubr.f32.gmra.mrb[48].mxu1 %v2786_v36 }
 0x235   :  { %v2659_v15 = vpop.permute.xlu1 %2658  ;;  %5614 = vmatprep.mubr.msk.f32.mxu1 %vm1303_vm6, %v2789_v19 }
 0x236   :  { %2697 = vst.msk [vmem:[#allocation2 + $0x190] sm:$0xff] %vm1710_vm11, %v2659_v15  ;;  %v2469_v21 = vpop.permute.xlu0 %2468 }
 0x237   :  { %2506 = vst.msk [vmem:[#allocation2 + $0x1a0] sm:$0xff] %vm1514_vm9, %v2469_v21 }
 0x239   :  { %v2565_v27 = vpop.permute.xlu1 %2564 }
 0x23a   :  { %2602 = vst.msk [vmem:[#allocation2 + $0x1a0] sm:$0xff] %vm1612_vm10, %v2565_v27  ;;  %v2661_v13 = vpop.permute.xlu0 %2660 }
 0x23b   :  { %2698 = vst.msk [vmem:[#allocation2 + $0x1a0] sm:$0xff] %vm1710_vm11, %v2661_v13 }
 0x23d   :  { %v2471_v62 = vpop.permute.xlu1 %2470  ;;  %v2788_v49 = vld [vmem:[#allocation2 + $0x190] sm:$0xff] }
 0x23e   :  { %2507 = vst.msk [vmem:[#allocation2 + $0x1b0] sm:$0xff] %vm1514_vm9, %v2471_v62  ;;  %v2567_v53 = vpop.permute.xlu0 %2566  ;;  %3115 = vmatmul.mubr.f32.gmra.mrb[50].mxu1 %v2788_v49 }
 0x23f   :  { %2603 = vst.msk [vmem:[#allocation2 + $0x1b0] sm:$0xff] %vm1612_vm10, %v2567_v53  ;;  %5615 = vmatprep.mubr.msk.f32.mxu1 %vm1303_vm6, %v2791_v56  ;;  %v8508_v56 = vld [vmem:[%s9504_s4] ss:$0 sm:$0xff] }
 0x241   :  { %v2663_v52 = vpop.permute.xlu1 %2662 }
 0x242   :  { %2699 = vst.msk [vmem:[#allocation2 + $0x1b0] sm:$0xff] %vm1710_vm11, %v2663_v52  ;;  %v2473_v30 = vpop.permute.xlu0 %2472  ;;  %v2790_v43 = vld [vmem:[#allocation2 + $0x1a0] sm:$0xff] }
 0x243   :  { %2508 = vst.msk [vmem:[#allocation2 + $0x1c0] sm:$0xff] %vm1514_vm9, %v2473_v30  ;;  %3120 = vmatmul.mubr.f32.gmra.mrb[52].mxu1 %v2790_v43  ;;  %v8513_v52 = vld [vmem:[%s9506_s6] ss:$0 sm:$0xff] }
 0x244   :  { %5616 = vmatprep.mubr.msk.f32.mxu1 %vm1303_vm6, %v2793_v10  ;;  %v3393_v60 = vadd.f32 %v8330_v28, %v8513_v52 }
 0x245   :  { %v2569_v8 = vpop.permute.xlu1 %2568 }
 0x246   :  { %2604 = vst.msk [vmem:[#allocation2 + $0x1c0] sm:$0xff] %vm1612_vm10, %v2569_v8  ;;  %v3388_v8 = vadd.f32 %v8513_v52, %v8334_v12  ;;  %v3403_v12 = vadd.f32 %v8344_v31, %v8513_v52  ;;  %v3408_v31 = vadd.f32 %v8513_v52, %v8359_v11  ;;  %v8549_v11 = vadd.f32 %v8513_v52, %v8374_v40 }
 0x247   :  { %v8448_v59 = vpop.f32.mrb[78].mxu0  ;;  %v8560_v40 = vadd.f32 %v8384_v37, %v8513_v52 }
 0x248   :  { %v8458_v24 = vpop.f32.mrb[79].mxu0 }
 0x249   :  { %v2665_v34 = vpop.permute.xlu0 %2664  ;;  %v2792_v57 = vld [vmem:[#allocation2 + $0x1b0] sm:$0xff] }
 0x24a   :  { %2700 = vst.msk [vmem:[#allocation2 + $0x1c0] sm:$0xff] %vm1710_vm11, %v2665_v34  ;;  %3125 = vmatmul.mubr.f32.gmra.mrb[54].mxu1 %v2792_v57 }
 0x24b   :  { %5617 = vmatprep.mubr.msk.f32.mxu1 %vm1303_vm6, %v2795_v7  ;;  %v8467_v48 = vpop.f32.mrb[80].mxu0 }
 0x24c   :  { %v2475_v3 = vpop.permute.xlu1 %2474  ;;  %v8469_v51 = vpop.f32.mrb[81].mxu0 }
 0x24d   :  { %2509 = vst.msk [vmem:[#allocation2 + $0x1d0] sm:$0xff] %vm1514_vm9, %v2475_v3  ;;  %v2571_v5 = vpop.permute.xlu0 %2570 }
 0x24e   :  { %2605 = vst.msk [vmem:[#allocation2 + $0x1d0] sm:$0xff] %vm1612_vm10, %v2571_v5 }
 0x250   :  { %v2667_v41 = vpop.permute.xlu1 %2666 }
 0x251   :  { %2701 = vst.msk [vmem:[#allocation2 + $0x1d0] sm:$0xff] %vm1710_vm11, %v2667_v41  ;;  %v2477_v33 = vpop.permute.xlu0 %2476  ;;  %v2794_v44 = vld [vmem:[#allocation2 + $0x1c0] sm:$0xff] }
 0x252   :  { %2510 = vst.msk [vmem:[#allocation2 + $0x1e0] sm:$0xff] %vm1514_vm9, %v2477_v33  ;;  %3130 = vmatmul.mubr.f32.gmra.mrb[56].mxu1 %v2794_v44  ;;  %vm3886_vm9 = vcmask 520192  }
 0x253   :  { %5618 = vmatprep.mubr.msk.f32.mxu1 %vm1303_vm6, %v2797_v18  ;;  %v3398_v18 = vadd.f32 %v8513_v52, %v8346_v54 }
 0x254   :  { %v2573_v16 = vpop.permute.xlu1 %2572 }
 0x255   :  { %2606 = vst.msk [vmem:[#allocation2 + $0x1e0] sm:$0xff] %vm1612_vm10, %v2573_v16  ;;  %v2669_v17 = vpop.permute.xlu0 %2668  ;;  %vm3954_vm10 = vcmask 1048064  }
 0x256   :  { %2702 = vst.msk [vmem:[#allocation2 + $0x1e0] sm:$0xff] %vm1710_vm11, %v2669_v17  ;;  %vm3962_vm11 = vcmask 1044992  }
 0x258   :  { %v2479_v25 = vpop.permute.xlu1 %2478  ;;  %v2796_v14 = vld [vmem:[#allocation2 + $0x1d0] sm:$0xff]  ;;  %v8487_v15 = vpop.f32.mrb[82].mxu0 }
 0x259   :  { %2511 = vst.msk [vmem:[#allocation2 + $0x1f0] sm:$0x3f] %vm1530_vm13, %v2479_v25  ;;  %v2575_v58 = vpop.permute.xlu0 %2574  ;;  %3135 = vmatmul.mubr.f32.gmra.mrb[58].mxu1 %v2796_v14  ;;  %v8490_v36 = vpop.f32.mrb[83].mxu0 }
 0x25a   :  { %2607 = vst.msk [vmem:[#allocation2 + $0x1f0] sm:$0x3f] %vm1628_vm14, %v2575_v58  ;;  %5619 = vmatprep.mubr.msk.f32.mxu1 %vm1303_vm6, %v2799_v46 }
 0x25c   :  { %v2671_v20 = vpop.permute.xlu1 %2670 }
 0x25d   :  { %2703 = vst.msk [vmem:[#allocation2 + $0x1f0] sm:$0x3f] %vm1726_vm15, %v2671_v20  ;;  %v2798_v50 = vld [vmem:[#allocation2 + $0x1e0] sm:$0xff]  ;;  %v8534_v20 = vadd.f32 %v8357_v42, %v8513_v52 }
 0x25e   :  { %3140 = vmatmul.mubr.f32.gmra.mrb[60].mxu1 %v2798_v50 }
 0x25f   :  { %5620 = vmatprep.mubr.msk.f32.mxu1 %vm1303_vm6, %v2801_v22  ;;  %vm3846_vm6 = vcmask 523264  }
 0x264   :  { %v2800_v21 = vld [vmem:[#allocation2 + $0x1f0] sm:$0xff] }
 0x265   :  { %3145 = vmatmul.mubr.f32.gmra.mrb[62].mxu1 %v2800_v21 }
 0x267   :  { %v8493_v19 = vpop.f32.mrb[84].mxu0 }
 0x268   :  { %v8495_v27 = vpop.f32.mrb[85].mxu0 }
 0x276   :  { %v8497_v13 = vpop.f32.mrb[86].mxu0 }
 0x277   :  { %v8499_v62 = vpop.f32.mrb[87].mxu0 }
 0x285   :  { %v8501_v49 = vpop.f32.mrb[88].mxu0 }
 0x286   :  { %v8503_v53 = vpop.f32.mrb[89].mxu0 }
 0x28e   :  { %v2991_v30 = vpop.f32.mrb[0].mxu1 }
 0x28f   :  { %v2992_v43 = vadd.f32 %v8508_v56, %v2991_v30  ;;  %v2993_v10 = vpop.f32.mrb[1].mxu1 }
 0x291   :  { %v3150_v34 = vmax.f32 %v2992_v43, 0.0 }
 0x293   :  { %v2996_v3 = vpop.f32.mrb[2].mxu1  ;;  %v3546_v57 = vadd.f32 %v3388_v8, %v3150_v34 }
 0x294   :  { %v2997_v5 = vadd.f32 %v8508_v56, %v2996_v3  ;;  %v2998_v7 = vpop.f32.mrb[3].mxu1 }
 0x295   :  { %v3594_v2 = vrot.slane %v3546_v57, 1  ;;  %v3657_v9 = vrot.slane %v3546_v57, 2  ;;  %v3720_v16 = vrot.slane %v3546_v57, 3  ;;  %v3783_v17 = vrot.slane %v3546_v57, 4 }
 0x296   :  { %v3151_v26 = vmax.f32 %v2997_v5, 0.0  ;;  %v8545_v5 = vadd.f32 %v8372_v23, %v8513_v52 }
 0x297   :  { %v8519_v0 = vpop.f32.mrb[90].mxu0 }
 0x298   :  { %v3001_v41 = vpop.f32.mrb[4].mxu1  ;;  %v8523_v38 = vpop.f32.mrb[91].mxu0  ;;  %v3547_v28 = vadd.f32 %v3393_v60, %v3151_v26 }
 0x299   :  { %v3002_v33 = vadd.f32 %v8508_v56, %v3001_v41  ;;  %v3003_v44 = vpop.f32.mrb[5].mxu1 }
 0x29a   :  { %v3595_v45 = vrot.slane %v3547_v28, 1  ;;  %v3658_v25 = vrot.slane %v3547_v28, 2  ;;  %v3721_v14 = vrot.slane %v3547_v28, 3  ;;  %v3784_v58 = vrot.slane %v3547_v28, 4 }
 0x29b   :  { %v3152_v47 = vmax.f32 %v3002_v33, 0.0 }
 0x29c   :  { %v3006_v46 = vpop.f32.mrb[6].mxu1  ;;  %v3596_v21 = vsel %vm791_vm2, %v3594_v2, %v3595_v45  ;;  %v3659_v30 = vsel %vm919_vm3, %v3657_v9, %v3658_v25  ;;  %v3722_v43 = vsel %vm1047_vm4, %v3720_v16, %v3721_v14  ;;  %v3785_v10 = vsel %vm1175_vm5, %v3783_v17, %v3784_v58 }
 0x29d   :  { %v3548_v50 = vadd.f32 %v3398_v18, %v3152_v47  ;;  %v3007_v54 = vadd.f32 %v8508_v56, %v3006_v46  ;;  %v3008_v22 = vpop.f32.mrb[7].mxu1  ;;  %v3641_v8 = vmax.f32 %v3546_v57, %v3596_v21  ;;  %v8564_v17 = vadd.f32 %v8513_v52, %v8386_v61  ;;  %v4569_v21 = vld [vmem:[%s9507_s7 + $0x88] sm:$0xff] }
 0x29f   :  { %v3597_v34 = vrot.slane %v3548_v50, 1  ;;  %v3660_v3 = vrot.slane %v3548_v50, 2  ;;  %v3723_v42 = vrot.slane %v3548_v50, 3  ;;  %v3786_v7 = vrot.slane %v3548_v50, 4 }
 0x2a0   :  { %v3153_v60 = vmax.f32 %v3007_v54, 0.0  ;;  %v3011_v26 = vpop.f32.mrb[8].mxu1  ;;  %v3704_v41 = vmax.f32 %v3641_v8, %v3659_v30  ;;  %v4552_v30 = vld [vmem:[%s9507_s7] sm:$0xff] }
 0x2a1   :  { %v3598_v33 = vsel %vm791_vm2, %v3595_v45, %v3597_v34  ;;  %v3661_v44 = vsel %vm919_vm3, %v3658_v25, %v3660_v3  ;;  %v3724_v57 = vsel %vm1047_vm4, %v3721_v14, %v3723_v42  ;;  %v3013_v18 = vpop.f32.mrb[9].mxu1  ;;  %v3787_v9 = vsel %vm1175_vm5, %v3784_v58, %v3786_v7  ;;  %v4568_v58 = vld [vmem:[%s9507_s7 + $0x80] sm:$0xff] }
 0x2a2   :  { %v3642_v2 = vmax.f32 %v3547_v28, %v3598_v33  ;;  %v8555_v23 = vadd.f32 %v3403_v12, %v3153_v60  ;;  %v3012_v16 = vadd.f32 %v8508_v56, %v3011_v26  ;;  %v3767_v47 = vmax.f32 %v3704_v41, %v3722_v43  ;;  %v4553_v43 = vld [vmem:[%s9507_s7 + $0x8] sm:$0xff] }
 0x2a4   :  { %v3705_v45 = vmax.f32 %v3642_v2, %v3661_v44  ;;  %v3599_v25 = vrot.slane %v8555_v23, 1  ;;  %v3662_v28 = vrot.slane %v8555_v23, 2  ;;  %v3725_v12 = vrot.slane %v8555_v23, 3  ;;  %v3016_v14 = vpop.f32.mrb[10].mxu1 }
 0x2a5   :  { %v3830_v37 = vmax.f32 %v3767_v47, %v3785_v10  ;;  %v3788_v46 = vrot.slane %v8555_v23, 4  ;;  %v3154_v54 = vmax.f32 %v3012_v16, 0.0  ;;  %v3017_v61 = vadd.f32 %v8508_v56, %v3016_v14  ;;  %v3018_v22 = vpop.f32.mrb[11].mxu1 }
 0x2a6   :  { %v3768_v8 = vmax.f32 %v3705_v45, %v3724_v57  ;;  %v3600_v10 = vsel %vm791_vm2, %v3597_v34, %v3599_v25  ;;  %v3663_v60 = vsel %vm919_vm3, %v3660_v3, %v3662_v28  ;;  %v3726_v26 = vsel %vm1047_vm4, %v3723_v42, %v3725_v12 }
 0x2a7   :  { %3847 = vst.msk [vmem:[#allocation9] sm:$0xff] %vm3846_vm6, %v3830_v37  ;;  %v3643_v41 = vmax.f32 %v3548_v50, %v3600_v10  ;;  %v3789_v33 = vsel %vm1175_vm5, %v3786_v7, %v3788_v46  ;;  %v3550_v44 = vadd.f32 %v3408_v31, %v3154_v54  ;;  %v3155_v18 = vmax.f32 %v3017_v61, 0.0 }
 0x2a8   :  { %v8592_v16 = vadd.f32 %v8396_v63, %v8513_v52  ;;  %v3831_v57 = vmax.f32 %v3768_v8, %v3787_v9  ;;  %v3021_v34 = vpop.f32.mrb[12].mxu1  ;;  %v6189_v3 = vpack.c.bf16 %v4569_v21, %v4568_v58  ;;  %v6191_v45 = vpack.c.bf16 %v4553_v43, %v4552_v30 }
 0x2a9   :  { %v8588_v2 = vpop.f32.mrb[92].mxu0  ;;  %v3706_v42 = vmax.f32 %v3643_v41, %v3663_v60  ;;  %v3601_v14 = vrot.slane %v3550_v44, 1  ;;  %v3664_v37 = vrot.slane %v3550_v44, 2  ;;  %v3727_v50 = vrot.slane %v3550_v44, 3  ;;  %v3023_v22 = vpop.f32.mrb[13].mxu1 }
 0x2aa   :  { %v8594_v47 = vpop.f32.mrb[93].mxu0  ;;  %v8598_v31 = vadd.f32 %v8513_v52, %v8398_v39  ;;  %3848 = vst.msk [vmem:[#allocation9 + $0x8] sm:$0xff] %vm3846_vm6, %v3831_v57  ;;  %v3790_v7 = vrot.slane %v3550_v44, 4  ;;  %v8602_v63 = vadd.f32 %v8534_v20, %v3155_v18  ;;  %v3022_v9 = vadd.f32 %v8508_v56, %v3021_v34  ;;  %6190 = vmatprep.subr.bf16.mxu1 %v6189_v3 }
 0x2ab   :  { %v3769_v58 = vmax.f32 %v3706_v42, %v3726_v26  ;;  %v3602_v54 = vsel %vm791_vm2, %v3599_v25, %v3601_v14  ;;  %v3665_v61 = vsel %vm919_vm3, %v3662_v28, %v3664_v37  ;;  %v3728_v21 = vsel %vm1047_vm4, %v3725_v12, %v3727_v50  ;;  %6192 = vmatpush3.bf16.msra.mxu1 %v6191_v45 }
 0x2ac   :  { %v3644_v39 = vmax.f32 %v8555_v23, %v3602_v54  ;;  %v3791_v30 = vsel %vm1175_vm5, %v3788_v46, %v3790_v7  ;;  %v3603_v43 = vrot.slane %v8602_v63, 1  ;;  %v3666_v20 = vrot.slane %v8602_v63, 2  ;;  %v3026_v8 = vpop.f32.mrb[14].mxu1 }
 0x2ad   :  { %v3832_v10 = vmax.f32 %v3769_v58, %v3789_v33  ;;  %v3729_v60 = vrot.slane %v8602_v63, 3  ;;  %v3792_v26 = vrot.slane %v8602_v63, 4  ;;  %v3156_v25 = vmax.f32 %v3022_v9, 0.0  ;;  %v3028_v28 = vpop.f32.mrb[15].mxu1 }
 0x2ae   :  { %v3707_v12 = vmax.f32 %v3644_v39, %v3665_v61  ;;  %v3604_v18 = vsel %vm791_vm2, %v3601_v14, %v3603_v43  ;;  %v3667_v23 = vsel %vm919_vm3, %v3664_v37, %v3666_v20  ;;  %v3027_v46 = vadd.f32 %v8508_v56, %v3026_v8 }
 0x2af   :  { %3849 = vst.msk [vmem:[#allocation9 + $0x10] sm:$0xff] %vm3846_vm6, %v3832_v10  ;;  %v3645_v33 = vmax.f32 %v3550_v44, %v3604_v18  ;;  %v3730_v34 = vsel %vm1047_vm4, %v3727_v50, %v3729_v60  ;;  %v3793_v3 = vsel %vm1175_vm5, %v3790_v7, %v3792_v26  ;;  %v3552_v45 = vadd.f32 %v8549_v11, %v3156_v25 }
 0x2b0   :  { %v8614_v41 = vpop.f32.mrb[94].mxu0  ;;  %v8627_v42 = vadd.f32 %v8409_v6, %v8513_v52  ;;  %v8631_v14 = vadd.f32 %v8513_v52, %v8411_v35  ;;  %v3770_v37 = vmax.f32 %v3707_v12, %v3728_v21  ;;  %v3157_v22 = vmax.f32 %v3027_v46, 0.0  ;;  %v3031_v9 = vpop.f32.mrb[16].mxu1 }
 0x2b1   :  { %v8619_v57 = vpop.f32.mrb[95].mxu0  ;;  %v3708_v58 = vmax.f32 %v3645_v33, %v3667_v23  ;;  %v3605_v54 = vrot.slane %v3552_v45, 1  ;;  %v3668_v44 = vrot.slane %v3552_v45, 2  ;;  %v3731_v61 = vrot.slane %v3552_v45, 3  ;;  %v3864_v50 = vld [vmem:[#allocation9] ss:$2 sm:$0xff] }
 0x2b2   :  { %v3033_v39 = vpop.f32.mrb[17].mxu1  ;;  %v3833_v7 = vmax.f32 %v3770_v37, %v3791_v30  ;;  %v3794_v8 = vrot.slane %v3552_v45, 4  ;;  %v8634_v11 = vadd.f32 %v8545_v5, %v3157_v22  ;;  %3890 = vst.msk [vmem:[#allocation7 + $0x2] sm:$0xff] %vm3846_vm6, %v3864_v50  ;;  %3879 = vst.msk [vmem:[#allocation5] sm:$0xff] %vm3846_vm6, %v3864_v50  ;;  %v3032_v6 = vadd.f32 %v8508_v56, %v3031_v9  ;;  %v4570_v23 = vld [vmem:[%s9507_s7 + $0x90] sm:$0xff] }
 0x2b3   :  { %v3771_v35 = vmax.f32 %v3708_v58, %v3730_v34  ;;  %v3606_v21 = vsel %vm791_vm2, %v3603_v43, %v3605_v54  ;;  %v3669_v10 = vsel %vm919_vm3, %v3666_v20, %v3668_v44  ;;  %v3732_v25 = vsel %vm1047_vm4, %v3729_v60, %v3731_v61  ;;  %v4571_v43 = vld [vmem:[%s9507_s7 + $0x98] sm:$0xff]  ;;  %v4554_v33 = vld [vmem:[%s9507_s7 + $0x10] sm:$0xff] }
 0x2b4   :  { %3850 = vst.msk [vmem:[#allocation9 + $0x18] sm:$0xff] %vm3846_vm6, %v3833_v7  ;;  %v3646_v30 = vmax.f32 %v8602_v63, %v3606_v21  ;;  %v3795_v5 = vsel %vm1175_vm5, %v3792_v26, %v3794_v8  ;;  %v3607_v28 = vrot.slane %v8634_v11, 1  ;;  %v3670_v12 = vrot.slane %v8634_v11, 2  ;;  %v3036_v18 = vpop.f32.mrb[18].mxu1  ;;  %v4555_v34 = vld [vmem:[%s9507_s7 + $0x18] sm:$0xff] }
 0x2b5   :  { %v3834_v20 = vmax.f32 %v3771_v35, %v3793_v3  ;;  %v3733_v60 = vrot.slane %v8634_v11, 3  ;;  %v3796_v63 = vrot.slane %v8634_v11, 4  ;;  %v3158_v46 = vmax.f32 %v3032_v6, 0.0  ;;  %v3038_v26 = vpop.f32.mrb[19].mxu1 }
 0x2b6   :  { %v3709_v37 = vmax.f32 %v3646_v30, %v3669_v10  ;;  %v3608_v22 = vsel %vm791_vm2, %v3605_v54, %v3607_v28  ;;  %v3671_v9 = vsel %vm919_vm3, %v3668_v44, %v3670_v12  ;;  %v3037_v3 = vadd.f32 %v8508_v56, %v3036_v18 }
 0x2b7   :  { %3851 = vst.msk [vmem:[#allocation9 + $0x20] sm:$0xff] %vm3846_vm6, %v3834_v20  ;;  %v3647_v58 = vmax.f32 %v3552_v45, %v3608_v22  ;;  %v3734_v50 = vsel %vm1047_vm4, %v3731_v61, %v3733_v60  ;;  %v3797_v39 = vsel %vm1175_vm5, %v3794_v8, %v3796_v63  ;;  %v3554_v7 = vadd.f32 %v8564_v17, %v3158_v46 }
 0x2b8   :  { %v3772_v6 = vmax.f32 %v3709_v37, %v3732_v25  ;;  %v3159_v35 = vmax.f32 %v3037_v3, 0.0  ;;  %v3041_v21 = vpop.f32.mrb[20].mxu1  ;;  %v6193_v26 = vpack.c.bf16 %v4571_v43, %v4570_v23  ;;  %v6195_v10 = vpack.c.bf16 %v4555_v34, %v4554_v33  ;;  %v4556_v3 = vld [vmem:[%s9507_s7 + $0x20] sm:$0xff] }
 0x2b9   :  { %v3710_v30 = vmax.f32 %v3647_v58, %v3671_v9  ;;  %v3914_v54 = vld [vmem:[#allocation7 + $0x1] sm:$0xff]  ;;  %v3609_v1 = vrot.slane %v3554_v7, 1  ;;  %v3672_v44 = vrot.slane %v3554_v7, 2  ;;  %v3735_v55 = vrot.slane %v3554_v7, 3  ;;  %v3043_v18 = vpop.f32.mrb[21].mxu1 }
 0x2ba   :  { %v3898_v29 = vld [vmem:[#allocation7] sm:$0xff]  ;;  %v3835_v20 = vmax.f32 %v3772_v6, %v3795_v5  ;;  %3930 = vrot.lane.b32.xlu1 %v3914_v54, %s6297_s16  ;;  %v3798_v45 = vrot.slane %v3554_v7, 4  ;;  %v8670_v61 = vadd.f32 %v8560_v40, %v3159_v35  ;;  %v3042_v17 = vadd.f32 %v8508_v56, %v3041_v21  ;;  %6194 = vmatprep.subr.bf16.mxu1 %v6193_v26 }
 0x2bb   :  { %v3964_v8 = vld [vmem:[#allocation7 + $0x2] sm:$0xff]  ;;  %3906 = vst.msk [vmem:[#allocation4] sm:$0xff] %vm3846_vm6, %v3898_v29  ;;  %v3773_v25 = vmax.f32 %v3710_v30, %v3734_v50  ;;  %v3610_v23 = vsel %vm791_vm2, %v3607_v28, %v3609_v1  ;;  %v3673_v43 = vsel %vm919_vm3, %v3670_v12, %v3672_v44  ;;  %v3736_v46 = vsel %vm1047_vm4, %v3733_v60, %v3735_v55  ;;  %v4572_v12 = vld [vmem:[%s9507_s7 + $0xa0] sm:$0xff] }
 0x2bc   :  { %v3866_v5 = vld [vmem:[#allocation9 + $0x10] ss:$2 sm:$0xff]  ;;  %3972 = vst.msk [vmem:[#allocation4 + $0x8] sm:$0xff] %vm3846_vm6, %v3964_v8  ;;  %6196 = vmatpush3.bf16.msra.mxu1 %v6195_v10  ;;  %3852 = vst.msk [vmem:[#allocation9 + $0x28] sm:$0xff] %vm3846_vm6, %v3835_v20  ;;  %v3648_v40 = vmax.f32 %v8634_v11, %v3610_v23  ;;  %v3799_v33 = vsel %vm1175_vm5, %v3796_v63, %v3798_v45  ;;  %v3611_v29 = vrot.slane %v8670_v61, 1  ;;  %v3674_v34 = vrot.slane %v8670_v61, 2 }
 0x2bd   :  { %3891 = vst.msk [vmem:[#allocation7 + $0xa] sm:$0xff] %vm3846_vm6, %v3866_v5  ;;  %3880 = vst.msk [vmem:[#allocation5 + $0x8] sm:$0xff] %vm3846_vm6, %v3866_v5  ;;  %v3046_v28 = vpop.f32.mrb[22].mxu1  ;;  %v4573_v60 = vld [vmem:[%s9507_s7 + $0xa8] sm:$0xff]  ;;  %v3836_v11 = vmax.f32 %v3773_v25, %v3797_v39  ;;  %v3737_v63 = vrot.slane %v8670_v61, 3  ;;  %v3800_v37 = vrot.slane %v8670_v61, 4 }
 0x2be   :  { %v3160_v22 = vmax.f32 %v3042_v17, 0.0  ;;  %v3048_v9 = vpop.f32.mrb[23].mxu1  ;;  %v4557_v58 = vld [vmem:[%s9507_s7 + $0x28] sm:$0xff]  ;;  %v3711_v50 = vmax.f32 %v3648_v40, %v3673_v43  ;;  %v3612_v6 = vsel %vm791_vm2, %v3609_v1, %v3611_v29  ;;  %v3675_v35 = vsel %vm919_vm3, %v3672_v44, %v3674_v34 }
 0x2bf   :  { %v3047_v39 = vadd.f32 %v8508_v56, %v3046_v28  ;;  %3853 = vst.msk [vmem:[#allocation9 + $0x30] sm:$0xff] %vm3846_vm6, %v3836_v11  ;;  %v3649_v21 = vmax.f32 %v3554_v7, %v3612_v6  ;;  %v3738_v26 = vsel %vm1047_vm4, %v3735_v55, %v3737_v63  ;;  %v3801_v10 = vsel %vm1175_vm5, %v3798_v45, %v3800_v37 }
 0x2c0   :  { %v8706_v30 = vadd.f32 %v8598_v31, %v3160_v22  ;;  %v3774_v54 = vmax.f32 %v3711_v50, %v3736_v46  ;;  %v3051_v20 = vpop.f32.mrb[24].mxu1  ;;  %v6197_v17 = vpack.c.bf16 %v4573_v60, %v4572_v12  ;;  %v6199_v8 = vpack.c.bf16 %v4557_v58, %v4556_v3 }
 0x2c1   :  { %v3161_v18 = vmax.f32 %v3047_v39, 0.0  ;;  %v3712_v1 = vmax.f32 %v3649_v21, %v3675_v35  ;;  %v3053_v7 = vpop.f32.mrb[25].mxu1  ;;  %v3052_v31 = vadd.f32 %v8508_v56, %v3051_v20  ;;  %v4575_v39 = vld [vmem:[%s9507_s7 + $0xb8] sm:$0xff] }
 0x2c2   :  { %v3613_v44 = vrot.slane %v8706_v30, 1  ;;  %v3676_v25 = vrot.slane %v8706_v30, 2  ;;  %v3739_v23 = vrot.slane %v8706_v30, 3  ;;  %v3837_v43 = vmax.f32 %v3774_v54, %v3799_v33  ;;  %6198 = vmatprep.subr.bf16.mxu1 %v6197_v17  ;;  %v4574_v33 = vld [vmem:[%s9507_s7 + $0xb0] sm:$0xff] }
 0x2c3   :  { %v3802_v55 = vrot.slane %v8706_v30, 4  ;;  %v8713_v45 = vadd.f32 %v8592_v16, %v3161_v18  ;;  %v3775_v46 = vmax.f32 %v3712_v1, %v3738_v26  ;;  %6200 = vmatpush3.bf16.msra.mxu1 %v6199_v8  ;;  %v3868_v9 = vld [vmem:[#allocation9 + $0x20] ss:$2 sm:$0xff]  ;;  %v4969_v1 = vld [vmem:[%s9509_s9] sm:$0xff] }
 0x2c4   :  { %v3965_v5 = vld [vmem:[#allocation7 + $0xa] sm:$0xff]  ;;  %v3614_v12 = vsel %vm791_vm2, %v3611_v29, %v3613_v44  ;;  %v3677_v60 = vsel %vm919_vm3, %v3674_v34, %v3676_v25  ;;  %v3740_v11 = vsel %vm1047_vm4, %v3737_v63, %v3739_v23  ;;  %3854 = vst.msk [vmem:[#allocation9 + $0x38] sm:$0xff] %vm3846_vm6, %v3837_v43  ;;  %v3056_v3 = vpop.f32.mrb[26].mxu1  ;;  %3892 = vst.msk [vmem:[#allocation7 + $0x12] sm:$0xff] %vm3846_vm6, %v3868_v9 }
 0x2c5   :  { %v3980_v40 = vld [vmem:[#allocation7 + $0x3] sm:$0xff]  ;;  %3973 = vst.msk [vmem:[#allocation4 + $0x20] sm:$0xff] %vm3846_vm6, %v3965_v5  ;;  %v3650_v16 = vmax.f32 %v8670_v61, %v3614_v12  ;;  %v3803_v29 = vsel %vm1175_vm5, %v3800_v37, %v3802_v55  ;;  %v3615_v63 = vrot.slane %v8713_v45, 1  ;;  %v3678_v22 = vrot.slane %v8713_v45, 2  ;;  %3881 = vst.msk [vmem:[#allocation5 + $0x10] sm:$0xff] %vm3846_vm6, %v3868_v9  ;;  %v3058_v37 = vpop.f32.mrb[27].mxu1 }
 0x2c6   :  { %v3915_v28 = vld [vmem:[#allocation7 + $0x9] sm:$0xff]  ;;  %3996 = vrot.lane.b32.xlu0 %v3980_v40, %s6297_s16  ;;  %v3838_v58 = vmax.f32 %v3775_v46, %v3801_v10  ;;  %v3741_v50 = vrot.slane %v8713_v45, 3  ;;  %v3804_v6 = vrot.slane %v8713_v45, 4  ;;  %v3162_v61 = vmax.f32 %v3052_v31, 0.0  ;;  %v8780_v9 = vld [vmem:[%s9507_s7 + $0xc0] sm:$0xff] }
 0x2c7   :  { %3932 = vrot.lane.b32.xlu1 %v3915_v28, %s6297_s16  ;;  %v4028_v34 = vld [vmem:[#allocation7 + $0x4] sm:$0xff]  ;;  %v3713_v21 = vmax.f32 %v3650_v16, %v3677_v60  ;;  %v3616_v26 = vsel %vm791_vm2, %v3613_v44, %v3615_v63  ;;  %v3679_v10 = vsel %vm919_vm3, %v3676_v25, %v3678_v22  ;;  %v3057_v54 = vadd.f32 %v8508_v56, %v3056_v3 }
 0x2c8   :  { %4036 = vst.msk [vmem:[#allocation4 + $0x10] sm:$0xff] %vm3846_vm6, %v4028_v34  ;;  %v3899_v35 = vld [vmem:[#allocation7 + $0x8] sm:$0xff]  ;;  %3855 = vst.msk [vmem:[#allocation9 + $0x40] sm:$0xff] %vm3846_vm6, %v3838_v58  ;;  %v3651_v18 = vmax.f32 %v8706_v30, %v3616_v26  ;;  %v3742_v20 = vsel %vm1047_vm4, %v3739_v23, %v3741_v50  ;;  %v3805_v17 = vsel %vm1175_vm5, %v3802_v55, %v3804_v6  ;;  %v4970_v44 = vld [vmem:[%s9509_s9 + $0x8] sm:$0xff]  ;;  %v3061_v28 = vpop.f32.mrb[28].mxu1 }
 0x2c9   :  { %3907 = vst.msk [vmem:[#allocation4 + $0x18] sm:$0xff] %vm3846_vm6, %v3899_v35  ;;  %v8747_v8 = vadd.f32 %v8631_v14, %v3162_v61  ;;  %v8757_v25 = vadd.f32 %v8513_v52, %v8458_v24  ;;  %v3776_v30 = vmax.f32 %v3713_v21, %v3740_v11  ;;  %v3163_v7 = vmax.f32 %v3057_v54, 0.0  ;;  %v3063_v34 = vpop.f32.mrb[29].mxu1 }
 0x2ca   :  { %v6201_v23 = vpack.c.bf16 %v4575_v39, %v4574_v33  ;;  %v3714_v43 = vmax.f32 %v3651_v18, %v3679_v10  ;;  %v8766_v24 = vpack.c.bf16 %v4970_v44, %v4969_v1  ;;  %v3062_v54 = vadd.f32 %v8508_v56, %v3061_v28  ;;  %v8813_v1 = vld [vmem:[%s9507_s7 + $0x40] sm:$0xff]  ;;  %v4971_v28 = vld [vmem:[%s9509_s9 + $0x10] sm:$0xff] }
 0x2cb   :  { %v3617_v55 = vrot.slane %v8747_v8, 1  ;;  %v3680_v14 = vrot.slane %v8747_v8, 2  ;;  %v3743_v31 = vrot.slane %v8747_v8, 3  ;;  %v3839_v46 = vmax.f32 %v3776_v30, %v3803_v29  ;;  %v3870_v16 = vld [vmem:[#allocation9 + $0x30] ss:$2 sm:$0xff]  ;;  %v4558_v29 = vld [vmem:[%s9507_s7 + $0x30] sm:$0xff] }
 0x2cc   :  { %v3806_v5 = vrot.slane %v8747_v8, 4  ;;  %v8764_v40 = vadd.f32 %v8627_v42, %v3163_v7  ;;  %6202 = vmatprep.subr.bf16.mxu1 %v6201_v23  ;;  %v3777_v12 = vmax.f32 %v3714_v43, %v3742_v20  ;;  %v4559_v42 = vld [vmem:[%s9507_s7 + $0x38] sm:$0xff]  ;;  %3893 = vst.msk [vmem:[#allocation7 + $0x1a] sm:$0xff] %vm3846_vm6, %v3870_v16  ;;  %3882 = vst.msk [vmem:[#allocation5 + $0x18] sm:$0xff] %vm3846_vm6, %v3870_v16  ;;  %6238 = vmatprep.subr.bf16.mxu0 %v8766_v24  ;;  %v4561_v43 = vld [vmem:[%s9507_s7 + $0x48] sm:$0xff] }
 0x2cd   :  { %v3618_v60 = vsel %vm791_vm2, %v3615_v63, %v3617_v55  ;;  %v3681_v11 = vsel %vm919_vm3, %v3678_v22, %v3680_v14  ;;  %v3744_v33 = vsel %vm1047_vm4, %v3741_v50, %v3743_v31  ;;  %v8785_v63 = vld [vmem:[%s9507_s7 + $0xc8] sm:$0xff]  ;;  %3856 = vst.msk [vmem:[#allocation9 + $0x48] sm:$0xff] %vm3846_vm6, %v3839_v46  ;;  %v3900_v3 = vld [vmem:[#allocation7 + $0x10] sm:$0xff]  ;;  %v3164_v23 = vmax.f32 %v3062_v54, 0.0  ;;  %v3066_v16 = vpop.f32.mrb[30].mxu1  ;;  %v8850_v34 = vld [vmem:[%s9507_s7 + $0x50] sm:$0xff] }
 0x2ce   :  { %v3966_v58 = vld [vmem:[#allocation7 + $0x12] sm:$0xff]  ;;  %v3652_v50 = vmax.f32 %v8713_v45, %v3618_v60  ;;  %v3807_v61 = vsel %vm1175_vm5, %v3804_v6, %v3806_v5  ;;  %v3619_v37 = vrot.slane %v8764_v40, 1  ;;  %v3682_v35 = vrot.slane %v8764_v40, 2  ;;  %3908 = vst.msk [vmem:[#allocation4 + $0x30] sm:$0xff] %vm3846_vm6, %v3900_v3  ;;  %v4974_v3 = vld [vmem:[%s9509_s9 + $0x28] sm:$0xff] }
 0x2cf   :  { %v4506_v22 = vld [vmem:[#allocation4 + $0x10] sm:$0xff]  ;;  %v3840_v39 = vmax.f32 %v3777_v12, %v3805_v17  ;;  %3974 = vst.msk [vmem:[#allocation4 + $0x38] sm:$0xff] %vm3846_vm6, %v3966_v58  ;;  %v3916_v45 = vld [vmem:[#allocation7 + $0x11] sm:$0xff]  ;;  %v3745_v26 = vrot.slane %v8764_v40, 3  ;;  %v3808_v10 = vrot.slane %v8764_v40, 4  ;;  %v6203_v46 = vpack.c.bf16 %v4559_v42, %v4558_v29 }
 0x2d0   :  { %6087 = vmatprep.mubr.msk.f32.mxu0 %vm3846_vm6, %v4506_v22  ;;  %v3981_v21 = vld [vmem:[#allocation7 + $0xb] sm:$0xff]  ;;  %3934 = vrot.lane.b32.xlu1 %v3916_v45, %s6297_s16  ;;  %v3715_v18 = vmax.f32 %v3652_v50, %v3681_v11  ;;  %v3620_v20 = vsel %vm791_vm2, %v3617_v55, %v3619_v37  ;;  %v3683_v17 = vsel %vm919_vm3, %v3680_v14, %v3682_v35  ;;  %v9520_v14 = vmov 0.0   ;;  %v4973_v22 = vld [vmem:[%s9509_s9 + $0x20] sm:$0xff]  ;;  %v8873_v50 = vld [vmem:[%s9507_s7 + $0xe8] sm:$0xff] }
 0x2d1   :  { %v4029_v6 = vld [vmem:[#allocation7 + $0xc] sm:$0xff]  ;;  %3998 = vrot.lane.b32.xlu0 %v3981_v21, %s6297_s16  ;;  %3857 = vst.msk [vmem:[#allocation9 + $0x50] sm:$0xff] %vm3846_vm6, %v3840_v39  ;;  %v3653_v44 = vmax.f32 %v8747_v8, %v3620_v20  ;;  %v3746_v30 = vsel %vm1047_vm4, %v3743_v31, %v3745_v26  ;;  %v3809_v7 = vsel %vm1175_vm5, %v3806_v5, %v3808_v10  ;;  %v8868_v58 = vld [vmem:[%s9507_s7 + $0xe0] sm:$0xff] }
 0x2d2   :  { %4037 = vst.msk [vmem:[#allocation4 + $0x28] sm:$0xff] %vm3846_vm6, %v4029_v6  ;;  %v4578_v55 = vld [vmem:[%s9507_s7 + $0xd0] sm:$0xff]  ;;  %v4579_v8 = vld [vmem:[%s9507_s7 + $0xd8] sm:$0xff]  ;;  %v3778_v31 = vmax.f32 %v3715_v18, %v3744_v33  ;;  %v6205_v5 = vpack.c.bf16 %v8785_v63, %v8780_v9  ;;  %v3463_v12 = vadd.f32 %v8448_v59, %v8513_v52  ;;  %v8842_v11 = vadd.f32 %v8757_v25, %v3164_v23  ;;  %v3068_v25 = vpop.f32.mrb[31].mxu1 }
 0x2d3   :  { %3889 = vst.msk [vmem:[#allocation5 + $0x3d] sm:$0x7] %vm3888_vm7, %v9520_v14  ;;  %4348 = vst.msk [vmem:[#allocation5 + $0x7d] sm:$0x7] %vm3888_vm7, %v9520_v14  ;;  %v3716_v60 = vmax.f32 %v3653_v44, %v3683_v17  ;;  %v4972_v33 = vld [vmem:[%s9509_s9 + $0x18] sm:$0xff]  ;;  %v3067_v42 = vadd.f32 %v8508_v56, %v3066_v16  ;;  %6204 = vmatpush3.bf16.msra.mxu1 %v6203_v46  ;;  %v6207_v9 = vpack.c.bf16 %v4561_v43, %v8813_v1  ;;  %v3901_v39 = vld [vmem:[#allocation7 + $0x18] sm:$0xff] }
 0x2d4   :  { %v8855_v29 = vld [vmem:[%s9507_s7 + $0x58] sm:$0xff]  ;;  %v3841_v59 = vmax.f32 %v3778_v31, %v3807_v61  ;;  %v6209_v63 = vpack.c.bf16 %v4579_v8, %v4578_v55  ;;  %v3967_v21 = vld [vmem:[#allocation7 + $0x1a] sm:$0xff]  ;;  %v3621_v6 = vrot.slane %v8842_v11, 1  ;;  %v3684_v54 = vrot.slane %v8842_v11, 2  ;;  %6206 = vmatprep.subr.bf16.mxu1 %v6205_v5  ;;  %3909 = vst.msk [vmem:[#allocation4 + $0x48] sm:$0xff] %vm3846_vm6, %v3901_v39 }
 0x2d5   :  { %v3779_v61 = vmax.f32 %v3716_v60, %v3746_v30  ;;  %v3982_v45 = vld [vmem:[#allocation7 + $0x13] sm:$0xff]  ;;  %v3747_v18 = vrot.slane %v8842_v11, 3  ;;  %3975 = vst.msk [vmem:[#allocation4 + $0x50] sm:$0xff] %vm3846_vm6, %v3967_v21  ;;  %v3810_v17 = vrot.slane %v8842_v11, 4  ;;  %v3165_v44 = vmax.f32 %v3067_v42, 0.0 }
 0x2d6   :  { %3858 = vst.msk [vmem:[#allocation9 + $0x58] sm:$0xff] %vm3846_vm6, %v3841_v59  ;;  %4000 = vrot.lane.b32.xlu0 %v3982_v45, %s6297_s16  ;;  %v3917_v20 = vld [vmem:[#allocation7 + $0x19] sm:$0xff]  ;;  %v3872_v30 = vld [vmem:[#allocation9 + $0x40] ss:$2 sm:$0xff]  ;;  %v6241_v23 = vpack.c.bf16 %v4972_v33, %v4971_v28  ;;  %v6211_v43 = vpack.c.bf16 %v8855_v29, %v8850_v34  ;;  %v3622_v14 = vsel %vm791_vm2, %v3619_v37, %v3621_v6  ;;  %v3071_v33 = vpop.f32.mrb[32].mxu1 }
 0x2d7   :  { %v4030_v1 = vld [vmem:[#allocation7 + $0x14] sm:$0xff]  ;;  %v3842_v8 = vmax.f32 %v3779_v61, %v3809_v7  ;;  %3936 = vrot.lane.b32.xlu1 %v3917_v20, %s6297_s16  ;;  %v3685_v31 = vsel %vm919_vm3, %v3682_v35, %v3684_v54  ;;  %v3748_v46 = vsel %vm1047_vm4, %v3745_v26, %v3747_v18  ;;  %3894 = vst.msk [vmem:[#allocation7 + $0x22] sm:$0xff] %vm3846_vm6, %v3872_v30  ;;  %3883 = vst.msk [vmem:[#allocation5 + $0x20] sm:$0xff] %vm3846_vm6, %v3872_v30  ;;  %v8913_v26 = vld [vmem:[%s9507_s7 + $0x68] sm:$0xff]  ;;  %v3073_v42 = vpop.f32.mrb[33].mxu1 }
 0x2d8   :  { %4038 = vst.msk [vmem:[#allocation4 + $0x40] sm:$0xff] %vm3846_vm6, %v4030_v1  ;;  %v3654_v7 = vmax.f32 %v8764_v40, %v3622_v14  ;;  %v3811_v37 = vsel %vm1175_vm5, %v3808_v10, %v3810_v17  ;;  %v8903_v5 = vadd.f32 %v3463_v12, %v3165_v44  ;;  %6208 = vmatpush3.bf16.msra.mxu1 %v6207_v9  ;;  %v8908_v35 = vld [vmem:[%s9507_s7 + $0x60] sm:$0xff]  ;;  %v4975_v34 = vld [vmem:[%s9509_s9 + $0x30] sm:$0xff]  ;;  %v4976_v25 = vld [vmem:[%s9509_s9 + $0x38] sm:$0xff] }
 0x2d9   :  { %v4509_v55 = vld [vmem:[#allocation4 + $0x28] sm:$0xff]  ;;  %3859 = vst.msk [vmem:[#allocation9 + $0x60] sm:$0xff] %vm3846_vm6, %v3842_v8  ;;  %6210 = vmatprep.subr.bf16.mxu1 %v6209_v63  ;;  %v6245_v40 = vpack.c.bf16 %v4974_v3, %v4973_v22  ;;  %v6213_v10 = vpack.c.bf16 %v8873_v50, %v8868_v58  ;;  %v3072_v59 = vadd.f32 %v8508_v56, %v3071_v33  ;;  %v4582_v63 = vld [vmem:[%s9507_s7 + $0xf0] sm:$0xff] }
 0x2da   :  { %6088 = vmatmul.mubr.msk.f32.vlgmr.msra.gmra.mrb[96].mxu0 %vm3846_vm6, %v4509_v55  ;;  %v3717_v28 = vmax.f32 %v3654_v7, %v3685_v31  ;;  %v3623_v12 = vrot.slane %v8903_v5, 1  ;;  %v3686_v60 = vrot.slane %v8903_v5, 2  ;;  %v3749_v16 = vrot.slane %v8903_v5, 3  ;;  %v4566_v1 = vld [vmem:[%s9507_s7 + $0x70] sm:$0xff] }
 0x2db   :  { %6240 = vmatpush3.bf16.msra.mxu0 %v8766_v24  ;;  %v3468_v24 = vadd.f32 %v8513_v52, %v8469_v51  ;;  %v3812_v29 = vrot.slane %v8903_v5, 4  ;;  %v6215_v9 = vpack.c.bf16 %v8913_v26, %v8908_v35  ;;  %v4583_v51 = vld [vmem:[%s9507_s7 + $0xf8] sm:$0xff]  ;;  %v3166_v45 = vmax.f32 %v3072_v59, 0.0 }
 0x2dc   :  { %6242 = vmatprep.subr.bf16.mxu0 %v6241_v23  ;;  %v3780_v22 = vmax.f32 %v3717_v28, %v3748_v46  ;;  %v3624_v3 = vsel %vm791_vm2, %v3621_v6, %v3623_v12  ;;  %v3656_v58 = vmax.f32 %v8903_v5, %v3623_v12  ;;  %v3687_v50 = vsel %vm919_vm3, %v3684_v54, %v3686_v60  ;;  %v4567_v6 = vld [vmem:[%s9507_s7 + $0x78] sm:$0xff]  ;;  %v3076_v46 = vpop.f32.mrb[34].mxu1 }
 0x2dd   :  { %6212 = vmatpush3.bf16.msra.mxu1 %v6211_v43  ;;  %v3655_v61 = vmax.f32 %v8842_v11, %v3624_v3  ;;  %v3750_v39 = vsel %vm1047_vm4, %v3747_v18, %v3749_v16  ;;  %v3813_v21 = vsel %vm1175_vm5, %v3810_v17, %v3812_v29  ;;  %v3874_v20 = vld [vmem:[#allocation9 + $0x50] ss:$2 sm:$0xff]  ;;  %v6249_v18 = vpack.c.bf16 %v4976_v25, %v4975_v34  ;;  %v3078_v5 = vpop.f32.mrb[35].mxu1 }
 0x2de   :  { %6214 = vmatprep.subr.bf16.mxu1 %v6213_v10  ;;  %v3843_v54 = vmax.f32 %v3780_v22, %v3811_v37  ;;  %v3719_v30 = vmax.f32 %v3656_v58, %v3686_v60  ;;  %v3902_v11 = vld [vmem:[#allocation7 + $0x20] sm:$0xff]  ;;  %3895 = vst.msk [vmem:[#allocation7 + $0x2a] sm:$0xff] %vm3846_vm6, %v3874_v20  ;;  %3884 = vst.msk [vmem:[#allocation5 + $0x28] sm:$0xff] %vm3846_vm6, %v3874_v20  ;;  %v6217_v17 = vpack.c.bf16 %v4583_v51, %v4582_v63  ;;  %v8995_v20 = vld [vmem:[%s9504_s4] ss:$0 sm:$0xff] }
 0x2df   :  { %6244 = vmatpush3.bf16.msra.mxu0 %v6241_v23  ;;  %v4512_v44 = vld [vmem:[#allocation4 + $0x40] sm:$0xff]  ;;  %v3968_v43 = vld [vmem:[#allocation7 + $0x22] sm:$0xff]  ;;  %v3718_v23 = vmax.f32 %v3655_v61, %v3687_v50  ;;  %3910 = vst.msk [vmem:[#allocation4 + $0x60] sm:$0xff] %vm3846_vm6, %v3902_v11  ;;  %v8957_v14 = vadd.f32 %v3468_v24, %v3166_v45  ;;  %v3077_v37 = vadd.f32 %v8508_v56, %v3076_v46 }
 0x2e0   :  { %6246 = vmatprep.subr.bf16.mxu0 %v6245_v40  ;;  %6090 = vmatprep.mubr.msk.f32.mxu0 %vm3846_vm6, %v4512_v44  ;;  %v3983_v55 = vld [vmem:[#allocation7 + $0x1b] sm:$0xff]  ;;  %3976 = vst.msk [vmem:[#allocation4 + $0x68] sm:$0xff] %vm3846_vm6, %v3968_v43  ;;  %3860 = vst.msk [vmem:[#allocation9 + $0x68] sm:$0xff] %vm3846_vm6, %v3843_v54  ;;  %v3782_v7 = vmax.f32 %v3719_v30, %v3749_v16  ;;  %v6219_v26 = vpack.c.bf16 %v4567_v6, %v4566_v1  ;;  %v9001_v6 = vld [vmem:[%s9506_s6] ss:$0 sm:$0xff] }
 0x2e1   :  { %v3918_v8 = vld [vmem:[#allocation7 + $0x21] sm:$0xff]  ;;  %4002 = vrot.lane.b32.xlu0 %v3983_v55, %s6297_s16  ;;  %v3781_v35 = vmax.f32 %v3718_v23, %v3750_v39  ;;  %6216 = vmatpush3.bf16.msra.mxu1 %v6215_v9  ;;  %v3473_v10 = vadd.f32 %v8467_v48, %v8513_v52  ;;  %v3167_v12 = vmax.f32 %v3077_v37, 0.0  ;;  %v4064_v16 = vrot.slane %v8957_v14, 1 }
 0x2e2   :  { %v4031_v31 = vld [vmem:[#allocation7 + $0x1c] sm:$0xff]  ;;  %3938 = vrot.lane.b32.xlu1 %v3918_v8, %s6297_s16  ;;  %v3845_v28 = vmax.f32 %v3782_v7, %v3812_v29  ;;  %6218 = vmatprep.subr.bf16.mxu1 %v6217_v17  ;;  %v4127_v56 = vrot.slane %v8957_v14, 2  ;;  %v4253_v34 = vrot.slane %v8957_v14, 4  ;;  %v3478_v54 = vadd.f32 %v9001_v6, %v8490_v36 }
 0x2e3   :  { %4039 = vst.msk [vmem:[#allocation4 + $0x58] sm:$0xff] %vm3846_vm6, %v4031_v31  ;;  %6248 = vmatpush3.bf16.msra.mxu0 %v6245_v40  ;;  %v3844_v60 = vmax.f32 %v3781_v35, %v3813_v21  ;;  %v8968_v33 = vadd.f32 %v3473_v10, %v3167_v12  ;;  %v4190_v40 = vrot.slane %v8957_v14, 3  ;;  %v3081_v22 = vpop.f32.mrb[36].mxu1  ;;  %v3483_v35 = vadd.f32 %v9001_v6, %v8487_v15 }
 0x2e4   :  { %6250 = vmatprep.subr.bf16.mxu0 %v6249_v18  ;;  %3863 = vst.msk [vmem:[#allocation9 + $0x78] sm:$0x1] %vm3862_vm8, %v3845_v28  ;;  %v3083_v21 = vpop.f32.mrb[37].mxu1  ;;  %v3082_v1 = vadd.f32 %v8995_v20, %v3081_v22 }
 0x2e5   :  { %3861 = vst.msk [vmem:[#allocation9 + $0x70] sm:$0xff] %vm3846_vm6, %v3844_v60  ;;  %v3903_v48 = vld [vmem:[#allocation7 + $0x28] sm:$0xff]  ;;  %6220 = vmatpush3.bf16.msra.mxu1 %v6219_v26  ;;  %v4065_v29 = vrot.slane %v8968_v33, 1  ;;  %v4128_v59 = vrot.slane %v8968_v33, 2  ;;  %v4191_v42 = vrot.slane %v8968_v33, 3  ;;  %v4254_v25 = vrot.slane %v8968_v33, 4 }
 0x2e6   :  { %v3969_v52 = vld [vmem:[#allocation7 + $0x2a] sm:$0xff]  ;;  %3911 = vst.msk [vmem:[#allocation4 + $0x78] sm:$0xff] %vm3846_vm6, %v3903_v48  ;;  %6253 = vmatprep.subr.bf16.mxu1 %v8440_v4  ;;  %v3168_v30 = vmax.f32 %v3082_v1, 0.0  ;;  %v3488_v21 = vadd.f32 %v9001_v6, %v8495_v27 }
 0x2e7   :  { %v3984_v24 = vld [vmem:[#allocation7 + $0x23] sm:$0xff]  ;;  %6252 = vmatpush3.bf16.msra.mxu0 %v6249_v18  ;;  %3977 = vst.msk [vmem:[#allocation4 + $0x80] sm:$0xff] %vm3846_vm6, %v3969_v52  ;;  %v4066_v58 = vsel %vm791_vm2, %v4064_v16, %v4065_v29  ;;  %v4129_v50 = vsel %vm919_vm3, %v4127_v56, %v4128_v59  ;;  %v4192_v61 = vsel %vm1047_vm4, %v4190_v40, %v4191_v42 }
 0x2e8   :  { %4004 = vrot.lane.b32.xlu0 %v3984_v24, %s6297_s16  ;;  %v3919_v9 = vld [vmem:[#allocation7 + $0x29] sm:$0xff]  ;;  %v4255_v39 = vsel %vm1175_vm5, %v4253_v34, %v4254_v25  ;;  %v4111_v45 = vmax.f32 %v8957_v14, %v4066_v58  ;;  %v3086_v11 = vpop.f32.mrb[38].mxu1  ;;  %v9005_v17 = vadd.f32 %v3478_v54, %v3168_v30 }
 0x2e9   :  { %v4032_v63 = vld [vmem:[#allocation7 + $0x24] sm:$0xff]  ;;  %3940 = vrot.lane.b32.xlu1 %v3919_v9, %s6297_s16  ;;  %v3087_v23 = vadd.f32 %v8995_v20, %v3086_v11  ;;  %v3088_v55 = vpop.f32.mrb[39].mxu1 }
 0x2ea   :  { %v4515_v51 = vld [vmem:[#allocation4 + $0x58] sm:$0xff]  ;;  %4040 = vst.msk [vmem:[#allocation4 + $0x70] sm:$0xff] %vm3846_vm6, %v4032_v63  ;;  %v4174_v44 = vmax.f32 %v4111_v45, %v4129_v50  ;;  %v4067_v31 = vrot.slane %v9005_v17, 1  ;;  %v4130_v36 = vrot.slane %v9005_v17, 2  ;;  %v4193_v46 = vrot.slane %v9005_v17, 3 }
 0x2eb   :  { %v3876_v3 = vld [vmem:[#allocation9 + $0x60] ss:$2 sm:$0xff]  ;;  %6091 = vmatmul.mubr.msk.f32.gmra.mrb[98].mxu0 %vm3846_vm6, %v4515_v51  ;;  %v4256_v26 = vrot.slane %v9005_v17, 4  ;;  %v3169_v10 = vmax.f32 %v3087_v23, 0.0 }
 0x2ec   :  { %3896 = vst.msk [vmem:[#allocation7 + $0x32] sm:$0xff] %vm3846_vm6, %v3876_v3  ;;  %3885 = vst.msk [vmem:[#allocation5 + $0x30] sm:$0xff] %vm3846_vm6, %v3876_v3  ;;  %v3878_v43 = vld [vmem:[#allocation9 + $0x70] ss:$2 sm:$0x1f]  ;;  %v4237_v18 = vmax.f32 %v4174_v44, %v4192_v61  ;;  %v4068_v60 = vsel %vm791_vm2, %v4065_v29, %v4067_v31  ;;  %v4131_v16 = vsel %vm919_vm3, %v4128_v59, %v4130_v36 }
 0x2ed   :  { %3897 = vst.msk [vmem:[#allocation7 + $0x3a] sm:$0x1f] %vm3886_vm9, %v3878_v43  ;;  %3887 = vst.msk [vmem:[#allocation5 + $0x38] sm:$0x1f] %vm3886_vm9, %v3878_v43  ;;  %v4194_v56 = vsel %vm1047_vm4, %v4191_v42, %v4193_v46  ;;  %v4112_v15 = vmax.f32 %v8968_v33, %v4068_v60  ;;  %v4257_v40 = vsel %vm1175_vm5, %v4254_v25, %v4256_v26 }
 0x2ee   :  { %v4300_v14 = vmax.f32 %v4237_v18, %v4255_v39  ;;  %v3565_v34 = vadd.f32 %v3483_v35, %v3169_v10 }
 0x2ef   :  { %v3091_v48 = vpop.f32.mrb[40].mxu1  ;;  %v4175_v52 = vmax.f32 %v4112_v15, %v4131_v16 }
 0x2f0   :  { %4316 = vst.msk [vmem:[#allocation9] sm:$0xff] %vm3846_vm6, %v4300_v14  ;;  %v4069_v24 = vrot.slane %v3565_v34, 1  ;;  %v4132_v9 = vrot.slane %v3565_v34, 2  ;;  %v4195_v63 = vrot.slane %v3565_v34, 3  ;;  %v3093_v51 = vpop.f32.mrb[41].mxu1  ;;  %v4258_v22 = vrot.slane %v3565_v34, 4 }
 0x2f1   :  { %v4518_v8 = vld [vmem:[#allocation4 + $0x70] sm:$0xff]  ;;  %v3092_v59 = vadd.f32 %v8995_v20, %v3091_v48  ;;  %v4238_v58 = vmax.f32 %v4175_v52, %v4194_v56 }
 0x2f2   :  { %6093 = vmatprep.mubr.msk.f32.mxu0 %vm3846_vm6, %v4518_v8  ;;  %v4070_v33 = vsel %vm791_vm2, %v4067_v31, %v4069_v24  ;;  %v4133_v25 = vsel %vm919_vm3, %v4130_v36, %v4132_v9  ;;  %v4196_v50 = vsel %vm1047_vm4, %v4193_v46, %v4195_v63  ;;  %v4259_v1 = vsel %vm1175_vm5, %v4256_v26, %v4258_v22 }
 0x2f3   :  { %v3904_v7 = vld [vmem:[#allocation7 + $0x30] sm:$0xff]  ;;  %v4113_v45 = vmax.f32 %v9005_v17, %v4070_v33  ;;  %v3170_v54 = vmax.f32 %v3092_v59, 0.0  ;;  %v4301_v30 = vmax.f32 %v4238_v58, %v4257_v40  ;;  %v3493_v46 = vadd.f32 %v9001_v6, %v8493_v19 }
 0x2f4   :  { %v3970_v37 = vld [vmem:[#allocation7 + $0x32] sm:$0xff]  ;;  %3912 = vst.msk [vmem:[#allocation4 + $0x90] sm:$0xff] %vm3846_vm6, %v3904_v7  ;;  %v4035_v39 = vld [vmem:[#allocation7 + $0x3c] sm:$0x1f]  ;;  %v3096_v43 = vpop.f32.mrb[42].mxu1 }
 0x2f5   :  { %v3985_v5 = vld [vmem:[#allocation7 + $0x2b] sm:$0xff]  ;;  %3978 = vst.msk [vmem:[#allocation4 + $0x98] sm:$0xff] %vm3846_vm6, %v3970_v37  ;;  %v3905_v29 = vld [vmem:[#allocation7 + $0x38] sm:$0x1f]  ;;  %v4176_v18 = vmax.f32 %v4113_v45, %v4133_v25  ;;  %v3566_v23 = vadd.f32 %v3488_v21, %v3170_v54  ;;  %v3097_v27 = vadd.f32 %v8995_v20, %v3096_v43  ;;  %v3098_v17 = vpop.f32.mrb[43].mxu1  ;;  %4317 = vst.msk [vmem:[#allocation9 + $0x8] sm:$0xff] %vm3846_vm6, %v4301_v30 }
 0x2f6   :  { %4006 = vrot.lane.b32.xlu0 %v3985_v5, %s6297_s16  ;;  %v3920_v28 = vld [vmem:[#allocation7 + $0x31] sm:$0xff]  ;;  %3913 = vst.msk [vmem:[#allocation4 + $0xa8] sm:$0x1f] %vm3886_vm9, %v3905_v29  ;;  %v3921_v3 = vld [vmem:[#allocation7 + $0x39] sm:$0x1f] }
 0x2f7   :  { %v4033_v12 = vld [vmem:[#allocation7 + $0x2c] sm:$0xff]  ;;  %3942 = vrot.lane.b32.xlu1 %v3920_v28, %s6297_s16  ;;  %v4034_v61 = vld [vmem:[#allocation7 + $0x34] sm:$0xff]  ;;  %4043 = vst.msk [vmem:[#allocation4 + $0xb8] sm:$0x1f] %vm3886_vm9, %v4035_v39  ;;  %v4239_v8 = vmax.f32 %v4176_v18, %v4196_v50  ;;  %v4071_v14 = vrot.slane %v3566_v23, 1  ;;  %v4134_v31 = vrot.slane %v3566_v23, 2 }
 0x2f8   :  { %4041 = vst.msk [vmem:[#allocation4 + $0x88] sm:$0xff] %vm3846_vm6, %v4033_v12  ;;  %v3986_v42 = vld [vmem:[#allocation7 + $0x33] sm:$0xff]  ;;  %4042 = vst.msk [vmem:[#allocation4 + $0xa0] sm:$0xff] %vm3846_vm6, %v4034_v61  ;;  %v3987_v55 = vld [vmem:[#allocation7 + $0x3b] sm:$0x1f]  ;;  %v4197_v36 = vrot.slane %v3566_v23, 3 }
 0x2f9   :  { %v3971_v44 = vld [vmem:[#allocation7 + $0x3a] sm:$0x1f]  ;;  %v4260_v7 = vrot.slane %v3566_v23, 4  ;;  %v3171_v37 = vmax.f32 %v3097_v27, 0.0  ;;  %v4302_v5 = vmax.f32 %v4239_v8, %v4259_v1  ;;  %v4072_v35 = vsel %vm791_vm2, %v4069_v24, %v4071_v14 }
 0x2fa   :  { %4008 = vrot.lane.b32.xlu0 %v3986_v42, %s6297_s16  ;;  %3979 = vst.msk [vmem:[#allocation4 + $0xb0] sm:$0x1f] %vm3886_vm9, %v3971_v44  ;;  %v4135_v26 = vsel %vm919_vm3, %v4132_v9, %v4134_v31  ;;  %v4198_v10 = vsel %vm1047_vm4, %v4195_v63, %v4197_v36  ;;  %v4114_v28 = vmax.f32 %v3565_v34, %v4072_v35 }
 0x2fb   :  { %3944 = vrot.lane.b32.xlu1 %v3921_v3, %s6297_s16  ;;  %v4261_v12 = vsel %vm1175_vm5, %v4258_v22, %v4260_v7  ;;  %v3567_v60 = vadd.f32 %v3493_v46, %v3171_v37  ;;  %4318 = vst.msk [vmem:[#allocation9 + $0x10] sm:$0xff] %vm3846_vm6, %v4302_v5  ;;  %v3101_v15 = vpop.f32.mrb[44].mxu1  ;;  %v3498_v42 = vadd.f32 %v9001_v6, %v8499_v62 }
 0x2fc   :  { %v4177_v19 = vmax.f32 %v4114_v28, %v4135_v26  ;;  %v3103_v24 = vpop.f32.mrb[45].mxu1  ;;  %v3102_v34 = vadd.f32 %v8995_v20, %v3101_v15  ;;  %v4332_v63 = vld [vmem:[#allocation9] ss:$2 sm:$0xff]  ;;  %v3503_v62 = vadd.f32 %v9001_v6, %v8497_v13 }
 0x2fd   :  { %v4073_v40 = vrot.slane %v3567_v60, 1  ;;  %v4136_v48 = vrot.slane %v3567_v60, 2  ;;  %v4199_v52 = vrot.slane %v3567_v60, 3  ;;  %v4262_v9 = vrot.slane %v3567_v60, 4  ;;  %4349 = vst.msk [vmem:[#allocation7 + $0x2] sm:$0xff] %vm3846_vm6, %v4332_v63  ;;  %4340 = vst.msk [vmem:[#allocation5 + $0x40] sm:$0xff] %vm3846_vm6, %v4332_v63 }
 0x2fe   :  { %4010 = vrot.lane.b32.xlu0 %v3987_v55, %s6297_s16  ;;  %v4527_v56 = vld [vmem:[#allocation4 + $0xb8] sm:$0xff]  ;;  %v4240_v51 = vmax.f32 %v4177_v19, %v4198_v10  ;;  %v3172_v33 = vmax.f32 %v3102_v34, 0.0  ;;  %v3508_v19 = vadd.f32 %v9001_v6, %v8503_v53 }
 0x2ff   :  { %v4521_v11 = vld [vmem:[#allocation4 + $0x88] sm:$0xff]  ;;  %v4524_v16 = vld [vmem:[#allocation4 + $0xa0] sm:$0xff]  ;;  %v4074_v29 = vsel %vm791_vm2, %v4071_v14, %v4073_v40  ;;  %v4137_v22 = vsel %vm919_vm3, %v4134_v31, %v4136_v48  ;;  %v4200_v59 = vsel %vm1047_vm4, %v4197_v36, %v4199_v52  ;;  %v4263_v58 = vsel %vm1175_vm5, %v4260_v7, %v4262_v9 }
 0x300   :  { %6094 = vmatmul.mubr.msk.f32.gmra.mrb[100].mxu0 %vm3846_vm6, %v4521_v11  ;;  %v4115_v3 = vmax.f32 %v3566_v23, %v4074_v29  ;;  %v4303_v25 = vmax.f32 %v4240_v51, %v4261_v12  ;;  %v3568_v61 = vadd.f32 %v3498_v42, %v3172_v33 }
 0x301   :  { %6096 = vmatprep.mubr.msk.f32.mxu0 %vm3846_vm6, %v4524_v16  ;;  %v3106_v39 = vpop.f32.mrb[46].mxu1 }
 0x302   :  { %v4178_v50 = vmax.f32 %v4115_v3, %v4137_v22  ;;  %4319 = vst.msk [vmem:[#allocation9 + $0x18] sm:$0xff] %vm3846_vm6, %v4303_v25  ;;  %v3107_v21 = vadd.f32 %v8995_v20, %v3106_v39  ;;  %v3108_v45 = vpop.f32.mrb[47].mxu1  ;;  %v4075_v54 = vrot.slane %v3568_v61, 1  ;;  %v4138_v44 = vrot.slane %v3568_v61, 2 }
 0x303   :  { %v4201_v30 = vrot.slane %v3568_v61, 3  ;;  %v4264_v11 = vrot.slane %v3568_v61, 4  ;;  %v3513_v45 = vadd.f32 %v9001_v6, %v8501_v49 }
 0x304   :  { %6097 = vmatmul.mubr.msk.f32.gmra.mrb[102].mxu0 %vm3846_vm6, %v4527_v56  ;;  %v4241_v1 = vmax.f32 %v4178_v50, %v4200_v59  ;;  %v3173_v43 = vmax.f32 %v3107_v21, 0.0  ;;  %v4076_v23 = vsel %vm791_vm2, %v4073_v40, %v4075_v54  ;;  %v4139_v27 = vsel %vm919_vm3, %v4136_v48, %v4138_v44  ;;  %v4373_v55 = vld [vmem:[#allocation7 + $0x1] sm:$0xff] }
 0x305   :  { %v4202_v17 = vsel %vm1047_vm4, %v4199_v52, %v4201_v30  ;;  %v4357_v8 = vld [vmem:[#allocation7] sm:$0xff]  ;;  %v4116_v14 = vmax.f32 %v3567_v60, %v4076_v23  ;;  %v4265_v31 = vsel %vm1175_vm5, %v4262_v9, %v4264_v11  ;;  %4389 = vrot.lane.b32.xlu1 %v4373_v55, %s6297_s16 }
 0x306   :  { %v4304_v18 = vmax.f32 %v4241_v1, %v4263_v58  ;;  %v3569_v36 = vadd.f32 %v3503_v62, %v3173_v43  ;;  %4365 = vst.msk [vmem:[#allocation4 + $0xc0] sm:$0xff] %vm3846_vm6, %v4357_v8  ;;  %v4421_v13 = vld [vmem:[#allocation7 + $0x2] sm:$0xff] }
 0x307   :  { %v3111_v46 = vpop.f32.mrb[48].mxu1  ;;  %4429 = vst.msk [vmem:[#allocation4 + $0xc8] sm:$0xff] %vm3846_vm6, %v4421_v13  ;;  %v4179_v7 = vmax.f32 %v4116_v14, %v4139_v27 }
 0x308   :  { %4320 = vst.msk [vmem:[#allocation9 + $0x20] sm:$0xff] %vm3846_vm6, %v4304_v18  ;;  %v4077_v37 = vrot.slane %v3569_v36, 1  ;;  %v4140_v5 = vrot.slane %v3569_v36, 2  ;;  %v4203_v35 = vrot.slane %v3569_v36, 3  ;;  %v3113_v26 = vpop.f32.mrb[49].mxu1  ;;  %v4266_v28 = vrot.slane %v3569_v36, 4 }
 0x309   :  { %v4333_v10 = vld [vmem:[#allocation9 + $0x10] ss:$2 sm:$0xff]  ;;  %v3112_v12 = vadd.f32 %v8995_v20, %v3111_v46  ;;  %v4242_v60 = vmax.f32 %v4179_v7, %v4202_v17 }
 0x30a   :  { %4341 = vst.msk [vmem:[#allocation5 + $0x48] sm:$0xff] %vm3846_vm6, %v4333_v10  ;;  %v4078_v16 = vsel %vm791_vm2, %v4075_v54, %v4077_v37  ;;  %v4141_v56 = vsel %vm919_vm3, %v4138_v44, %v4140_v5  ;;  %v4204_v15 = vsel %vm1047_vm4, %v4201_v30, %v4203_v35  ;;  %4350 = vst.msk [vmem:[#allocation7 + $0xa] sm:$0xff] %vm3846_vm6, %v4333_v10 }
 0x30b   :  { %v4117_v40 = vmax.f32 %v3568_v61, %v4078_v16  ;;  %v4267_v48 = vsel %vm1175_vm5, %v4264_v11, %v4266_v28  ;;  %v3174_v52 = vmax.f32 %v3112_v12, 0.0  ;;  %v4305_v24 = vmax.f32 %v4242_v60, %v4265_v31 }
 0x30c   :  { %v3518_v31 = vadd.f32 %v9001_v6, %v8523_v38 }
 0x30d   :  { %v4180_v9 = vmax.f32 %v4117_v40, %v4141_v56  ;;  %v3570_v34 = vadd.f32 %v3508_v19, %v3174_v52  ;;  %4321 = vst.msk [vmem:[#allocation9 + $0x28] sm:$0xff] %vm3846_vm6, %v4305_v24 }
 0x30f   :  { %v4243_v63 = vmax.f32 %v4180_v9, %v4204_v15  ;;  %v4079_v51 = vrot.slane %v3570_v34, 1  ;;  %v4142_v29 = vrot.slane %v3570_v34, 2  ;;  %v4205_v22 = vrot.slane %v3570_v34, 3 }
 0x310   :  { %v4268_v42 = vrot.slane %v3570_v34, 4 }
 0x311   :  { %v3116_v59 = vpop.f32.mrb[50].mxu1  ;;  %v4306_v33 = vmax.f32 %v4243_v63, %v4267_v48  ;;  %v4080_v53 = vsel %vm791_vm2, %v4077_v37, %v4079_v51  ;;  %v4143_v25 = vsel %vm919_vm3, %v4140_v5, %v4142_v29  ;;  %v4206_v50 = vsel %vm1047_vm4, %v4203_v35, %v4205_v22  ;;  %v4437_v61 = vld [vmem:[#allocation7 + $0x3] sm:$0xff] }
 0x312   :  { %v3117_v3 = vadd.f32 %v8995_v20, %v3116_v59  ;;  %v3118_v58 = vpop.f32.mrb[51].mxu1  ;;  %v4374_v39 = vld [vmem:[#allocation7 + $0x9] sm:$0xff]  ;;  %v4118_v1 = vmax.f32 %v3569_v36, %v4080_v53  ;;  %v4269_v54 = vsel %vm1175_vm5, %v4266_v28, %v4268_v42  ;;  %4453 = vrot.lane.b32.xlu0 %v4437_v61, %s6297_s16 }
 0x313   :  { %v4485_v21 = vld [vmem:[#allocation7 + $0x4] sm:$0xff]  ;;  %4391 = vrot.lane.b32.xlu1 %v4374_v39, %s6297_s16  ;;  %4322 = vst.msk [vmem:[#allocation9 + $0x30] sm:$0xff] %vm3846_vm6, %v4306_v33 }
 0x314   :  { %v3175_v44 = vmax.f32 %v3117_v3, 0.0  ;;  %4493 = vst.msk [vmem:[#allocation4 + $0xd0] sm:$0xff] %vm3846_vm6, %v4485_v21  ;;  %v4358_v30 = vld [vmem:[#allocation7 + $0x8] sm:$0xff]  ;;  %v4181_v11 = vmax.f32 %v4118_v1, %v4143_v25 }
 0x315   :  { %v4422_v62 = vld [vmem:[#allocation7 + $0xa] sm:$0xff]  ;;  %4366 = vst.msk [vmem:[#allocation4 + $0xd8] sm:$0xff] %vm3846_vm6, %v4358_v30 }
 0x316   :  { %4430 = vst.msk [vmem:[#allocation4 + $0xe0] sm:$0xff] %vm3846_vm6, %v4422_v62  ;;  %v3571_v49 = vadd.f32 %v3513_v45, %v3175_v44  ;;  %v3121_v43 = vpop.f32.mrb[52].mxu1  ;;  %v4334_v18 = vld [vmem:[#allocation9 + $0x20] ss:$2 sm:$0xff]  ;;  %v4244_v17 = vmax.f32 %v4181_v11, %v4206_v50  ;;  %v3528_v44 = vadd.f32 %v9001_v6, %v8594_v47  ;;  %v4953_v47 = vld [vmem:[#allocation5] sm:$0xff] }
 0x317   :  { %v3122_v23 = vadd.f32 %v8995_v20, %v3121_v43  ;;  %v3123_v27 = vpop.f32.mrb[53].mxu1  ;;  %4342 = vst.msk [vmem:[#allocation5 + $0x50] sm:$0xff] %vm3846_vm6, %v4334_v18  ;;  %4351 = vst.msk [vmem:[#allocation7 + $0x12] sm:$0xff] %vm3846_vm6, %v4334_v18 }
 0x318   :  { %v4081_v55 = vrot.slane %v3571_v49, 1  ;;  %v4144_v8 = vrot.slane %v3571_v49, 2  ;;  %v4207_v14 = vrot.slane %v3571_v49, 3  ;;  %v4270_v36 = vrot.slane %v3571_v49, 4 }
 0x319   :  { %v3176_v13 = vmax.f32 %v3122_v23, 0.0  ;;  %v4307_v46 = vmax.f32 %v4244_v17, %v4269_v54 }
 0x31a   :  { %v4082_v7 = vsel %vm791_vm2, %v4079_v51, %v4081_v55  ;;  %v4145_v37 = vsel %vm919_vm3, %v4142_v29, %v4144_v8  ;;  %v4208_v5 = vsel %vm1047_vm4, %v4205_v22, %v4207_v14  ;;  %v4271_v26 = vsel %vm1175_vm5, %v4268_v42, %v4270_v36 }
 0x31b   :  { %v4119_v35 = vmax.f32 %v3570_v34, %v4082_v7  ;;  %v3572_v10 = vadd.f32 %v3518_v31, %v3176_v13  ;;  %v4530_v28 = vld [vmem:[#allocation4 + $0xd0] sm:$0xff]  ;;  %4323 = vst.msk [vmem:[#allocation9 + $0x38] sm:$0xff] %vm3846_vm6, %v4307_v46  ;;  %v3523_v29 = vadd.f32 %v9001_v6, %v8519_v0 }
 0x31c   :  { %6099 = vmatprep.mubr.msk.f32.mxu0 %vm3846_vm6, %v4530_v28 }
 0x31d   :  { %v4182_v12 = vmax.f32 %v4119_v35, %v4145_v37  ;;  %v4083_v38 = vrot.slane %v3572_v10, 1  ;;  %v4146_v60 = vrot.slane %v3572_v10, 2  ;;  %v4209_v16 = vrot.slane %v3572_v10, 3  ;;  %v3126_v56 = vpop.f32.mrb[54].mxu1 }
 0x31e   :  { %v4272_v15 = vrot.slane %v3572_v10, 4  ;;  %v3127_v19 = vadd.f32 %v8995_v20, %v3126_v56  ;;  %v3128_v40 = vpop.f32.mrb[55].mxu1  ;;  %v4438_v34 = vld [vmem:[#allocation7 + $0xb] sm:$0xff] }
 0x31f   :  { %v4245_v48 = vmax.f32 %v4182_v12, %v4208_v5  ;;  %v4084_v52 = vsel %vm791_vm2, %v4081_v55, %v4083_v38  ;;  %v4147_v24 = vsel %vm919_vm3, %v4144_v8, %v4146_v60  ;;  %v4210_v9 = vsel %vm1047_vm4, %v4207_v14, %v4209_v16  ;;  %v4375_v63 = vld [vmem:[#allocation7 + $0x11] sm:$0xff]  ;;  %4455 = vrot.lane.b32.xlu0 %v4438_v34, %s6297_s16 }
 0x320   :  { %v4486_v51 = vld [vmem:[#allocation7 + $0xc] sm:$0xff]  ;;  %v4120_v22 = vmax.f32 %v3571_v49, %v4084_v52  ;;  %v4273_v59 = vsel %vm1175_vm5, %v4270_v36, %v4272_v15  ;;  %v3177_v42 = vmax.f32 %v3127_v19, 0.0  ;;  %4393 = vrot.lane.b32.xlu1 %v4375_v63, %s6297_s16 }
 0x321   :  { %4494 = vst.msk [vmem:[#allocation4 + $0xe8] sm:$0xff] %vm3846_vm6, %v4486_v51  ;;  %v4359_v3 = vld [vmem:[#allocation7 + $0x10] sm:$0xff]  ;;  %v4308_v33 = vmax.f32 %v4245_v48, %v4271_v26 }
 0x322   :  { %v4423_v58 = vld [vmem:[#allocation7 + $0x12] sm:$0xff]  ;;  %4367 = vst.msk [vmem:[#allocation4 + $0xf0] sm:$0xff] %vm3846_vm6, %v4359_v3  ;;  %v4183_v53 = vmax.f32 %v4120_v22, %v4147_v24  ;;  %v3573_v25 = vadd.f32 %v3523_v29, %v3177_v42 }
 0x323   :  { %4431 = vst.msk [vmem:[#allocation4 + $0xf8] sm:$0xff] %vm3846_vm6, %v4423_v58  ;;  %v4335_v50 = vld [vmem:[#allocation9 + $0x30] ss:$2 sm:$0xff]  ;;  %4324 = vst.msk [vmem:[#allocation9 + $0x40] sm:$0xff] %vm3846_vm6, %v4308_v33  ;;  %v4956_v33 = vld [vmem:[#allocation5 + $0x18] sm:$0xff] }
 0x324   :  { %4343 = vst.msk [vmem:[#allocation5 + $0x58] sm:$0xff] %vm3846_vm6, %v4335_v50  ;;  %4352 = vst.msk [vmem:[#allocation7 + $0x1a] sm:$0xff] %vm3846_vm6, %v4335_v50  ;;  %v4246_v21 = vmax.f32 %v4183_v53, %v4210_v9  ;;  %v4085_v45 = vrot.slane %v3573_v25, 1  ;;  %v4148_v1 = vrot.slane %v3573_v25, 2  ;;  %v4211_v54 = vrot.slane %v3573_v25, 3  ;;  %v4955_v9 = vld [vmem:[#allocation5 + $0x10] sm:$0xff] }
 0x325   :  { %v3131_v0 = vpop.f32.mrb[56].mxu1  ;;  %v4274_v30 = vrot.slane %v3573_v25, 4  ;;  %v3538_v53 = vadd.f32 %v9001_v6, %v8619_v57  ;;  %v4957_v50 = vld [vmem:[#allocation5 + $0x20] sm:$0xff] }
 0x326   :  { %v3132_v61 = vadd.f32 %v8995_v20, %v3131_v0  ;;  %v3133_v39 = vpop.f32.mrb[57].mxu1  ;;  %v4309_v11 = vmax.f32 %v4246_v21, %v4273_v59  ;;  %v4086_v49 = vsel %vm791_vm2, %v4083_v38, %v4085_v45  ;;  %v4149_v43 = vsel %vm919_vm3, %v4146_v60, %v4148_v1  ;;  %v4954_v38 = vld [vmem:[#allocation5 + $0x8] sm:$0xff] }
 0x327   :  { %v4212_v18 = vsel %vm1047_vm4, %v4209_v16, %v4211_v54  ;;  %v4121_v23 = vmax.f32 %v3572_v10, %v4086_v49  ;;  %v4275_v27 = vsel %vm1175_vm5, %v4272_v15, %v4274_v30  ;;  %v3533_v60 = vadd.f32 %v9001_v6, %v8588_v2 }
 0x328   :  { %v3178_v62 = vmax.f32 %v3132_v61, 0.0  ;;  %v4533_v55 = vld [vmem:[#allocation4 + $0xe8] sm:$0xff]  ;;  %4325 = vst.msk [vmem:[#allocation9 + $0x48] sm:$0xff] %vm3846_vm6, %v4309_v11 }
 0x329   :  { %6100 = vmatmul.mubr.msk.f32.gmra.mrb[104].mxu0 %vm3846_vm6, %v4533_v55  ;;  %v4184_v8 = vmax.f32 %v4121_v23, %v4149_v43 }
 0x32a   :  { %v9132_v17 = vadd.f32 %v3528_v44, %v3178_v62  ;;  %6127 = vmatprep.mubr.msk.f32.mxu0 %vm3846_vm6, %v4953_v47  ;;  %v4958_v44 = vld [vmem:[#allocation5 + $0x28] sm:$0xff] }
 0x32b   :  { %v4247_v5 = vmax.f32 %v4184_v8, %v4212_v18  ;;  %v4439_v28 = vld [vmem:[#allocation7 + $0x13] sm:$0xff]  ;;  %v4959_v18 = vld [vmem:[#allocation5 + $0x30] sm:$0xff] }
 0x32c   :  { %v4087_v14 = vrot.slane %v9132_v17, 1  ;;  %v4150_v31 = vrot.slane %v9132_v17, 2  ;;  %v4213_v36 = vrot.slane %v9132_v17, 3  ;;  %v3136_v13 = vpop.f32.mrb[58].mxu1  ;;  %v4276_v46 = vrot.slane %v9132_v17, 4  ;;  %v4376_v12 = vld [vmem:[#allocation7 + $0x19] sm:$0xff]  ;;  %v3931_v16 = vpop.permute.xlu1 %3930  ;;  %4457 = vrot.lane.b32.xlu0 %v4439_v28, %s6297_s16 }
 0x32d   :  { %v3137_v7 = vadd.f32 %v8995_v20, %v3136_v13  ;;  %v3138_v37 = vpop.f32.mrb[59].mxu1  ;;  %4395 = vrot.lane.b32.xlu1 %v4376_v12, %s6297_s16  ;;  %v4360_v40 = vld [vmem:[#allocation7 + $0x18] sm:$0xff]  ;;  %3955 = vst.msk [vmem:[#allocation4] sm:$0xff] %vm3954_vm10, %v3931_v16  ;;  %v4310_v24 = vmax.f32 %v4247_v5, %v4275_v27  ;;  %6128 = vmatmul.mubr.msk.f32.vlgmr.msra.gmra.mrb[106].mxu0 %vm3846_vm6, %v4954_v38 }
 0x32e   :  { %v4088_v35 = vsel %vm791_vm2, %v4085_v45, %v4087_v14  ;;  %v4151_v26 = vsel %vm919_vm3, %v4148_v1, %v4150_v31  ;;  %v4214_v10 = vsel %vm1047_vm4, %v4211_v54, %v4213_v36  ;;  %v4277_v15 = vsel %vm1175_vm5, %v4274_v30, %v4276_v46  ;;  %v4424_v48 = vld [vmem:[#allocation7 + $0x1a] sm:$0xff]  ;;  %4368 = vst.msk [vmem:[#allocation4 + $0x108] sm:$0xff] %vm3846_vm6, %v4360_v40 }
 0x32f   :  { %v4122_v56 = vmax.f32 %v3573_v25, %v4088_v35  ;;  %v3179_v19 = vmax.f32 %v3137_v7, 0.0  ;;  %v4487_v52 = vld [vmem:[#allocation7 + $0x14] sm:$0xff]  ;;  %4432 = vst.msk [vmem:[#allocation4 + $0x110] sm:$0xff] %vm3846_vm6, %v4424_v48  ;;  %6130 = vmatprep.mubr.msk.f32.mxu0 %vm3846_vm6, %v4955_v9  ;;  %4326 = vst.msk [vmem:[#allocation9 + $0x50] sm:$0xff] %vm3846_vm6, %v4310_v24  ;;  %v4962_v40 = vld [vmem:[#allocation5 + $0x48] sm:$0xff] }
 0x330   :  { %4495 = vst.msk [vmem:[#allocation4 + $0x100] sm:$0xff] %vm3846_vm6, %v4487_v52  ;;  %v4336_v51 = vld [vmem:[#allocation9 + $0x40] ss:$2 sm:$0xff]  ;;  %v4961_v38 = vld [vmem:[#allocation5 + $0x40] sm:$0xff] }
 0x331   :  { %v4185_v2 = vmax.f32 %v4122_v56, %v4151_v26  ;;  %v9155_v34 = vadd.f32 %v3533_v60, %v3179_v19  ;;  %v3141_v63 = vpop.f32.mrb[60].mxu1  ;;  %4344 = vst.msk [vmem:[#allocation5 + $0x60] sm:$0xff] %vm3846_vm6, %v4336_v51  ;;  %4353 = vst.msk [vmem:[#allocation7 + $0x22] sm:$0xff] %vm3846_vm6, %v4336_v51  ;;  %6131 = vmatmul.mubr.msk.f32.gmra.mrb[108].mxu0 %vm3846_vm6, %v4956_v33  ;;  %v4960_v7 = vld [vmem:[#allocation5 + $0x38] sm:$0xff]  ;;  %v4963_v52 = vld [vmem:[#allocation5 + $0x50] sm:$0xff] }
 0x332   :  { %v3142_v29 = vadd.f32 %v8995_v20, %v3141_v63  ;;  %v3143_v22 = vpop.f32.mrb[61].mxu1  ;;  %6133 = vmatprep.mubr.msk.f32.mxu0 %vm3846_vm6, %v4957_v50  ;;  %v4964_v33 = vld [vmem:[#allocation5 + $0x58] sm:$0xff] }
 0x333   :  { %v4248_v59 = vmax.f32 %v4185_v2, %v4214_v10  ;;  %v4089_v42 = vrot.slane %v9155_v34, 1  ;;  %v4152_v3 = vrot.slane %v9155_v34, 2  ;;  %v4215_v58 = vrot.slane %v9155_v34, 3 }
 0x334   :  { %v4278_v25 = vrot.slane %v9155_v34, 4  ;;  %v3180_v0 = vmax.f32 %v3142_v29, 0.0  ;;  %v4504_v51 = vld [vmem:[#allocation4] sm:$0xff] }
 0x335   :  { %v4311_v61 = vmax.f32 %v4248_v59, %v4277_v15  ;;  %v4090_v39 = vsel %vm791_vm2, %v4087_v14, %v4089_v42  ;;  %v4153_v21 = vsel %vm919_vm3, %v4150_v31, %v4152_v3  ;;  %v4216_v45 = vsel %vm1047_vm4, %v4213_v36, %v4215_v58  ;;  %6134 = vmatmul.mubr.msk.f32.gmra.mrb[110].mxu0 %vm3846_vm6, %v4958_v44 }
 0x336   :  { %v4123_v1 = vmax.f32 %v9132_v17, %v4090_v39  ;;  %v4279_v54 = vsel %vm1175_vm5, %v4276_v46, %v4278_v25  ;;  %v9175_v57 = vadd.f32 %v3538_v53, %v3180_v0  ;;  %6136 = vmatprep.mubr.msk.f32.mxu0 %vm3846_vm6, %v4959_v18 }
 0x337   :  { %4327 = vst.msk [vmem:[#allocation9 + $0x58] sm:$0xff] %vm3846_vm6, %v4311_v61 }
 0x338   :  { %v4186_v30 = vmax.f32 %v4123_v1, %v4153_v21  ;;  %v4091_v62 = vrot.slane %v9175_v57, 1  ;;  %v4154_v11 = vrot.slane %v9175_v57, 2  ;;  %v4217_v49 = vrot.slane %v9175_v57, 3  ;;  %v3146_v43 = vpop.f32.mrb[62].mxu1  ;;  %v3997_v23 = vpop.permute.xlu0 %3996  ;;  %v4440_v13 = vld [vmem:[#allocation7 + $0x1b] sm:$0xff] }
 0x339   :  { %v3933_v27 = vpop.permute.xlu1 %3932  ;;  %v4280_v17 = vrot.slane %v9175_v57, 4  ;;  %v3147_v55 = vadd.f32 %v8995_v20, %v3146_v43  ;;  %4020 = vst.msk [vmem:[#allocation4 + $0x8] sm:$0xff] %vm3954_vm10, %v3997_v23  ;;  %v3148_v36 = vpop.f32.mrb[63].mxu1  ;;  %v4377_v46 = vld [vmem:[#allocation7 + $0x21] sm:$0xff]  ;;  %v3543_v20 = vadd.f32 %v9001_v6, %v8614_v41  ;;  %4459 = vrot.lane.b32.xlu0 %v4440_v13, %s6297_s16  ;;  %6137 = vmatmul.mubr.msk.f32.gmra.mrb[112].mxu0 %vm3846_vm6, %v4960_v7  ;;  %v9522_v43 = vld [vmem:[#allocation15_spill] sm:$0xff] }
 0x33a   :  { %3956 = vst.msk [vmem:[#allocation4 + $0x18] sm:$0xff] %vm3954_vm10, %v3933_v27  ;;  %v4249_v47 = vmax.f32 %v4186_v30, %v4216_v45  ;;  %v4092_v8 = vsel %vm791_vm2, %v4089_v42, %v4091_v62  ;;  %v4155_v14 = vsel %vm919_vm3, %v4152_v3, %v4154_v11  ;;  %v4218_v31 = vsel %vm1047_vm4, %v4215_v58, %v4217_v49  ;;  %v4361_v26 = vld [vmem:[#allocation7 + $0x20] sm:$0xff]  ;;  %v9521_v30 = vld [vmem:[#allocation14_spill] sm:$0xff] }
 0x33b   :  { %v4124_v37 = vmax.f32 %v9155_v34, %v4092_v8  ;;  %v4281_v5 = vsel %vm1175_vm5, %v4278_v25, %v4280_v17  ;;  %v3181_v35 = vmax.f32 %v3147_v55, 0.0  ;;  %4397 = vrot.lane.b32.xlu1 %v4377_v46, %s6297_s16  ;;  %v4425_v10 = vld [vmem:[#allocation7 + $0x22] sm:$0xff]  ;;  %4369 = vst.msk [vmem:[#allocation4 + $0x120] sm:$0xff] %vm3846_vm6, %v4361_v26  ;;  %6139 = vmatprep.mubr.msk.f32.mxu0 %vm3846_vm6, %v4961_v38  ;;  %v4965_v25 = vld [vmem:[#allocation5 + $0x60] sm:$0xff] }
 0x33c   :  { %v4488_v28 = vld [vmem:[#allocation7 + $0x1c] sm:$0xff]  ;;  %v4312_v12 = vmax.f32 %v4249_v47, %v4279_v54  ;;  %4433 = vst.msk [vmem:[#allocation4 + $0x128] sm:$0xff] %vm3846_vm6, %v4425_v10 }
 0x33d   :  { %4496 = vst.msk [vmem:[#allocation4 + $0x118] sm:$0xff] %vm3846_vm6, %v4488_v28  ;;  %v4187_v41 = vmax.f32 %v4124_v37, %v4155_v14  ;;  %v3577_v6 = vadd.f32 %v3543_v20, %v3181_v35  ;;  %6140 = vmatmul.mubr.msk.f32.gmra.mrb[114].mxu0 %vm3846_vm6, %v4962_v40 }
 0x33e   :  { %v4337_v60 = vld [vmem:[#allocation9 + $0x50] ss:$2 sm:$0xff]  ;;  %4328 = vst.msk [vmem:[#allocation9 + $0x60] sm:$0xff] %vm3846_vm6, %v4312_v12  ;;  %6142 = vmatprep.mubr.msk.f32.mxu0 %vm3846_vm6, %v4963_v52 }
 0x33f   :  { %4345 = vst.msk [vmem:[#allocation5 + $0x68] sm:$0xff] %vm3846_vm6, %v4337_v60  ;;  %4354 = vst.msk [vmem:[#allocation7 + $0x2a] sm:$0xff] %vm3846_vm6, %v4337_v60  ;;  %v4250_v16 = vmax.f32 %v4187_v41, %v4218_v31  ;;  %v4093_v56 = vrot.slane %v3577_v6, 1  ;;  %v4156_v15 = vrot.slane %v3577_v6, 2  ;;  %v4219_v19 = vrot.slane %v3577_v6, 3 }
 0x340   :  { %v4282_v48 = vrot.slane %v3577_v6, 4  ;;  %v4505_v9 = vld [vmem:[#allocation4 + $0x8] sm:$0xff] }
 0x341   :  { %v4313_v24 = vmax.f32 %v4250_v16, %v4281_v5  ;;  %v4094_v2 = vsel %vm791_vm2, %v4091_v62, %v4093_v56  ;;  %v4126_v34 = vmax.f32 %v3577_v6, %v4093_v56  ;;  %v4157_v63 = vsel %vm919_vm3, %v4154_v11, %v4156_v15  ;;  %4711 = vmatprep.mubr.f32.mxu1 %v4505_v9 }
 0x342   :  { %v4125_v29 = vmax.f32 %v9175_v57, %v4094_v2  ;;  %v4220_v22 = vsel %vm1047_vm4, %v4217_v49, %v4219_v19  ;;  %v4283_v59 = vsel %vm1175_vm5, %v4280_v17, %v4282_v48  ;;  %4712 = vmatmul.mubr.f32.vlgmr.msra.gmra.mrb[64].mxu1 %v4504_v51  ;;  %v3935_v3 = vpop.permute.xlu1 %3934  ;;  %6143 = vmatmul.mubr.msk.f32.gmra.mrb[116].mxu0 %vm3846_vm6, %v4964_v33  ;;  %v4507_v49 = vld [vmem:[#allocation4 + $0x18] sm:$0xff] }
 0x343   :  { %4329 = vst.msk [vmem:[#allocation9 + $0x68] sm:$0xff] %vm3846_vm6, %v4313_v24  ;;  %v3999_v42 = vpop.permute.xlu0 %3998  ;;  %v4189_v58 = vmax.f32 %v4126_v34, %v4156_v15  ;;  %6257 = vmatpush3.bf16.msra.mxu1 %v8440_v4  ;;  %6145 = vmatprep.mubr.msk.f32.mxu0 %vm3846_vm6, %v4965_v25 }
 0x344   :  { %4021 = vst.msk [vmem:[#allocation4 + $0x20] sm:$0xff] %vm3954_vm10, %v3999_v42  ;;  %3957 = vst.msk [vmem:[#allocation4 + $0x30] sm:$0xff] %vm3954_vm10, %v3935_v3  ;;  %v4188_v53 = vmax.f32 %v4125_v29, %v4157_v63  ;;  %6254 = vmatprep.subr.bf16.mxu1 %v8446_v32 }
 0x345   :  { %v4252_v0 = vmax.f32 %v4189_v58, %v4219_v19 }
 0x346   :  { %v4251_v50 = vmax.f32 %v4188_v53, %v4220_v22  ;;  %v4441_v61 = vld [vmem:[#allocation7 + $0x23] sm:$0xff] }
 0x347   :  { %v4378_v39 = vld [vmem:[#allocation7 + $0x29] sm:$0xff]  ;;  %v4966_v21 = vld [vmem:[#allocation5 + $0x68] sm:$0xff]  ;;  %v4315_v45 = vmax.f32 %v4252_v0, %v4282_v48  ;;  %4461 = vrot.lane.b32.xlu0 %v4441_v61, %s6297_s16  ;;  %6258 = vmatpush3.bf16.msra.mxu1 %v8446_v32 }
 0x348   :  { %4399 = vrot.lane.b32.xlu1 %v4378_v39, %s6297_s16  ;;  %v4362_v1 = vld [vmem:[#allocation7 + $0x28] sm:$0xff]  ;;  %v4314_v44 = vmax.f32 %v4251_v50, %v4283_v59  ;;  %6146 = vmatmul.mubr.msk.f32.gmra.mrb[118].mxu0 %vm3846_vm6, %v4966_v21  ;;  %v4001_v4 = vpop.permute.xlu0 %4000 }
 0x349   :  { %v4426_v54 = vld [vmem:[#allocation7 + $0x2a] sm:$0xff]  ;;  %4370 = vst.msk [vmem:[#allocation4 + $0x138] sm:$0xff] %vm3846_vm6, %v4362_v1  ;;  %6255 = vmatprep.subr.bf16.mxu1 %v9521_v30  ;;  %v3937_v11 = vpop.permute.xlu1 %3936 }
 0x34a   :  { %v4489_v57 = vld [vmem:[#allocation7 + $0x24] sm:$0xff]  ;;  %4434 = vst.msk [vmem:[#allocation4 + $0x140] sm:$0xff] %vm3846_vm6, %v4426_v54  ;;  %4330 = vst.msk [vmem:[#allocation9 + $0x70] sm:$0xff] %vm3846_vm6, %v4314_v44 }
 0x34b   :  { %4497 = vst.msk [vmem:[#allocation4 + $0x130] sm:$0xff] %vm3846_vm6, %v4489_v57  ;;  %v4338_v62 = vld [vmem:[#allocation9 + $0x60] ss:$2 sm:$0xff]  ;;  %v4508_v32 = vld [vmem:[#allocation4 + $0x20] sm:$0xff]  ;;  %6259 = vmatpush3.bf16.msra.mxu1 %v9521_v30 }
 0x34c   :  { %4331 = vst.msk [vmem:[#allocation9 + $0x78] sm:$0x1] %vm3862_vm8, %v4315_v45  ;;  %4716 = vmatprep.mubr.f32.mxu1 %v4508_v32  ;;  %6256 = vmatprep.subr.bf16.mxu1 %v9522_v43  ;;  %v4510_v27 = vld [vmem:[#allocation4 + $0x30] sm:$0xff] }
 0x34d   :  { %4022 = vst.msk [vmem:[#allocation4 + $0x38] sm:$0xff] %vm3954_vm10, %v4001_v4  ;;  %3958 = vst.msk [vmem:[#allocation4 + $0x48] sm:$0xff] %vm3954_vm10, %v3937_v11  ;;  %4717 = vmatmul.mubr.f32.gmra.mrb[66].mxu1 %v4507_v49 }
 0x34e   :  { %4346 = vst.msk [vmem:[#allocation5 + $0x70] sm:$0xff] %vm3846_vm6, %v4338_v62  ;;  %4355 = vst.msk [vmem:[#allocation7 + $0x32] sm:$0xff] %vm3846_vm6, %v4338_v62 }
 0x34f   :  { %6260 = vmatpush3.bf16.msra.mxu1 %v9522_v43 }
 0x353   :  { %v4339_v18 = vld [vmem:[#allocation9 + $0x70] ss:$2 sm:$0x1f]  ;;  %v4003_v8 = vpop.permute.xlu0 %4002 }
 0x354   :  { %v4511_v23 = vld [vmem:[#allocation4 + $0x38] sm:$0xff]  ;;  %4347 = vst.msk [vmem:[#allocation5 + $0x78] sm:$0x1f] %vm3886_vm9, %v4339_v18  ;;  %4356 = vst.msk [vmem:[#allocation7 + $0x3a] sm:$0x1f] %vm3886_vm9, %v4339_v18  ;;  %v3939_v14 = vpop.permute.xlu1 %3938  ;;  %v4513_v12 = vld [vmem:[#allocation4 + $0x48] sm:$0xff] }
 0x355   :  { %4721 = vmatprep.mubr.f32.mxu1 %v4511_v23  ;;  %v4442_v17 = vld [vmem:[#allocation7 + $0x2b] sm:$0xff]  ;;  %4023 = vst.msk [vmem:[#allocation4 + $0x50] sm:$0xff] %vm3954_vm10, %v4003_v8  ;;  %3959 = vst.msk [vmem:[#allocation4 + $0x60] sm:$0xff] %vm3954_vm10, %v3939_v14 }
 0x356   :  { %v4379_v55 = vld [vmem:[#allocation7 + $0x31] sm:$0xff]  ;;  %v4967_v47 = vld [vmem:[#allocation5 + $0x70] sm:$0xff]  ;;  %4722 = vmatmul.mubr.f32.gmra.mrb[68].mxu1 %v4510_v27  ;;  %4463 = vrot.lane.b32.xlu0 %v4442_v17, %s6297_s16 }
 0x357   :  { %v4363_v31 = vld [vmem:[#allocation7 + $0x30] sm:$0xff]  ;;  %4401 = vrot.lane.b32.xlu1 %v4379_v55, %s6297_s16  ;;  %6148 = vmatprep.mubr.msk.f32.mxu0 %vm3846_vm6, %v4967_v47 }
 0x358   :  { %v4427_v36 = vld [vmem:[#allocation7 + $0x32] sm:$0xff]  ;;  %4371 = vst.msk [vmem:[#allocation4 + $0x150] sm:$0xff] %vm3846_vm6, %v4363_v31 }
 0x359   :  { %4435 = vst.msk [vmem:[#allocation4 + $0x158] sm:$0xff] %vm3846_vm6, %v4427_v36  ;;  %v4490_v13 = vld [vmem:[#allocation7 + $0x2c] sm:$0xff] }
 0x35a   :  { %4498 = vst.msk [vmem:[#allocation4 + $0x148] sm:$0xff] %vm3846_vm6, %v4490_v13  ;;  %v4005_v46 = vpop.permute.xlu0 %4004 }
 0x35b   :  { %v4443_v7 = vld [vmem:[#allocation7 + $0x33] sm:$0xff]  ;;  %4024 = vst.msk [vmem:[#allocation4 + $0x68] sm:$0xff] %vm3954_vm10, %v4005_v46  ;;  %v3941_v5 = vpop.permute.xlu1 %3940  ;;  %v4492_v38 = vld [vmem:[#allocation7 + $0x3c] sm:$0x1f] }
 0x35c   :  { %v4380_v20 = vld [vmem:[#allocation7 + $0x39] sm:$0x1f]  ;;  %v4968_v37 = vld [vmem:[#allocation5 + $0x78] sm:$0xff]  ;;  %4465 = vrot.lane.b32.xlu0 %v4443_v7, %s6297_s16  ;;  %v4514_v10 = vld [vmem:[#allocation4 + $0x50] sm:$0xff]  ;;  %3960 = vst.msk [vmem:[#allocation4 + $0x78] sm:$0xff] %vm3954_vm10, %v3941_v5 }
 0x35d   :  { %4403 = vrot.lane.b32.xlu1 %v4380_v20, %s6297_s16  ;;  %v4364_v35 = vld [vmem:[#allocation7 + $0x38] sm:$0x1f]  ;;  %6149 = vmatmul.mubr.msk.f32.gmra.mrb[120].mxu0 %vm3846_vm6, %v4968_v37  ;;  %4500 = vst.msk [vmem:[#allocation4 + $0x178] sm:$0x1f] %vm3886_vm9, %v4492_v38  ;;  %v4539_v20 = vld [vmem:[#allocation4 + $0x118] sm:$0xff]  ;;  %v4542_v37 = vld [vmem:[#allocation4 + $0x130] sm:$0xff] }
 0x35e   :  { %v4428_v26 = vld [vmem:[#allocation7 + $0x3a] sm:$0x1f]  ;;  %4372 = vst.msk [vmem:[#allocation4 + $0x168] sm:$0x1f] %vm3886_vm9, %v4364_v35  ;;  %4726 = vmatprep.mubr.f32.mxu1 %v4514_v10 }
 0x35f   :  { %4436 = vst.msk [vmem:[#allocation4 + $0x170] sm:$0x1f] %vm3886_vm9, %v4428_v26  ;;  %v4491_v28 = vld [vmem:[#allocation7 + $0x34] sm:$0xff]  ;;  %4727 = vmatmul.mubr.f32.gmra.mrb[70].mxu1 %v4513_v12 }
 0x360   :  { %4499 = vst.msk [vmem:[#allocation4 + $0x160] sm:$0xff] %vm3846_vm6, %v4491_v28  ;;  %v4444_v41 = vld [vmem:[#allocation7 + $0x3b] sm:$0x1f] }
 0x361   :  { %4467 = vrot.lane.b32.xlu0 %v4444_v41, %s6297_s16  ;;  %v4516_v60 = vld [vmem:[#allocation4 + $0x60] sm:$0xff]  ;;  %v4545_v5 = vld [vmem:[#allocation4 + $0x148] sm:$0xff] }
 0x362   :  { %v4517_v6 = vld [vmem:[#allocation4 + $0x68] sm:$0xff]  ;;  %v4536_v7 = vld [vmem:[#allocation4 + $0x100] sm:$0xff] }
 0x363   :  { %4731 = vmatprep.mubr.f32.mxu1 %v4517_v6  ;;  %v4519_v48 = vld [vmem:[#allocation4 + $0x78] sm:$0xff] }
 0x364   :  { %4732 = vmatmul.mubr.f32.gmra.mrb[72].mxu1 %v4516_v60  ;;  %v4551_v26 = vld [vmem:[#allocation4 + $0x178] sm:$0xff] }
 0x367   :  { %v4548_v35 = vld [vmem:[#allocation4 + $0x160] sm:$0xff] }
 0x368   :  { %v4007_v16 = vpop.permute.xlu0 %4006 }
 0x369   :  { %4025 = vst.msk [vmem:[#allocation4 + $0x80] sm:$0xff] %vm3954_vm10, %v4007_v16  ;;  %v3943_v56 = vpop.permute.xlu1 %3942 }
 0x36a   :  { %3961 = vst.msk [vmem:[#allocation4 + $0x90] sm:$0xff] %vm3954_vm10, %v3943_v56 }
 0x36c   :  { %v4009_v15 = vpop.permute.xlu0 %4008 }
 0x36d   :  { %4026 = vst.msk [vmem:[#allocation4 + $0x98] sm:$0xff] %vm3954_vm10, %v4009_v15  ;;  %v3945_v19 = vpop.permute.xlu1 %3944 }
 0x36e   :  { %3963 = vst.msk [vmem:[#allocation4 + $0xa8] sm:$0x1f] %vm3962_vm11, %v3945_v19  ;;  %v9315_v19 = vld [vmem:[%s9510_s10] ss:$0 sm:$0xff] }
 0x370   :  { %v4520_v40 = vld [vmem:[#allocation4 + $0x80] sm:$0xff]  ;;  %v4011_v52 = vpop.permute.xlu0 %4010 }
 0x371   :  { %4736 = vmatprep.mubr.f32.mxu1 %v4520_v40  ;;  %4027 = vst.msk [vmem:[#allocation4 + $0xb0] sm:$0x1f] %vm3962_vm11, %v4011_v52  ;;  %v4522_v9 = vld [vmem:[#allocation4 + $0x90] sm:$0xff] }
 0x372   :  { %4737 = vmatmul.mubr.f32.gmra.mrb[74].mxu1 %v4519_v48 }
 0x374   :  { %v4523_v24 = vld [vmem:[#allocation4 + $0x98] sm:$0xff] }
 0x375   :  { %4741 = vmatprep.mubr.f32.mxu1 %v4523_v24  ;;  %v4525_v34 = vld [vmem:[#allocation4 + $0xa8] sm:$0xff] }
 0x376   :  { %4742 = vmatmul.mubr.f32.gmra.mrb[76].mxu1 %v4522_v9 }
 0x377   :  { %v4390_v63 = vpop.permute.xlu1 %4389 }
 0x378   :  { %v4526_v2 = vld [vmem:[#allocation4 + $0xb0] sm:$0xff]  ;;  %4413 = vst.msk [vmem:[#allocation4 + $0xc0] sm:$0xff] %vm3954_vm10, %v4390_v63 }
 0x379   :  { %4746 = vmatprep.mubr.f32.mxu1 %v4526_v2  ;;  %v9326_v2 = vld [vmem:[%s9508_s8] ss:$0 sm:$0xff]  ;;  %s6300_s8 = smov [#allocation11]  }
 0x37a   :  { %4747 = vmatmul.mubr.f32.gmra.mrb[78].mxu1 %v4525_v34  ;;  %s5515_s10 = sshll.u32 %s6300_s8, 4  ;;  %s5516_s10 = int_to_ptr.vmem [resolvable:$true] %s5515_s10 }
 0x37b   :  { %s6271_s28 = scalar_lea.vmem %s5516_s10, 32  ;;  %p6276_p1 = scmp.lt.s32.totalorder %s5516_s10, %s5516_s10 }
 0x37c   :  { %p6272_p0 = scmp.ne.s32.totalorder %s5516_s10, %s6271_s28  ;;  %p6277_p2 = scmp.lt.s32.totalorder %s6271_s28, %s6271_s28 }
 0x37e   :  { %p6278_p3 = por %p6277_p2, %p6276_p1 }
 0x37f   :  { %v4528_v59 = vld [vmem:[#allocation4 + $0xc0] sm:$0xff] }
 0x380   :  { %p6279_p4 = pnand %p6278_p3, %p6272_p0 }
 0x384   :  { %v4454_v51 = vpop.permute.xlu0 %4453 }
 0x385   :  { %v4392_v29 = vpop.permute.xlu1 %4391  ;;  %4477 = vst.msk [vmem:[#allocation4 + $0xc8] sm:$0xff] %vm3954_vm10, %v4454_v51 }
 0x386   :  { %4414 = vst.msk [vmem:[#allocation4 + $0xd8] sm:$0xff] %vm3954_vm10, %v4392_v29 }
 0x38c   :  { %v4529_v22 = vld [vmem:[#allocation4 + $0xc8] sm:$0xff] }
 0x38d   :  { %4751 = vmatprep.mubr.f32.mxu1 %v4529_v22  ;;  %v4531_v33 = vld [vmem:[#allocation4 + $0xd8] sm:$0xff] }
 0x38e   :  { %4752 = vmatmul.mubr.f32.gmra.mrb[80].mxu1 %v4528_v59 }
 0x391   :  { %v4456_v42 = vpop.permute.xlu0 %4455 }
 0x392   :  { %v4394_v3 = vpop.permute.xlu1 %4393  ;;  %4478 = vst.msk [vmem:[#allocation4 + $0xe0] sm:$0xff] %vm3954_vm10, %v4456_v42 }
 0x393   :  { %4415 = vst.msk [vmem:[#allocation4 + $0xf0] sm:$0xff] %vm3954_vm10, %v4394_v3 }
 0x399   :  { %v4532_v58 = vld [vmem:[#allocation4 + $0xe0] sm:$0xff] }
 0x39a   :  { %4756 = vmatprep.mubr.f32.mxu1 %v4532_v58  ;;  %v4534_v50 = vld [vmem:[#allocation4 + $0xf0] sm:$0xff] }
 0x39b   :  { %4757 = vmatmul.mubr.f32.gmra.mrb[82].mxu1 %v4531_v33 }
 0x39e   :  { %v4458_v53 = vpop.permute.xlu0 %4457 }
 0x39f   :  { %v4396_v25 = vpop.permute.xlu1 %4395  ;;  %4479 = vst.msk [vmem:[#allocation4 + $0xf8] sm:$0xff] %vm3954_vm10, %v4458_v53 }
 0x3a0   :  { %4416 = vst.msk [vmem:[#allocation4 + $0x108] sm:$0xff] %vm3954_vm10, %v4396_v25 }
 0x3a6   :  { %v4535_v0 = vld [vmem:[#allocation4 + $0xf8] sm:$0xff] }
 0x3a7   :  { %4761 = vmatprep.mubr.f32.mxu1 %v4535_v0  ;;  %v4537_v54 = vld [vmem:[#allocation4 + $0x108] sm:$0xff] }
 0x3a8   :  { %4762 = vmatmul.mubr.f32.gmra.mrb[84].mxu1 %v4534_v50 }
 0x3ab   :  { %v4460_v21 = vpop.permute.xlu0 %4459 }
 0x3ac   :  { %4480 = vst.msk [vmem:[#allocation4 + $0x110] sm:$0xff] %vm3954_vm10, %v4460_v21 }
 0x3ad   :  { %v9267_v61 = vpop.f32.mrb[96].mxu0  ;;  %v4398_v45 = vpop.permute.xlu1 %4397 }
 0x3ae   :  { %v9269_v39 = vpop.f32.mrb[97].mxu0  ;;  %4417 = vst.msk [vmem:[#allocation4 + $0x120] sm:$0xff] %vm3954_vm10, %v4398_v45 }
 0x3b3   :  { %v4538_v1 = vld [vmem:[#allocation4 + $0x110] sm:$0xff] }
 0x3b4   :  { %4766 = vmatprep.mubr.f32.mxu1 %v4538_v1 }
 0x3b5   :  { %4767 = vmatmul.mubr.f32.gmra.mrb[86].mxu1 %v4537_v54  ;;  %v4540_v11 = vld [vmem:[#allocation4 + $0x120] sm:$0xff] }
 0x3b9   :  { %v4462_v57 = vpop.permute.xlu0 %4461 }
 0x3ba   :  { %v4400_v44 = vpop.permute.xlu1 %4399  ;;  %4481 = vst.msk [vmem:[#allocation4 + $0x128] sm:$0xff] %vm3954_vm10, %v4462_v57 }
 0x3bb   :  { %4418 = vst.msk [vmem:[#allocation4 + $0x138] sm:$0xff] %vm3954_vm10, %v4400_v44 }
 0x3be   :  { %v9275_v4 = vpop.f32.mrb[98].mxu0 }
 0x3bf   :  { %v9277_v30 = vpop.f32.mrb[99].mxu0 }
 0x3c1   :  { %v4541_v62 = vld [vmem:[#allocation4 + $0x128] sm:$0xff] }
 0x3c2   :  { %4771 = vmatprep.mubr.f32.mxu1 %v4541_v62  ;;  %v4543_v17 = vld [vmem:[#allocation4 + $0x138] sm:$0xff] }
 0x3c3   :  { %4772 = vmatmul.mubr.f32.gmra.mrb[88].mxu1 %v4540_v11 }
 0x3c8   :  { %v4464_v32 = vpop.permute.xlu0 %4463 }
 0x3c9   :  { %4482 = vst.msk [vmem:[#allocation4 + $0x140] sm:$0xff] %vm3954_vm10, %v4464_v32  ;;  %v4402_v49 = vpop.permute.xlu1 %4401 }
 0x3ca   :  { %4419 = vst.msk [vmem:[#allocation4 + $0x150] sm:$0xff] %vm3954_vm10, %v4402_v49 }
 0x3ce   :  { %v4466_v43 = vpop.permute.xlu0 %4465 }
 0x3cf   :  { %v4404_v18 = vpop.permute.xlu1 %4403  ;;  %4483 = vst.msk [vmem:[#allocation4 + $0x158] sm:$0xff] %vm3954_vm10, %v4466_v43 }
 0x3d0   :  { %4420 = vst.msk [vmem:[#allocation4 + $0x168] sm:$0x1f] %vm3962_vm11, %v4404_v18  ;;  %v4544_v23 = vld [vmem:[#allocation4 + $0x140] sm:$0xff] }
 0x3d1   :  { %4776 = vmatprep.mubr.f32.mxu1 %v4544_v23  ;;  %v4546_v31 = vld [vmem:[#allocation4 + $0x150] sm:$0xff] }
 0x3d2   :  { %4777 = vmatmul.mubr.f32.gmra.mrb[90].mxu1 %v4543_v17 }
 0x3d3   :  { %v9283_v27 = vpop.f32.mrb[100].mxu0  ;;  %v4468_v47 = vpop.permute.xlu0 %4467 }
 0x3d4   :  { %v9285_v55 = vpop.f32.mrb[101].mxu0  ;;  %4484 = vst.msk [vmem:[#allocation4 + $0x170] sm:$0x1f] %vm3962_vm11, %v4468_v47 }
 0x3d6   :  { %v4547_v8 = vld [vmem:[#allocation4 + $0x158] sm:$0xff] }
 0x3d7   :  { %v9288_v14 = vpop.f32.mrb[102].mxu0  ;;  %4781 = vmatprep.mubr.f32.mxu1 %v4547_v8  ;;  %v4549_v46 = vld [vmem:[#allocation4 + $0x168] sm:$0xff] }
 0x3d8   :  { %v9290_v36 = vpop.f32.mrb[103].mxu0  ;;  %4782 = vmatmul.mubr.f32.gmra.mrb[92].mxu1 %v4546_v31 }
 0x3db   :  { %v4550_v13 = vld [vmem:[#allocation4 + $0x170] sm:$0xff] }
 0x3dc   :  { %4786 = vmatprep.mubr.f32.mxu1 %v4550_v13 }
 0x3dd   :  { %4787 = vmatmul.mubr.f32.gmra.mrb[94].mxu1 %v4549_v46 }
 0x3de   :  { %6102 = vmatprep.mubr.msk.f32.mxu1 %vm3846_vm6, %v4536_v7 }
 0x3e1   :  { %6103 = vmatmul.mubr.msk.f32.vlgmr.msra.gmra.mrb[96].mxu1 %vm3846_vm6, %v4539_v20 }
 0x3e2   :  { %6105 = vmatprep.mubr.msk.f32.mxu1 %vm3846_vm6, %v4542_v37 }
 0x3e5   :  { %6106 = vmatmul.mubr.msk.f32.gmra.mrb[98].mxu1 %vm3846_vm6, %v4545_v5 }
 0x3e6   :  { %6108 = vmatprep.mubr.msk.f32.mxu1 %vm3846_vm6, %v4548_v35 }
 0x3e9   :  { %6109 = vmatmul.mubr.msk.f32.gmra.mrb[100].mxu1 %vm3846_vm6, %v4551_v26 }
 0x3fc   :  { %v9298_v10 = vpop.f32.mrb[104].mxu0 }
 0x3fd   :  { %v9300_v28 = vpop.f32.mrb[105].mxu0 }
 0x400   :  { %v6129_v12 = vpop.f32.mrb[106].mxu0 }
 0x401   :  { %v5098_v38 = vpop.f32.mrb[107].mxu0  ;;  %v5104_v32 = vadd.f32 %v6129_v12, %v9315_v19 }
 0x402   :  { %v5099_v0 = vadd.f32 %v9315_v19, %v5098_v38 }
 0x404   :  { %v9302_v41 = vpop.f32.mrb[108].mxu0 }
 0x405   :  { %v5108_v6 = vpop.f32.mrb[109].mxu0 }
 0x408   :  { %v9304_v60 = vpop.f32.mrb[110].mxu0 }
 0x409   :  { %v9306_v16 = vpop.f32.mrb[111].mxu0 }
 0x40c   :  { %v9308_v56 = vpop.f32.mrb[112].mxu0 }
 0x40d   :  { %v9310_v15 = vpop.f32.mrb[113].mxu0 }
 0x410   :  { %v6141_v40 = vpop.f32.mrb[114].mxu0 }
 0x411   :  { %v9318_v48 = vadd.f32 %v6141_v40, %v9315_v19  ;;  %v5138_v52 = vpop.f32.mrb[115].mxu0 }
 0x412   :  { %v9321_v24 = vadd.f32 %v9315_v19, %v5138_v52 }
 0x415   :  { %v5821_v9 = vpop.f32.mrb[64].mxu1  ;;  %v6144_v63 = vpop.f32.mrb[116].mxu0 }
 0x416   :  { %v5822_v34 = vpop.f32.mrb[65].mxu1  ;;  %v9329_v29 = vadd.f32 %v6144_v63, %v9315_v19  ;;  %v5148_v22 = vpop.f32.mrb[117].mxu0 }
 0x417   :  { %v5823_v51 = vadd.f32 %v5822_v34, %v5821_v9  ;;  %v9332_v59 = vadd.f32 %v9315_v19, %v5148_v22 }
 0x419   :  { %v4714_v42 = vadd.f32 %v5823_v51, %v9326_v2 }
 0x41b   :  { %v6147_v3 = vpop.f32.mrb[118].mxu0  ;;  %v4859_v58 = vadd.f32 %v9269_v39, %v4714_v42 }
 0x41c   :  { %v9337_v33 = vadd.f32 %v6147_v3, %v9315_v19  ;;  %v5158_v53 = vpop.f32.mrb[119].mxu0 }
 0x41d   :  { %v9340_v25 = vadd.f32 %v9315_v19, %v5158_v53  ;;  %v4937_v50 = vmax.f32 %v4859_v58, 0.0 }
 0x41f   :  { %v5177_v21 = vadd.f32 %v5099_v0, %v4937_v50 }
 0x420   :  { %v5824_v45 = vpop.f32.mrb[66].mxu1 }
 0x421   :  { %v5825_v1 = vpop.f32.mrb[67].mxu1  ;;  %v5201_v23 = vrot.slane %v5177_v21, 1  ;;  %v5232_v17 = vrot.slane %v5177_v21, 2  ;;  %v5263_v47 = vrot.slane %v5177_v21, 3  ;;  %v5294_v20 = vrot.slane %v5177_v21, 4 }
 0x422   :  { %v5826_v54 = vadd.f32 %v5825_v1, %v5824_v45 }
 0x424   :  { %v4719_v57 = vadd.f32 %v5826_v54, %v9326_v2 }
 0x426   :  { %v4864_v62 = vadd.f32 %v9267_v61, %v4719_v57  ;;  %v5109_v61 = vadd.f32 %v9315_v19, %v5108_v6 }
 0x428   :  { %v4938_v49 = vmax.f32 %v4864_v62, 0.0 }
 0x429   :  { %v5827_v44 = vpop.f32.mrb[68].mxu1 }
 0x42a   :  { %v5828_v39 = vpop.f32.mrb[69].mxu1  ;;  %v5178_v18 = vadd.f32 %v5104_v32, %v4938_v49 }
 0x42b   :  { %v5829_v11 = vadd.f32 %v5828_v39, %v5827_v44 }
 0x42c   :  { %v5202_v31 = vrot.slane %v5178_v18, 1  ;;  %v5233_v13 = vrot.slane %v5178_v18, 2  ;;  %v5264_v46 = vrot.slane %v5178_v18, 3  ;;  %v5295_v7 = vrot.slane %v5178_v18, 4 }
 0x42d   :  { %v4724_v43 = vadd.f32 %v5829_v11, %v9326_v2 }
 0x42e   :  { %v5203_v35 = vsel %vm791_vm2, %v5201_v23, %v5202_v31  ;;  %v5234_v26 = vsel %vm919_vm3, %v5232_v17, %v5233_v13  ;;  %v5265_v12 = vsel %vm1047_vm4, %v5263_v47, %v5264_v46  ;;  %v5296_v6 = vsel %vm1175_vm5, %v5294_v20, %v5295_v7 }
 0x42f   :  { %v4869_v8 = vadd.f32 %v9277_v30, %v4724_v43  ;;  %v5224_v30 = vmax.f32 %v5177_v21, %v5203_v35  ;;  %v5114_v43 = vadd.f32 %v9302_v41, %v9315_v19 }
 0x430   :  { %v6150_v5 = vpop.f32.mrb[120].mxu0 }
 0x431   :  { %v4939_v37 = vmax.f32 %v4869_v8, 0.0  ;;  %v9353_v38 = vadd.f32 %v6150_v5, %v9315_v19  ;;  %v5168_v40 = vpop.f32.mrb[121].mxu0  ;;  %v5255_v51 = vmax.f32 %v5224_v30, %v5234_v26 }
 0x432   :  { %v5830_v9 = vpop.f32.mrb[70].mxu1  ;;  %v9356_v34 = vadd.f32 %v9315_v19, %v5168_v40 }
 0x433   :  { %v5179_v52 = vadd.f32 %v5109_v61, %v4939_v37  ;;  %v5831_v63 = vpop.f32.mrb[71].mxu1  ;;  %v5286_v45 = vmax.f32 %v5255_v51, %v5265_v12 }
 0x434   :  { %v5832_v53 = vadd.f32 %v5831_v63, %v5830_v9 }
 0x435   :  { %v5204_v22 = vrot.slane %v5179_v52, 1  ;;  %v5235_v42 = vrot.slane %v5179_v52, 2  ;;  %v5266_v3 = vrot.slane %v5179_v52, 3  ;;  %v5297_v58 = vrot.slane %v5179_v52, 4 }
 0x436   :  { %v4729_v54 = vadd.f32 %v5832_v53, %v9326_v2  ;;  %v5317_v62 = vmax.f32 %v5286_v45, %v5296_v6 }
 0x437   :  { %v5205_v0 = vsel %vm791_vm2, %v5202_v31, %v5204_v22  ;;  %v5236_v50 = vsel %vm919_vm3, %v5233_v13, %v5235_v42  ;;  %v5267_v21 = vsel %vm1047_vm4, %v5264_v46, %v5266_v3  ;;  %v5298_v57 = vsel %vm1175_vm5, %v5295_v7, %v5297_v58  ;;  %v5833_v44 = vpop.f32.mrb[72].mxu1 }
 0x438   :  { %v5225_v1 = vmax.f32 %v5178_v18, %v5205_v0  ;;  %v4874_v11 = vadd.f32 %v9275_v4, %v4729_v54  ;;  %v5834_v32 = vpop.f32.mrb[73].mxu1  ;;  %5325 = vst [vmem:[#allocation10] sm:$0xff] %v5317_v62  ;;  %v5119_v4 = vadd.f32 %v9315_v19, %v9306_v16 }
 0x439   :  { %v5835_v49 = vadd.f32 %v5834_v32, %v5833_v44  ;;  %v5124_v44 = vadd.f32 %v9304_v60, %v9315_v19 }
 0x43a   :  { %v5256_v39 = vmax.f32 %v5225_v1, %v5236_v50  ;;  %v4940_v23 = vmax.f32 %v4874_v11, 0.0 }
 0x43b   :  { %v4734_v47 = vadd.f32 %v5835_v49, %v9326_v2 }
 0x43c   :  { %v5287_v17 = vmax.f32 %v5256_v39, %v5267_v21  ;;  %v5180_v18 = vadd.f32 %v5114_v43, %v4940_v23 }
 0x43d   :  { %v4879_v31 = vadd.f32 %v9285_v55, %v4734_v47 }
 0x43e   :  { %v5318_v8 = vmax.f32 %v5287_v17, %v5298_v57  ;;  %v5206_v13 = vrot.slane %v5180_v18, 1  ;;  %v5237_v46 = vrot.slane %v5180_v18, 2  ;;  %v5268_v7 = vrot.slane %v5180_v18, 3 }
 0x43f   :  { %v5299_v20 = vrot.slane %v5180_v18, 4  ;;  %v4941_v61 = vmax.f32 %v4879_v31, 0.0 }
 0x440   :  { %5326 = vst [vmem:[#allocation10 + $0x8] sm:$0xff] %v5318_v8  ;;  %v5207_v37 = vsel %vm791_vm2, %v5204_v22, %v5206_v13  ;;  %v5238_v41 = vsel %vm919_vm3, %v5235_v42, %v5237_v46  ;;  %v5269_v5 = vsel %vm1047_vm4, %v5266_v3, %v5268_v7 }
 0x441   :  { %v5300_v35 = vsel %vm1175_vm5, %v5297_v58, %v5299_v20  ;;  %v5226_v26 = vmax.f32 %v5179_v52, %v5207_v37  ;;  %v5181_v12 = vadd.f32 %v5119_v4, %v4941_v61 }
 0x443   :  { %v5257_v30 = vmax.f32 %v5226_v26, %v5238_v41  ;;  %v5208_v9 = vrot.slane %v5181_v12, 1  ;;  %v5239_v6 = vrot.slane %v5181_v12, 2  ;;  %v5270_v63 = vrot.slane %v5181_v12, 3 }
 0x444   :  { %v5301_v51 = vrot.slane %v5181_v12, 4 }
 0x445   :  { %v5836_v55 = vpop.f32.mrb[74].mxu1  ;;  %v5209_v16 = vsel %vm791_vm2, %v5206_v13, %v5208_v9  ;;  %v5240_v22 = vsel %vm919_vm3, %v5237_v46, %v5239_v6  ;;  %v5271_v42 = vsel %vm1047_vm4, %v5268_v7, %v5270_v63  ;;  %v5288_v0 = vmax.f32 %v5257_v30, %v5269_v5 }
 0x446   :  { %v5837_v40 = vpop.f32.mrb[75].mxu1  ;;  %v5227_v3 = vmax.f32 %v5180_v18, %v5209_v16  ;;  %v5302_v52 = vsel %vm1175_vm5, %v5299_v20, %v5301_v51  ;;  %v5129_v13 = vadd.f32 %v9315_v19, %v9310_v15  ;;  %v5134_v15 = vadd.f32 %v9308_v56, %v9315_v19 }
 0x447   :  { %v5838_v53 = vadd.f32 %v5837_v40, %v5836_v55  ;;  %v5319_v21 = vmax.f32 %v5288_v0, %v5300_v35 }
 0x448   :  { %v5258_v45 = vmax.f32 %v5227_v3, %v5240_v22 }
 0x449   :  { %v4739_v58 = vadd.f32 %v5838_v53, %v9326_v2  ;;  %v5839_v50 = vpop.f32.mrb[76].mxu1  ;;  %5327 = vst [vmem:[#allocation10 + $0x10] sm:$0xff] %v5319_v21 }
 0x44a   :  { %v5840_v54 = vpop.f32.mrb[77].mxu1  ;;  %v5289_v39 = vmax.f32 %v5258_v45, %v5271_v42 }
 0x44b   :  { %v4884_v1 = vadd.f32 %v9283_v27, %v4739_v58  ;;  %v5841_v57 = vadd.f32 %v5840_v54, %v5839_v50 }
 0x44c   :  { %v5320_v23 = vmax.f32 %v5289_v39, %v5302_v52 }
 0x44d   :  { %v4942_v62 = vmax.f32 %v4884_v1, 0.0  ;;  %v4744_v11 = vadd.f32 %v5841_v57, %v9326_v2  ;;  %v5842_v32 = vpop.f32.mrb[78].mxu1 }
 0x44e   :  { %v5843_v43 = vpop.f32.mrb[79].mxu1  ;;  %5328 = vst [vmem:[#allocation10 + $0x18] sm:$0xff] %v5320_v23  ;;  %v5333_v23 = vld [vmem:[#allocation10] ss:$2 sm:$0xff] }
 0x44f   :  { %v5182_v49 = vadd.f32 %v5124_v44, %v4942_v62  ;;  %v4889_v17 = vadd.f32 %v9290_v36, %v4744_v11  ;;  %v5844_v47 = vadd.f32 %v5843_v43, %v5842_v32 }
 0x451   :  { %v5210_v18 = vrot.slane %v5182_v49, 1  ;;  %v5241_v8 = vrot.slane %v5182_v49, 2  ;;  %v5272_v27 = vrot.slane %v5182_v49, 3  ;;  %v5303_v31 = vrot.slane %v5182_v49, 4 }
 0x452   :  { %v4943_v60 = vmax.f32 %v4889_v17, 0.0  ;;  %v4749_v46 = vadd.f32 %v5844_v47, %v9326_v2 }
 0x453   :  { %v5211_v7 = vsel %vm791_vm2, %v5208_v9, %v5210_v18  ;;  %v5242_v20 = vsel %vm919_vm3, %v5239_v6, %v5241_v8  ;;  %v5273_v4 = vsel %vm1047_vm4, %v5270_v63, %v5272_v27  ;;  %v5304_v36 = vsel %vm1175_vm5, %v5301_v51, %v5303_v31 }
 0x454   :  { %v5228_v61 = vmax.f32 %v5181_v12, %v5211_v7  ;;  %v5183_v37 = vadd.f32 %v5129_v13, %v4943_v60  ;;  %v4894_v41 = vadd.f32 %v9288_v14, %v4749_v46 }
 0x456   :  { %v5212_v5 = vrot.slane %v5183_v37, 1  ;;  %v5243_v35 = vrot.slane %v5183_v37, 2  ;;  %v5274_v26 = vrot.slane %v5183_v37, 3  ;;  %v5305_v55 = vrot.slane %v5183_v37, 4 }
 0x457   :  { %v4944_v40 = vmax.f32 %v4894_v41, 0.0  ;;  %v5259_v30 = vmax.f32 %v5228_v61, %v5242_v20 }
 0x458   :  { %v5213_v9 = vsel %vm791_vm2, %v5210_v18, %v5212_v5  ;;  %v5244_v6 = vsel %vm919_vm3, %v5241_v8, %v5243_v35  ;;  %v5275_v63 = vsel %vm1047_vm4, %v5272_v27, %v5274_v26  ;;  %v5306_v12 = vsel %vm1175_vm5, %v5303_v31, %v5305_v55 }
 0x459   :  { %v5229_v51 = vmax.f32 %v5182_v49, %v5213_v9  ;;  %v5184_v53 = vadd.f32 %v5134_v15, %v4944_v40  ;;  %v5290_v14 = vmax.f32 %v5259_v30, %v5273_v4  ;;  %v5335_v49 = vld [vmem:[#allocation10 + $0x10] ss:$2 sm:$0xff] }
 0x45a   :  { %v5340_v18 = vadd.f32 %v5335_v49, %v5333_v23 }
 0x45b   :  { %v5214_v16 = vrot.slane %v5184_v53, 1  ;;  %v5245_v22 = vrot.slane %v5184_v53, 2  ;;  %v5276_v42 = vrot.slane %v5184_v53, 3  ;;  %v5307_v0 = vrot.slane %v5184_v53, 4 }
 0x45c   :  { %v5260_v3 = vmax.f32 %v5229_v51, %v5244_v6  ;;  %v5321_v58 = vmax.f32 %v5290_v14, %v5304_v36 }
 0x45d   :  { %v5215_v56 = vsel %vm791_vm2, %v5212_v5, %v5214_v16  ;;  %v5231_v19 = vmax.f32 %v5184_v53, %v5214_v16  ;;  %v5246_v52 = vsel %vm919_vm3, %v5243_v35, %v5245_v22  ;;  %v5277_v50 = vsel %vm1047_vm4, %v5274_v26, %v5276_v42 }
 0x45e   :  { %v5230_v21 = vmax.f32 %v5183_v37, %v5215_v56  ;;  %v5291_v45 = vmax.f32 %v5260_v3, %v5275_v63  ;;  %v5308_v1 = vsel %vm1175_vm5, %v5305_v55, %v5307_v0  ;;  %5329 = vst [vmem:[#allocation10 + $0x20] sm:$0xff] %v5321_v58 }
 0x45f   :  { %v5262_v54 = vmax.f32 %v5231_v19, %v5245_v22 }
 0x460   :  { %v5261_v57 = vmax.f32 %v5230_v21, %v5246_v52  ;;  %v5322_v44 = vmax.f32 %v5291_v45, %v5306_v12 }
 0x461   :  { %v5293_v62 = vmax.f32 %v5262_v54, %v5276_v42  ;;  %v5845_v43 = vpop.f32.mrb[80].mxu1 }
 0x462   :  { %v5292_v39 = vmax.f32 %v5261_v57, %v5277_v50  ;;  %5330 = vst [vmem:[#allocation10 + $0x28] sm:$0xff] %v5322_v44  ;;  %v5846_v47 = vpop.f32.mrb[81].mxu1 }
 0x463   :  { %v5324_v11 = vmax.f32 %v5293_v62, %v5307_v0  ;;  %v5847_v8 = vadd.f32 %v5846_v47, %v5845_v43 }
 0x464   :  { %v5323_v32 = vmax.f32 %v5292_v39, %v5308_v1 }
 0x465   :  { %5332 = vst [vmem:[#allocation10 + $0x38] sm:$0x1] %v5324_v11  ;;  %v4754_v13 = vadd.f32 %v5847_v8, %v9326_v2 }
 0x466   :  { %5331 = vst [vmem:[#allocation10 + $0x30] sm:$0xff] %v5323_v32 }
 0x467   :  { %v4899_v7 = vadd.f32 %v9300_v28, %v4754_v13 }
 0x469   :  { %v5337_v17 = vld [vmem:[#allocation10 + $0x20] ss:$2 sm:$0xff]  ;;  %v4945_v4 = vmax.f32 %v4899_v7, 0.0 }
 0x46a   :  { %v5341_v31 = vadd.f32 %v5340_v18, %v5337_v17 }
 0x46b   :  { %v5185_v61 = vadd.f32 %v9321_v24, %v4945_v4 }
 0x46d   :  { %v5339_v27 = vld [vmem:[#allocation10 + $0x30] ss:$2 sm:$0x1f]  ;;  %v5361_v63 = vrot.slane %v5185_v61, 1  ;;  %v5392_v12 = vrot.slane %v5185_v61, 2  ;;  %v5423_v24 = vrot.slane %v5185_v61, 3 }
 0x46e   :  { %v5342_v60 = vsel %vm1047_vm4, %v5339_v27, 0.0  ;;  %v5848_v41 = vpop.f32.mrb[82].mxu1  ;;  %v5454_v51 = vrot.slane %v5185_v61, 4 }
 0x46f   :  { %v5343_v46 = vadd.f32 %v5342_v60, %v5341_v31  ;;  %v5849_v5 = vpop.f32.mrb[83].mxu1 }
 0x470   :  { %v5850_v26 = vadd.f32 %v5849_v5, %v5848_v41 }
 0x471   :  { %v5344_v20 = vrot.slane %v5343_v46, 4 }
 0x472   :  { %v4759_v15 = vadd.f32 %v5850_v26, %v9326_v2 }
 0x473   :  { %v5345_v36 = vadd.f32 %v5344_v20, %v5343_v46 }
 0x474   :  { %v4904_v30 = vadd.f32 %v9298_v10, %v4759_v15 }
 0x475   :  { %v5346_v37 = vrot.slane %v5345_v36, 2 }
 0x476   :  { %v4946_v6 = vmax.f32 %v4904_v30, 0.0 }
 0x477   :  { %v5347_v35 = vadd.f32 %v5346_v37, %v5345_v36 }
 0x478   :  { %v9410_v28 = vadd.f32 %v9318_v48, %v4946_v6 }
 0x479   :  { %v5348_v55 = vrot.slane %v5347_v35, 1 }
 0x47a   :  { %v5362_v53 = vrot.slane %v9410_v28, 1  ;;  %v5393_v14 = vrot.slane %v9410_v28, 2  ;;  %v5424_v16 = vrot.slane %v9410_v28, 3  ;;  %v5455_v22 = vrot.slane %v9410_v28, 4 }
 0x47b   :  { %v5349_v40 = vadd.f32 %v5348_v55, %v5347_v35  ;;  %v5851_v42 = vpop.f32.mrb[84].mxu1 }
 0x47c   :  { %v5852_v10 = vpop.f32.mrb[85].mxu1  ;;  %v5363_v0 = vsel %vm791_vm2, %v5361_v63, %v5362_v53  ;;  %v5394_v48 = vsel %vm919_vm3, %v5392_v12, %v5393_v14  ;;  %v5425_v3 = vsel %vm1047_vm4, %v5423_v24, %v5424_v16  ;;  %v5456_v58 = vsel %vm1175_vm5, %v5454_v51, %v5455_v22 }
 0x47d   :  { %v5351_v9 = vmul.f32 0.03448276, %v5349_v40  ;;  %v5384_v56 = vmax.f32 %v5185_v61, %v5363_v0  ;;  %v5853_v19 = vadd.f32 %v5852_v10, %v5851_v42 }
 0x47f   :  { %5352 = vst [vmem:[#allocation11] sm:$0x1] %v5351_v9  ;;  %v5415_v52 = vmax.f32 %v5384_v56, %v5394_v48  ;;  %v4764_v31 = vadd.f32 %v5853_v19, %v9326_v2 }
 0x481   :  { %v5446_v50 = vmax.f32 %v5415_v52, %v5425_v3 }
 0x483   :  { %v5477_v21 = vmax.f32 %v5446_v50, %v5456_v58 }
 0x485   :  { %5485 = vst [vmem:[#allocation10] sm:$0xff] %v5477_v21 }
 0x488   :  { %v5854_v45 = vpop.f32.mrb[86].mxu1 }
 0x489   :  { %v5855_v1 = vpop.f32.mrb[87].mxu1 }
 0x48a   :  { %v5856_v54 = vadd.f32 %v5855_v1, %v5854_v45 }
 0x48c   :  { %v4769_v8 = vadd.f32 %v5856_v54, %v9326_v2 }
 0x496   :  { %v5857_v57 = vpop.f32.mrb[88].mxu1 }
 0x497   :  { %v5858_v44 = vpop.f32.mrb[89].mxu1 }
 0x498   :  { %v5859_v62 = vadd.f32 %v5858_v44, %v5857_v57 }
 0x49a   :  { %v4774_v61 = vadd.f32 %v5859_v62, %v9326_v2 }
 0x4a5   :  { %v5860_v39 = vpop.f32.mrb[90].mxu1 }
 0x4a6   :  { %v5861_v11 = vpop.f32.mrb[91].mxu1 }
 0x4a7   :  { %v5862_v32 = vadd.f32 %v5861_v11, %v5860_v39 }
 0x4a9   :  { %v4779_v20 = vadd.f32 %v5862_v32, %v9326_v2 }
 0x4ab   :  { %v5863_v49 = vpop.f32.mrb[92].mxu1 }
 0x4ac   :  { %v5864_v43 = vpop.f32.mrb[93].mxu1 }
 0x4ad   :  { %v5865_v23 = vadd.f32 %v5864_v43, %v5863_v49 }
 0x4b0   :  { %v5866_v17 = vpop.f32.mrb[94].mxu1 }
 0x4b1   :  { %v5867_v47 = vpop.f32.mrb[95].mxu1 }
 0x4b2   :  { %v5868_v18 = vadd.f32 %v5867_v47, %v5866_v17 }
 0x4b4   :  { %v6104_v27 = vpop.f32.mrb[96].mxu1  ;;  %v4789_v55 = vadd.f32 %v5868_v18, %v9326_v2 }
 0x4b5   :  { %v4914_v13 = vadd.f32 %v6104_v27, %v4769_v8  ;;  %v4908_v60 = vpop.f32.mrb[97].mxu1 }
 0x4b6   :  { %v4909_v46 = vadd.f32 %v4908_v60, %v4764_v31 }
 0x4b7   :  { %v4948_v7 = vmax.f32 %v4914_v13, 0.0 }
 0x4b8   :  { %v4947_v4 = vmax.f32 %v4909_v46, 0.0  ;;  %v6107_v36 = vpop.f32.mrb[98].mxu1 }
 0x4b9   :  { %v9433_v37 = vadd.f32 %v9329_v29, %v4948_v7  ;;  %v4924_v41 = vadd.f32 %v6107_v36, %v4779_v20  ;;  %v4918_v5 = vpop.f32.mrb[99].mxu1 }
 0x4ba   :  { %v5187_v35 = vadd.f32 %v9332_v59, %v4947_v4  ;;  %v4919_v26 = vadd.f32 %v4918_v5, %v4774_v61  ;;  %v4784_v59 = vadd.f32 %v5865_v23, %v9326_v2 }
 0x4bb   :  { %v5366_v15 = vrot.slane %v9433_v37, 1  ;;  %v5397_v40 = vrot.slane %v9433_v37, 2  ;;  %v5428_v30 = vrot.slane %v9433_v37, 3  ;;  %v5459_v9 = vrot.slane %v9433_v37, 4 }
 0x4bc   :  { %v5364_v6 = vrot.slane %v5187_v35, 1  ;;  %v5395_v63 = vrot.slane %v5187_v35, 2  ;;  %v5426_v12 = vrot.slane %v5187_v35, 3  ;;  %v5457_v29 = vrot.slane %v5187_v35, 4  ;;  %v6110_v24 = vpop.f32.mrb[100].mxu1 }
 0x4bd   :  { %v4950_v51 = vmax.f32 %v4924_v41, 0.0  ;;  %v4949_v42 = vmax.f32 %v4919_v26, 0.0  ;;  %v4934_v10 = vadd.f32 %v6110_v24, %v4789_v55  ;;  %v4928_v0 = vpop.f32.mrb[101].mxu1 }
 0x4be   :  { %v5365_v48 = vsel %vm791_vm2, %v5362_v53, %v5364_v6  ;;  %v5367_v3 = vsel %vm791_vm2, %v5364_v6, %v5366_v15  ;;  %v5396_v58 = vsel %vm919_vm3, %v5393_v14, %v5395_v63  ;;  %v5398_v56 = vsel %vm919_vm3, %v5395_v63, %v5397_v40 }
 0x4bf   :  { %v5385_v19 = vmax.f32 %v9410_v28, %v5365_v48  ;;  %v5386_v52 = vmax.f32 %v5187_v35, %v5367_v3  ;;  %v5427_v2 = vsel %vm1047_vm4, %v5424_v16, %v5426_v12  ;;  %v5429_v50 = vsel %vm1047_vm4, %v5426_v12, %v5428_v30 }
 0x4c0   :  { %v5458_v53 = vsel %vm1175_vm5, %v5455_v22, %v5457_v29  ;;  %v5460_v21 = vsel %vm1175_vm5, %v5457_v29, %v5459_v9  ;;  %v9460_v45 = vadd.f32 %v9337_v33, %v4950_v51  ;;  %v5189_v14 = vadd.f32 %v9340_v25, %v4949_v42 }
 0x4c1   :  { %v5416_v1 = vmax.f32 %v5385_v19, %v5396_v58  ;;  %v5417_v54 = vmax.f32 %v5386_v52, %v5398_v56  ;;  %v4952_v57 = vmax.f32 %v4934_v10, 0.0  ;;  %v4929_v44 = vadd.f32 %v4928_v0, %v4784_v59 }
 0x4c2   :  { %v5370_v62 = vrot.slane %v9460_v45, 1  ;;  %v5401_v16 = vrot.slane %v9460_v45, 2  ;;  %v5432_v39 = vrot.slane %v9460_v45, 3  ;;  %v5463_v28 = vrot.slane %v9460_v45, 4 }
 0x4c3   :  { %v5447_v22 = vmax.f32 %v5416_v1, %v5427_v2  ;;  %v5448_v11 = vmax.f32 %v5417_v54, %v5429_v50  ;;  %v5368_v32 = vrot.slane %v5189_v14, 1  ;;  %v5399_v49 = vrot.slane %v5189_v14, 2 }
 0x4c4   :  { %v5430_v33 = vrot.slane %v5189_v14, 3  ;;  %v5461_v43 = vrot.slane %v5189_v14, 4  ;;  %v5192_v25 = vadd.f32 %v9353_v38, %v4952_v57  ;;  %v4951_v23 = vmax.f32 %v4929_v44, 0.0 }
 0x4c5   :  { %v5478_v17 = vmax.f32 %v5447_v22, %v5458_v53  ;;  %v5479_v47 = vmax.f32 %v5448_v11, %v5460_v21  ;;  %v5369_v18 = vsel %vm791_vm2, %v5366_v15, %v5368_v32  ;;  %v5371_v8 = vsel %vm791_vm2, %v5368_v32, %v5370_v62 }
 0x4c6   :  { %v5387_v27 = vmax.f32 %v9433_v37, %v5369_v18  ;;  %v5388_v31 = vmax.f32 %v5189_v14, %v5371_v8  ;;  %v5400_v13 = vsel %vm919_vm3, %v5397_v40, %v5399_v49  ;;  %v5402_v60 = vsel %vm919_vm3, %v5399_v49, %v5401_v16 }
 0x4c7   :  { %v5431_v46 = vsel %vm1047_vm4, %v5428_v30, %v5430_v33  ;;  %v5433_v7 = vsel %vm1047_vm4, %v5430_v33, %v5432_v39  ;;  %v5462_v38 = vsel %vm1175_vm5, %v5459_v9, %v5461_v43  ;;  %v5464_v20 = vsel %vm1175_vm5, %v5461_v43, %v5463_v28  ;;  %5486 = vst [vmem:[#allocation10 + $0x8] sm:$0xff] %v5478_v17 }
 0x4c8   :  { %5487 = vst [vmem:[#allocation10 + $0x10] sm:$0xff] %v5479_v47  ;;  %v5418_v4 = vmax.f32 %v5387_v27, %v5400_v13  ;;  %v5419_v36 = vmax.f32 %v5388_v31, %v5402_v60  ;;  %v5374_v61 = vrot.slane %v5192_v25, 1  ;;  %v5405_v41 = vrot.slane %v5192_v25, 2 }
 0x4c9   :  { %v5436_v37 = vrot.slane %v5192_v25, 3  ;;  %v5191_v5 = vadd.f32 %v9356_v34, %v4951_v23  ;;  %v5467_v15 = vrot.slane %v5192_v25, 4 }
 0x4ca   :  { %v5449_v35 = vmax.f32 %v5418_v4, %v5431_v46  ;;  %v5450_v26 = vmax.f32 %v5419_v36, %v5433_v7  ;;  %v5391_v55 = vmax.f32 %v5192_v25, %v5374_v61 }
 0x4cb   :  { %v5372_v40 = vrot.slane %v5191_v5, 1  ;;  %v5403_v30 = vrot.slane %v5191_v5, 2  ;;  %v5434_v6 = vrot.slane %v5191_v5, 3  ;;  %v5465_v63 = vrot.slane %v5191_v5, 4 }
 0x4cc   :  { %v5480_v9 = vmax.f32 %v5449_v35, %v5462_v38  ;;  %v5481_v12 = vmax.f32 %v5450_v26, %v5464_v20  ;;  %v5422_v29 = vmax.f32 %v5391_v55, %v5405_v41 }
 0x4cd   :  { %v5373_v24 = vsel %vm791_vm2, %v5370_v62, %v5372_v40  ;;  %v5375_v51 = vsel %vm791_vm2, %v5372_v40, %v5374_v61  ;;  %v5404_v42 = vsel %vm919_vm3, %v5401_v16, %v5403_v30  ;;  %v5406_v10 = vsel %vm919_vm3, %v5403_v30, %v5405_v41 }
 0x4ce   :  { %v5453_v34 = vmax.f32 %v5422_v29, %v5436_v37  ;;  %v5389_v59 = vmax.f32 %v9460_v45, %v5373_v24  ;;  %v5390_v0 = vmax.f32 %v5191_v5, %v5375_v51  ;;  %v5435_v48 = vsel %vm1047_vm4, %v5432_v39, %v5434_v6  ;;  %5488 = vst [vmem:[#allocation10 + $0x18] sm:$0xff] %v5480_v9  ;;  %v5493_v1 = vld [vmem:[#allocation10] ss:$2 sm:$0xff] }
 0x4cf   :  { %5489 = vst [vmem:[#allocation10 + $0x20] sm:$0xff] %v5481_v12  ;;  %v5437_v3 = vsel %vm1047_vm4, %v5434_v6, %v5436_v37  ;;  %v5466_v58 = vsel %vm1175_vm5, %v5463_v28, %v5465_v63  ;;  %v5468_v56 = vsel %vm1175_vm5, %v5465_v63, %v5467_v15 }
 0x4d0   :  { %v5484_v19 = vmax.f32 %v5453_v34, %v5467_v15  ;;  %v5420_v52 = vmax.f32 %v5389_v59, %v5404_v42  ;;  %v5421_v2 = vmax.f32 %v5390_v0, %v5406_v10 }
 0x4d2   :  { %v5451_v50 = vmax.f32 %v5420_v52, %v5435_v48  ;;  %v5452_v53 = vmax.f32 %v5421_v2, %v5437_v3  ;;  %5492 = vst [vmem:[#allocation10 + $0x38] sm:$0x1] %v5484_v19 }
 0x4d4   :  { %v5482_v21 = vmax.f32 %v5451_v50, %v5466_v58  ;;  %v5483_v14 = vmax.f32 %v5452_v53, %v5468_v56 }
 0x4d5   :  { %v5494_v45 = vld [vmem:[#allocation10 + $0x10] ss:$2 sm:$0xff] }
 0x4d6   :  { %5490 = vst [vmem:[#allocation10 + $0x28] sm:$0xff] %v5482_v21  ;;  %5491 = vst [vmem:[#allocation10 + $0x30] sm:$0xff] %v5483_v14  ;;  %v5497_v54 = vadd.f32 %v5494_v45, %v5493_v1 }
 0x4dd   :  { %v5495_v57 = vld [vmem:[#allocation10 + $0x20] ss:$2 sm:$0xff]  ;;  %v5496_v44 = vld [vmem:[#allocation10 + $0x30] ss:$2 sm:$0x1f] }
 0x4de   :  { %v5498_v62 = vadd.f32 %v5497_v54, %v5495_v57  ;;  %v5499_v16 = vsel %vm1047_vm4, %v5496_v44, 0.0 }
 0x4e0   :  { %v5500_v39 = vadd.f32 %v5499_v16, %v5498_v62 }
 0x4e2   :  { %v5501_v28 = vrot.slane %v5500_v39, 4 }
 0x4e4   :  { %v5502_v22 = vadd.f32 %v5501_v28, %v5500_v39 }
 0x4e6   :  { %v5503_v11 = vrot.slane %v5502_v22, 2 }
 0x4e8   :  { %v5504_v32 = vadd.f32 %v5503_v11, %v5502_v22 }
 0x4ea   :  { %v5505_v49 = vrot.slane %v5504_v32, 1 }
 0x4ec   :  { %v5506_v33 = vadd.f32 %v5505_v49, %v5504_v32 }
 0x4ee   :  { %v5507_v43 = vmul.f32 0.03448276, %v5506_v33 }
 0x4f0   :  { %5508 = vst [vmem:[#allocation11 + $0x1] sm:$0x1] %v5507_v43 }
 0x4f1   :  { %6282 = shalt.err (!%p6279_p4)
}
 0x4f2   :  { %s6283_s12 = scalar_lea.hbm %s9511_s11, 32 }
 0x4f3   :  { %p6284_p5 = scmp.ne.s32.totalorder %s9511_s11, %s6283_s12  ;;  %p6287_p6 = scmp.lt.u32.totalorder %s6283_s12, %s9511_s11 }
 0x4f5   :  { %p6289_p7 = pnand %p6287_p6, %p6284_p5 }
 0x4f7   :  { %6292 = shalt.err (!%p6289_p7)
}
 0x4f8   :  { %5518 = dma.vmem_to_hbm [thread:$0]  %s5516_s10, 32, %s9511_s11, [#allocation12]  }
 0x4f9   :  { %6293 = dma.done.wait [#allocation12], 32  }
 0x4fa   :  { %6294 = vsyncadd [#allocation12], 4294967264 }
 0x4fb   :  { %5522 = vsyncpa [#allocation12], 1 }

</bundles_post_ra>
